<compile_context>
chip_gen: v7x
topology: tpu7x:2x2x1
jax: 0.10.0
libtpu: 0.0.40
codegen_flags: <defaults>
</compile_context>

<pallas_src>
import functools
import math

import jax
import jax.numpy as jnp
from jax.experimental import pallas as pl
from jax.experimental.pallas import tpu as pltpu


def _layernorm(x, g, b, eps=1e-5):
    mu = jnp.mean(x, axis=-1, keepdims=True)
    xc = x - mu
    var = jnp.mean(xc * xc, axis=-1, keepdims=True)
    return xc * jax.lax.rsqrt(var + eps) * g + b


def _gelu_exact(x):
    # PyTorch nn.GELU default (erf-based, exact)
    return 0.5 * x * (1.0 + jax.lax.erf(x * (1.0 / math.sqrt(2.0))))


def decoder_block_kernel(q_ref, kv_ref, mask_ref,
                         ln1_g, ln1_b, ln2_g, ln2_b, ln3_g, ln3_b,
                         wq, wkv, wproj_r, bproj, w1, b1, w2, b2,
                         out_ref,
                         qh_s, kh_s, vh_s, m_s, l_s, acc_s,
                         *, num_heads, kv_chunk):
    f32 = jnp.float32
    bf16 = jnp.bfloat16

    TQ, C = q_ref.shape          # query tile
    H = num_heads
    hd = C // H
    TK = kv_chunk
    scale = 1.0 / math.sqrt(hd)

    ti = pl.program_id(1)        # query-tile index
    ki = pl.program_id(2)        # kv-chunk index
    nk = pl.num_programs(2)

    # --- once per BATCH: KV LayerNorm + projection + head split, cached in persistent
    #     VMEM scratch (kh_s / vh_s) and reused by every query tile / kv chunk. ---------
    @pl.when(jnp.logical_and(ti == 0, ki == 0))
    def _kv_cache():
        kvn = _layernorm(kv_ref[...], ln2_g[...], ln2_b[...])                  # (N, C) f32
        kvp = jnp.dot(kvn.astype(bf16), wkv[...], preferred_element_type=f32)  # (N, 2C)
        for h in range(H):
            lo, hi = h * hd, (h + 1) * hd
            kh_s[h] = kvp[:, lo:hi].astype(bf16)
            vh_s[h] = kvp[:, C + lo:C + hi].astype(bf16)

    # --- once per QUERY TILE: online-softmax init + q LayerNorm/projection/head split
    #     (q heads cached across kv chunks in qh_s). -------------------------------------
    @pl.when(ki == 0)
    def _q_init():
        m_s[...] = jnp.full(m_s.shape, -jnp.inf, f32)
        l_s[...] = jnp.zeros(l_s.shape, f32)
        acc_s[...] = jnp.zeros(acc_s.shape, f32)
        qn = _layernorm(q_ref[...], ln1_g[...], ln1_b[...])                    # (TQ, C) f32
        qp = jnp.dot(qn.astype(bf16), wq[...], preferred_element_type=f32)     # (TQ, C)
        for h in range(H):
            qh_s[h] = qp[:, h * hd:(h + 1) * hd].astype(bf16)

    # --- per KV chunk: flash-style online-softmax update --------------------------------
    start = pl.multiple_of(ki * TK, TK)
    k_c = kh_s[:, pl.ds(start, TK), :]                  # (H, TK, hd) bf16 (cached)
    v_c = vh_s[:, pl.ds(start, TK), :]                  # (H, TK, hd) bf16 (cached)
    q_h = qh_s[...]                                     # (H, TQ, hd) bf16 (cached)
    mask = mask_ref[...].astype(f32)                    # (H, TQ, TK), streamed bf16

    s = jnp.einsum("hqd,hkd->hqk", q_h, k_c,
                   preferred_element_type=f32) * scale + mask                  # (H, TQ, TK)
    m_prev = m_s[...]
    m_new = jnp.maximum(m_prev, jnp.max(s, axis=-1, keepdims=True))
    alpha = jnp.exp(m_prev - m_new)
    p = jnp.exp(s - m_new)
    l_s[...] = alpha * l_s[...] + jnp.sum(p, axis=-1, keepdims=True)
    acc_s[...] = alpha * acc_s[...] + jnp.einsum(
        "hqk,hkd->hqd", p.astype(bf16), v_c, preferred_element_type=f32)
    m_s[...] = m_new

    # --- last KV chunk: output projection (head merge folded into wproj_r), residual,
    #     MLP (GELU), second residual, store. --------------------------------------------
    @pl.when(ki == nk - 1)
    def _finalize():
        q_in = q_ref[...]
        o_h = acc_s[...] * pl.reciprocal(l_s[...], approx=True)                # (H, TQ, hd)
        ph = jnp.einsum("hqd,hdc->hqc", o_h.astype(bf16), wproj_r[...],
                        preferred_element_type=f32)                            # (H, TQ, C)
        attn = jnp.sum(ph, axis=0) + bproj[...]                                # (TQ, C)

        x = q_in + attn            # first residual (dropout / drop_path identity at p=0)

        xn = _layernorm(x, ln3_g[...], ln3_b[...])
        h1 = jnp.dot(xn.astype(bf16), w1[...], preferred_element_type=f32) + b1[...]
        h1 = _gelu_exact(h1)
        h2 = jnp.dot(h1.astype(bf16), w2[...], preferred_element_type=f32) + b2[...]

        out_ref[...] = x + h2      # second residual


def _vmem_limit_bytes():
    # Per-generation scoped-VMEM budget: ~85% of physical, capped.
    # v5e/v6e (128 MiB) -> ~108 MiB; v7x (64 MiB) -> ~54 MiB.  Conservative fallback.
    try:
        cap = getattr(pltpu.get_tpu_info(), "vmem_capacity_bytes", None)
        if cap:
            return int(min(cap * 0.85, 110 * 1024 * 1024))
    except Exception:
        pass
    return 54 * 1024 * 1024


def decoder_block(q, kv, mask, params, num_heads, q_tile=None, kv_tile=None):
    B, N, C = q.shape
    H = num_heads
    assert C % H == 0, "dim must be divisible by num_heads"
    hd = C // H
    Hmlp = params["w1"].shape[1]

    TQ = N if q_tile is None else q_tile
    TK = N if kv_tile is None else kv_tile
    assert N % TQ == 0, "q_tile must divide the sequence length"
    assert N % TK == 0, "kv_tile must divide the sequence length"
    NT = N // TQ
    NK = N // TK

    bf16 = jnp.bfloat16
    # bf16 weights + bf16 mask: halves HBM traffic and VMEM footprint of the big streams.
    wq = params["wq"].astype(bf16)
    wkv = params["wkv"].astype(bf16)
    wproj_r = params["wproj"].astype(bf16).reshape(H, hd, C)   # head merge folded into proj
    w1 = params["w1"].astype(bf16)
    w2 = params["w2"].astype(bf16)
    mask_bf16 = mask.astype(bf16)

    def const_spec(shape):
        # Constant index_map -> fetched once; single-buffer to avoid 2x VMEM residency.
        return pl.BlockSpec(shape, lambda b, t, k: (0,) * len(shape),
                            pipeline_mode=pl.Buffered(1))

    in_specs = [
        pl.BlockSpec((pl.Squeezed(), TQ, C), lambda b, t, k: (b, t, 0)),         # q tile
        pl.BlockSpec((pl.Squeezed(), N, C), lambda b, t, k: (b, 0, 0),
                     pipeline_mode=pl.Buffered(1)),                              # full kv / batch
        pl.BlockSpec((pl.Squeezed(), H, TQ, TK), lambda b, t, k: (b, 0, t, k)),  # mask chunk
        const_spec((1, C)), const_spec((1, C)),                                  # ln2_1 g/b
        const_spec((1, C)), const_spec((1, C)),                                  # ln2_2 g/b
        const_spec((1, C)), const_spec((1, C)),                                  # norm2 g/b
        const_spec((C, C)),                                                      # Wq^T
        const_spec((C, 2 * C)),                                                  # Wkv^T
        const_spec((H, hd, C)),                                                  # Wproj^T per head
        const_spec((1, C)),                                                      # bproj
        const_spec((C, Hmlp)),                                                   # W1^T
        const_spec((1, Hmlp)),                                                   # b1
        const_spec((Hmlp, C)),                                                   # W2^T
        const_spec((1, C)),                                                      # b2
    ]

    kernel = functools.partial(decoder_block_kernel, num_heads=H, kv_chunk=TK)

    flops = int(2 * B * N * C * (C + 2 * C + C + 2 * Hmlp) + 4 * B * H * N * N * hd)
    transcendentals = int(B * H * N * N + B * N * Hmlp)
    bytes_accessed = int(4 * 3 * B * N * C                       # q, kv, out (f32)
                         + 2 * B * H * N * N                     # mask (bf16)
                         + 2 * (4 * C * C + 2 * C * Hmlp))       # weights (bf16)

    return pl.pallas_call(
        kernel,
        out_shape=jax.ShapeDtypeStruct((B, N, C), jnp.float32),
        grid_spec=pltpu.PrefetchScalarGridSpec(
            num_scalar_prefetch=0,
            grid=(B, NT, NK),
            in_specs=in_specs,
            out_specs=pl.BlockSpec((pl.Squeezed(), TQ, C), lambda b, t, k: (b, t, 0)),
            scratch_shapes=[
                pltpu.VMEM((H, TQ, hd), bf16),          # cached q heads (per query tile)
                pltpu.VMEM((H, N, hd), bf16),           # cached K heads (per batch)
                pltpu.VMEM((H, N, hd), bf16),           # cached V heads (per batch)
                pltpu.VMEM((H, TQ, 1), jnp.float32),    # online-softmax running max
                pltpu.VMEM((H, TQ, 1), jnp.float32),    # online-softmax running denom
                pltpu.VMEM((H, TQ, hd), jnp.float32),   # online-softmax accumulator
            ],
        ),
        compiler_params=pltpu.CompilerParams(
            # t and k must be "arbitrary": the KV cache (t) and the online softmax (k)
            # both rely on sequential, in-order execution per batch.
            dimension_semantics=("parallel", "arbitrary", "arbitrary"),
            vmem_limit_bytes=_vmem_limit_bytes(),
        ),
        cost_estimate=pl.CostEstimate(
            flops=flops, transcendentals=transcendentals, bytes_accessed=bytes_accessed),
    )(q, kv, mask_bf16,
      params["ln1_g"], params["ln1_b"],
      params["ln2_g"], params["ln2_b"],
      params["ln3_g"], params["ln3_b"],
      wq, wkv, wproj_r, params["bproj"],
      w1, params["b1"], w2, params["b2"])


def decoder_block_ref(q, kv, mask, params, num_heads):
    """Pure-JAX f32 reference matching the PyTorch module semantics."""
    B, N, C = q.shape
    hd = C // num_heads
    scale = 1.0 / math.sqrt(hd)

    def ln(x, g, b):
        mu = jnp.mean(x, axis=-1, keepdims=True)
        var = jnp.mean((x - mu) ** 2, axis=-1, keepdims=True)
        return (x - mu) / jnp.sqrt(var + 1e-5) * g + b

    qn = ln(q, params["ln1_g"], params["ln1_b"])
    kvn = ln(kv, params["ln2_g"], params["ln2_b"])
    qp = qn @ params["wq"]
    kvp = kvn @ params["wkv"]
    k, v = kvp[..., :C], kvp[..., C:]
    qh = qp.reshape(B, N, num_heads, hd).transpose(0, 2, 1, 3)
    kh = k.reshape(B, N, num_heads, hd).transpose(0, 2, 1, 3)
    vh = v.reshape(B, N, num_heads, hd).transpose(0, 2, 1, 3)
    attn = jnp.einsum("bhnd,bhmd->bhnm", qh, kh) * scale + mask
    attn = jax.nn.softmax(attn, axis=-1)
    x = jnp.einsum("bhnm,bhmd->bhnd", attn, vh).transpose(0, 2, 1, 3).reshape(B, N, C)
    x = x @ params["wproj"] + params["bproj"]
    q1 = q + x
    xn = ln(q1, params["ln3_g"], params["ln3_b"])
    h1 = jax.nn.gelu(xn @ params["w1"] + params["b1"], approximate=False)
    h2 = h1 @ params["w2"] + params["b2"]
    return q1 + h2


def init_params(key, dim, num_heads, mlp_ratio=4.0):
    hidden = int(dim * mlp_ratio)
    ks = jax.random.split(key, 6)
    std = 0.02
    return {
        "ln1_g": jnp.ones((1, dim), jnp.float32),
        "ln1_b": jnp.zeros((1, dim), jnp.float32),
        "ln2_g": jnp.ones((1, dim), jnp.float32),
        "ln2_b": jnp.zeros((1, dim), jnp.float32),
        "ln3_g": jnp.ones((1, dim), jnp.float32),
        "ln3_b": jnp.zeros((1, dim), jnp.float32),
        "wq": std * jax.random.normal(ks[0], (dim, dim), jnp.float32),
        "wkv": std * jax.random.normal(ks[1], (dim, 2 * dim), jnp.float32),
        "wproj": std * jax.random.normal(ks[2], (dim, dim), jnp.float32),
        "bproj": jnp.zeros((1, dim), jnp.float32),
        "w1": std * jax.random.normal(ks[3], (dim, hidden), jnp.float32),
        "b1": 0.01 * jax.random.normal(ks[4], (1, hidden), jnp.float32),
        "w2": std * jax.random.normal(ks[5], (hidden, dim), jnp.float32),
        "b2": jnp.zeros((1, dim), jnp.float32),
    }


if __name__ == "__main__":
    # Small demo shapes that still exercise every path: batch=2, tokens=256, dim=32, heads=4
    # (head_dim=8, mlp hidden=128); q_tile=128 / kv_tile=128 -> grid (2, 2, 2), i.e. KV-cache
    # reuse across query tiles AND multi-chunk online softmax both run.
    B, N, C, H = 2, 256, 32, 4
    key = jax.random.PRNGKey(0)
    kq, kkv, km, kp = jax.random.split(key, 4)

    q = jax.random.normal(kq, (B, N, C), jnp.float32)
    kv = jax.random.normal(kkv, (B, N, C), jnp.float32)
    mask = 0.1 * jax.random.normal(km, (B, H, N, N), jnp.float32)
    params = init_params(kp, C, H, mlp_ratio=4.0)

    out = decoder_block(q, kv, mask, params, num_heads=H, q_tile=128, kv_tile=128)
    out = jax.block_until_ready(out)

    ref = decoder_block_ref(q, kv, mask, params, num_heads=H)
    assert out.shape == (B, N, C)
    # bf16 matmul operands / bf16 mask + approx reciprocal -> relaxed tolerance vs f32 ref.
    assert jnp.allclose(out, ref, atol=2e-2, rtol=2e-2), "mismatch vs reference"
    print("KERNEL_OK")
</pallas_src>

<mosaic_0001>
module attributes {stable_mosaic.version = 11 : i64} {
  func.func @decoder_block_kernel(%arg0: i32, %arg1: i32, %arg2: i32, %arg3: memref<1x128x32xf32, #tpu.memory_space<vmem>>, %arg4: memref<1x256x32xf32, #tpu.memory_space<vmem>>, %arg5: memref<1x4x128x128xbf16, #tpu.memory_space<vmem>>, %arg6: memref<1x32xf32, #tpu.memory_space<vmem>>, %arg7: memref<1x32xf32, #tpu.memory_space<vmem>>, %arg8: memref<1x32xf32, #tpu.memory_space<vmem>>, %arg9: memref<1x32xf32, #tpu.memory_space<vmem>>, %arg10: memref<1x32xf32, #tpu.memory_space<vmem>>, %arg11: memref<1x32xf32, #tpu.memory_space<vmem>>, %arg12: memref<32x32xbf16, #tpu.memory_space<vmem>>, %arg13: memref<32x64xbf16, #tpu.memory_space<vmem>>, %arg14: memref<4x8x32xbf16, #tpu.memory_space<vmem>>, %arg15: memref<1x32xf32, #tpu.memory_space<vmem>>, %arg16: memref<32x128xbf16, #tpu.memory_space<vmem>>, %arg17: memref<1x128xf32, #tpu.memory_space<vmem>>, %arg18: memref<128x32xbf16, #tpu.memory_space<vmem>>, %arg19: memref<1x32xf32, #tpu.memory_space<vmem>>, %arg20: memref<1x128x32xf32, #tpu.memory_space<vmem>>, %arg21: memref<4x128x8xbf16, #tpu.memory_space<vmem>>, %arg22: memref<4x256x8xbf16, #tpu.memory_space<vmem>>, %arg23: memref<4x256x8xbf16, #tpu.memory_space<vmem>>, %arg24: memref<4x128x1xf32, #tpu.memory_space<vmem>>, %arg25: memref<4x128x1xf32, #tpu.memory_space<vmem>>, %arg26: memref<4x128x8xf32, #tpu.memory_space<vmem>>) attributes {dimension_semantics = [#tpu.dimension_semantics<parallel>, #tpu.dimension_semantics<arbitrary>, #tpu.dimension_semantics<arbitrary>], iteration_bounds = array<i64: 2, 2, 2>, scalar_prefetch = 0 : i64, scratch_operands = 6 : i64, tpu.core_type = #tpu.core_type<tc>, window_params = [{transform_indices = @transform_0, window_bounds = array<i64: 1, 128, 32>}, {pipeline_mode = #tpu.pipeline_mode<synchronous>, transform_indices = @transform_1, window_bounds = array<i64: 1, 256, 32>}, {transform_indices = @transform_2, window_bounds = array<i64: 1, 4, 128, 128>}, {pipeline_mode = #tpu.pipeline_mode<synchronous>, transform_indices = @transform_3, window_bounds = array<i64: 1, 32>}, {pipeline_mode = #tpu.pipeline_mode<synchronous>, transform_indices = @transform_4, window_bounds = array<i64: 1, 32>}, {pipeline_mode = #tpu.pipeline_mode<synchronous>, transform_indices = @transform_5, window_bounds = array<i64: 1, 32>}, {pipeline_mode = #tpu.pipeline_mode<synchronous>, transform_indices = @transform_6, window_bounds = array<i64: 1, 32>}, {pipeline_mode = #tpu.pipeline_mode<synchronous>, transform_indices = @transform_7, window_bounds = array<i64: 1, 32>}, {pipeline_mode = #tpu.pipeline_mode<synchronous>, transform_indices = @transform_8, window_bounds = array<i64: 1, 32>}, {pipeline_mode = #tpu.pipeline_mode<synchronous>, transform_indices = @transform_9, window_bounds = array<i64: 32, 32>}, {pipeline_mode = #tpu.pipeline_mode<synchronous>, transform_indices = @transform_10, window_bounds = array<i64: 32, 64>}, {pipeline_mode = #tpu.pipeline_mode<synchronous>, transform_indices = @transform_11, window_bounds = array<i64: 4, 8, 32>}, {pipeline_mode = #tpu.pipeline_mode<synchronous>, transform_indices = @transform_12, window_bounds = array<i64: 1, 32>}, {pipeline_mode = #tpu.pipeline_mode<synchronous>, transform_indices = @transform_13, window_bounds = array<i64: 32, 128>}, {pipeline_mode = #tpu.pipeline_mode<synchronous>, transform_indices = @transform_14, window_bounds = array<i64: 1, 128>}, {pipeline_mode = #tpu.pipeline_mode<synchronous>, transform_indices = @transform_15, window_bounds = array<i64: 128, 32>}, {pipeline_mode = #tpu.pipeline_mode<synchronous>, transform_indices = @transform_16, window_bounds = array<i64: 1, 32>}, {transform_indices = @transform_17, window_bounds = array<i64: 1, 128, 32>}]} {
    %c0_i32 = arith.constant 0 : i32
    %0 = arith.cmpi eq, %arg1, %c0_i32 : i32
    %c0_i32_0 = arith.constant 0 : i32
    %1 = arith.cmpi eq, %arg2, %c0_i32_0 : i32
    %2 = arith.andi %0, %1 : i1
    %3 = arith.extui %2 : i1 to i32
    %c0_i32_1 = arith.constant 0 : i32
    %4 = arith.cmpi ne, %3, %c0_i32_1 : i32
    scf.if %4 {
      %c0_37 = arith.constant 0 : index
      %c0_38 = arith.constant 0 : index
      %c0_39 = arith.constant 0 : index
      %48 = vector.load %arg4[%c0_37, %c0_38, %c0_39] : memref<1x256x32xf32, #tpu.memory_space<vmem>>, vector<1x256x32xf32>
      %49 = vector.shape_cast %48 : vector<1x256x32xf32> to vector<256x32xf32>
      %c0_40 = arith.constant 0 : index
      %c0_41 = arith.constant 0 : index
      %50 = vector.load %arg8[%c0_40, %c0_41] : memref<1x32xf32, #tpu.memory_space<vmem>>, vector<1x32xf32>
      %c0_42 = arith.constant 0 : index
      %c0_43 = arith.constant 0 : index
      %51 = vector.load %arg9[%c0_42, %c0_43] : memref<1x32xf32, #tpu.memory_space<vmem>>, vector<1x32xf32>
      %cst_44 = arith.constant dense<0.000000e+00> : vector<256xf32>
      %52 = vector.multi_reduction <add>, %49, %cst_44 [1] : vector<256x32xf32> to vector<256xf32>
      %53 = vector.shape_cast %52 : vector<256xf32> to vector<256x1xf32>
      %cst_45 = arith.constant 3.200000e+01 : f32
      %54 = vector.broadcast %cst_45 : f32 to vector<256x1xf32>
      %55 = arith.divf %53, %54 : vector<256x1xf32>
      %56 = vector.broadcast %55 : vector<256x1xf32> to vector<256x32xf32>
      %57 = arith.subf %49, %56 : vector<256x32xf32>
      %58 = arith.mulf %57, %57 : vector<256x32xf32>
      %cst_46 = arith.constant dense<0.000000e+00> : vector<256xf32>
      %59 = vector.multi_reduction <add>, %58, %cst_46 [1] : vector<256x32xf32> to vector<256xf32>
      %60 = vector.shape_cast %59 : vector<256xf32> to vector<256x1xf32>
      %cst_47 = arith.constant 3.200000e+01 : f32
      %61 = vector.broadcast %cst_47 : f32 to vector<256x1xf32>
      %62 = arith.divf %60, %61 : vector<256x1xf32>
      %cst_48 = arith.constant 9.99999974E-6 : f32
      %63 = vector.broadcast %cst_48 : f32 to vector<256x1xf32>
      %64 = arith.addf %62, %63 : vector<256x1xf32>
      %65 = math.rsqrt %64 : vector<256x1xf32>
      %66 = vector.broadcast %65 : vector<256x1xf32> to vector<256x32xf32>
      %67 = arith.mulf %57, %66 : vector<256x32xf32>
      %68 = vector.broadcast %50 : vector<1x32xf32> to vector<256x32xf32>
      %69 = arith.mulf %67, %68 : vector<256x32xf32>
      %70 = vector.broadcast %51 : vector<1x32xf32> to vector<256x32xf32>
      %71 = arith.addf %69, %70 : vector<256x32xf32>
      %72 = arith.truncf %71 : vector<256x32xf32> to vector<256x32xbf16>
      %c0_49 = arith.constant 0 : index
      %c0_50 = arith.constant 0 : index
      %73 = vector.load %arg13[%c0_49, %c0_50] : memref<32x64xbf16, #tpu.memory_space<vmem>>, vector<32x64xbf16>
      %cst_51 = arith.constant dense<0.000000e+00> : vector<256x64xf32>
      %74 = tpu.matmul %72, %73, %cst_51 {dimension_numbers = #tpu.dot_dimension_numbers<[1], [0], [0], [1], [0, 0, 1, 1], [], []>} : vector<256x32xbf16>, vector<32x64xbf16>, vector<256x64xf32> -> vector<256x64xf32>
      %75 = vector.extract_strided_slice %74 {offsets = [0, 0], sizes = [256, 8], strides = [1, 1]} : vector<256x64xf32> to vector<256x8xf32>
      %76 = arith.truncf %75 : vector<256x8xf32> to vector<256x8xbf16>
      %c0_52 = arith.constant 0 : index
      %c0_53 = arith.constant 0 : index
      %c0_54 = arith.constant 0 : index
      %77 = vector.load %arg22[%c0_52, %c0_53, %c0_54] : memref<4x256x8xbf16, #tpu.memory_space<vmem>>, vector<1x256x8xbf16>
      %78 = vector.shape_cast %77 : vector<1x256x8xbf16> to vector<256x8xbf16>
      %79 = vector.shape_cast %76 : vector<256x8xbf16> to vector<1x256x8xbf16>
      tpu.vector_store %arg22[%c0_52, %c0_53, %c0_54], %79 {strides = array<i32>} : memref<4x256x8xbf16, #tpu.memory_space<vmem>>, vector<1x256x8xbf16>,
      %80 = vector.extract_strided_slice %74 {offsets = [0, 32], sizes = [256, 8], strides = [1, 1]} : vector<256x64xf32> to vector<256x8xf32>
      %81 = arith.truncf %80 : vector<256x8xf32> to vector<256x8xbf16>
      %c0_55 = arith.constant 0 : index
      %c0_56 = arith.constant 0 : index
      %c0_57 = arith.constant 0 : index
      %82 = vector.load %arg23[%c0_55, %c0_56, %c0_57] : memref<4x256x8xbf16, #tpu.memory_space<vmem>>, vector<1x256x8xbf16>
      %83 = vector.shape_cast %82 : vector<1x256x8xbf16> to vector<256x8xbf16>
      %84 = vector.shape_cast %81 : vector<256x8xbf16> to vector<1x256x8xbf16>
      tpu.vector_store %arg23[%c0_55, %c0_56, %c0_57], %84 {strides = array<i32>} : memref<4x256x8xbf16, #tpu.memory_space<vmem>>, vector<1x256x8xbf16>,
      %85 = vector.extract_strided_slice %74 {offsets = [0, 8], sizes = [256, 8], strides = [1, 1]} : vector<256x64xf32> to vector<256x8xf32>
      %86 = arith.truncf %85 : vector<256x8xf32> to vector<256x8xbf16>
      %c1 = arith.constant 1 : index
      %c0_58 = arith.constant 0 : index
      %c0_59 = arith.constant 0 : index
      %87 = vector.load %arg22[%c1, %c0_58, %c0_59] : memref<4x256x8xbf16, #tpu.memory_space<vmem>>, vector<1x256x8xbf16>
      %88 = vector.shape_cast %87 : vector<1x256x8xbf16> to vector<256x8xbf16>
      %89 = vector.shape_cast %86 : vector<256x8xbf16> to vector<1x256x8xbf16>
      tpu.vector_store %arg22[%c1, %c0_58, %c0_59], %89 {strides = array<i32>} : memref<4x256x8xbf16, #tpu.memory_space<vmem>>, vector<1x256x8xbf16>,
      %90 = vector.extract_strided_slice %74 {offsets = [0, 40], sizes = [256, 8], strides = [1, 1]} : vector<256x64xf32> to vector<256x8xf32>
      %91 = arith.truncf %90 : vector<256x8xf32> to vector<256x8xbf16>
      %c1_60 = arith.constant 1 : index
      %c0_61 = arith.constant 0 : index
      %c0_62 = arith.constant 0 : index
      %92 = vector.load %arg23[%c1_60, %c0_61, %c0_62] : memref<4x256x8xbf16, #tpu.memory_space<vmem>>, vector<1x256x8xbf16>
      %93 = vector.shape_cast %92 : vector<1x256x8xbf16> to vector<256x8xbf16>
      %94 = vector.shape_cast %91 : vector<256x8xbf16> to vector<1x256x8xbf16>
      tpu.vector_store %arg23[%c1_60, %c0_61, %c0_62], %94 {strides = array<i32>} : memref<4x256x8xbf16, #tpu.memory_space<vmem>>, vector<1x256x8xbf16>,
      %95 = vector.extract_strided_slice %74 {offsets = [0, 16], sizes = [256, 8], strides = [1, 1]} : vector<256x64xf32> to vector<256x8xf32>
      %96 = arith.truncf %95 : vector<256x8xf32> to vector<256x8xbf16>
      %c2 = arith.constant 2 : index
      %c0_63 = arith.constant 0 : index
      %c0_64 = arith.constant 0 : index
      %97 = vector.load %arg22[%c2, %c0_63, %c0_64] : memref<4x256x8xbf16, #tpu.memory_space<vmem>>, vector<1x256x8xbf16>
      %98 = vector.shape_cast %97 : vector<1x256x8xbf16> to vector<256x8xbf16>
      %99 = vector.shape_cast %96 : vector<256x8xbf16> to vector<1x256x8xbf16>
      tpu.vector_store %arg22[%c2, %c0_63, %c0_64], %99 {strides = array<i32>} : memref<4x256x8xbf16, #tpu.memory_space<vmem>>, vector<1x256x8xbf16>,
      %100 = vector.extract_strided_slice %74 {offsets = [0, 48], sizes = [256, 8], strides = [1, 1]} : vector<256x64xf32> to vector<256x8xf32>
      %101 = arith.truncf %100 : vector<256x8xf32> to vector<256x8xbf16>
      %c2_65 = arith.constant 2 : index
      %c0_66 = arith.constant 0 : index
      %c0_67 = arith.constant 0 : index
      %102 = vector.load %arg23[%c2_65, %c0_66, %c0_67] : memref<4x256x8xbf16, #tpu.memory_space<vmem>>, vector<1x256x8xbf16>
      %103 = vector.shape_cast %102 : vector<1x256x8xbf16> to vector<256x8xbf16>
      %104 = vector.shape_cast %101 : vector<256x8xbf16> to vector<1x256x8xbf16>
      tpu.vector_store %arg23[%c2_65, %c0_66, %c0_67], %104 {strides = array<i32>} : memref<4x256x8xbf16, #tpu.memory_space<vmem>>, vector<1x256x8xbf16>,
      %105 = vector.extract_strided_slice %74 {offsets = [0, 24], sizes = [256, 8], strides = [1, 1]} : vector<256x64xf32> to vector<256x8xf32>
      %106 = arith.truncf %105 : vector<256x8xf32> to vector<256x8xbf16>
      %c3 = arith.constant 3 : index
      %c0_68 = arith.constant 0 : index
      %c0_69 = arith.constant 0 : index
      %107 = vector.load %arg22[%c3, %c0_68, %c0_69] : memref<4x256x8xbf16, #tpu.memory_space<vmem>>, vector<1x256x8xbf16>
      %108 = vector.shape_cast %107 : vector<1x256x8xbf16> to vector<256x8xbf16>
      %109 = vector.shape_cast %106 : vector<256x8xbf16> to vector<1x256x8xbf16>
      tpu.vector_store %arg22[%c3, %c0_68, %c0_69], %109 {strides = array<i32>} : memref<4x256x8xbf16, #tpu.memory_space<vmem>>, vector<1x256x8xbf16>,
      %110 = vector.extract_strided_slice %74 {offsets = [0, 56], sizes = [256, 8], strides = [1, 1]} : vector<256x64xf32> to vector<256x8xf32>
      %111 = arith.truncf %110 : vector<256x8xf32> to vector<256x8xbf16>
      %c3_70 = arith.constant 3 : index
      %c0_71 = arith.constant 0 : index
      %c0_72 = arith.constant 0 : index
      %112 = vector.load %arg23[%c3_70, %c0_71, %c0_72] : memref<4x256x8xbf16, #tpu.memory_space<vmem>>, vector<1x256x8xbf16>
      %113 = vector.shape_cast %112 : vector<1x256x8xbf16> to vector<256x8xbf16>
      %114 = vector.shape_cast %111 : vector<256x8xbf16> to vector<1x256x8xbf16>
      tpu.vector_store %arg23[%c3_70, %c0_71, %c0_72], %114 {strides = array<i32>} : memref<4x256x8xbf16, #tpu.memory_space<vmem>>, vector<1x256x8xbf16>,
    } else {
    }
    %c0_i32_2 = arith.constant 0 : i32
    %5 = arith.cmpi eq, %arg2, %c0_i32_2 : i32
    %6 = arith.extui %5 : i1 to i32
    %c0_i32_3 = arith.constant 0 : i32
    %7 = arith.cmpi ne, %6, %c0_i32_3 : i32
    scf.if %7 {
      %cst_37 = arith.constant 0xFF800000 : f32
      %48 = vector.broadcast %cst_37 : f32 to vector<4x128x1xf32>
      %c0_38 = arith.constant 0 : index
      %c0_39 = arith.constant 0 : index
      %c0_40 = arith.constant 0 : index
      %49 = vector.load %arg24[%c0_38, %c0_39, %c0_40] : memref<4x128x1xf32, #tpu.memory_space<vmem>>, vector<4x128x1xf32>
      tpu.vector_store %arg24[%c0_38, %c0_39, %c0_40], %48 {strides = array<i32>} : memref<4x128x1xf32, #tpu.memory_space<vmem>>, vector<4x128x1xf32>,
      %cst_41 = arith.constant 0.000000e+00 : f32
      %50 = vector.broadcast %cst_41 : f32 to vector<4x128x1xf32>
      %c0_42 = arith.constant 0 : index
      %c0_43 = arith.constant 0 : index
      %c0_44 = arith.constant 0 : index
      %51 = vector.load %arg25[%c0_42, %c0_43, %c0_44] : memref<4x128x1xf32, #tpu.memory_space<vmem>>, vector<4x128x1xf32>
      tpu.vector_store %arg25[%c0_42, %c0_43, %c0_44], %50 {strides = array<i32>} : memref<4x128x1xf32, #tpu.memory_space<vmem>>, vector<4x128x1xf32>,
      %cst_45 = arith.constant 0.000000e+00 : f32
      %52 = vector.broadcast %cst_45 : f32 to vector<4x128x8xf32>
      %c0_46 = arith.constant 0 : index
      %c0_47 = arith.constant 0 : index
      %c0_48 = arith.constant 0 : index
      %53 = vector.load %arg26[%c0_46, %c0_47, %c0_48] : memref<4x128x8xf32, #tpu.memory_space<vmem>>, vector<4x128x8xf32>
      tpu.vector_store %arg26[%c0_46, %c0_47, %c0_48], %52 {strides = array<i32>} : memref<4x128x8xf32, #tpu.memory_space<vmem>>, vector<4x128x8xf32>,
      %c0_49 = arith.constant 0 : index
      %c0_50 = arith.constant 0 : index
      %c0_51 = arith.constant 0 : index
      %54 = vector.load %arg3[%c0_49, %c0_50, %c0_51] : memref<1x128x32xf32, #tpu.memory_space<vmem>>, vector<1x128x32xf32>
      %55 = vector.shape_cast %54 : vector<1x128x32xf32> to vector<128x32xf32>
      %c0_52 = arith.constant 0 : index
      %c0_53 = arith.constant 0 : index
      %56 = vector.load %arg6[%c0_52, %c0_53] : memref<1x32xf32, #tpu.memory_space<vmem>>, vector<1x32xf32>
      %c0_54 = arith.constant 0 : index
      %c0_55 = arith.constant 0 : index
      %57 = vector.load %arg7[%c0_54, %c0_55] : memref<1x32xf32, #tpu.memory_space<vmem>>, vector<1x32xf32>
      %cst_56 = arith.constant dense<0.000000e+00> : vector<128xf32>
      %58 = vector.multi_reduction <add>, %55, %cst_56 [1] : vector<128x32xf32> to vector<128xf32>
      %59 = vector.shape_cast %58 : vector<128xf32> to vector<128x1xf32>
      %cst_57 = arith.constant 3.200000e+01 : f32
      %60 = vector.broadcast %cst_57 : f32 to vector<128x1xf32>
      %61 = arith.divf %59, %60 : vector<128x1xf32>
      %62 = vector.broadcast %61 : vector<128x1xf32> to vector<128x32xf32>
      %63 = arith.subf %55, %62 : vector<128x32xf32>
      %64 = arith.mulf %63, %63 : vector<128x32xf32>
      %cst_58 = arith.constant dense<0.000000e+00> : vector<128xf32>
      %65 = vector.multi_reduction <add>, %64, %cst_58 [1] : vector<128x32xf32> to vector<128xf32>
      %66 = vector.shape_cast %65 : vector<128xf32> to vector<128x1xf32>
      %cst_59 = arith.constant 3.200000e+01 : f32
      %67 = vector.broadcast %cst_59 : f32 to vector<128x1xf32>
      %68 = arith.divf %66, %67 : vector<128x1xf32>
      %cst_60 = arith.constant 9.99999974E-6 : f32
      %69 = vector.broadcast %cst_60 : f32 to vector<128x1xf32>
      %70 = arith.addf %68, %69 : vector<128x1xf32>
      %71 = math.rsqrt %70 : vector<128x1xf32>
      %72 = vector.broadcast %71 : vector<128x1xf32> to vector<128x32xf32>
      %73 = arith.mulf %63, %72 : vector<128x32xf32>
      %74 = vector.broadcast %56 : vector<1x32xf32> to vector<128x32xf32>
      %75 = arith.mulf %73, %74 : vector<128x32xf32>
      %76 = vector.broadcast %57 : vector<1x32xf32> to vector<128x32xf32>
      %77 = arith.addf %75, %76 : vector<128x32xf32>
      %78 = arith.truncf %77 : vector<128x32xf32> to vector<128x32xbf16>
      %c0_61 = arith.constant 0 : index
      %c0_62 = arith.constant 0 : index
      %79 = vector.load %arg12[%c0_61, %c0_62] : memref<32x32xbf16, #tpu.memory_space<vmem>>, vector<32x32xbf16>
      %cst_63 = arith.constant dense<0.000000e+00> : vector<128x32xf32>
      %80 = tpu.matmul %78, %79, %cst_63 {dimension_numbers = #tpu.dot_dimension_numbers<[1], [0], [0], [1], [0, 0, 1, 1], [], []>} : vector<128x32xbf16>, vector<32x32xbf16>, vector<128x32xf32> -> vector<128x32xf32>
      %81 = vector.extract_strided_slice %80 {offsets = [0, 0], sizes = [128, 8], strides = [1, 1]} : vector<128x32xf32> to vector<128x8xf32>
      %82 = arith.truncf %81 : vector<128x8xf32> to vector<128x8xbf16>
      %c0_64 = arith.constant 0 : index
      %c0_65 = arith.constant 0 : index
      %c0_66 = arith.constant 0 : index
      %83 = vector.load %arg21[%c0_64, %c0_65, %c0_66] : memref<4x128x8xbf16, #tpu.memory_space<vmem>>, vector<1x128x8xbf16>
      %84 = vector.shape_cast %83 : vector<1x128x8xbf16> to vector<128x8xbf16>
      %85 = vector.shape_cast %82 : vector<128x8xbf16> to vector<1x128x8xbf16>
      tpu.vector_store %arg21[%c0_64, %c0_65, %c0_66], %85 {strides = array<i32>} : memref<4x128x8xbf16, #tpu.memory_space<vmem>>, vector<1x128x8xbf16>,
      %86 = vector.extract_strided_slice %80 {offsets = [0, 8], sizes = [128, 8], strides = [1, 1]} : vector<128x32xf32> to vector<128x8xf32>
      %87 = arith.truncf %86 : vector<128x8xf32> to vector<128x8xbf16>
      %c1 = arith.constant 1 : index
      %c0_67 = arith.constant 0 : index
      %c0_68 = arith.constant 0 : index
      %88 = vector.load %arg21[%c1, %c0_67, %c0_68] : memref<4x128x8xbf16, #tpu.memory_space<vmem>>, vector<1x128x8xbf16>
      %89 = vector.shape_cast %88 : vector<1x128x8xbf16> to vector<128x8xbf16>
      %90 = vector.shape_cast %87 : vector<128x8xbf16> to vector<1x128x8xbf16>
      tpu.vector_store %arg21[%c1, %c0_67, %c0_68], %90 {strides = array<i32>} : memref<4x128x8xbf16, #tpu.memory_space<vmem>>, vector<1x128x8xbf16>,
      %91 = vector.extract_strided_slice %80 {offsets = [0, 16], sizes = [128, 8], strides = [1, 1]} : vector<128x32xf32> to vector<128x8xf32>
      %92 = arith.truncf %91 : vector<128x8xf32> to vector<128x8xbf16>
      %c2 = arith.constant 2 : index
      %c0_69 = arith.constant 0 : index
      %c0_70 = arith.constant 0 : index
      %93 = vector.load %arg21[%c2, %c0_69, %c0_70] : memref<4x128x8xbf16, #tpu.memory_space<vmem>>, vector<1x128x8xbf16>
      %94 = vector.shape_cast %93 : vector<1x128x8xbf16> to vector<128x8xbf16>
      %95 = vector.shape_cast %92 : vector<128x8xbf16> to vector<1x128x8xbf16>
      tpu.vector_store %arg21[%c2, %c0_69, %c0_70], %95 {strides = array<i32>} : memref<4x128x8xbf16, #tpu.memory_space<vmem>>, vector<1x128x8xbf16>,
      %96 = vector.extract_strided_slice %80 {offsets = [0, 24], sizes = [128, 8], strides = [1, 1]} : vector<128x32xf32> to vector<128x8xf32>
      %97 = arith.truncf %96 : vector<128x8xf32> to vector<128x8xbf16>
      %c3 = arith.constant 3 : index
      %c0_71 = arith.constant 0 : index
      %c0_72 = arith.constant 0 : index
      %98 = vector.load %arg21[%c3, %c0_71, %c0_72] : memref<4x128x8xbf16, #tpu.memory_space<vmem>>, vector<1x128x8xbf16>
      %99 = vector.shape_cast %98 : vector<1x128x8xbf16> to vector<128x8xbf16>
      %100 = vector.shape_cast %97 : vector<128x8xbf16> to vector<1x128x8xbf16>
      tpu.vector_store %arg21[%c3, %c0_71, %c0_72], %100 {strides = array<i32>} : memref<4x128x8xbf16, #tpu.memory_space<vmem>>, vector<1x128x8xbf16>,
    } else {
    }
    %c128_i32 = arith.constant 128 : i32
    %8 = arith.muli %arg2, %c128_i32 : i32
    %9 = tpu.assume_multiple %8, 128 : i32
    %c0 = arith.constant 0 : index
    %10 = arith.index_cast %9 : i32 to index
    %c0_4 = arith.constant 0 : index
    %11 = vector.load %arg22[%c0, %10, %c0_4] : memref<4x256x8xbf16, #tpu.memory_space<vmem>>, vector<4x128x8xbf16>
    %c0_5 = arith.constant 0 : index
    %12 = arith.index_cast %9 : i32 to index
    %c0_6 = arith.constant 0 : index
    %13 = vector.load %arg23[%c0_5, %12, %c0_6] : memref<4x256x8xbf16, #tpu.memory_space<vmem>>, vector<4x128x8xbf16>
    %c0_7 = arith.constant 0 : index
    %c0_8 = arith.constant 0 : index
    %c0_9 = arith.constant 0 : index
    %14 = vector.load %arg21[%c0_7, %c0_8, %c0_9] : memref<4x128x8xbf16, #tpu.memory_space<vmem>>, vector<4x128x8xbf16>
    %c0_10 = arith.constant 0 : index
    %c0_11 = arith.constant 0 : index
    %c0_12 = arith.constant 0 : index
    %c0_13 = arith.constant 0 : index
    %15 = vector.load %arg5[%c0_10, %c0_11, %c0_12, %c0_13] : memref<1x4x128x128xbf16, #tpu.memory_space<vmem>>, vector<1x4x128x128xbf16>
    %16 = vector.shape_cast %15 : vector<1x4x128x128xbf16> to vector<4x128x128xbf16>
    %17 = arith.extf %16 : vector<4x128x128xbf16> to vector<4x128x128xf32>
    "tpu.trace_start"() <{level = 10 : i32, message = "hqd,hkd->hqk"}> : () -> ()
    %cst = arith.constant dense<0.000000e+00> : vector<4x128x128xf32>
    %18 = tpu.matmul %14, %11, %cst {dimension_numbers = #tpu.dot_dimension_numbers<[2], [2], [1], [1], [0, 0, 0, 1, 1, 1], [0], [0]>} : vector<4x128x8xbf16>, vector<4x128x8xbf16>, vector<4x128x128xf32> -> vector<4x128x128xf32>
    "tpu.trace_stop"() : () -> ()
    %cst_14 = arith.constant 0.353553385 : f32
    %19 = vector.broadcast %cst_14 : f32 to vector<4x128x128xf32>
    %20 = arith.mulf %18, %19 : vector<4x128x128xf32>
    %21 = arith.addf %20, %17 : vector<4x128x128xf32>
    %c0_15 = arith.constant 0 : index
    %c0_16 = arith.constant 0 : index
    %c0_17 = arith.constant 0 : index
    %22 = vector.load %arg24[%c0_15, %c0_16, %c0_17] : memref<4x128x1xf32, #tpu.memory_space<vmem>>, vector<4x128x1xf32>
    %cst_18 = arith.constant dense<0xFF800000> : vector<4x128xf32>
    %23 = vector.multi_reduction <maximumf>, %21, %cst_18 [2] : vector<4x128x128xf32> to vector<4x128xf32>
    %24 = vector.shape_cast %23 : vector<4x128xf32> to vector<4x128x1xf32>
    %25 = arith.maximumf %22, %24 : vector<4x128x1xf32>
    %26 = arith.subf %22, %25 : vector<4x128x1xf32>
    %27 = math.exp %26 : vector<4x128x1xf32>
    %28 = vector.broadcast %25 : vector<4x128x1xf32> to vector<4x128x128xf32>
    %29 = arith.subf %21, %28 : vector<4x128x128xf32>
    %30 = math.exp %29 : vector<4x128x128xf32>
    %c0_19 = arith.constant 0 : index
    %c0_20 = arith.constant 0 : index
    %c0_21 = arith.constant 0 : index
    %31 = vector.load %arg25[%c0_19, %c0_20, %c0_21] : memref<4x128x1xf32, #tpu.memory_space<vmem>>, vector<4x128x1xf32>
    %32 = arith.mulf %27, %31 : vector<4x128x1xf32>
    %cst_22 = arith.constant dense<0.000000e+00> : vector<4x128xf32>
    %33 = vector.multi_reduction <add>, %30, %cst_22 [2] : vector<4x128x128xf32> to vector<4x128xf32>
    %34 = vector.shape_cast %33 : vector<4x128xf32> to vector<4x128x1xf32>
    %35 = arith.addf %32, %34 : vector<4x128x1xf32>
    %c0_23 = arith.constant 0 : index
    %c0_24 = arith.constant 0 : index
    %c0_25 = arith.constant 0 : index
    %36 = vector.load %arg25[%c0_23, %c0_24, %c0_25] : memref<4x128x1xf32, #tpu.memory_space<vmem>>, vector<4x128x1xf32>
    tpu.vector_store %arg25[%c0_23, %c0_24, %c0_25], %35 {strides = array<i32>} : memref<4x128x1xf32, #tpu.memory_space<vmem>>, vector<4x128x1xf32>,
    %c0_26 = arith.constant 0 : index
    %c0_27 = arith.constant 0 : index
    %c0_28 = arith.constant 0 : index
    %37 = vector.load %arg26[%c0_26, %c0_27, %c0_28] : memref<4x128x8xf32, #tpu.memory_space<vmem>>, vector<4x128x8xf32>
    %38 = vector.broadcast %27 : vector<4x128x1xf32> to vector<4x128x8xf32>
    %39 = arith.mulf %38, %37 : vector<4x128x8xf32>
    %40 = arith.truncf %30 : vector<4x128x128xf32> to vector<4x128x128xbf16>
    "tpu.trace_start"() <{level = 10 : i32, message = "hqk,hkd->hqd"}> : () -> ()
    %cst_29 = arith.constant dense<0.000000e+00> : vector<4x128x8xf32>
    %41 = tpu.matmul %40, %13, %cst_29 {dimension_numbers = #tpu.dot_dimension_numbers<[2], [1], [1], [2], [0, 0, 0, 1, 1, 2], [0], [0]>} : vector<4x128x128xbf16>, vector<4x128x8xbf16>, vector<4x128x8xf32> -> vector<4x128x8xf32>
    "tpu.trace_stop"() : () -> ()
    %42 = arith.addf %39, %41 : vector<4x128x8xf32>
    %c0_30 = arith.constant 0 : index
    %c0_31 = arith.constant 0 : index
    %c0_32 = arith.constant 0 : index
    %43 = vector.load %arg26[%c0_30, %c0_31, %c0_32] : memref<4x128x8xf32, #tpu.memory_space<vmem>>, vector<4x128x8xf32>
    tpu.vector_store %arg26[%c0_30, %c0_31, %c0_32], %42 {strides = array<i32>} : memref<4x128x8xf32, #tpu.memory_space<vmem>>, vector<4x128x8xf32>,
    %c0_33 = arith.constant 0 : index
    %c0_34 = arith.constant 0 : index
    %c0_35 = arith.constant 0 : index
    %44 = vector.load %arg24[%c0_33, %c0_34, %c0_35] : memref<4x128x1xf32, #tpu.memory_space<vmem>>, vector<4x128x1xf32>
    tpu.vector_store %arg24[%c0_33, %c0_34, %c0_35], %25 {strides = array<i32>} : memref<4x128x1xf32, #tpu.memory_space<vmem>>, vector<4x128x1xf32>,
    %c1_i32 = arith.constant 1 : i32
    %45 = arith.cmpi eq, %arg2, %c1_i32 : i32
    %46 = arith.extui %45 : i1 to i32
    %c0_i32_36 = arith.constant 0 : i32
    %47 = arith.cmpi ne, %46, %c0_i32_36 : i32
    scf.if %47 {
      %c0_37 = arith.constant 0 : index
      %c0_38 = arith.constant 0 : index
      %c0_39 = arith.constant 0 : index
      %48 = vector.load %arg3[%c0_37, %c0_38, %c0_39] : memref<1x128x32xf32, #tpu.memory_space<vmem>>, vector<1x128x32xf32>
      %49 = vector.shape_cast %48 : vector<1x128x32xf32> to vector<128x32xf32>
      %c0_40 = arith.constant 0 : index
      %c0_41 = arith.constant 0 : index
      %c0_42 = arith.constant 0 : index
      %50 = vector.load %arg26[%c0_40, %c0_41, %c0_42] : memref<4x128x8xf32, #tpu.memory_space<vmem>>, vector<4x128x8xf32>
      %c0_43 = arith.constant 0 : index
      %c0_44 = arith.constant 0 : index
      %c0_45 = arith.constant 0 : index
      %51 = vector.load %arg25[%c0_43, %c0_44, %c0_45] : memref<4x128x1xf32, #tpu.memory_space<vmem>>, vector<4x128x1xf32>
      %52 = tpu.reciprocal %51 {approx = true} : vector<4x128x1xf32> -> vector<4x128x1xf32>
      %53 = vector.broadcast %52 : vector<4x128x1xf32> to vector<4x128x8xf32>
      %54 = arith.mulf %50, %53 : vector<4x128x8xf32>
      %55 = arith.truncf %54 : vector<4x128x8xf32> to vector<4x128x8xbf16>
      %c0_46 = arith.constant 0 : index
      %c0_47 = arith.constant 0 : index
      %c0_48 = arith.constant 0 : index
      %56 = vector.load %arg14[%c0_46, %c0_47, %c0_48] : memref<4x8x32xbf16, #tpu.memory_space<vmem>>, vector<4x8x32xbf16>
      "tpu.trace_start"() <{level = 10 : i32, message = "hqd,hdc->hqc"}> : () -> ()
      %cst_49 = arith.constant dense<0.000000e+00> : vector<4x128x32xf32>
      %57 = tpu.matmul %55, %56, %cst_49 {dimension_numbers = #tpu.dot_dimension_numbers<[2], [1], [1], [2], [0, 0, 0, 1, 1, 2], [0], [0]>} : vector<4x128x8xbf16>, vector<4x8x32xbf16>, vector<4x128x32xf32> -> vector<4x128x32xf32>
      "tpu.trace_stop"() : () -> ()
      %cst_50 = arith.constant dense<0.000000e+00> : vector<128x32xf32>
      %58 = vector.multi_reduction <add>, %57, %cst_50 [0] : vector<4x128x32xf32> to vector<128x32xf32>
      %c0_51 = arith.constant 0 : index
      %c0_52 = arith.constant 0 : index
      %59 = vector.load %arg15[%c0_51, %c0_52] : memref<1x32xf32, #tpu.memory_space<vmem>>, vector<1x32xf32>
      %60 = vector.broadcast %59 : vector<1x32xf32> to vector<128x32xf32>
      %61 = arith.addf %58, %60 : vector<128x32xf32>
      %62 = arith.addf %49, %61 : vector<128x32xf32>
      %c0_53 = arith.constant 0 : index
      %c0_54 = arith.constant 0 : index
      %63 = vector.load %arg10[%c0_53, %c0_54] : memref<1x32xf32, #tpu.memory_space<vmem>>, vector<1x32xf32>
      %c0_55 = arith.constant 0 : index
      %c0_56 = arith.constant 0 : index
      %64 = vector.load %arg11[%c0_55, %c0_56] : memref<1x32xf32, #tpu.memory_space<vmem>>, vector<1x32xf32>
      %cst_57 = arith.constant dense<0.000000e+00> : vector<128xf32>
      %65 = vector.multi_reduction <add>, %62, %cst_57 [1] : vector<128x32xf32> to vector<128xf32>
      %66 = vector.shape_cast %65 : vector<128xf32> to vector<128x1xf32>
      %cst_58 = arith.constant 3.200000e+01 : f32
      %67 = vector.broadcast %cst_58 : f32 to vector<128x1xf32>
      %68 = arith.divf %66, %67 : vector<128x1xf32>
      %69 = vector.broadcast %68 : vector<128x1xf32> to vector<128x32xf32>
      %70 = arith.subf %62, %69 : vector<128x32xf32>
      %71 = arith.mulf %70, %70 : vector<128x32xf32>
      %cst_59 = arith.constant dense<0.000000e+00> : vector<128xf32>
      %72 = vector.multi_reduction <add>, %71, %cst_59 [1] : vector<128x32xf32> to vector<128xf32>
      %73 = vector.shape_cast %72 : vector<128xf32> to vector<128x1xf32>
      %cst_60 = arith.constant 3.200000e+01 : f32
      %74 = vector.broadcast %cst_60 : f32 to vector<128x1xf32>
      %75 = arith.divf %73, %74 : vector<128x1xf32>
      %cst_61 = arith.constant 9.99999974E-6 : f32
      %76 = vector.broadcast %cst_61 : f32 to vector<128x1xf32>
      %77 = arith.addf %75, %76 : vector<128x1xf32>
      %78 = math.rsqrt %77 : vector<128x1xf32>
      %79 = vector.broadcast %78 : vector<128x1xf32> to vector<128x32xf32>
      %80 = arith.mulf %70, %79 : vector<128x32xf32>
      %81 = vector.broadcast %63 : vector<1x32xf32> to vector<128x32xf32>
      %82 = arith.mulf %80, %81 : vector<128x32xf32>
      %83 = vector.broadcast %64 : vector<1x32xf32> to vector<128x32xf32>
      %84 = arith.addf %82, %83 : vector<128x32xf32>
      %85 = arith.truncf %84 : vector<128x32xf32> to vector<128x32xbf16>
      %c0_62 = arith.constant 0 : index
      %c0_63 = arith.constant 0 : index
      %86 = vector.load %arg16[%c0_62, %c0_63] : memref<32x128xbf16, #tpu.memory_space<vmem>>, vector<32x128xbf16>
      %cst_64 = arith.constant dense<0.000000e+00> : vector<128x128xf32>
      %87 = tpu.matmul %85, %86, %cst_64 {dimension_numbers = #tpu.dot_dimension_numbers<[1], [0], [0], [1], [0, 0, 1, 1], [], []>} : vector<128x32xbf16>, vector<32x128xbf16>, vector<128x128xf32> -> vector<128x128xf32>
      %c0_65 = arith.constant 0 : index
      %c0_66 = arith.constant 0 : index
      %88 = vector.load %arg17[%c0_65, %c0_66] : memref<1x128xf32, #tpu.memory_space<vmem>>, vector<1x128xf32>
      %89 = vector.broadcast %88 : vector<1x128xf32> to vector<128x128xf32>
      %90 = arith.addf %87, %89 : vector<128x128xf32>
      %cst_67 = arith.constant 5.000000e-01 : f32
      %91 = vector.broadcast %cst_67 : f32 to vector<128x128xf32>
      %92 = arith.mulf %91, %90 : vector<128x128xf32>
      %cst_68 = arith.constant 0.707106769 : f32
      %93 = vector.broadcast %cst_68 : f32 to vector<128x128xf32>
      %94 = arith.mulf %90, %93 : vector<128x128xf32>
      %95 = math.erf %94 : vector<128x128xf32>
      %cst_69 = arith.constant 1.000000e+00 : f32
      %96 = vector.broadcast %cst_69 : f32 to vector<128x128xf32>
      %97 = arith.addf %96, %95 : vector<128x128xf32>
      %98 = arith.mulf %92, %97 : vector<128x128xf32>
      %99 = arith.truncf %98 : vector<128x128xf32> to vector<128x128xbf16>
      %c0_70 = arith.constant 0 : index
      %c0_71 = arith.constant 0 : index
      %100 = vector.load %arg18[%c0_70, %c0_71] : memref<128x32xbf16, #tpu.memory_space<vmem>>, vector<128x32xbf16>
      %cst_72 = arith.constant dense<0.000000e+00> : vector<128x32xf32>
      %101 = tpu.matmul %99, %100, %cst_72 {dimension_numbers = #tpu.dot_dimension_numbers<[1], [0], [0], [1], [0, 0, 1, 1], [], []>} : vector<128x128xbf16>, vector<128x32xbf16>, vector<128x32xf32> -> vector<128x32xf32>
      %c0_73 = arith.constant 0 : index
      %c0_74 = arith.constant 0 : index
      %102 = vector.load %arg19[%c0_73, %c0_74] : memref<1x32xf32, #tpu.memory_space<vmem>>, vector<1x32xf32>
      %103 = vector.broadcast %102 : vector<1x32xf32> to vector<128x32xf32>
      %104 = arith.addf %101, %103 : vector<128x32xf32>
      %105 = arith.addf %62, %104 : vector<128x32xf32>
      %c0_75 = arith.constant 0 : index
      %c0_76 = arith.constant 0 : index
      %c0_77 = arith.constant 0 : index
      %106 = vector.load %arg20[%c0_75, %c0_76, %c0_77] : memref<1x128x32xf32, #tpu.memory_space<vmem>>, vector<1x128x32xf32>
      %107 = vector.shape_cast %106 : vector<1x128x32xf32> to vector<128x32xf32>
      %108 = vector.shape_cast %105 : vector<128x32xf32> to vector<1x128x32xf32>
      tpu.vector_store %arg20[%c0_75, %c0_76, %c0_77], %108 {strides = array<i32>} : memref<1x128x32xf32, #tpu.memory_space<vmem>>, vector<1x128x32xf32>,
    } else {
    }
    return
  }
  func.func @transform_0(%arg0: i32, %arg1: i32, %arg2: i32) -> (i32, i32, i32) {
    %c0_i32 = arith.constant 0 : i32
    %c0_i32_0 = arith.constant 0 : i32
    return %arg0, %arg1, %c0_i32 : i32, i32, i32
  }
  func.func @transform_1(%arg0: i32, %arg1: i32, %arg2: i32) -> (i32, i32, i32) {
    %c0_i32 = arith.constant 0 : i32
    %c0_i32_0 = arith.constant 0 : i32
    %c0_i32_1 = arith.constant 0 : i32
    return %arg0, %c0_i32, %c0_i32_0 : i32, i32, i32
  }
  func.func @transform_2(%arg0: i32, %arg1: i32, %arg2: i32) -> (i32, i32, i32, i32) {
    %c0_i32 = arith.constant 0 : i32
    %c0_i32_0 = arith.constant 0 : i32
    return %arg0, %c0_i32, %arg1, %arg2 : i32, i32, i32, i32
  }
  func.func @transform_3(%arg0: i32, %arg1: i32, %arg2: i32) -> (i32, i32) {
    %c0_i32 = arith.constant 0 : i32
    %c0_i32_0 = arith.constant 0 : i32
    %c0_i32_1 = arith.constant 0 : i32
    return %c0_i32, %c0_i32_0 : i32, i32
  }
  func.func @transform_4(%arg0: i32, %arg1: i32, %arg2: i32) -> (i32, i32) {
    %c0_i32 = arith.constant 0 : i32
    %c0_i32_0 = arith.constant 0 : i32
    %c0_i32_1 = arith.constant 0 : i32
    return %c0_i32, %c0_i32_0 : i32, i32
  }
  func.func @transform_5(%arg0: i32, %arg1: i32, %arg2: i32) -> (i32, i32) {
    %c0_i32 = arith.constant 0 : i32
    %c0_i32_0 = arith.constant 0 : i32
    %c0_i32_1 = arith.constant 0 : i32
    return %c0_i32, %c0_i32_0 : i32, i32
  }
  func.func @transform_6(%arg0: i32, %arg1: i32, %arg2: i32) -> (i32, i32) {
    %c0_i32 = arith.constant 0 : i32
    %c0_i32_0 = arith.constant 0 : i32
    %c0_i32_1 = arith.constant 0 : i32
    return %c0_i32, %c0_i32_0 : i32, i32
  }
  func.func @transform_7(%arg0: i32, %arg1: i32, %arg2: i32) -> (i32, i32) {
    %c0_i32 = arith.constant 0 : i32
    %c0_i32_0 = arith.constant 0 : i32
    %c0_i32_1 = arith.constant 0 : i32
    return %c0_i32, %c0_i32_0 : i32, i32
  }
  func.func @transform_8(%arg0: i32, %arg1: i32, %arg2: i32) -> (i32, i32) {
    %c0_i32 = arith.constant 0 : i32
    %c0_i32_0 = arith.constant 0 : i32
    %c0_i32_1 = arith.constant 0 : i32
    return %c0_i32, %c0_i32_0 : i32, i32
  }
  func.func @transform_9(%arg0: i32, %arg1: i32, %arg2: i32) -> (i32, i32) {
    %c0_i32 = arith.constant 0 : i32
    %c0_i32_0 = arith.constant 0 : i32
    %c0_i32_1 = arith.constant 0 : i32
    return %c0_i32, %c0_i32_0 : i32, i32
  }
  func.func @transform_10(%arg0: i32, %arg1: i32, %arg2: i32) -> (i32, i32) {
    %c0_i32 = arith.constant 0 : i32
    %c0_i32_0 = arith.constant 0 : i32
    %c0_i32_1 = arith.constant 0 : i32
    return %c0_i32, %c0_i32_0 : i32, i32
  }
  func.func @transform_11(%arg0: i32, %arg1: i32, %arg2: i32) -> (i32, i32, i32) {
    %c0_i32 = arith.constant 0 : i32
    %c0_i32_0 = arith.constant 0 : i32
    %c0_i32_1 = arith.constant 0 : i32
    %c0_i32_2 = arith.constant 0 : i32
    return %c0_i32, %c0_i32_0, %c0_i32_1 : i32, i32, i32
  }
  func.func @transform_12(%arg0: i32, %arg1: i32, %arg2: i32) -> (i32, i32) {
    %c0_i32 = arith.constant 0 : i32
    %c0_i32_0 = arith.constant 0 : i32
    %c0_i32_1 = arith.constant 0 : i32
    return %c0_i32, %c0_i32_0 : i32, i32
  }
  func.func @transform_13(%arg0: i32, %arg1: i32, %arg2: i32) -> (i32, i32) {
    %c0_i32 = arith.constant 0 : i32
    %c0_i32_0 = arith.constant 0 : i32
    %c0_i32_1 = arith.constant 0 : i32
    return %c0_i32, %c0_i32_0 : i32, i32
  }
  func.func @transform_14(%arg0: i32, %arg1: i32, %arg2: i32) -> (i32, i32) {
    %c0_i32 = arith.constant 0 : i32
    %c0_i32_0 = arith.constant 0 : i32
    %c0_i32_1 = arith.constant 0 : i32
    return %c0_i32, %c0_i32_0 : i32, i32
  }
  func.func @transform_15(%arg0: i32, %arg1: i32, %arg2: i32) -> (i32, i32) {
    %c0_i32 = arith.constant 0 : i32
    %c0_i32_0 = arith.constant 0 : i32
    %c0_i32_1 = arith.constant 0 : i32
    return %c0_i32, %c0_i32_0 : i32, i32
  }
  func.func @transform_16(%arg0: i32, %arg1: i32, %arg2: i32) -> (i32, i32) {
    %c0_i32 = arith.constant 0 : i32
    %c0_i32_0 = arith.constant 0 : i32
    %c0_i32_1 = arith.constant 0 : i32
    return %c0_i32, %c0_i32_0 : i32, i32
  }
  func.func @transform_17(%arg0: i32, %arg1: i32, %arg2: i32) -> (i32, i32, i32) {
    %c0_i32 = arith.constant 0 : i32
    %c0_i32_0 = arith.constant 0 : i32
    return %arg0, %arg1, %c0_i32 : i32, i32, i32
  }
}

</mosaic_0001>

<bundles_post_ra>
// kernel: tpu_custom_call.1
= control target key start
LH: loop header
LB: loop body
LE: loop exit
PB: predicated region body
PF: predicated region fallthrough
CT: control target
= control target key end

     0   :  { %s14297_s0 = inlined_call_operand.vmem [shape: f32[2,256,32], index: 0, kind: input, shape index: {}]   ;;  %s14298_s1 = inlined_call_operand.vmem [shape: f32[2,256,32], index: 1, kind: input, shape index: {}]   ;;  %s14299_s2 = inlined_call_operand.hbm [shape: bf16[2,4,256,256], index: 2, kind: input, shape index: {}]   ;;  %s14300_s3 = inlined_call_operand.vmem [shape: f32[1,32], index: 3, kind: input, shape index: {}]   ;;  %s14301_s4 = inlined_call_operand.vmem [shape: f32[1,32], index: 4, kind: input, shape index: {}]   ;;  %s14302_s5 = inlined_call_operand.vmem [shape: f32[1,32], index: 5, kind: input, shape index: {}]   ;;  %s14303_s6 = inlined_call_operand.vmem [shape: f32[1,32], index: 6, kind: input, shape index: {}]   ;;  %s14304_s7 = inlined_call_operand.vmem [shape: f32[1,32], index: 7, kind: input, shape index: {}]   ;;  %s14305_s8 = inlined_call_operand.vmem [shape: f32[1,32], index: 8, kind: input, shape index: {}]   ;;  %s14306_s9 = inlined_call_operand.vmem [shape: bf16[32,32], index: 9, kind: input, shape index: {}]   ;;  %s14307_s10 = inlined_call_operand.vmem [shape: bf16[32,64], index: 10, kind: input, shape index: {}]   ;;  %s14308_s11 = inlined_call_operand.vmem [shape: bf16[4,8,32], index: 11, kind: input, shape index: {}]   ;;  %s14309_s12 = inlined_call_operand.vmem [shape: f32[1,32], index: 12, kind: input, shape index: {}]   ;;  %s14310_s13 = inlined_call_operand.vmem [shape: bf16[32,128], index: 13, kind: input, shape index: {}]   ;;  %s14311_s14 = inlined_call_operand.vmem [shape: f32[1,128], index: 14, kind: input, shape index: {}]   ;;  %s14312_s15 = inlined_call_operand.vmem [shape: bf16[128,32], index: 15, kind: input, shape index: {}]   ;;  %s14313_s16 = inlined_call_operand.vmem [shape: f32[1,32], index: 16, kind: input, shape index: {}]   ;;  %s14314_s17 = inlined_call_operand.vmem [shape: f32[2,256,32], index: 17, kind: output, shape index: {}]  }
   0x1   :  { %14473 = sst [smem:[#allocation145_spill]] %s14297_s0 }
   0x2   :  { %14474 = sst [smem:[#allocation146_spill]] %s14298_s1 }
   0x3   :  { %14475 = sst [smem:[#allocation147_spill]] %s14301_s4 }
   0x4   :  { %14476 = sst [smem:[#allocation148_spill]] %s14304_s7 }
   0x5   :  { %14477 = sst [smem:[#allocation149_spill]] %s14305_s8 }
   0x6   :  { %14478 = sst [smem:[#allocation150_spill]] %s14308_s11 }
   0x7   :  { %14479 = sst [smem:[#allocation151_spill]] %s14309_s12 }
   0x8   :  { %14480 = sst [smem:[#allocation152_spill]] %s14310_s13 }
   0x9   :  { %14481 = sst [smem:[#allocation153_spill]] %s14311_s14 }
   0xa   :  { %14482 = sst [smem:[#allocation154_spill]] %s14312_s15 }
   0xb   :  { %14483 = sst [smem:[#allocation155_spill]] %s14313_s16 }
   0xc   :  { %22 = vsyncpa [#allocation9], 0 }
   0xd   :  { %24 = vsyncpa [#allocation9 + $0x1], 0  ;;  %s10041_s24 = smov 0   ;;  %s10043_s25 = smov 0  }
   0xe   :  { %s10045_s26 = smov 0   ;;  %s10047_s27 = smov 0  }
   0xf   :  { %s10049_s28 = smov 0   ;;  %s10051_s29 = smov 0  }
  0x10   :  { %s10053_s0 = smov 0   ;;  %s10055_s30 = smov 0  }
  0x11   :  { %s10057_s18 = smov 0   ;;  %s10059_s19 = smov 0  }
  0x12 LB: > { %14484 = sst [smem:[#allocation14_spill]] %s9920_s30  ;;  %s42_s1 = sadd.s32 1, %s9916_s0  ;;  %s9928_s19 = sphi %s10059_s19, %s30_s19   ;;  %s9924_s18 = sphi %s10057_s18, %s14867_s18   ;;  %s9920_s30 = sphi %s10055_s30, %s14866_s30   ;;  %s9916_s0 = sphi %s10053_s0, %s14872_s0   ;;  %s9912_s29 = sphi %s10051_s29, %s14864_s29   ;;  %s9908_s28 = sphi %s10049_s28, %s14863_s28   ;;  %s9904_s27 = sphi %s10047_s27, %s14871_s27   ;;  %s9900_s26 = sphi %s10045_s26, %s14870_s26   ;;  %s9896_s25 = sphi %s10043_s25, %s14869_s25   ;;  %s9892_s24 = sphi %s10041_s24, %s14868_s24  }
  0x13   : > { %14485 = sst [smem:[#allocation15_spill]] %s9924_s18  ;;  %p43_p0 = scmp.ge.s32.totalorder %s42_s1, 2 }
  0x14   : > { %s45_s20 = sadd.s32 1, %s9920_s30  ;;  %s8168_s21 = sadd.s32 4294967295, %s9928_s19  }
  0x15   : > { %s14874_s1 = smov (%p43_p0, %s42_s1), 0  ;;  %s14876_s20 = smov (!%p43_p0, %s45_s20), %s9920_s30 }
  0x16   : > { %14486 = sst [smem:[#allocation16_spill]] %s14874_s1  ;;  %s49_s22 = sadd.s32 1, %s9924_s18 }
  0x17   : > { %p121_p1 = scmp.ne.s32.totalorder %s9900_s26, %s9896_s25  ;;  %p47_p2 = scmp.ge.s32.totalorder %s14876_s20, 2 }
  0x18   : > { %p122_p3 = scmp.eq.s32.totalorder %s9928_s19, 0  ;;  %p127_p4 = scmp.ne.s32.totalorder %s9896_s25, %s9892_s24 }
  0x19   : > { %p128_p5 = scmp.eq.s32.totalorder %s8168_s21, 0  ;;  %s14878_s20 = smov (%p47_p2, %s14876_s20), 0 }
  0x1a   : > { %14487 = sst [smem:[#allocation17_spill]] %s14878_s20  ;;  %s14880_s22 = smov (!%p47_p2, %s49_s22), %s9924_s18 }
  0x1b   : > { %p10103_p6 = por %p122_p3, %p121_p1  ;;  %p51_p7 = scmp.ge.s32.totalorder %s14880_s22, 2 }
  0x1c   : > { %p10107_p8 = por %p128_p5, %p127_p4  ;;  %s108_s14 = ssub.s32 %s9920_s30, %s14878_s20 }
  0x1d   : > { %s14882_s22 = smov (%p51_p7, %s14880_s22), 0  ;;  %s110_s8 = ssub.s32 %s9916_s0, %s14874_s1 }
  0x1e   : > { %14490 = sst [smem:[#allocation18_spill]] %s14882_s22  ;;  %s107_s24 = ssub.s32 %s9924_s18, %s14882_s22 }
  0x1f   : > { %s109_s21 = sor.u32 %s108_s14, %s107_s24  ;;  %s114_s15 = sadd.s32 1, %s9900_s26 }
  0x20   : > { %s111_s7 = sor.u32 %s110_s8, %s109_s21  ;;  %p8171_p10 = scmp.ge.s32.totalorder %s9928_s19, 8 }
  0x21   : > { %p112_p9 = scmp.eq.s32.totalorder %s111_s7, 0 }
  0x22   : > { %519 = sbr.rel (%p8171_p10) target bundleno = 58 (0x3a), region = 76 }
  0x23   : > { %s10121_s13 = scalar_select %p112_p9, %s9900_s26, %s114_s15  }
  0x25   : > { %14491 = sst [smem:[#allocation19_spill]] %s10121_s13 }
  0x29   : > { %s536_s20 = sand.u32 1, %s9900_s26   ;;  %s8315_s1 = sshll.u32 %s9920_s30, 5 }
  0x2a   : > { %s8172_s22 = sshll.u32 %s536_s20, 8  ;;  %s546_s8 = sadd.s32 %s9916_s0, %s8315_s1 }
  0x2b   : > { %s8175_s14 = sshll.u32 %s9924_s18, 8  ;;  %s540_s15 = scalar_lea.vmem [#allocation8], %s8172_s22 }
  0x2c   : > { %s548_s7 = sadd.s32 %s8175_s14, %s546_s8  ;;  %s563_s24 = sshll.u32 %s540_s15, 4  ;;  %s564_s24 = int_to_ptr.vmem [resolvable:$true] %s563_s24 }
  0x2d   : > { %s8176_s21 = sshll.u32 %s548_s7, 6  ;;  %s9930_s13 = smov 4096  }
  0x2e   : > { %9175 = sst [smem:[#allocation11]] (%p10103_p6), %s9930_s13  ;;  %s9931_s4 = smov 1024  }
  0x2f   : > { %s9174_s12 = scalar_select %p10103_p6, [#allocation0], [#allocation12] }
  0x30   : > { %9176 = sst [smem:[#allocation11 + $0x1]] (%p10103_p6), %s9931_s4  ;;  %s9932_s30 = smov 16  }
  0x31   : > { %s555_s11 = sld [smem:[%s9174_s12]]   ;;  %s9933_s1 = smov 128  }
  0x32   : > { %9177 = sst [smem:[#allocation11 + $0x2]] (%p10103_p6), %s9932_s30  ;;  %s9934_s22 = smov 64  }
  0x33   : > { %9178 = sst [smem:[#allocation11 + $0x3]] (%p10103_p6), %s9933_s1  ;;  %s9935_s8 = smov 4  }
  0x34   : > { %9179 = sst [smem:[#allocation11 + $0x4]] (%p10103_p6), %s9934_s22  ;;  %s550_s12 = scalar_lea.hbm %s14299_s2, %s8176_s21 }
  0x35   : > { %9180 = sst [smem:[#allocation11 + $0x5]] (%p10103_p6), %s9935_s8  ;;  %s537_s4 = scalar_lea.sflag [#allocation9], %s536_s20 }
  0x36   : > { %s9936_s18 = smov [#allocation10]  }
  0x37   : > { %s8177_s7 = sshll.u32 %s555_s11, 26 }
  0x38   : > { %s8178_s15 = sadd.s32 134217728, %s8177_s7 }
  0x39   : > { %9181 = dma.general (%p10103_p6), %s550_s12, 4096, %s564_s24, %s537_s4, %s9936_s18, [#allocation11], %s8178_s15, 0  }
  0x3a PF: > { %p8179_p11 = scmp.ge.s32.totalorder %s9928_s19, 1  ;;  %p584_p12 = scmp.lt.s32.totalorder %s9928_s19, 9 }
  0x3c   : > { %p585_p13 = pnand %p8179_p11, %p584_p12 }
  0x3e   : > { %588 = sbr.rel (%p585_p13) target bundleno = 3919 (0xf4f), region = 88 }
  0x45   : > { %s590_s30 = sand.u32 1, %s9896_s25  }
  0x46   : > { %s8180_s1 = sshll.u32 %s590_s30, 8  ;;  %s591_s22 = scalar_lea.sflag [#allocation9], %s590_s30 }
  0x47   : > { %s10150_s8 = scalar_lea.vmem [#allocation8], %s8180_s1 }
  0x48   : > { %9887 = dma.done.wait (%p10107_p8), %s591_s22, 4096  }
  0x49   : > { %9889 = vsyncadd (%p10107_p8), %s591_s22, 4294963200  ;;  %s8181_s11 = sshll.u32 %s9908_s28, 4  ;;  %p664_p0 = scmp.lt.s32.totalorder %s9912_s29, 1 }
  0x4a   : > { %p666_p1 = scmp.lt.s32.totalorder %s8181_s11, 31  ;;  %p690_p2 = scmp.eq.s32.totalorder %s9908_s28, 0 }
  0x4b   : > { %s14884_s29 = smov (!%p664_p0, %s9912_s29), 1  ;;  %s14492_s13 = sld [smem:[#allocation146_spill]] }
  0x4c   : > { %s14886_s11 = smov (!%p666_p1, %s8181_s11), 31  ;;  %s8182_s18 = sshll.u32 %s14884_s29, 5 }
  0x4d   : > { %s8316_s20 = sshll.u32 %s14884_s29, 8  ;;  %s669_s23 = sadd.s32 %s8182_s18, %s14886_s11 }
  0x4e   : > { %s8183_s16 = sshll.u32 %s669_s23, 3  ;;  %p691_p3 = scmp.eq.s32.totalorder %s9904_s27, 0 }
  0x4f   : > { %s14493_s15 = sld [smem:[#allocation145_spill]]  ;;  %s10174_s28 = scalar_lea.vmem %s14314_s17, %s8183_s16 }
  0x50   : > { %p692_p4 = pnand %p691_p3, %p690_p2 }
  0x51   : > { %s10163_s14 = scalar_lea.vmem %s14492_s13, %s8316_s20  ;;  %vm730_vm0 = vcmask (!%p692_p4), 261120   ;;  %vm1481_vm1 = vcmask (!%p692_p4), 64512   ;;  %s9937_s13 = smov (!%p692_p4), 96  }
  0x52   : > { %695 = sbr.rel (%p692_p4) target bundleno = 966 (0x3c6), region = 96  ;;  %v10177_v0 = vld [vmem:[%s10163_s14] sm:$0xff] (!%p692_p4)  ;;  %v10183_v2 = vld [vmem:[%s10163_s14 + $0x8] sm:$0xff] (!%p692_p4)  ;;  %v10197_v8 = vld [vmem:[%s10163_s14 + $0x10] sm:$0xff] (!%p692_p4)  ;;  %s9940_s12 = smov (!%p692_p4), 112  }
  0x53   : > { %v10180_v1 = vld [vmem:[%s10163_s14 + $0x80] sm:$0xff] (!%p692_p4)  ;;  %v731_v3 = vsel (!%p692_p4), %vm730_vm0, %v10177_v0, 0.0  ;;  %v10190_v5 = vld [vmem:[%s10163_s14 + $0x88] sm:$0xff] (!%p692_p4)  ;;  %v734_v6 = vsel (!%p692_p4), %vm730_vm0, %v10183_v2, 0.0  ;;  %v10200_v9 = vld [vmem:[%s10163_s14 + $0x18] sm:$0xff] (!%p692_p4)  ;;  %v737_v10 = vsel (!%p692_p4), %vm730_vm0, %v10197_v8, 0.0 }
  0x54   : > { %v779_v4 = vsel (!%p692_p4), %vm730_vm0, %v10180_v1, 0.0  ;;  %732 = vadd.xlane.f32.xlu0 (!%p692_p4), %v731_v3  ;;  %v782_v7 = vsel (!%p692_p4), %vm730_vm0, %v10190_v5, 0.0  ;;  %v740_v11 = vsel (!%p692_p4), %vm730_vm0, %v10200_v9, 0.0  ;;  %v10207_v12 = vld [vmem:[%s10163_s14 + $0x90] sm:$0xff] (!%p692_p4)  ;;  %v10210_v13 = vld [vmem:[%s10163_s14 + $0x98] sm:$0xff] (!%p692_p4)  ;;  %v10213_v14 = vld [vmem:[%s10163_s14 + $0x20] sm:$0xff] (!%p692_p4) }
  0x55   : > { %s10169_s4 = scalar_lea.vmem %s14493_s15, %s8183_s16  ;;  %780 = vadd.xlane.f32.xlu1 (!%p692_p4), %v779_v4  ;;  %v785_v15 = vsel (!%p692_p4), %vm730_vm0, %v10207_v12, 0.0  ;;  %v788_v16 = vsel (!%p692_p4), %vm730_vm0, %v10210_v13, 0.0  ;;  %v10220_v17 = vld [vmem:[%s10163_s14 + $0x28] sm:$0xff] (!%p692_p4)  ;;  %v743_v18 = vsel (!%p692_p4), %vm730_vm0, %v10213_v14, 0.0  ;;  %v10227_v20 = vld [vmem:[%s10163_s14 + $0xa0] sm:$0xff] (!%p692_p4)  ;;  %v10237_v24 = vld [vmem:[%s10163_s14 + $0x30] sm:$0xff] (!%p692_p4) }
  0x56   : > { %v746_v19 = vsel (!%p692_p4), %vm730_vm0, %v10220_v17, 0.0  ;;  %v10230_v21 = vld [vmem:[%s10163_s14 + $0xa8] sm:$0xff] (!%p692_p4)  ;;  %v791_v22 = vsel (!%p692_p4), %vm730_vm0, %v10227_v20, 0.0  ;;  %v10240_v25 = vld [vmem:[%s10163_s14 + $0x38] sm:$0xff] (!%p692_p4)  ;;  %v749_v26 = vsel (!%p692_p4), %vm730_vm0, %v10237_v24, 0.0  ;;  %v10247_v28 = vld [vmem:[%s10163_s14 + $0xb0] sm:$0xff] (!%p692_p4) }
  0x57   : > { %v794_v23 = vsel (!%p692_p4), %vm730_vm0, %v10230_v21, 0.0  ;;  %v752_v27 = vsel (!%p692_p4), %vm730_vm0, %v10240_v25, 0.0  ;;  %v10250_v29 = vld [vmem:[%s10163_s14 + $0xb8] sm:$0xff] (!%p692_p4)  ;;  %v797_v30 = vsel (!%p692_p4), %vm730_vm0, %v10247_v28, 0.0  ;;  %v10257_v32 = vld [vmem:[%s10163_s14 + $0x40] sm:$0xff] (!%p692_p4)  ;;  %v10260_v33 = vld [vmem:[%s10163_s14 + $0x48] sm:$0xff] (!%p692_p4) }
  0x58   : > { %735 = vadd.xlane.f32.xlu0 (!%p692_p4), %v734_v6  ;;  %v800_v31 = vsel (!%p692_p4), %vm730_vm0, %v10250_v29, 0.0  ;;  %v755_v34 = vsel (!%p692_p4), %vm730_vm0, %v10257_v32, 0.0  ;;  %v758_v35 = vsel (!%p692_p4), %vm730_vm0, %v10260_v33, 0.0  ;;  %v10267_v36 = vld [vmem:[%s10163_s14 + $0xc0] sm:$0xff] (!%p692_p4)  ;;  %v10270_v37 = vld [vmem:[%s10163_s14 + $0xc8] sm:$0xff] (!%p692_p4)  ;;  %v10277_v40 = vld [vmem:[%s10163_s14 + $0x50] sm:$0xff] (!%p692_p4) }
  0x59   : > { %783 = vadd.xlane.f32.xlu1 %v782_v7  ;;  %v803_v38 = vsel %vm730_vm0, %v10267_v36, 0.0  ;;  %v806_v39 = vsel %vm730_vm0, %v10270_v37, 0.0  ;;  %v10280_v41 = vld [vmem:[%s10163_s14 + $0x58] sm:$0xff]  ;;  %v761_v42 = vsel %vm730_vm0, %v10277_v40, 0.0  ;;  %v10287_v44 = vld [vmem:[%s10163_s14 + $0xd0] sm:$0xff]  ;;  %v10297_v48 = vld [vmem:[%s10163_s14 + $0x60] sm:$0xff] }
  0x5a   : > { %v764_v43 = vsel %vm730_vm0, %v10280_v41, 0.0  ;;  %v10290_v45 = vld [vmem:[%s10163_s14 + $0xd8] sm:$0xff]  ;;  %v809_v46 = vsel %vm730_vm0, %v10287_v44, 0.0  ;;  %v10300_v49 = vld [vmem:[%s10163_s14 + $0x68] sm:$0xff]  ;;  %v767_v50 = vsel %vm730_vm0, %v10297_v48, 0.0  ;;  %v10307_v52 = vld [vmem:[%s10163_s14 + $0xe0] sm:$0xff] }
  0x5b   : > { %v812_v47 = vsel %vm730_vm0, %v10290_v45, 0.0  ;;  %v770_v51 = vsel %vm730_vm0, %v10300_v49, 0.0  ;;  %v10310_v53 = vld [vmem:[%s10163_s14 + $0xe8] sm:$0xff]  ;;  %v815_v54 = vsel %vm730_vm0, %v10307_v52, 0.0  ;;  %v10317_v56 = vld [vmem:[%s10163_s14 + $0x70] sm:$0xff]  ;;  %v10320_v57 = vld [vmem:[%s10163_s14 + $0x78] sm:$0xff] }
  0x5c   : > { %738 = vadd.xlane.f32.xlu0 %v737_v10  ;;  %v818_v55 = vsel %vm730_vm0, %v10310_v53, 0.0  ;;  %v773_v58 = vsel %vm730_vm0, %v10317_v56, 0.0  ;;  %v776_v59 = vsel %vm730_vm0, %v10320_v57, 0.0  ;;  %v10327_v60 = vld [vmem:[%s10163_s14 + $0xf0] sm:$0xff]  ;;  %v10330_v61 = vld [vmem:[%s10163_s14 + $0xf8] sm:$0xff]  ;;  %s9938_s14 = smov 120  }
  0x5d   : > { %741 = vadd.xlane.f32.xlu1 %v740_v11  ;;  %v821_v62 = vsel %vm730_vm0, %v10327_v60, 0.0  ;;  %v824_v63 = vsel %vm730_vm0, %v10330_v61, 0.0  ;;  %s9939_s16 = smov 88   ;;  %s9941_s7 = smov 80  }
  0x5e   : > { %s9942_s15 = smov 104   ;;  %s9943_s30 = smov 72  }
  0x60   : > { %786 = vadd.xlane.f32.xlu0 %v785_v15 }
  0x61   : > { %789 = vadd.xlane.f32.xlu1 %v788_v16 }
  0x64   : > { %744 = vadd.xlane.f32.xlu0 %v743_v18 }
  0x65   : > { %747 = vadd.xlane.f32.xlu1 %v746_v19 }
  0x68   : > { %792 = vadd.xlane.f32.xlu0 %v791_v22 }
  0x69   : > { %795 = vadd.xlane.f32.xlu1 %v794_v23 }
  0x6c   : > { %750 = vadd.xlane.f32.xlu0 %v749_v26 }
  0x6d   : > { %753 = vadd.xlane.f32.xlu1 %v752_v27 }
  0x70   : > { %798 = vadd.xlane.f32.xlu0 %v797_v30 }
  0x71   : > { %801 = vadd.xlane.f32.xlu1 %v800_v31 }
  0x74   : > { %756 = vadd.xlane.f32.xlu0 %v755_v34 }
  0x75   : > { %759 = vadd.xlane.f32.xlu1 %v758_v35 }
  0x78   : > { %804 = vadd.xlane.f32.xlu0 %v803_v38 }
  0x79   : > { %807 = vadd.xlane.f32.xlu1 %v806_v39 }
  0x7c   : > { %762 = vadd.xlane.f32.xlu0 %v761_v42 }
  0x7d   : > { %765 = vadd.xlane.f32.xlu1 %v764_v43 }
  0x80   : > { %810 = vadd.xlane.f32.xlu0 %v809_v46 }
  0x81   : > { %813 = vadd.xlane.f32.xlu1 %v812_v47 }
  0x84   : > { %768 = vadd.xlane.f32.xlu0 %v767_v50 }
  0x85   : > { %771 = vadd.xlane.f32.xlu1 %v770_v51 }
  0x88   : > { %816 = vadd.xlane.f32.xlu0 %v815_v54 }
  0x89   : > { %819 = vadd.xlane.f32.xlu1 %v818_v55 }
  0x8c   : > { %774 = vadd.xlane.f32.xlu0 %v773_v58 }
  0x8d   : > { %777 = vadd.xlane.f32.xlu1 %v776_v59 }
  0x90   : > { %822 = vadd.xlane.f32.xlu0 %v821_v62 }
  0x91   : > { %825 = vadd.xlane.f32.xlu1 %v824_v63 }
  0xe1   : > { %v733_v3 = vpop.xlane.xlu0 %732 }
  0xe2   : > { %v781_v4 = vpop.xlane.xlu1 %780  ;;  %v828_v6 = vmul.f32 0.03125, %v733_v3 }
  0xe3   : > { %v844_v7 = vmul.f32 0.03125, %v781_v4 }
  0xe4   : > { %v10337_v10 = vsub.f32 %v10177_v0, %v828_v6 }
  0xe5   : > { %v10340_v11 = vsub.f32 %v10180_v1, %v844_v7  ;;  %v736_v15 = vpop.xlane.xlu0 %735 }
  0xe6   : > { %v784_v16 = vpop.xlane.xlu1 %783  ;;  %v829_v18 = vmul.f32 0.03125, %v736_v15  ;;  %v892_v22 = vmul.f32 %v10337_v10, %v10337_v10 }
  0xe7   : > { %v845_v19 = vmul.f32 0.03125, %v784_v16  ;;  %v908_v23 = vmul.f32 %v10340_v11, %v10340_v11 }
  0xe8   : > { %v10347_v26 = vsub.f32 %v10183_v2, %v829_v18  ;;  %v924_v0 = vsel %vm730_vm0, %v892_v22, 0.0 }
  0xe9   : > { %v10350_v27 = vsub.f32 %v10190_v5, %v845_v19  ;;  %925 = vadd.xlane.f32.xlu0 %v924_v0  ;;  %v739_v1 = vpop.xlane.xlu0 %738  ;;  %v972_v31 = vsel %vm730_vm0, %v908_v23, 0.0 }
  0xea   : > { %v742_v30 = vpop.xlane.xlu1 %741  ;;  %v830_v34 = vmul.f32 0.03125, %v739_v1  ;;  %v893_v38 = vmul.f32 %v10347_v26, %v10347_v26 }
  0xeb   : > { %v831_v35 = vmul.f32 0.03125, %v742_v30  ;;  %v909_v39 = vmul.f32 %v10350_v27, %v10350_v27 }
  0xec   : > { %v10359_v2 = vsub.f32 %v10197_v8, %v830_v34  ;;  %v927_v42 = vsel %vm730_vm0, %v893_v38, 0.0 }
  0xed   : > { %v10362_v5 = vsub.f32 %v10200_v9, %v831_v35  ;;  %973 = vadd.xlane.f32.xlu0 %v972_v31  ;;  %928 = vadd.xlane.f32.xlu1 %v927_v42  ;;  %v787_v43 = vpop.xlane.xlu0 %786  ;;  %v975_v47 = vsel %vm730_vm0, %v909_v39, 0.0 }
  0xee   : > { %v790_v46 = vpop.xlane.xlu1 %789  ;;  %v846_v50 = vmul.f32 0.03125, %v787_v43  ;;  %v894_v54 = vmul.f32 %v10359_v2, %v10359_v2 }
  0xef   : > { %v847_v51 = vmul.f32 0.03125, %v790_v46  ;;  %v895_v8 = vmul.f32 %v10362_v5, %v10362_v5 }
  0xf0   : > { %v10371_v55 = vsub.f32 %v10207_v12, %v846_v50  ;;  %v930_v58 = vsel %vm730_vm0, %v894_v54, 0.0 }
  0xf1   : > { %v10374_v9 = vsub.f32 %v10210_v13, %v847_v51  ;;  %976 = vadd.xlane.f32.xlu1 %v975_v47  ;;  %931 = vadd.xlane.f32.xlu0 %v930_v58  ;;  %v745_v59 = vpop.xlane.xlu0 %744  ;;  %v933_v63 = vsel %vm730_vm0, %v895_v8, 0.0 }
  0xf2   : > { %v748_v62 = vpop.xlane.xlu1 %747  ;;  %v832_v3 = vmul.f32 0.03125, %v745_v59  ;;  %v910_v6 = vmul.f32 %v10371_v55, %v10371_v55 }
  0xf3   : > { %v833_v4 = vmul.f32 0.03125, %v748_v62  ;;  %v911_v12 = vmul.f32 %v10374_v9, %v10374_v9 }
  0xf4   : > { %v10383_v7 = vsub.f32 %v10213_v14, %v832_v3  ;;  %v978_v15 = vsel %vm730_vm0, %v910_v6, 0.0 }
  0xf5   : > { %v10386_v13 = vsub.f32 %v10220_v17, %v833_v4  ;;  %934 = vadd.xlane.f32.xlu1 %v933_v63  ;;  %979 = vadd.xlane.f32.xlu0 %v978_v15  ;;  %v793_v16 = vpop.xlane.xlu0 %792  ;;  %v981_v19 = vsel %vm730_vm0, %v911_v12, 0.0 }
  0xf6   : > { %v796_v18 = vpop.xlane.xlu1 %795  ;;  %v848_v22 = vmul.f32 0.03125, %v793_v16  ;;  %v896_v0 = vmul.f32 %v10383_v7, %v10383_v7 }
  0xf7   : > { %v849_v23 = vmul.f32 0.03125, %v796_v18  ;;  %v897_v14 = vmul.f32 %v10386_v13, %v10386_v13 }
  0xf8   : > { %v10395_v1 = vsub.f32 %v10227_v20, %v848_v22  ;;  %v936_v30 = vsel %vm730_vm0, %v896_v0, 0.0 }
  0xf9   : > { %v10398_v17 = vsub.f32 %v10230_v21, %v849_v23  ;;  %982 = vadd.xlane.f32.xlu1 %v981_v19  ;;  %937 = vadd.xlane.f32.xlu0 %v936_v30  ;;  %v751_v31 = vpop.xlane.xlu0 %750  ;;  %v939_v35 = vsel %vm730_vm0, %v897_v14, 0.0 }
  0xfa   : > { %v754_v34 = vpop.xlane.xlu1 %753  ;;  %v834_v38 = vmul.f32 0.03125, %v751_v31  ;;  %v912_v42 = vmul.f32 %v10395_v1, %v10395_v1 }
  0xfb   : > { %v835_v39 = vmul.f32 0.03125, %v754_v34  ;;  %v913_v20 = vmul.f32 %v10398_v17, %v10398_v17 }
  0xfc   : > { %v10407_v43 = vsub.f32 %v10237_v24, %v834_v38  ;;  %v984_v46 = vsel %vm730_vm0, %v912_v42, 0.0 }
  0xfd   : > { %v10410_v21 = vsub.f32 %v10240_v25, %v835_v39  ;;  %940 = vadd.xlane.f32.xlu1 %v939_v35  ;;  %985 = vadd.xlane.f32.xlu0 %v984_v46  ;;  %v799_v47 = vpop.xlane.xlu0 %798  ;;  %v987_v51 = vsel %vm730_vm0, %v913_v20, 0.0 }
  0xfe   : > { %v802_v50 = vpop.xlane.xlu1 %801  ;;  %v850_v54 = vmul.f32 0.03125, %v799_v47  ;;  %v898_v58 = vmul.f32 %v10407_v43, %v10407_v43 }
  0xff   : > { %v851_v8 = vmul.f32 0.03125, %v802_v50  ;;  %v899_v24 = vmul.f32 %v10410_v21, %v10410_v21 }
 0x100   : > { %v10419_v59 = vsub.f32 %v10247_v28, %v850_v54  ;;  %v942_v62 = vsel %vm730_vm0, %v898_v58, 0.0 }
 0x101   : > { %v10422_v25 = vsub.f32 %v10250_v29, %v851_v8  ;;  %988 = vadd.xlane.f32.xlu1 %v987_v51  ;;  %943 = vadd.xlane.f32.xlu0 %v942_v62  ;;  %v757_v63 = vpop.xlane.xlu0 %756  ;;  %v945_v4 = vsel %vm730_vm0, %v899_v24, 0.0 }
 0x102   : > { %v760_v3 = vpop.xlane.xlu1 %759  ;;  %v836_v6 = vmul.f32 0.03125, %v757_v63  ;;  %v914_v15 = vmul.f32 %v10419_v59, %v10419_v59 }
 0x103   : > { %v837_v12 = vmul.f32 0.03125, %v760_v3  ;;  %v915_v28 = vmul.f32 %v10422_v25, %v10422_v25 }
 0x104   : > { %v10431_v16 = vsub.f32 %v10257_v32, %v836_v6  ;;  %v990_v18 = vsel %vm730_vm0, %v914_v15, 0.0  ;;  %v9284_v15 = vld [vmem:[%s14307_s10] sm:$0xff]  }
 0x105   : > { %v10434_v29 = vsub.f32 %v10260_v33, %v837_v12  ;;  %946 = vadd.xlane.f32.xlu1 %v945_v4  ;;  %991 = vadd.xlane.f32.xlu0 %v990_v18  ;;  %v805_v19 = vpop.xlane.xlu0 %804  ;;  %v993_v23 = vsel %vm730_vm0, %v915_v28, 0.0 }
 0x106   : > { %v808_v22 = vpop.xlane.xlu1 %807  ;;  %v852_v0 = vmul.f32 0.03125, %v805_v19  ;;  %v900_v30 = vmul.f32 %v10431_v16, %v10431_v16  ;;  %8694 = vmatprep.subr.bf16.mxu0 %v9284_v15  ;;  %9130 = vmatprep.subr.bf16.mxu1 %v9284_v15 }
 0x107   : > { %v853_v14 = vmul.f32 0.03125, %v808_v22  ;;  %v901_v32 = vmul.f32 %v10434_v29, %v10434_v29  ;;  %8695 = vmatpush3.bf16.msra.mxu0 %v9284_v15  ;;  %9132 = vmatpush3.bf16.msra.mxu1 %v9284_v15 }
 0x108   : > { %v10443_v31 = vsub.f32 %v10267_v36, %v852_v0  ;;  %v948_v34 = vsel %vm730_vm0, %v900_v30, 0.0 }
 0x109   : > { %v10446_v33 = vsub.f32 %v10270_v37, %v853_v14  ;;  %994 = vadd.xlane.f32.xlu1 %v993_v23  ;;  %949 = vadd.xlane.f32.xlu0 %v948_v34  ;;  %v763_v35 = vpop.xlane.xlu0 %762  ;;  %v951_v39 = vsel %vm730_vm0, %v901_v32, 0.0  ;;  %v9285_v32 = vld [vmem:[%s14307_s10 + $0x8] sm:$0xff]  }
 0x10a   : > { %v766_v38 = vpop.xlane.xlu1 %765  ;;  %v838_v42 = vmul.f32 0.03125, %v763_v35  ;;  %v916_v46 = vmul.f32 %v10443_v31, %v10443_v31  ;;  %8696 = vmatprep.subr.bf16.mxu0 %v9285_v32  ;;  %9131 = vmatprep.subr.bf16.mxu1 %v9285_v32 }
 0x10b   : > { %v839_v20 = vmul.f32 0.03125, %v766_v38  ;;  %v917_v36 = vmul.f32 %v10446_v33, %v10446_v33  ;;  %8697 = vmatpush3.bf16.msra.mxu0 %v9285_v32  ;;  %9133 = vmatpush3.bf16.msra.mxu1 %v9285_v32 }
 0x10c   : > { %v10455_v47 = vsub.f32 %v10277_v40, %v838_v42  ;;  %v996_v50 = vsel %vm730_vm0, %v916_v46, 0.0 }
 0x10d   : > { %v10458_v37 = vsub.f32 %v10280_v41, %v839_v20  ;;  %952 = vadd.xlane.f32.xlu1 %v951_v39  ;;  %997 = vadd.xlane.f32.xlu0 %v996_v50  ;;  %v811_v51 = vpop.xlane.xlu0 %810  ;;  %v999_v8 = vsel %vm730_vm0, %v917_v36, 0.0 }
 0x10e   : > { %v814_v54 = vpop.xlane.xlu1 %813  ;;  %v854_v58 = vmul.f32 0.03125, %v811_v51  ;;  %v902_v62 = vmul.f32 %v10455_v47, %v10455_v47 }
 0x10f   : > { %v855_v24 = vmul.f32 0.03125, %v814_v54  ;;  %v903_v40 = vmul.f32 %v10458_v37, %v10458_v37 }
 0x110   : > { %v10467_v63 = vsub.f32 %v10287_v44, %v854_v58  ;;  %v954_v3 = vsel %vm730_vm0, %v902_v62, 0.0 }
 0x111   : > { %v10470_v41 = vsub.f32 %v10290_v45, %v855_v24  ;;  %1000 = vadd.xlane.f32.xlu1 %v999_v8  ;;  %955 = vadd.xlane.f32.xlu0 %v954_v3  ;;  %v769_v4 = vpop.xlane.xlu0 %768  ;;  %v957_v12 = vsel %vm730_vm0, %v903_v40, 0.0 }
 0x112   : > { %v772_v6 = vpop.xlane.xlu1 %771  ;;  %v840_v28 = vmul.f32 0.03125, %v769_v4  ;;  %v918_v44 = vmul.f32 %v10467_v63, %v10467_v63 }
 0x113   : > { %v841_v18 = vmul.f32 0.03125, %v772_v6  ;;  %v919_v45 = vmul.f32 %v10470_v41, %v10470_v41 }
 0x114   : > { %v10482_v19 = vsub.f32 %v10297_v48, %v840_v28  ;;  %v1002_v23 = vsel %vm730_vm0, %v918_v44, 0.0 }
 0x115   : > { %v10485_v22 = vsub.f32 %v10300_v49, %v841_v18  ;;  %958 = vadd.xlane.f32.xlu1 %v957_v12  ;;  %1003 = vadd.xlane.f32.xlu0 %v1002_v23  ;;  %v817_v0 = vpop.xlane.xlu0 %816  ;;  %v1005_v30 = vsel %vm730_vm0, %v919_v45, 0.0 }
 0x116   : > { %v820_v14 = vpop.xlane.xlu1 %819  ;;  %v856_v34 = vmul.f32 0.03125, %v817_v0  ;;  %v904_v49 = vmul.f32 %v10482_v19, %v10482_v19 }
 0x117   : > { %v857_v48 = vmul.f32 0.03125, %v820_v14  ;;  %v905_v35 = vmul.f32 %v10485_v22, %v10485_v22 }
 0x118   : > { %v10497_v38 = vsub.f32 %v10307_v52, %v856_v34  ;;  %v960_v42 = vsel %vm730_vm0, %v904_v49, 0.0 }
 0x119   : > { %v10500_v39 = vsub.f32 %v10310_v53, %v857_v48  ;;  %1006 = vadd.xlane.f32.xlu1 %v1005_v30  ;;  %961 = vadd.xlane.f32.xlu0 %v960_v42  ;;  %v775_v20 = vpop.xlane.xlu0 %774  ;;  %v963_v36 = vsel %vm730_vm0, %v905_v35, 0.0 }
 0x11a   : > { %v778_v46 = vpop.xlane.xlu1 %777  ;;  %v842_v50 = vmul.f32 0.03125, %v775_v20  ;;  %v920_v54 = vmul.f32 %v10497_v38, %v10497_v38 }
 0x11b   : > { %v843_v51 = vmul.f32 0.03125, %v778_v46  ;;  %v921_v52 = vmul.f32 %v10500_v39, %v10500_v39 }
 0x11c   : > { %v10509_v53 = vsub.f32 %v10317_v56, %v842_v50  ;;  %v1008_v58 = vsel %vm730_vm0, %v920_v54, 0.0 }
 0x11d   : > { %v10512_v8 = vsub.f32 %v10320_v57, %v843_v51  ;;  %964 = vadd.xlane.f32.xlu1 %v963_v36  ;;  %1009 = vadd.xlane.f32.xlu0 %v1008_v58  ;;  %v823_v24 = vpop.xlane.xlu0 %822  ;;  %v1011_v40 = vsel %vm730_vm0, %v921_v52, 0.0 }
 0x11e   : > { %v826_v62 = vpop.xlane.xlu1 %825  ;;  %v858_v3 = vmul.f32 0.03125, %v823_v24  ;;  %v906_v6 = vmul.f32 %v10509_v53, %v10509_v53 }
 0x11f   : > { %v859_v4 = vmul.f32 0.03125, %v826_v62  ;;  %v907_v56 = vmul.f32 %v10512_v8, %v10512_v8 }
 0x120   : > { %v10521_v12 = vsub.f32 %v10327_v60, %v858_v3  ;;  %v966_v15 = vsel %vm730_vm0, %v906_v6, 0.0 }
 0x121   : > { %v10524_v57 = vsub.f32 %v10330_v61, %v859_v4  ;;  %1012 = vadd.xlane.f32.xlu1 %v1011_v40  ;;  %967 = vadd.xlane.f32.xlu0 %v966_v15  ;;  %v969_v28 = vsel %vm730_vm0, %v907_v56, 0.0 }
 0x122   : > { %v922_v18 = vmul.f32 %v10521_v12, %v10521_v12 }
 0x123   : > { %v923_v44 = vmul.f32 %v10524_v57, %v10524_v57 }
 0x124   : > { %v1014_v45 = vsel %vm730_vm0, %v922_v18, 0.0 }
 0x125   : > { %970 = vadd.xlane.f32.xlu1 %v969_v28  ;;  %1015 = vadd.xlane.f32.xlu0 %v1014_v45  ;;  %v1017_v60 = vsel %vm730_vm0, %v923_v44, 0.0  ;;  %v10538_v28 = vld [vmem:[%s14302_s5] ss:$0 sm:$0xff] }
 0x129   : > { %1018 = vadd.xlane.f32.xlu1 %v1017_v60 }
 0x176   : > { %v926_v61 = vpop.xlane.xlu0 %925 }
 0x177   : > { %v1020_v23 = vmul.f32 0.03125, %v926_v61 }
 0x179   : > { %v1052_v0 = vadd.f32 1e-05, %v1020_v23 }
 0x17a   : > { %v929_v14 = vpop.xlane.xlu1 %928  ;;  %v974_v30 = vpop.xlane.xlu0 %973 }
 0x17b   : > { %9286 = vrsqrt.f32 %v1052_v0  ;;  %v1021_v32 = vmul.f32 0.03125, %v929_v14  ;;  %v1036_v34 = vmul.f32 0.03125, %v974_v30 }
 0x17d   : > { %v1053_v48 = vadd.f32 1e-05, %v1021_v32  ;;  %v1068_v49 = vadd.f32 1e-05, %v1036_v34  ;;  %v10545_v32 = vld [vmem:[%s14303_s6] ss:$0 sm:$0xff] }
 0x17e   : > { %v977_v35 = vpop.xlane.xlu1 %976  ;;  %v932_v42 = vpop.xlane.xlu0 %931 }
 0x17f   : > { %9288 = vrsqrt.f32 %v1053_v48  ;;  %v1037_v20 = vmul.f32 0.03125, %v977_v35  ;;  %v1022_v46 = vmul.f32 0.03125, %v932_v42 }
 0x180   : > { %9290 = vrsqrt.f32 %v1068_v49 }
 0x181   : > { %v1069_v36 = vadd.f32 1e-05, %v1037_v20  ;;  %v1054_v50 = vadd.f32 1e-05, %v1022_v46 }
 0x182   : > { %v935_v51 = vpop.xlane.xlu1 %934  ;;  %v980_v54 = vpop.xlane.xlu0 %979 }
 0x183   : > { %9292 = vrsqrt.f32 %v1069_v36  ;;  %v1023_v52 = vmul.f32 0.03125, %v935_v51  ;;  %v1038_v58 = vmul.f32 0.03125, %v980_v54 }
 0x184   : > { %9294 = vrsqrt.f32 %v1054_v50 }
 0x185   : > { %v9287_v24 = vpop.eup %9286  ;;  %v1055_v62 = vadd.f32 1e-05, %v1023_v52  ;;  %v1070_v40 = vadd.f32 1e-05, %v1038_v58 }
 0x186   : > { %v983_v3 = vpop.xlane.xlu1 %982  ;;  %v938_v4 = vpop.xlane.xlu0 %937  ;;  %v1116_v6 = vmul.f32 %v9287_v24, %v10337_v10 }
 0x187   : > { %9296 = vrsqrt.f32 %v1055_v62  ;;  %v1039_v56 = vmul.f32 0.03125, %v983_v3  ;;  %v1024_v15 = vmul.f32 0.03125, %v938_v4 }
 0x188   : > { %9298 = vrsqrt.f32 %v1070_v40  ;;  %v1154_v14 = vmul.f32 %v10538_v28, %v1116_v6 }
 0x189   : > { %v9289_v18 = vpop.eup %9288  ;;  %v1071_v44 = vadd.f32 1e-05, %v1039_v56  ;;  %v1056_v45 = vadd.f32 1e-05, %v1024_v15 }
 0x18a   : > { %v9291_v60 = vpop.eup %9290  ;;  %v941_v61 = vpop.xlane.xlu1 %940  ;;  %v1117_v0 = vmul.f32 %v9289_v18, %v10347_v26  ;;  %v1192_v36 = vadd.f32 %v10545_v32, %v1154_v14 }
 0x18b   : > { %v986_v23 = vpop.xlane.xlu0 %985  ;;  %9300 = vrsqrt.f32 %v1071_v44  ;;  %v1025_v10 = vmul.f32 0.03125, %v941_v61  ;;  %v1132_v34 = vmul.f32 %v9291_v60, %v10340_v11 }
 0x18c   : > { %v1040_v30 = vmul.f32 0.03125, %v986_v23  ;;  %9302 = vrsqrt.f32 %v1056_v45  ;;  %v1155_v48 = vmul.f32 %v10538_v28, %v1117_v0 }
 0x18d   : > { %v9293_v49 = vpop.eup %9292  ;;  %v1057_v35 = vadd.f32 1e-05, %v1025_v10  ;;  %v1170_v54 = vmul.f32 %v10538_v28, %v1132_v34 }
 0x18e   : > { %v1072_v42 = vadd.f32 1e-05, %v1040_v30  ;;  %v9295_v20 = vpop.eup %9294  ;;  %v989_v26 = vpop.xlane.xlu1 %988  ;;  %v1193_v50 = vadd.f32 %v10545_v32, %v1155_v48  ;;  %v1133_v51 = vmul.f32 %v9293_v49, %v10350_v27 }
 0x18f   : > { %v944_v46 = vpop.xlane.xlu0 %943  ;;  %9304 = vrsqrt.f32 %v1057_v35  ;;  %v1041_v52 = vmul.f32 0.03125, %v989_v26  ;;  %v1118_v62 = vmul.f32 %v9295_v20, %v10359_v2  ;;  %v1208_v27 = vadd.f32 %v10545_v32, %v1170_v54 }
 0x190   : > { %v1026_v11 = vmul.f32 0.03125, %v944_v46  ;;  %9306 = vrsqrt.f32 %v1072_v42  ;;  %v1224_v58 = vpack.c.bf16 %v1193_v50, %v1192_v36  ;;  %v1171_v24 = vmul.f32 %v10538_v28, %v1133_v51 }
 0x191   : > { %v9297_v40 = vpop.eup %9296  ;;  %v1073_v3 = vadd.f32 1e-05, %v1041_v52  ;;  %v1156_v45 = vmul.f32 %v10538_v28, %v1118_v62 }
 0x192   : > { %v1058_v4 = vadd.f32 1e-05, %v1026_v11  ;;  %v9299_v6 = vpop.eup %9298  ;;  %v947_v56 = vpop.xlane.xlu1 %946  ;;  %8698 = vmatprep.mubr.msk.bf16.mxu0 %vm730_vm0, %v1224_v58  ;;  %v1209_v18 = vadd.f32 %v10545_v32, %v1171_v24  ;;  %v1119_v44 = vmul.f32 %v9297_v40, %v10362_v5 }
 0x193   : > { %v992_v15 = vpop.xlane.xlu0 %991  ;;  %9308 = vrsqrt.f32 %v1073_v3  ;;  %v1027_v60 = vmul.f32 0.03125, %v947_v56  ;;  %v1134_v2 = vmul.f32 %v9299_v6, %v10371_v55  ;;  %v1194_v5 = vadd.f32 %v10545_v32, %v1156_v45 }
 0x194   : > { %v1042_v61 = vmul.f32 0.03125, %v992_v15  ;;  %9310 = vrsqrt.f32 %v1058_v4  ;;  %v1232_v23 = vpack.c.bf16 %v1209_v18, %v1208_v27  ;;  %v1157_v0 = vmul.f32 %v10538_v28, %v1119_v44 }
 0x195   : > { %v9301_v14 = vpop.eup %9300  ;;  %v1059_v10 = vadd.f32 1e-05, %v1027_v60  ;;  %v1172_v55 = vmul.f32 %v10538_v28, %v1134_v2 }
 0x196   : > { %v1074_v30 = vadd.f32 1e-05, %v1042_v61  ;;  %v9303_v34 = vpop.eup %9302  ;;  %v995_v48 = vpop.xlane.xlu1 %994  ;;  %8714 = vmatprep.mubr.msk.bf16.mxu1 %vm730_vm0, %v1232_v23  ;;  %v1195_v35 = vadd.f32 %v10545_v32, %v1157_v0  ;;  %v1135_v42 = vmul.f32 %v9301_v14, %v10374_v9 }
 0x197   : > { %v950_v49 = vpop.xlane.xlu0 %949  ;;  %9312 = vrsqrt.f32 %v1059_v10  ;;  %v1043_v20 = vmul.f32 0.03125, %v995_v48  ;;  %v1120_v50 = vmul.f32 %v9303_v34, %v10383_v7  ;;  %v1210_v9 = vadd.f32 %v10545_v32, %v1172_v55 }
 0x198   : > { %v1028_v26 = vmul.f32 0.03125, %v950_v49  ;;  %9314 = vrsqrt.f32 %v1074_v30  ;;  %v1225_v46 = vpack.c.bf16 %v1195_v35, %v1194_v5  ;;  %v1173_v36 = vmul.f32 %v10538_v28, %v1135_v42 }
 0x199   : > { %v9305_v51 = vpop.eup %9304  ;;  %v1075_v54 = vadd.f32 1e-05, %v1043_v20  ;;  %v1158_v3 = vmul.f32 %v10538_v28, %v1120_v50 }
 0x19a   : > { %v1060_v52 = vadd.f32 1e-05, %v1028_v26  ;;  %v9307_v11 = vpop.eup %9306  ;;  %v953_v58 = vpop.xlane.xlu1 %952  ;;  %8699 = vmatmul.mubr.msk.bf16.vlgmr.msra.gmra.mrb[0].mxu0 %vm730_vm0, %v1225_v46  ;;  %v1211_v62 = vadd.f32 %v10545_v32, %v1173_v36  ;;  %v1121_v40 = vmul.f32 %v9305_v51, %v10386_v13 }
 0x19b   : > { %v998_v24 = vpop.xlane.xlu0 %997  ;;  %9316 = vrsqrt.f32 %v1075_v54  ;;  %v1029_v4 = vmul.f32 0.03125, %v953_v58  ;;  %v1136_v7 = vmul.f32 %v9307_v11, %v10395_v1  ;;  %v1196_v13 = vadd.f32 %v10545_v32, %v1158_v3 }
 0x19c   : > { %v1044_v6 = vmul.f32 0.03125, %v998_v24  ;;  %9318 = vrsqrt.f32 %v1060_v52  ;;  %v1233_v56 = vpack.c.bf16 %v1211_v62, %v1210_v9  ;;  %v1159_v15 = vmul.f32 %v10538_v28, %v1121_v40 }
 0x19d   : > { %v9309_v27 = vpop.eup %9308  ;;  %v1061_v18 = vadd.f32 1e-05, %v1029_v4  ;;  %v1174_v1 = vmul.f32 %v10538_v28, %v1136_v7 }
 0x19e   : > { %v1076_v44 = vadd.f32 1e-05, %v1044_v6  ;;  %v9311_v45 = vpop.eup %9310  ;;  %v1001_v60 = vpop.xlane.xlu1 %1000  ;;  %8715 = vmatmul.mubr.msk.bf16.vlgmr.msra.gmra.mrb[0].mxu1 %vm730_vm0, %v1233_v56  ;;  %v1197_v2 = vadd.f32 %v10545_v32, %v1159_v15  ;;  %v1137_v23 = vmul.f32 %v9309_v27, %v10398_v17 }
 0x19f   : > { %v956_v61 = vpop.xlane.xlu0 %955  ;;  %9320 = vrsqrt.f32 %v1061_v18  ;;  %v1045_v0 = vmul.f32 0.03125, %v1001_v60  ;;  %v1122_v34 = vmul.f32 %v9311_v45, %v10407_v43  ;;  %v1212_v17 = vadd.f32 %v10545_v32, %v1174_v1 }
 0x1a0   : > { %v1030_v14 = vmul.f32 0.03125, %v956_v61  ;;  %9322 = vrsqrt.f32 %v1076_v44  ;;  %v1226_v10 = vpack.c.bf16 %v1197_v2, %v1196_v13  ;;  %v1175_v30 = vmul.f32 %v10538_v28, %v1137_v23 }
 0x1a1   : > { %v9313_v48 = vpop.eup %9312  ;;  %v1077_v49 = vadd.f32 1e-05, %v1045_v0  ;;  %v1160_v46 = vmul.f32 %v10538_v28, %v1122_v34 }
 0x1a2   : > { %v1062_v5 = vadd.f32 1e-05, %v1030_v14  ;;  %v9315_v35 = vpop.eup %9314  ;;  %v959_v42 = vpop.xlane.xlu1 %958  ;;  %8702 = vmatprep.mubr.msk.bf16.mxu0 %vm730_vm0, %v1226_v10  ;;  %v1213_v20 = vadd.f32 %v10545_v32, %v1175_v30  ;;  %v1123_v26 = vmul.f32 %v9313_v48, %v10410_v21 }
 0x1a3   : > { %v1004_v55 = vpop.xlane.xlu0 %1003  ;;  %9324 = vrsqrt.f32 %v1077_v49  ;;  %v1031_v36 = vmul.f32 0.03125, %v959_v42  ;;  %v1138_v43 = vmul.f32 %v9315_v35, %v10419_v59  ;;  %v1198_v21 = vadd.f32 %v10545_v32, %v1160_v46 }
 0x1a4   : > { %v1046_v50 = vmul.f32 0.03125, %v1004_v55  ;;  %9326 = vrsqrt.f32 %v1062_v5  ;;  %v1234_v51 = vpack.c.bf16 %v1213_v20, %v1212_v17  ;;  %v1161_v54 = vmul.f32 %v10538_v28, %v1123_v26 }
 0x1a5   : > { %v9317_v52 = vpop.eup %9316  ;;  %v1063_v11 = vadd.f32 1e-05, %v1031_v36  ;;  %v1176_v59 = vmul.f32 %v10538_v28, %v1138_v43 }
 0x1a6   : > { %v1078_v58 = vadd.f32 1e-05, %v1046_v50  ;;  %v9319_v24 = vpop.eup %9318  ;;  %v1007_v9 = vpop.xlane.xlu1 %1006  ;;  %8718 = vmatprep.mubr.msk.bf16.mxu1 %vm730_vm0, %v1234_v51  ;;  %v1199_v40 = vadd.f32 %v10545_v32, %v1161_v54  ;;  %v1139_v3 = vmul.f32 %v9317_v52, %v10422_v25 }
 0x1a7   : > { %v962_v62 = vpop.xlane.xlu0 %961  ;;  %9328 = vrsqrt.f32 %v1063_v11  ;;  %v1047_v4 = vmul.f32 0.03125, %v1007_v9  ;;  %v1124_v15 = vmul.f32 %v9319_v24, %v10431_v16  ;;  %v1214_v25 = vadd.f32 %v10545_v32, %v1176_v59 }
 0x1a8   : > { %v1032_v6 = vmul.f32 0.03125, %v962_v62  ;;  %9330 = vrsqrt.f32 %v1078_v58  ;;  %v1227_v7 = vpack.c.bf16 %v1199_v40, %v1198_v21  ;;  %v1177_v56 = vmul.f32 %v10538_v28, %v1139_v3 }
 0x1a9   : > { %v9321_v27 = vpop.eup %9320  ;;  %v1079_v18 = vadd.f32 1e-05, %v1047_v4  ;;  %v1162_v23 = vmul.f32 %v10538_v28, %v1124_v15 }
 0x1aa   : > { %v1064_v44 = vadd.f32 1e-05, %v1032_v6  ;;  %v9323_v45 = vpop.eup %9322  ;;  %v965_v60 = vpop.xlane.xlu1 %964  ;;  %8703 = vmatmul.mubr.msk.bf16.gmra.mrb[4].mxu0 %vm730_vm0, %v1227_v7  ;;  %v1215_v13 = vadd.f32 %v10545_v32, %v1177_v56  ;;  %v1125_v2 = vmul.f32 %v9321_v27, %v10434_v29 }
 0x1ab   : > { %v1010_v61 = vpop.xlane.xlu0 %1009  ;;  %9332 = vrsqrt.f32 %v1079_v18  ;;  %v1033_v1 = vmul.f32 0.03125, %v965_v60  ;;  %v1140_v16 = vmul.f32 %v9323_v45, %v10443_v31  ;;  %v1200_v29 = vadd.f32 %v10545_v32, %v1162_v23 }
 0x1ac   : > { %v1048_v0 = vmul.f32 0.03125, %v1010_v61  ;;  %9334 = vrsqrt.f32 %v1064_v44  ;;  %v1235_v14 = vpack.c.bf16 %v1215_v13, %v1214_v25  ;;  %v1163_v10 = vmul.f32 %v10538_v28, %v1125_v2 }
 0x1ad   : > { %v9325_v30 = vpop.eup %9324  ;;  %v1065_v34 = vadd.f32 1e-05, %v1033_v1  ;;  %v1178_v31 = vmul.f32 %v10538_v28, %v1140_v16 }
 0x1ae   : > { %v1080_v48 = vadd.f32 1e-05, %v1048_v0  ;;  %v9327_v49 = vpop.eup %9326  ;;  %v1013_v5 = vpop.xlane.xlu1 %1012  ;;  %8719 = vmatmul.mubr.msk.bf16.gmra.mrb[4].mxu1 %vm730_vm0, %v1235_v14  ;;  %v1201_v42 = vadd.f32 %v10545_v32, %v1163_v10  ;;  %v1141_v55 = vmul.f32 %v9325_v30, %v10446_v33 }
 0x1af   : > { %v968_v35 = vpop.xlane.xlu0 %967  ;;  %9336 = vrsqrt.f32 %v1065_v34  ;;  %v1049_v17 = vmul.f32 0.03125, %v1013_v5  ;;  %v1126_v36 = vmul.f32 %v9327_v49, %v10455_v47  ;;  %v1216_v33 = vadd.f32 %v10545_v32, %v1178_v31 }
 0x1b0   : > { %v1034_v20 = vmul.f32 0.03125, %v968_v35  ;;  %9338 = vrsqrt.f32 %v1080_v48  ;;  %v1228_v26 = vpack.c.bf16 %v1201_v42, %v1200_v29  ;;  %v1179_v46 = vmul.f32 %v10538_v28, %v1141_v55 }
 0x1b1   : > { %v9329_v50 = vpop.eup %9328  ;;  %v1081_v43 = vadd.f32 1e-05, %v1049_v17  ;;  %v1164_v9 = vmul.f32 %v10538_v28, %v1126_v36 }
 0x1b2   : > { %v1066_v51 = vadd.f32 1e-05, %v1034_v20  ;;  %v9331_v54 = vpop.eup %9330  ;;  %v971_v52 = vpop.xlane.xlu1 %970  ;;  %8706 = vmatprep.mubr.msk.bf16.mxu0 %vm730_vm0, %v1228_v26  ;;  %v1217_v58 = vadd.f32 %v10545_v32, %v1179_v46  ;;  %v1127_v24 = vmul.f32 %v9329_v50, %v10458_v37 }
 0x1b3   : > { %v1016_v11 = vpop.xlane.xlu0 %1015  ;;  %9340 = vrsqrt.f32 %v1081_v43  ;;  %v1035_v62 = vmul.f32 0.03125, %v971_v52  ;;  %v1142_v47 = vmul.f32 %v9331_v54, %v10467_v63  ;;  %v1202_v37 = vadd.f32 %v10545_v32, %v1164_v9 }
 0x1b4   : > { %v1050_v21 = vmul.f32 0.03125, %v1016_v11  ;;  %9342 = vrsqrt.f32 %v1066_v51  ;;  %v1236_v40 = vpack.c.bf16 %v1217_v58, %v1216_v33  ;;  %v1165_v3 = vmul.f32 %v10538_v28, %v1127_v24 }
 0x1b5   : > { %v9333_v59 = vpop.eup %9332  ;;  %v1067_v4 = vadd.f32 1e-05, %v1035_v62  ;;  %v1180_v18 = vmul.f32 %v10538_v28, %v1142_v47 }
 0x1b6   : > { %v1082_v6 = vadd.f32 1e-05, %v1050_v21  ;;  %v9335_v7 = vpop.eup %9334  ;;  %v1019_v56 = vpop.xlane.xlu1 %1018  ;;  %8722 = vmatprep.mubr.msk.bf16.mxu1 %vm730_vm0, %v1236_v40  ;;  %v1203_v15 = vadd.f32 %v10545_v32, %v1165_v3  ;;  %v1143_v27 = vmul.f32 %v9333_v59, %v10470_v41 }
 0x1b7   : > { %9344 = vrsqrt.f32 %v1067_v4  ;;  %v1051_v63 = vmul.f32 0.03125, %v1019_v56  ;;  %v1128_v44 = vmul.f32 %v9335_v7, %v10482_v19  ;;  %v1218_v2 = vadd.f32 %v10545_v32, %v1180_v18 }
 0x1b8   : > { %9346 = vrsqrt.f32 %v1082_v6  ;;  %v1229_v45 = vpack.c.bf16 %v1203_v15, %v1202_v37  ;;  %v1181_v60 = vmul.f32 %v10538_v28, %v1143_v27 }
 0x1b9   : > { %v9337_v61 = vpop.eup %9336  ;;  %v1083_v25 = vadd.f32 1e-05, %v1051_v63  ;;  %v1166_v1 = vmul.f32 %v10538_v28, %v1128_v44 }
 0x1ba   : > { %v9339_v13 = vpop.eup %9338  ;;  %8707 = vmatmul.mubr.msk.bf16.gmra.mrb[8].mxu0 %vm730_vm0, %v1229_v45  ;;  %v1219_v23 = vadd.f32 %v10545_v32, %v1181_v60  ;;  %v1129_v41 = vmul.f32 %v9337_v61, %v10485_v22 }
 0x1bb   : > { %9348 = vrsqrt.f32 %v1083_v25  ;;  %v1144_v19 = vmul.f32 %v9339_v13, %v10497_v38  ;;  %v1204_v30 = vadd.f32 %v10545_v32, %v1166_v1 }
 0x1bc   : > { %v1237_v0 = vpack.c.bf16 %v1219_v23, %v1218_v2  ;;  %v1167_v16 = vmul.f32 %v10538_v28, %v1129_v41 }
 0x1bd   : > { %v9341_v14 = vpop.eup %9340  ;;  %v1182_v22 = vmul.f32 %v10538_v28, %v1144_v19 }
 0x1be   : > { %v9343_v10 = vpop.eup %9342  ;;  %8723 = vmatmul.mubr.msk.bf16.gmra.mrb[8].mxu1 %vm730_vm0, %v1237_v0  ;;  %v1205_v34 = vadd.f32 %v10545_v32, %v1167_v16  ;;  %v1145_v48 = vmul.f32 %v9341_v14, %v10500_v39 }
 0x1bf   : > { %v1130_v49 = vmul.f32 %v9343_v10, %v10509_v53  ;;  %v1220_v42 = vadd.f32 %v10545_v32, %v1182_v22 }
 0x1c0   : > { %v1230_v5 = vpack.c.bf16 %v1205_v34, %v1204_v30  ;;  %v1183_v38 = vmul.f32 %v10538_v28, %v1145_v48 }
 0x1c1   : > { %v9345_v35 = vpop.eup %9344  ;;  %v1168_v17 = vmul.f32 %v10538_v28, %v1130_v49 }
 0x1c2   : > { %v9347_v29 = vpop.eup %9346  ;;  %8710 = vmatprep.mubr.msk.bf16.mxu0 %vm730_vm0, %v1230_v5  ;;  %v1221_v55 = vadd.f32 %v10545_v32, %v1183_v38  ;;  %v1131_v31 = vmul.f32 %v9345_v35, %v10512_v8 }
 0x1c3   : > { %v1146_v39 = vmul.f32 %v9347_v29, %v10521_v12  ;;  %v1206_v46 = vadd.f32 %v10545_v32, %v1168_v17 }
 0x1c4   : > { %v1238_v20 = vpack.c.bf16 %v1221_v55, %v1220_v42  ;;  %v1169_v53 = vmul.f32 %v10538_v28, %v1131_v31 }
 0x1c5   : > { %v9349_v26 = vpop.eup %9348  ;;  %v1184_v43 = vmul.f32 %v10538_v28, %v1146_v39 }
 0x1c6   : > { %8726 = vmatprep.mubr.msk.bf16.mxu1 %vm730_vm0, %v1238_v20  ;;  %v1207_v36 = vadd.f32 %v10545_v32, %v1169_v53  ;;  %v1147_v50 = vmul.f32 %v9349_v26, %v10524_v57 }
 0x1c7   : > { %v1222_v12 = vadd.f32 %v10545_v32, %v1184_v43 }
 0x1c8   : > { %v1231_v51 = vpack.c.bf16 %v1207_v36, %v1206_v46  ;;  %v1185_v8 = vmul.f32 %v10538_v28, %v1147_v50 }
 0x1ca   : > { %8711 = vmatmul.mubr.msk.bf16.gmra.mrb[12].mxu0 %vm730_vm0, %v1231_v51  ;;  %v1223_v54 = vadd.f32 %v10545_v32, %v1185_v8 }
 0x1cc   : > { %v1239_v52 = vpack.c.bf16 %v1223_v54, %v1222_v12 }
 0x1ce   : > { %8727 = vmatmul.mubr.msk.bf16.gmra.mrb[12].mxu1 %vm730_vm0, %v1239_v52 }
 0x26d   : > { %v8700_v11 = vpop.f32.mrb[0].mxu0 }
 0x26e   : > { %v1338_v33 = vpop.f32.mrb[1].mxu0 }
 0x26f   : > { %v8701_v58 = vpop.f32.mrb[2].mxu0 }
 0x270   : > { %v10656_v24 = vpack.c.bf16 %v8701_v58, %v8700_v11  ;;  %v1341_v57 = vpop.f32.mrb[3].mxu0 }
 0x271   : > { %v10658_v9 = vpack.c.bf16 %v1341_v57, %v1338_v33  ;;  %v8716_v62 = vpop.f32.mrb[0].mxu1 }
 0x272   : > { %1483 = vst.msk [vmem:[#allocation3 + $0x8] sm:$0xff] %vm1481_vm1, %v10656_v24  ;;  %1516 = vrot.lane.b32.xlu1 %v10656_v24, %s9937_s13  ;;  %v1402_v28 = vpop.f32.mrb[1].mxu1 }
 0x273   : > { %1482 = vst.msk [vmem:[#allocation3] sm:$0xff] %vm1481_vm1, %v10658_v9  ;;  %1514 = vrot.lane.b32.xlu0 %v10658_v9, %s9937_s13  ;;  %v8717_v32 = vpop.f32.mrb[2].mxu1 }
 0x274   : > { %v10668_v21 = vpack.c.bf16 %v8717_v32, %v8716_v62  ;;  %v1405_v47 = vpop.f32.mrb[3].mxu1 }
 0x275   : > { %v10670_v40 = vpack.c.bf16 %v1405_v47, %v1402_v28 }
 0x276   : > { %1491 = vst.msk [vmem:[#allocation3 + $0x48] sm:$0xff] %vm1481_vm1, %v10668_v21  ;;  %1532 = vrot.lane.b32.xlu1 %v10668_v21, %s9937_s13 }
 0x277   : > { %1490 = vst.msk [vmem:[#allocation3 + $0x40] sm:$0xff] %vm1481_vm1, %v10670_v40  ;;  %1530 = vrot.lane.b32.xlu0 %v10670_v40, %s9937_s13 }
 0x27a   : > { %1580 = vrot.lane.b32.xlu1 %v10656_v24, %s9938_s14 }
 0x27b   : > { %1578 = vrot.lane.b32.xlu0 %v10658_v9, %s9938_s14 }
 0x27d   : > { %v8704_v3 = vpop.f32.mrb[4].mxu0 }
 0x27e   : > { %1596 = vrot.lane.b32.xlu1 %v10668_v21, %s9938_s14  ;;  %v1354_v59 = vpop.f32.mrb[5].mxu0 }
 0x27f   : > { %1594 = vrot.lane.b32.xlu0 %v10670_v40, %s9938_s14  ;;  %v8705_v4 = vpop.f32.mrb[6].mxu0 }
 0x280   : > { %v10688_v6 = vpack.c.bf16 %v8705_v4, %v8704_v3  ;;  %v1357_v7 = vpop.f32.mrb[7].mxu0 }
 0x281   : > { %v10690_v56 = vpack.c.bf16 %v1357_v7, %v1354_v59  ;;  %v8720_v37 = vpop.f32.mrb[4].mxu1 }
 0x282   : > { %1485 = vst.msk [vmem:[#allocation3 + $0x18] sm:$0xff] %vm1481_vm1, %v10688_v6  ;;  %1645 = vrot.lane.b32.xlu1 %v10656_v24, %s9939_s16  ;;  %v1418_v15 = vpop.f32.mrb[5].mxu1 }
 0x283   : > { %1484 = vst.msk [vmem:[#allocation3 + $0x10] sm:$0xff] %vm1481_vm1, %v10690_v56  ;;  %1643 = vrot.lane.b32.xlu0 %v10658_v9, %s9939_s16  ;;  %v8721_v27 = vpop.f32.mrb[6].mxu1 }
 0x284   : > { %v10700_v18 = vpack.c.bf16 %v8721_v27, %v8720_v37  ;;  %v1421_v63 = vpop.f32.mrb[7].mxu1 }
 0x285   : > { %v10702_v44 = vpack.c.bf16 %v1421_v63, %v1418_v15 }
 0x286   : > { %1493 = vst.msk [vmem:[#allocation3 + $0x58] sm:$0xff] %vm1481_vm1, %v10700_v18  ;;  %1661 = vrot.lane.b32.xlu1 %v10668_v21, %s9939_s16 }
 0x287   : > { %1492 = vst.msk [vmem:[#allocation3 + $0x50] sm:$0xff] %vm1481_vm1, %v10702_v44  ;;  %1659 = vrot.lane.b32.xlu0 %v10670_v40, %s9939_s16 }
 0x28a   : > { %1710 = vrot.lane.b32.xlu1 %v10656_v24, %s9940_s12 }
 0x28b   : > { %1708 = vrot.lane.b32.xlu0 %v10658_v9, %s9940_s12 }
 0x28d   : > { %v8708_v45 = vpop.f32.mrb[8].mxu0 }
 0x28e   : > { %1726 = vrot.lane.b32.xlu1 %v10668_v21, %s9940_s12  ;;  %v1370_v60 = vpop.f32.mrb[9].mxu0 }
 0x28f   : > { %1724 = vrot.lane.b32.xlu0 %v10670_v40, %s9940_s12  ;;  %v8709_v61 = vpop.f32.mrb[10].mxu0 }
 0x290   : > { %v10720_v25 = vpack.c.bf16 %v8709_v61, %v8708_v45  ;;  %v1373_v13 = vpop.f32.mrb[11].mxu0 }
 0x291   : > { %v10722_v2 = vpack.c.bf16 %v1373_v13, %v1370_v60  ;;  %v8724_v23 = vpop.f32.mrb[8].mxu1 }
 0x292   : > { %1487 = vst.msk [vmem:[#allocation3 + $0x28] sm:$0xff] %vm1481_vm1, %v10720_v25  ;;  %1775 = vrot.lane.b32.xlu1 %v10656_v24, %s9941_s7  ;;  %v1434_v41 = vpop.f32.mrb[9].mxu1 }
 0x293   : > { %1486 = vst.msk [vmem:[#allocation3 + $0x20] sm:$0xff] %vm1481_vm1, %v10722_v2  ;;  %1773 = vrot.lane.b32.xlu0 %v10658_v9, %s9941_s7  ;;  %v8725_v1 = vpop.f32.mrb[10].mxu1 }
 0x294   : > { %v10732_v19 = vpack.c.bf16 %v8725_v1, %v8724_v23  ;;  %v1437_v0 = vpop.f32.mrb[11].mxu1 }
 0x295   : > { %v10734_v16 = vpack.c.bf16 %v1437_v0, %v1434_v41 }
 0x296   : > { %1495 = vst.msk [vmem:[#allocation3 + $0x68] sm:$0xff] %vm1481_vm1, %v10732_v19  ;;  %1791 = vrot.lane.b32.xlu1 %v10668_v21, %s9941_s7 }
 0x297   : > { %1494 = vst.msk [vmem:[#allocation3 + $0x60] sm:$0xff] %vm1481_vm1, %v10734_v16  ;;  %1789 = vrot.lane.b32.xlu0 %v10670_v40, %s9941_s7 }
 0x29a   : > { %1840 = vrot.lane.b32.xlu1 %v10656_v24, %s9942_s15 }
 0x29b   : > { %1838 = vrot.lane.b32.xlu0 %v10658_v9, %s9942_s15 }
 0x29d   : > { %v8712_v14 = vpop.f32.mrb[12].mxu0 }
 0x29e   : > { %1856 = vrot.lane.b32.xlu1 %v10668_v21, %s9942_s15  ;;  %v1386_v10 = vpop.f32.mrb[13].mxu0 }
 0x29f   : > { %1854 = vrot.lane.b32.xlu0 %v10670_v40, %s9942_s15  ;;  %v8713_v30 = vpop.f32.mrb[14].mxu0 }
 0x2a0   : > { %v10752_v34 = vpack.c.bf16 %v8713_v30, %v8712_v14  ;;  %v1389_v48 = vpop.f32.mrb[15].mxu0 }
 0x2a1   : > { %v10754_v22 = vpack.c.bf16 %v1389_v48, %v1386_v10  ;;  %v8728_v49 = vpop.f32.mrb[12].mxu1 }
 0x2a2   : > { %1489 = vst.msk [vmem:[#allocation3 + $0x38] sm:$0xff] %vm1481_vm1, %v10752_v34  ;;  %1905 = vrot.lane.b32.xlu1 %v10656_v24, %s9943_s30  ;;  %v1450_v5 = vpop.f32.mrb[13].mxu1 }
 0x2a3   : > { %1488 = vst.msk [vmem:[#allocation3 + $0x30] sm:$0xff] %vm1481_vm1, %v10754_v22  ;;  %1903 = vrot.lane.b32.xlu0 %v10658_v9, %s9943_s30  ;;  %v8729_v38 = vpop.f32.mrb[14].mxu1 }
 0x2a4   : > { %v10764_v35 = vpack.c.bf16 %v8729_v38, %v8728_v49  ;;  %v1453_v29 = vpop.f32.mrb[15].mxu1 }
 0x2a5   : > { %v10766_v42 = vpack.c.bf16 %v1453_v29, %v1450_v5 }
 0x2a6   : > { %1497 = vst.msk [vmem:[#allocation3 + $0x78] sm:$0xff] %vm1481_vm1, %v10764_v35  ;;  %1921 = vrot.lane.b32.xlu1 %v10668_v21, %s9943_s30 }
 0x2a7   : > { %1496 = vst.msk [vmem:[#allocation3 + $0x70] sm:$0xff] %vm1481_vm1, %v10766_v42  ;;  %1919 = vrot.lane.b32.xlu0 %v10670_v40, %s9943_s30 }
 0x2aa   : > { %1520 = vrot.lane.b32.xlu1 %v10688_v6, %s9937_s13 }
 0x2ab   : > { %1534 = vrot.lane.b32.xlu0 %v10702_v44, %s9937_s13 }
 0x2ae   : > { %1536 = vrot.lane.b32.xlu1 %v10700_v18, %s9937_s13 }
 0x2af   : > { %1582 = vrot.lane.b32.xlu0 %v10690_v56, %s9938_s14 }
 0x2b2   : > { %1584 = vrot.lane.b32.xlu1 %v10688_v6, %s9938_s14 }
 0x2b3   : > { %1598 = vrot.lane.b32.xlu0 %v10702_v44, %s9938_s14 }
 0x2b6   : > { %1600 = vrot.lane.b32.xlu1 %v10700_v18, %s9938_s14 }
 0x2b7   : > { %1647 = vrot.lane.b32.xlu0 %v10690_v56, %s9939_s16 }
 0x2ba   : > { %1649 = vrot.lane.b32.xlu1 %v10688_v6, %s9939_s16 }
 0x2bb   : > { %1663 = vrot.lane.b32.xlu0 %v10702_v44, %s9939_s16 }
 0x2be   : > { %1665 = vrot.lane.b32.xlu1 %v10700_v18, %s9939_s16 }
 0x2bf   : > { %1712 = vrot.lane.b32.xlu0 %v10690_v56, %s9940_s12 }
 0x2c2   : > { %1714 = vrot.lane.b32.xlu1 %v10688_v6, %s9940_s12 }
 0x2c3   : > { %1728 = vrot.lane.b32.xlu0 %v10702_v44, %s9940_s12 }
 0x2c6   : > { %1730 = vrot.lane.b32.xlu1 %v10700_v18, %s9940_s12 }
 0x2c7   : > { %1777 = vrot.lane.b32.xlu0 %v10690_v56, %s9941_s7 }
 0x2ca   : > { %1779 = vrot.lane.b32.xlu1 %v10688_v6, %s9941_s7 }
 0x2cb   : > { %1793 = vrot.lane.b32.xlu0 %v10702_v44, %s9941_s7 }
 0x2ce   : > { %1795 = vrot.lane.b32.xlu1 %v10700_v18, %s9941_s7 }
 0x2cf   : > { %1842 = vrot.lane.b32.xlu0 %v10690_v56, %s9942_s15 }
 0x2d2   : > { %1844 = vrot.lane.b32.xlu1 %v10688_v6, %s9942_s15 }
 0x2d3   : > { %1858 = vrot.lane.b32.xlu0 %v10702_v44, %s9942_s15 }
 0x2d6   : > { %1860 = vrot.lane.b32.xlu1 %v10700_v18, %s9942_s15 }
 0x2d7   : > { %1907 = vrot.lane.b32.xlu0 %v10690_v56, %s9943_s30 }
 0x2da   : > { %1909 = vrot.lane.b32.xlu1 %v10688_v6, %s9943_s30 }
 0x2db   : > { %1923 = vrot.lane.b32.xlu0 %v10702_v44, %s9943_s30 }
 0x2de   : > { %1925 = vrot.lane.b32.xlu1 %v10700_v18, %s9943_s30 }
 0x2df   : > { %1522 = vrot.lane.b32.xlu0 %v10722_v2, %s9937_s13 }
 0x2e2   : > { %1518 = vrot.lane.b32.xlu1 %v10690_v56, %s9937_s13 }
 0x2e3   : > { %1538 = vrot.lane.b32.xlu0 %v10734_v16, %s9937_s13 }
 0x2e4   : > { %v1517_v55 = vpop.permute.xlu1 %1516 }
 0x2e5   : > { %1563 = vst.msk [vmem:[#allocation4 + $0x8] sm:$0xff] %vm1481_vm1, %v1517_v55  ;;  %v1515_v31 = vpop.permute.xlu0 %1514 }
 0x2e6   : > { %1562 = vst.msk [vmem:[#allocation4] sm:$0xff] %vm1481_vm1, %v1515_v31  ;;  %1524 = vrot.lane.b32.xlu1 %v10720_v25, %s9937_s13 }
 0x2e7   : > { %1586 = vrot.lane.b32.xlu0 %v10722_v2, %s9938_s14 }
 0x2e8   : > { %v1533_v17 = vpop.permute.xlu1 %1532 }
 0x2e9   : > { %1571 = vst.msk [vmem:[#allocation4 + $0x48] sm:$0xff] %vm1481_vm1, %v1533_v17  ;;  %v1531_v39 = vpop.permute.xlu0 %1530 }
 0x2ea   : > { %1570 = vst.msk [vmem:[#allocation4 + $0x40] sm:$0xff] %vm1481_vm1, %v1531_v39  ;;  %1540 = vrot.lane.b32.xlu1 %v10732_v19, %s9937_s13 }
 0x2eb   : > { %1602 = vrot.lane.b32.xlu0 %v10734_v16, %s9938_s14 }
 0x2ec   : > { %v1581_v20 = vpop.permute.xlu1 %1580 }
 0x2ed   : > { %1628 = vst.msk [vmem:[#allocation3 + $0x88] sm:$0xff] %vm1481_vm1, %v1581_v20  ;;  %v1579_v53 = vpop.permute.xlu0 %1578 }
 0x2ee   : > { %1627 = vst.msk [vmem:[#allocation3 + $0x80] sm:$0xff] %vm1481_vm1, %v1579_v53  ;;  %1588 = vrot.lane.b32.xlu1 %v10720_v25, %s9938_s14 }
 0x2ef   : > { %1651 = vrot.lane.b32.xlu0 %v10722_v2, %s9939_s16 }
 0x2f0   : > { %v1597_v26 = vpop.permute.xlu1 %1596 }
 0x2f1   : > { %1636 = vst.msk [vmem:[#allocation3 + $0xc8] sm:$0xff] %vm1481_vm1, %v1597_v26  ;;  %v1595_v46 = vpop.permute.xlu0 %1594 }
 0x2f2   : > { %1635 = vst.msk [vmem:[#allocation3 + $0xc0] sm:$0xff] %vm1481_vm1, %v1595_v46  ;;  %1604 = vrot.lane.b32.xlu1 %v10732_v19, %s9938_s14 }
 0x2f3   : > { %1667 = vrot.lane.b32.xlu0 %v10734_v16, %s9939_s16 }
 0x2f4   : > { %v1646_v36 = vpop.permute.xlu1 %1645 }
 0x2f5   : > { %1693 = vst.msk [vmem:[#allocation4 + $0x88] sm:$0xff] %vm1481_vm1, %v1646_v36  ;;  %v1644_v50 = vpop.permute.xlu0 %1643 }
 0x2f6   : > { %1692 = vst.msk [vmem:[#allocation4 + $0x80] sm:$0xff] %vm1481_vm1, %v1644_v50  ;;  %1653 = vrot.lane.b32.xlu1 %v10720_v25, %s9939_s16 }
 0x2f7   : > { %1716 = vrot.lane.b32.xlu0 %v10722_v2, %s9940_s12 }
 0x2f8   : > { %v1662_v43 = vpop.permute.xlu1 %1661 }
 0x2f9   : > { %1701 = vst.msk [vmem:[#allocation4 + $0xc8] sm:$0xff] %vm1481_vm1, %v1662_v43  ;;  %v1660_v51 = vpop.permute.xlu0 %1659 }
 0x2fa   : > { %1700 = vst.msk [vmem:[#allocation4 + $0xc0] sm:$0xff] %vm1481_vm1, %v1660_v51  ;;  %1669 = vrot.lane.b32.xlu1 %v10732_v19, %s9939_s16 }
 0x2fb   : > { %1732 = vrot.lane.b32.xlu0 %v10734_v16, %s9940_s12 }
 0x2fc   : > { %v1711_v8 = vpop.permute.xlu1 %1710 }
 0x2fd   : > { %1758 = vst.msk [vmem:[#allocation3 + $0x108] sm:$0xff] %vm1481_vm1, %v1711_v8  ;;  %v1709_v12 = vpop.permute.xlu0 %1708 }
 0x2fe   : > { %1757 = vst.msk [vmem:[#allocation3 + $0x100] sm:$0xff] %vm1481_vm1, %v1709_v12  ;;  %1718 = vrot.lane.b32.xlu1 %v10720_v25, %s9940_s12 }
 0x2ff   : > { %1781 = vrot.lane.b32.xlu0 %v10722_v2, %s9941_s7 }
 0x300   : > { %v1727_v54 = vpop.permute.xlu1 %1726 }
 0x301   : > { %1766 = vst.msk [vmem:[#allocation3 + $0x148] sm:$0xff] %vm1481_vm1, %v1727_v54  ;;  %v1725_v52 = vpop.permute.xlu0 %1724 }
 0x302   : > { %1765 = vst.msk [vmem:[#allocation3 + $0x140] sm:$0xff] %vm1481_vm1, %v1725_v52  ;;  %1734 = vrot.lane.b32.xlu1 %v10732_v19, %s9940_s12 }
 0x303   : > { %1797 = vrot.lane.b32.xlu0 %v10734_v16, %s9941_s7 }
 0x304   : > { %v1776_v11 = vpop.permute.xlu1 %1775 }
 0x305   : > { %1823 = vst.msk [vmem:[#allocation4 + $0x108] sm:$0xff] %vm1481_vm1, %v1776_v11  ;;  %v1774_v33 = vpop.permute.xlu0 %1773 }
 0x306   : > { %1822 = vst.msk [vmem:[#allocation4 + $0x100] sm:$0xff] %vm1481_vm1, %v1774_v33  ;;  %1783 = vrot.lane.b32.xlu1 %v10720_v25, %s9941_s7 }
 0x307   : > { %1846 = vrot.lane.b32.xlu0 %v10722_v2, %s9942_s15 }
 0x308   : > { %v1792_v58 = vpop.permute.xlu1 %1791 }
 0x309   : > { %1831 = vst.msk [vmem:[#allocation4 + $0x148] sm:$0xff] %vm1481_vm1, %v1792_v58  ;;  %v1790_v24 = vpop.permute.xlu0 %1789 }
 0x30a   : > { %1830 = vst.msk [vmem:[#allocation4 + $0x140] sm:$0xff] %vm1481_vm1, %v1790_v24  ;;  %1799 = vrot.lane.b32.xlu1 %v10732_v19, %s9941_s7 }
 0x30b   : > { %1862 = vrot.lane.b32.xlu0 %v10734_v16, %s9942_s15 }
 0x30c   : > { %v1841_v57 = vpop.permute.xlu1 %1840 }
 0x30d   : > { %1888 = vst.msk [vmem:[#allocation3 + $0x188] sm:$0xff] %vm1481_vm1, %v1841_v57  ;;  %v1839_v9 = vpop.permute.xlu0 %1838 }
 0x30e   : > { %1887 = vst.msk [vmem:[#allocation3 + $0x180] sm:$0xff] %vm1481_vm1, %v1839_v9  ;;  %1848 = vrot.lane.b32.xlu1 %v10720_v25, %s9942_s15 }
 0x30f   : > { %1911 = vrot.lane.b32.xlu0 %v10722_v2, %s9943_s30 }
 0x310   : > { %v1857_v62 = vpop.permute.xlu1 %1856 }
 0x311   : > { %1896 = vst.msk [vmem:[#allocation3 + $0x1c8] sm:$0xff] %vm1481_vm1, %v1857_v62  ;;  %v1855_v28 = vpop.permute.xlu0 %1854 }
 0x312   : > { %1895 = vst.msk [vmem:[#allocation3 + $0x1c0] sm:$0xff] %vm1481_vm1, %v1855_v28  ;;  %1864 = vrot.lane.b32.xlu1 %v10732_v19, %s9942_s15 }
 0x313   : > { %1927 = vrot.lane.b32.xlu0 %v10734_v16, %s9943_s30 }
 0x314   : > { %v1906_v32 = vpop.permute.xlu1 %1905 }
 0x315   : > { %1953 = vst.msk [vmem:[#allocation4 + $0x188] sm:$0xff] %vm1481_vm1, %v1906_v32  ;;  %v1904_v21 = vpop.permute.xlu0 %1903 }
 0x316   : > { %1952 = vst.msk [vmem:[#allocation4 + $0x180] sm:$0xff] %vm1481_vm1, %v1904_v21  ;;  %1913 = vrot.lane.b32.xlu1 %v10720_v25, %s9943_s30 }
 0x317   : > { %1526 = vrot.lane.b32.xlu0 %v10754_v22, %s9937_s13 }
 0x318   : > { %v1922_v47 = vpop.permute.xlu1 %1921 }
 0x319   : > { %1961 = vst.msk [vmem:[#allocation4 + $0x1c8] sm:$0xff] %vm1481_vm1, %v1922_v47  ;;  %v1920_v40 = vpop.permute.xlu0 %1919 }
 0x31a   : > { %1960 = vst.msk [vmem:[#allocation4 + $0x1c0] sm:$0xff] %vm1481_vm1, %v1920_v40  ;;  %1929 = vrot.lane.b32.xlu1 %v10732_v19, %s9943_s30 }
 0x31b   : > { %1542 = vrot.lane.b32.xlu0 %v10766_v42, %s9937_s13 }
 0x31c   : > { %v1521_v3 = vpop.permute.xlu1 %1520 }
 0x31d   : > { %1565 = vst.msk [vmem:[#allocation4 + $0x18] sm:$0xff] %vm1481_vm1, %v1521_v3  ;;  %v1535_v59 = vpop.permute.xlu0 %1534 }
 0x31e   : > { %1572 = vst.msk [vmem:[#allocation4 + $0x50] sm:$0xff] %vm1481_vm1, %v1535_v59  ;;  %1528 = vrot.lane.b32.xlu1 %v10752_v34, %s9937_s13 }
 0x31f   : > { %1590 = vrot.lane.b32.xlu0 %v10754_v22, %s9938_s14 }
 0x320   : > { %v1537_v4 = vpop.permute.xlu1 %1536 }
 0x321   : > { %1573 = vst.msk [vmem:[#allocation4 + $0x58] sm:$0xff] %vm1481_vm1, %v1537_v4  ;;  %v1583_v6 = vpop.permute.xlu0 %1582 }
 0x322   : > { %1629 = vst.msk [vmem:[#allocation3 + $0x90] sm:$0xff] %vm1481_vm1, %v1583_v6  ;;  %1544 = vrot.lane.b32.xlu1 %v10764_v35, %s9937_s13 }
 0x323   : > { %1606 = vrot.lane.b32.xlu0 %v10766_v42, %s9938_s14 }
 0x324   : > { %v1585_v7 = vpop.permute.xlu1 %1584 }
 0x325   : > { %1630 = vst.msk [vmem:[#allocation3 + $0x98] sm:$0xff] %vm1481_vm1, %v1585_v7  ;;  %v1599_v56 = vpop.permute.xlu0 %1598 }
 0x326   : > { %1637 = vst.msk [vmem:[#allocation3 + $0xd0] sm:$0xff] %vm1481_vm1, %v1599_v56  ;;  %1592 = vrot.lane.b32.xlu1 %v10752_v34, %s9938_s14 }
 0x327   : > { %1655 = vrot.lane.b32.xlu0 %v10754_v22, %s9939_s16 }
 0x328   : > { %v1601_v37 = vpop.permute.xlu1 %1600 }
 0x329   : > { %1638 = vst.msk [vmem:[#allocation3 + $0xd8] sm:$0xff] %vm1481_vm1, %v1601_v37  ;;  %v1648_v15 = vpop.permute.xlu0 %1647 }
 0x32a   : > { %1694 = vst.msk [vmem:[#allocation4 + $0x90] sm:$0xff] %vm1481_vm1, %v1648_v15  ;;  %1608 = vrot.lane.b32.xlu1 %v10764_v35, %s9938_s14 }
 0x32b   : > { %1671 = vrot.lane.b32.xlu0 %v10766_v42, %s9939_s16 }
 0x32c   : > { %v1650_v27 = vpop.permute.xlu1 %1649 }
 0x32d   : > { %1695 = vst.msk [vmem:[#allocation4 + $0x98] sm:$0xff] %vm1481_vm1, %v1650_v27  ;;  %v1664_v18 = vpop.permute.xlu0 %1663 }
 0x32e   : > { %1702 = vst.msk [vmem:[#allocation4 + $0xd0] sm:$0xff] %vm1481_vm1, %v1664_v18  ;;  %1657 = vrot.lane.b32.xlu1 %v10752_v34, %s9939_s16 }
 0x32f   : > { %1720 = vrot.lane.b32.xlu0 %v10754_v22, %s9940_s12 }
 0x330   : > { %v1666_v63 = vpop.permute.xlu1 %1665 }
 0x331   : > { %1703 = vst.msk [vmem:[#allocation4 + $0xd8] sm:$0xff] %vm1481_vm1, %v1666_v63  ;;  %v1713_v44 = vpop.permute.xlu0 %1712 }
 0x332   : > { %1759 = vst.msk [vmem:[#allocation3 + $0x110] sm:$0xff] %vm1481_vm1, %v1713_v44  ;;  %1673 = vrot.lane.b32.xlu1 %v10764_v35, %s9939_s16 }
 0x333   : > { %1736 = vrot.lane.b32.xlu0 %v10766_v42, %s9940_s12 }
 0x334   : > { %v1715_v45 = vpop.permute.xlu1 %1714 }
 0x335   : > { %1760 = vst.msk [vmem:[#allocation3 + $0x118] sm:$0xff] %vm1481_vm1, %v1715_v45  ;;  %v1729_v60 = vpop.permute.xlu0 %1728 }
 0x336   : > { %1767 = vst.msk [vmem:[#allocation3 + $0x150] sm:$0xff] %vm1481_vm1, %v1729_v60  ;;  %1722 = vrot.lane.b32.xlu1 %v10752_v34, %s9940_s12 }
 0x337   : > { %1785 = vrot.lane.b32.xlu0 %v10754_v22, %s9941_s7 }
 0x338   : > { %v1731_v61 = vpop.permute.xlu1 %1730 }
 0x339   : > { %1768 = vst.msk [vmem:[#allocation3 + $0x158] sm:$0xff] %vm1481_vm1, %v1731_v61  ;;  %v1778_v25 = vpop.permute.xlu0 %1777 }
 0x33a   : > { %1824 = vst.msk [vmem:[#allocation4 + $0x110] sm:$0xff] %vm1481_vm1, %v1778_v25  ;;  %1738 = vrot.lane.b32.xlu1 %v10764_v35, %s9940_s12 }
 0x33b   : > { %1801 = vrot.lane.b32.xlu0 %v10766_v42, %s9941_s7 }
 0x33c   : > { %v1780_v13 = vpop.permute.xlu1 %1779 }
 0x33d   : > { %1825 = vst.msk [vmem:[#allocation4 + $0x118] sm:$0xff] %vm1481_vm1, %v1780_v13  ;;  %v1794_v2 = vpop.permute.xlu0 %1793 }
 0x33e   : > { %1832 = vst.msk [vmem:[#allocation4 + $0x150] sm:$0xff] %vm1481_vm1, %v1794_v2  ;;  %1787 = vrot.lane.b32.xlu1 %v10752_v34, %s9941_s7 }
 0x33f   : > { %1850 = vrot.lane.b32.xlu0 %v10754_v22, %s9942_s15 }
 0x340   : > { %v1796_v23 = vpop.permute.xlu1 %1795 }
 0x341   : > { %1833 = vst.msk [vmem:[#allocation4 + $0x158] sm:$0xff] %vm1481_vm1, %v1796_v23  ;;  %v1843_v41 = vpop.permute.xlu0 %1842 }
 0x342   : > { %1889 = vst.msk [vmem:[#allocation3 + $0x190] sm:$0xff] %vm1481_vm1, %v1843_v41  ;;  %1803 = vrot.lane.b32.xlu1 %v10764_v35, %s9941_s7 }
 0x343   : > { %1866 = vrot.lane.b32.xlu0 %v10766_v42, %s9942_s15 }
 0x344   : > { %v1845_v1 = vpop.permute.xlu1 %1844 }
 0x345   : > { %1890 = vst.msk [vmem:[#allocation3 + $0x198] sm:$0xff] %vm1481_vm1, %v1845_v1  ;;  %v1859_v19 = vpop.permute.xlu0 %1858 }
 0x346   : > { %1897 = vst.msk [vmem:[#allocation3 + $0x1d0] sm:$0xff] %vm1481_vm1, %v1859_v19  ;;  %1852 = vrot.lane.b32.xlu1 %v10752_v34, %s9942_s15 }
 0x347   : > { %1915 = vrot.lane.b32.xlu0 %v10754_v22, %s9943_s30 }
 0x348   : > { %v1861_v0 = vpop.permute.xlu1 %1860 }
 0x349   : > { %1898 = vst.msk [vmem:[#allocation3 + $0x1d8] sm:$0xff] %vm1481_vm1, %v1861_v0  ;;  %v1908_v16 = vpop.permute.xlu0 %1907 }
 0x34a   : > { %1954 = vst.msk [vmem:[#allocation4 + $0x190] sm:$0xff] %vm1481_vm1, %v1908_v16  ;;  %1868 = vrot.lane.b32.xlu1 %v10764_v35, %s9942_s15 }
 0x34b   : > { %1931 = vrot.lane.b32.xlu0 %v10766_v42, %s9943_s30 }
 0x34c   : > { %v1910_v14 = vpop.permute.xlu1 %1909 }
 0x34d   : > { %1955 = vst.msk [vmem:[#allocation4 + $0x198] sm:$0xff] %vm1481_vm1, %v1910_v14  ;;  %v1924_v10 = vpop.permute.xlu0 %1923 }
 0x34e   : > { %1962 = vst.msk [vmem:[#allocation4 + $0x1d0] sm:$0xff] %vm1481_vm1, %v1924_v10  ;;  %1917 = vrot.lane.b32.xlu1 %v10752_v34, %s9943_s30 }
 0x350   : > { %v1926_v30 = vpop.permute.xlu1 %1925 }
 0x351   : > { %1963 = vst.msk [vmem:[#allocation4 + $0x1d8] sm:$0xff] %vm1481_vm1, %v1926_v30  ;;  %v1523_v48 = vpop.permute.xlu0 %1522 }
 0x352   : > { %1566 = vst.msk [vmem:[#allocation4 + $0x20] sm:$0xff] %vm1481_vm1, %v1523_v48  ;;  %1933 = vrot.lane.b32.xlu1 %v10764_v35, %s9943_s30 }
 0x354   : > { %v1519_v22 = vpop.permute.xlu1 %1518 }
 0x355   : > { %1564 = vst.msk [vmem:[#allocation4 + $0x10] sm:$0xff] %vm1481_vm1, %v1519_v22  ;;  %v1539_v49 = vpop.permute.xlu0 %1538 }
 0x356   : > { %1574 = vst.msk [vmem:[#allocation4 + $0x60] sm:$0xff] %vm1481_vm1, %v1539_v49 }
 0x358   : > { %v1525_v5 = vpop.permute.xlu1 %1524 }
 0x359   : > { %1567 = vst.msk [vmem:[#allocation4 + $0x28] sm:$0xff] %vm1481_vm1, %v1525_v5  ;;  %v1587_v38 = vpop.permute.xlu0 %1586 }
 0x35a   : > { %1631 = vst.msk [vmem:[#allocation3 + $0xa0] sm:$0xff] %vm1481_vm1, %v1587_v38 }
 0x35c   : > { %v1541_v34 = vpop.permute.xlu1 %1540 }
 0x35d   : > { %1575 = vst.msk [vmem:[#allocation4 + $0x68] sm:$0xff] %vm1481_vm1, %v1541_v34  ;;  %v1603_v29 = vpop.permute.xlu0 %1602 }
 0x35e   : > { %1639 = vst.msk [vmem:[#allocation3 + $0xe0] sm:$0xff] %vm1481_vm1, %v1603_v29 }
 0x360   : > { %v1589_v42 = vpop.permute.xlu1 %1588 }
 0x361   : > { %1632 = vst.msk [vmem:[#allocation3 + $0xa8] sm:$0xff] %vm1481_vm1, %v1589_v42  ;;  %v1652_v35 = vpop.permute.xlu0 %1651 }
 0x362   : > { %1696 = vst.msk [vmem:[#allocation4 + $0xa0] sm:$0xff] %vm1481_vm1, %v1652_v35 }
 0x364   : > { %v1605_v55 = vpop.permute.xlu1 %1604 }
 0x365   : > { %1640 = vst.msk [vmem:[#allocation3 + $0xe8] sm:$0xff] %vm1481_vm1, %v1605_v55  ;;  %v1668_v31 = vpop.permute.xlu0 %1667 }
 0x366   : > { %1704 = vst.msk [vmem:[#allocation4 + $0xe0] sm:$0xff] %vm1481_vm1, %v1668_v31 }
 0x368   : > { %v1654_v17 = vpop.permute.xlu1 %1653 }
 0x369   : > { %1697 = vst.msk [vmem:[#allocation4 + $0xa8] sm:$0xff] %vm1481_vm1, %v1654_v17  ;;  %v1717_v39 = vpop.permute.xlu0 %1716 }
 0x36a   : > { %1761 = vst.msk [vmem:[#allocation3 + $0x120] sm:$0xff] %vm1481_vm1, %v1717_v39 }
 0x36c   : > { %v1670_v20 = vpop.permute.xlu1 %1669 }
 0x36d   : > { %1705 = vst.msk [vmem:[#allocation4 + $0xe8] sm:$0xff] %vm1481_vm1, %v1670_v20  ;;  %v1733_v53 = vpop.permute.xlu0 %1732 }
 0x36e   : > { %1769 = vst.msk [vmem:[#allocation3 + $0x160] sm:$0xff] %vm1481_vm1, %v1733_v53 }
 0x370   : > { %v1719_v26 = vpop.permute.xlu1 %1718 }
 0x371   : > { %1762 = vst.msk [vmem:[#allocation3 + $0x128] sm:$0xff] %vm1481_vm1, %v1719_v26  ;;  %v1782_v46 = vpop.permute.xlu0 %1781 }
 0x372   : > { %1826 = vst.msk [vmem:[#allocation4 + $0x120] sm:$0xff] %vm1481_vm1, %v1782_v46 }
 0x374   : > { %v1735_v36 = vpop.permute.xlu1 %1734 }
 0x375   : > { %1770 = vst.msk [vmem:[#allocation3 + $0x168] sm:$0xff] %vm1481_vm1, %v1735_v36  ;;  %v1798_v50 = vpop.permute.xlu0 %1797 }
 0x376   : > { %1834 = vst.msk [vmem:[#allocation4 + $0x160] sm:$0xff] %vm1481_vm1, %v1798_v50 }
 0x378   : > { %v1784_v43 = vpop.permute.xlu1 %1783 }
 0x379   : > { %1827 = vst.msk [vmem:[#allocation4 + $0x128] sm:$0xff] %vm1481_vm1, %v1784_v43  ;;  %v1847_v51 = vpop.permute.xlu0 %1846 }
 0x37a   : > { %1891 = vst.msk [vmem:[#allocation3 + $0x1a0] sm:$0xff] %vm1481_vm1, %v1847_v51 }
 0x37c   : > { %v1800_v8 = vpop.permute.xlu1 %1799 }
 0x37d   : > { %1835 = vst.msk [vmem:[#allocation4 + $0x168] sm:$0xff] %vm1481_vm1, %v1800_v8  ;;  %v1863_v12 = vpop.permute.xlu0 %1862 }
 0x37e   : > { %1899 = vst.msk [vmem:[#allocation3 + $0x1e0] sm:$0xff] %vm1481_vm1, %v1863_v12 }
 0x380   : > { %v1849_v54 = vpop.permute.xlu1 %1848 }
 0x381   : > { %1892 = vst.msk [vmem:[#allocation3 + $0x1a8] sm:$0xff] %vm1481_vm1, %v1849_v54  ;;  %v1912_v52 = vpop.permute.xlu0 %1911 }
 0x382   : > { %1956 = vst.msk [vmem:[#allocation4 + $0x1a0] sm:$0xff] %vm1481_vm1, %v1912_v52 }
 0x384   : > { %v1865_v11 = vpop.permute.xlu1 %1864 }
 0x385   : > { %1900 = vst.msk [vmem:[#allocation3 + $0x1e8] sm:$0xff] %vm1481_vm1, %v1865_v11  ;;  %v1928_v33 = vpop.permute.xlu0 %1927 }
 0x386   : > { %1964 = vst.msk [vmem:[#allocation4 + $0x1e0] sm:$0xff] %vm1481_vm1, %v1928_v33 }
 0x388   : > { %v1914_v58 = vpop.permute.xlu1 %1913 }
 0x389   : > { %1957 = vst.msk [vmem:[#allocation4 + $0x1a8] sm:$0xff] %vm1481_vm1, %v1914_v58  ;;  %v1527_v24 = vpop.permute.xlu0 %1526 }
 0x38a   : > { %1568 = vst.msk [vmem:[#allocation4 + $0x30] sm:$0xff] %vm1481_vm1, %v1527_v24 }
 0x38c   : > { %v1930_v57 = vpop.permute.xlu1 %1929 }
 0x38d   : > { %1965 = vst.msk [vmem:[#allocation4 + $0x1e8] sm:$0xff] %vm1481_vm1, %v1930_v57  ;;  %v1543_v9 = vpop.permute.xlu0 %1542 }
 0x38e   : > { %1576 = vst.msk [vmem:[#allocation4 + $0x70] sm:$0xff] %vm1481_vm1, %v1543_v9 }
 0x390   : > { %v1529_v62 = vpop.permute.xlu1 %1528 }
 0x391   : > { %1569 = vst.msk [vmem:[#allocation4 + $0x38] sm:$0xff] %vm1481_vm1, %v1529_v62  ;;  %v1591_v28 = vpop.permute.xlu0 %1590 }
 0x392   : > { %1633 = vst.msk [vmem:[#allocation3 + $0xb0] sm:$0xff] %vm1481_vm1, %v1591_v28 }
 0x394   : > { %v1545_v32 = vpop.permute.xlu1 %1544 }
 0x395   : > { %1577 = vst.msk [vmem:[#allocation4 + $0x78] sm:$0xff] %vm1481_vm1, %v1545_v32  ;;  %v1607_v21 = vpop.permute.xlu0 %1606 }
 0x396   : > { %1641 = vst.msk [vmem:[#allocation3 + $0xf0] sm:$0xff] %vm1481_vm1, %v1607_v21 }
 0x398   : > { %v1593_v47 = vpop.permute.xlu1 %1592 }
 0x399   : > { %1634 = vst.msk [vmem:[#allocation3 + $0xb8] sm:$0xff] %vm1481_vm1, %v1593_v47  ;;  %v1656_v40 = vpop.permute.xlu0 %1655 }
 0x39a   : > { %1698 = vst.msk [vmem:[#allocation4 + $0xb0] sm:$0xff] %vm1481_vm1, %v1656_v40 }
 0x39c   : > { %v1609_v3 = vpop.permute.xlu1 %1608 }
 0x39d   : > { %1642 = vst.msk [vmem:[#allocation3 + $0xf8] sm:$0xff] %vm1481_vm1, %v1609_v3  ;;  %v1672_v59 = vpop.permute.xlu0 %1671 }
 0x39e   : > { %1706 = vst.msk [vmem:[#allocation4 + $0xf0] sm:$0xff] %vm1481_vm1, %v1672_v59 }
 0x3a0   : > { %v1658_v4 = vpop.permute.xlu1 %1657 }
 0x3a1   : > { %1699 = vst.msk [vmem:[#allocation4 + $0xb8] sm:$0xff] %vm1481_vm1, %v1658_v4  ;;  %v1721_v6 = vpop.permute.xlu0 %1720 }
 0x3a2   : > { %1763 = vst.msk [vmem:[#allocation3 + $0x130] sm:$0xff] %vm1481_vm1, %v1721_v6 }
 0x3a4   : > { %v1674_v7 = vpop.permute.xlu1 %1673 }
 0x3a5   : > { %1707 = vst.msk [vmem:[#allocation4 + $0xf8] sm:$0xff] %vm1481_vm1, %v1674_v7  ;;  %v1737_v56 = vpop.permute.xlu0 %1736 }
 0x3a6   : > { %1771 = vst.msk [vmem:[#allocation3 + $0x170] sm:$0xff] %vm1481_vm1, %v1737_v56 }
 0x3a8   : > { %v1723_v37 = vpop.permute.xlu1 %1722 }
 0x3a9   : > { %1764 = vst.msk [vmem:[#allocation3 + $0x138] sm:$0xff] %vm1481_vm1, %v1723_v37  ;;  %v1786_v15 = vpop.permute.xlu0 %1785 }
 0x3aa   : > { %1828 = vst.msk [vmem:[#allocation4 + $0x130] sm:$0xff] %vm1481_vm1, %v1786_v15 }
 0x3ac   : > { %v1739_v27 = vpop.permute.xlu1 %1738 }
 0x3ad   : > { %1772 = vst.msk [vmem:[#allocation3 + $0x178] sm:$0xff] %vm1481_vm1, %v1739_v27  ;;  %v1802_v18 = vpop.permute.xlu0 %1801 }
 0x3ae   : > { %1836 = vst.msk [vmem:[#allocation4 + $0x170] sm:$0xff] %vm1481_vm1, %v1802_v18 }
 0x3b0   : > { %v1788_v63 = vpop.permute.xlu1 %1787 }
 0x3b1   : > { %1829 = vst.msk [vmem:[#allocation4 + $0x138] sm:$0xff] %vm1481_vm1, %v1788_v63  ;;  %v1851_v44 = vpop.permute.xlu0 %1850 }
 0x3b2   : > { %1893 = vst.msk [vmem:[#allocation3 + $0x1b0] sm:$0xff] %vm1481_vm1, %v1851_v44 }
 0x3b4   : > { %v1804_v45 = vpop.permute.xlu1 %1803 }
 0x3b5   : > { %1837 = vst.msk [vmem:[#allocation4 + $0x178] sm:$0xff] %vm1481_vm1, %v1804_v45  ;;  %v1867_v60 = vpop.permute.xlu0 %1866 }
 0x3b6   : > { %1901 = vst.msk [vmem:[#allocation3 + $0x1f0] sm:$0xff] %vm1481_vm1, %v1867_v60 }
 0x3b8   : > { %v1853_v61 = vpop.permute.xlu1 %1852 }
 0x3b9   : > { %1894 = vst.msk [vmem:[#allocation3 + $0x1b8] sm:$0xff] %vm1481_vm1, %v1853_v61  ;;  %v1916_v25 = vpop.permute.xlu0 %1915 }
 0x3ba   : > { %1958 = vst.msk [vmem:[#allocation4 + $0x1b0] sm:$0xff] %vm1481_vm1, %v1916_v25 }
 0x3bc   : > { %v1869_v13 = vpop.permute.xlu1 %1868 }
 0x3bd   : > { %1902 = vst.msk [vmem:[#allocation3 + $0x1f8] sm:$0xff] %vm1481_vm1, %v1869_v13  ;;  %v1932_v2 = vpop.permute.xlu0 %1931 }
 0x3be   : > { %1966 = vst.msk [vmem:[#allocation4 + $0x1f0] sm:$0xff] %vm1481_vm1, %v1932_v2 }
 0x3c0   : > { %v1918_v23 = vpop.permute.xlu1 %1917 }
 0x3c1   : > { %1959 = vst.msk [vmem:[#allocation4 + $0x1b8] sm:$0xff] %vm1481_vm1, %v1918_v23 }
 0x3c4   : > { %v1934_v41 = vpop.permute.xlu1 %1933 }
 0x3c5   : > { %1967 = vst.msk [vmem:[#allocation4 + $0x1f8] sm:$0xff] %vm1481_vm1, %v1934_v41 }
 0x3c6 PF: > { %p8209_p5 = scmp.ne.s32.totalorder %s9904_s27, 0 }
 0x3c7   : > { %v2165_v1 = vld [vmem:[%s10169_s4] sm:$0xff] (!%p8209_p5)  ;;  %vm2183_vm2 = vcmask (!%p8209_p5), 261120   ;;  %v2166_v0 = vld [vmem:[%s10169_s4 + $0x8] sm:$0xff] (!%p8209_p5)  ;;  %v2167_v22 = vld [vmem:[%s10169_s4 + $0x10] sm:$0xff] (!%p8209_p5)  ;;  %vm1971_vm3 = vcmask (!%p8209_p5), 7168   ;;  %s14494_s21 = sld [smem:[#allocation147_spill]] (!%p8209_p5) }
 0x3c8   : > { %1970 = sbr.rel (%p8209_p5) target bundleno = 1675 (0x68b), region = 100  ;;  %v2173_v19 = vld [vmem:[%s10169_s4 + $0x40] sm:$0xff] (!%p8209_p5)  ;;  %v2184_v16 = vsel (!%p8209_p5), %vm2183_vm2, %v2165_v1, 0.0  ;;  %v2174_v10 = vld [vmem:[%s10169_s4 + $0x48] sm:$0xff] (!%p8209_p5)  ;;  %v2187_v30 = vsel (!%p8209_p5), %vm2183_vm2, %v2166_v0, 0.0  ;;  %v2168_v49 = vld [vmem:[%s10169_s4 + $0x18] sm:$0xff] (!%p8209_p5) }
 0x3c9   : > { %v2208_v14 = vsel (!%p8209_p5), %vm2183_vm2, %v2173_v19, 0.0  ;;  %2185 = vadd.xlane.f32.xlu0 (!%p8209_p5), %v2184_v16  ;;  %v2211_v48 = vsel (!%p8209_p5), %vm2183_vm2, %v2174_v10, 0.0  ;;  %v2190_v5 = vsel (!%p8209_p5), %vm2183_vm2, %v2167_v22, 0.0  ;;  %v2193_v38 = vsel (!%p8209_p5), %vm2183_vm2, %v2168_v49, 0.0  ;;  %v11070_v34 = vld [vmem:[%s10169_s4 + $0x50] sm:$0xff] (!%p8209_p5)  ;;  %v11073_v29 = vld [vmem:[%s10169_s4 + $0x58] sm:$0xff] (!%p8209_p5) }
 0x3ca   : > { %2209 = vadd.xlane.f32.xlu1 (!%p8209_p5), %v2208_v14  ;;  %v2214_v42 = vsel (!%p8209_p5), %vm2183_vm2, %v11070_v34, 0.0  ;;  %v2217_v35 = vsel (!%p8209_p5), %vm2183_vm2, %v11073_v29, 0.0  ;;  %v11080_v55 = vld [vmem:[%s10169_s4 + $0x20] sm:$0xff] (!%p8209_p5)  ;;  %v11083_v31 = vld [vmem:[%s10169_s4 + $0x28] sm:$0xff] (!%p8209_p5)  ;;  %v11100_v36 = vld [vmem:[%s10169_s4 + $0x30] sm:$0xff] (!%p8209_p5)  ;;  %vm2100_vm4 = vcmask (!%p8209_p5), 64512  }
 0x3cb   : > { %v2196_v17 = vsel (!%p8209_p5), %vm2183_vm2, %v11080_v55, 0.0  ;;  %v2199_v39 = vsel (!%p8209_p5), %vm2183_vm2, %v11083_v31, 0.0  ;;  %v11090_v20 = vld [vmem:[%s10169_s4 + $0x60] sm:$0xff] (!%p8209_p5)  ;;  %v11093_v53 = vld [vmem:[%s10169_s4 + $0x68] sm:$0xff] (!%p8209_p5)  ;;  %v11103_v50 = vld [vmem:[%s10169_s4 + $0x38] sm:$0xff] (!%p8209_p5)  ;;  %v2202_v43 = vsel (!%p8209_p5), %vm2183_vm2, %v11100_v36, 0.0 }
 0x3cc   : > { %v2220_v26 = vsel (!%p8209_p5), %vm2183_vm2, %v11090_v20, 0.0  ;;  %v2223_v46 = vsel (!%p8209_p5), %vm2183_vm2, %v11093_v53, 0.0  ;;  %v2205_v51 = vsel (!%p8209_p5), %vm2183_vm2, %v11103_v50, 0.0  ;;  %v11110_v8 = vld [vmem:[%s10169_s4 + $0x70] sm:$0xff] (!%p8209_p5)  ;;  %v11113_v12 = vld [vmem:[%s10169_s4 + $0x78] sm:$0xff] (!%p8209_p5)  ;;  %s9946_s13 = smov (!%p8209_p5), 120  }
 0x3cd   : > { %2188 = vadd.xlane.f32.xlu0 (!%p8209_p5), %v2187_v30  ;;  %v2226_v54 = vsel (!%p8209_p5), %vm2183_vm2, %v11110_v8, 0.0  ;;  %v2229_v52 = vsel (!%p8209_p5), %vm2183_vm2, %v11113_v12, 0.0  ;;  %s9947_s14 = smov (!%p8209_p5), 112   ;;  %s9948_s16 = smov (!%p8209_p5), 104  }
 0x3ce   : > { %2212 = vadd.xlane.f32.xlu1 (!%p8209_p5), %v2211_v48 }
 0x3d1   : > { %2191 = vadd.xlane.f32.xlu0 %v2190_v5 }
 0x3d2   : > { %2194 = vadd.xlane.f32.xlu1 %v2193_v38 }
 0x3d5   : > { %2215 = vadd.xlane.f32.xlu0 %v2214_v42 }
 0x3d6   : > { %2218 = vadd.xlane.f32.xlu1 %v2217_v35 }
 0x3d9   : > { %2197 = vadd.xlane.f32.xlu0 %v2196_v17 }
 0x3da   : > { %2200 = vadd.xlane.f32.xlu1 %v2199_v39 }
 0x3dd   : > { %2221 = vadd.xlane.f32.xlu0 %v2220_v26 }
 0x3de   : > { %2224 = vadd.xlane.f32.xlu1 %v2223_v46 }
 0x3e1   : > { %2203 = vadd.xlane.f32.xlu0 %v2202_v43 }
 0x3e2   : > { %2206 = vadd.xlane.f32.xlu1 %v2205_v51 }
 0x3e5   : > { %2227 = vadd.xlane.f32.xlu0 %v2226_v54 }
 0x3e6   : > { %2230 = vadd.xlane.f32.xlu1 %v2229_v52 }
 0x456   : > { %v2186_v11 = vpop.xlane.xlu0 %2185 }
 0x457   : > { %v2210_v33 = vpop.xlane.xlu1 %2209  ;;  %v2233_v58 = vmul.f32 0.03125, %v2186_v11 }
 0x458   : > { %v2241_v24 = vmul.f32 0.03125, %v2210_v33 }
 0x459   : > { %v11119_v57 = vsub.f32 %v2165_v1, %v2233_v58 }
 0x45a   : > { %v11121_v9 = vsub.f32 %v2173_v19, %v2241_v24  ;;  %v2189_v62 = vpop.xlane.xlu0 %2188 }
 0x45b   : > { %v2213_v28 = vpop.xlane.xlu1 %2212  ;;  %v2234_v32 = vmul.f32 0.03125, %v2189_v62  ;;  %v2265_v47 = vmul.f32 %v11119_v57, %v11119_v57 }
 0x45c   : > { %v2242_v21 = vmul.f32 0.03125, %v2213_v28  ;;  %v2273_v40 = vmul.f32 %v11121_v9, %v11121_v9 }
 0x45d   : > { %v11127_v3 = vsub.f32 %v2166_v0, %v2234_v32  ;;  %v2281_v4 = vsel %vm2183_vm2, %v2265_v47, 0.0 }
 0x45e   : > { %v11129_v59 = vsub.f32 %v2174_v10, %v2242_v21  ;;  %2282 = vadd.xlane.f32.xlu0 %v2281_v4  ;;  %v2192_v6 = vpop.xlane.xlu0 %2191  ;;  %v2305_v56 = vsel %vm2183_vm2, %v2273_v40, 0.0 }
 0x45f   : > { %v2195_v7 = vpop.xlane.xlu1 %2194  ;;  %v2235_v37 = vmul.f32 0.03125, %v2192_v6  ;;  %v2266_v27 = vmul.f32 %v11127_v3, %v11127_v3 }
 0x460   : > { %v2236_v15 = vmul.f32 0.03125, %v2195_v7  ;;  %v2274_v18 = vmul.f32 %v11129_v59, %v11129_v59 }
 0x461   : > { %v11137_v63 = vsub.f32 %v2167_v22, %v2235_v37  ;;  %v2284_v45 = vsel %vm2183_vm2, %v2266_v27, 0.0 }
 0x462   : > { %v11139_v44 = vsub.f32 %v2168_v49, %v2236_v15  ;;  %2306 = vadd.xlane.f32.xlu0 %v2305_v56  ;;  %2285 = vadd.xlane.f32.xlu1 %v2284_v45  ;;  %v2216_v60 = vpop.xlane.xlu0 %2215  ;;  %v2308_v25 = vsel %vm2183_vm2, %v2274_v18, 0.0  ;;  %v9351_v18 = vld [vmem:[%s14306_s9 + $0x8] sm:$0xff]   ;;  %v9944_v45 = vmov -inf  }
 0x463   : > { %v2219_v61 = vpop.xlane.xlu1 %2218  ;;  %v2243_v13 = vmul.f32 0.03125, %v2216_v60  ;;  %v2267_v23 = vmul.f32 %v11137_v63, %v11137_v63  ;;  %1972 = vst.msk [vmem:[#allocation5] sm:$0xff] %vm1971_vm3, %v9944_v45  ;;  %1973 = vst.msk [vmem:[#allocation5 + $0x8] sm:$0xff] %vm1971_vm3, %v9944_v45  ;;  %v9945_v60 = vmov 0.0  }
 0x464   : > { %v2244_v2 = vmul.f32 0.03125, %v2219_v61  ;;  %v2268_v41 = vmul.f32 %v11139_v44, %v11139_v44  ;;  %1974 = vst.msk [vmem:[#allocation5 + $0x10] sm:$0xff] %vm1971_vm3, %v9944_v45  ;;  %1975 = vst.msk [vmem:[#allocation5 + $0x18] sm:$0xff] %vm1971_vm3, %v9944_v45 }
 0x465   : > { %v11148_v1 = vsub.f32 %v11070_v34, %v2243_v13  ;;  %v2287_v0 = vsel %vm2183_vm2, %v2267_v23, 0.0  ;;  %1976 = vst.msk [vmem:[#allocation5 + $0x20] sm:$0xff] %vm1971_vm3, %v9944_v45  ;;  %1977 = vst.msk [vmem:[#allocation5 + $0x28] sm:$0xff] %vm1971_vm3, %v9944_v45 }
 0x466   : > { %v11151_v19 = vsub.f32 %v11073_v29, %v2244_v2  ;;  %2309 = vadd.xlane.f32.xlu1 %v2308_v25  ;;  %2288 = vadd.xlane.f32.xlu0 %v2287_v0  ;;  %v2198_v16 = vpop.xlane.xlu0 %2197  ;;  %v2290_v10 = vsel %vm2183_vm2, %v2268_v41, 0.0  ;;  %1978 = vst.msk [vmem:[#allocation5 + $0x30] sm:$0xff] %vm1971_vm3, %v9944_v45  ;;  %1979 = vst.msk [vmem:[#allocation5 + $0x38] sm:$0xff] %vm1971_vm3, %v9944_v45 }
 0x467   : > { %v2201_v14 = vpop.xlane.xlu1 %2200  ;;  %v2237_v30 = vmul.f32 0.03125, %v2198_v16  ;;  %v2275_v22 = vmul.f32 %v11148_v1, %v11148_v1  ;;  %1980 = vst.msk [vmem:[#allocation5 + $0x40] sm:$0xff] %vm1971_vm3, %v9944_v45  ;;  %1981 = vst.msk [vmem:[#allocation5 + $0x48] sm:$0xff] %vm1971_vm3, %v9944_v45 }
 0x468   : > { %v2238_v48 = vmul.f32 0.03125, %v2201_v14  ;;  %v2276_v49 = vmul.f32 %v11151_v19, %v11151_v19  ;;  %1982 = vst.msk [vmem:[#allocation5 + $0x50] sm:$0xff] %vm1971_vm3, %v9944_v45  ;;  %1983 = vst.msk [vmem:[#allocation5 + $0x58] sm:$0xff] %vm1971_vm3, %v9944_v45 }
 0x469   : > { %v11160_v5 = vsub.f32 %v11080_v55, %v2237_v30  ;;  %v2311_v34 = vsel %vm2183_vm2, %v2275_v22, 0.0  ;;  %1984 = vst.msk [vmem:[#allocation5 + $0x60] sm:$0xff] %vm1971_vm3, %v9944_v45  ;;  %1985 = vst.msk [vmem:[#allocation5 + $0x68] sm:$0xff] %vm1971_vm3, %v9944_v45 }
 0x46a   : > { %v11163_v38 = vsub.f32 %v11083_v31, %v2238_v48  ;;  %2291 = vadd.xlane.f32.xlu1 %v2290_v10  ;;  %2312 = vadd.xlane.f32.xlu0 %v2311_v34  ;;  %v2222_v29 = vpop.xlane.xlu0 %2221  ;;  %v2314_v35 = vsel %vm2183_vm2, %v2276_v49, 0.0  ;;  %1986 = vst.msk [vmem:[#allocation5 + $0x70] sm:$0xff] %vm1971_vm3, %v9944_v45  ;;  %1987 = vst.msk [vmem:[#allocation5 + $0x78] sm:$0xff] %vm1971_vm3, %v9944_v45 }
 0x46b   : > { %v2225_v42 = vpop.xlane.xlu1 %2224  ;;  %v2245_v17 = vmul.f32 0.03125, %v2222_v29  ;;  %v2269_v26 = vmul.f32 %v11160_v5, %v11160_v5  ;;  %1988 = vst.msk [vmem:[#allocation5 + $0x80] sm:$0xff] %vm1971_vm3, %v9944_v45  ;;  %1989 = vst.msk [vmem:[#allocation5 + $0x88] sm:$0xff] %vm1971_vm3, %v9944_v45 }
 0x46c   : > { %v2246_v39 = vmul.f32 0.03125, %v2225_v42  ;;  %v2270_v55 = vmul.f32 %v11163_v38, %v11163_v38  ;;  %1990 = vst.msk [vmem:[#allocation5 + $0x90] sm:$0xff] %vm1971_vm3, %v9944_v45  ;;  %1991 = vst.msk [vmem:[#allocation5 + $0x98] sm:$0xff] %vm1971_vm3, %v9944_v45 }
 0x46d   : > { %v11172_v46 = vsub.f32 %v11090_v20, %v2245_v17  ;;  %v2293_v43 = vsel %vm2183_vm2, %v2269_v26, 0.0  ;;  %1992 = vst.msk [vmem:[#allocation5 + $0xa0] sm:$0xff] %vm1971_vm3, %v9944_v45  ;;  %1993 = vst.msk [vmem:[#allocation5 + $0xa8] sm:$0xff] %vm1971_vm3, %v9944_v45 }
 0x46e   : > { %v11175_v31 = vsub.f32 %v11093_v53, %v2246_v39  ;;  %2315 = vadd.xlane.f32.xlu1 %v2314_v35  ;;  %2294 = vadd.xlane.f32.xlu0 %v2293_v43  ;;  %v2204_v51 = vpop.xlane.xlu0 %2203  ;;  %v2296_v52 = vsel %vm2183_vm2, %v2270_v55, 0.0  ;;  %1994 = vst.msk [vmem:[#allocation5 + $0xb0] sm:$0xff] %vm1971_vm3, %v9944_v45  ;;  %1995 = vst.msk [vmem:[#allocation5 + $0xb8] sm:$0xff] %vm1971_vm3, %v9944_v45 }
 0x46f   : > { %v2207_v54 = vpop.xlane.xlu1 %2206  ;;  %v2239_v11 = vmul.f32 0.03125, %v2204_v51  ;;  %v2277_v58 = vmul.f32 %v11172_v46, %v11172_v46  ;;  %1996 = vst.msk [vmem:[#allocation5 + $0xc0] sm:$0xff] %vm1971_vm3, %v9944_v45  ;;  %1997 = vst.msk [vmem:[#allocation5 + $0xc8] sm:$0xff] %vm1971_vm3, %v9944_v45 }
 0x470   : > { %v2240_v33 = vmul.f32 0.03125, %v2207_v54  ;;  %v2278_v20 = vmul.f32 %v11175_v31, %v11175_v31  ;;  %1998 = vst.msk [vmem:[#allocation5 + $0xd0] sm:$0xff] %vm1971_vm3, %v9944_v45  ;;  %1999 = vst.msk [vmem:[#allocation5 + $0xd8] sm:$0xff] %vm1971_vm3, %v9944_v45 }
 0x471   : > { %v11184_v24 = vsub.f32 %v11100_v36, %v2239_v11  ;;  %v2317_v62 = vsel %vm2183_vm2, %v2277_v58, 0.0  ;;  %2000 = vst.msk [vmem:[#allocation5 + $0xe0] sm:$0xff] %vm1971_vm3, %v9944_v45  ;;  %2001 = vst.msk [vmem:[#allocation5 + $0xe8] sm:$0xff] %vm1971_vm3, %v9944_v45 }
 0x472   : > { %v11187_v53 = vsub.f32 %v11103_v50, %v2240_v33  ;;  %2297 = vadd.xlane.f32.xlu1 %v2296_v52  ;;  %2318 = vadd.xlane.f32.xlu0 %v2317_v62  ;;  %v2228_v28 = vpop.xlane.xlu0 %2227  ;;  %v2320_v21 = vsel %vm2183_vm2, %v2278_v20, 0.0  ;;  %2002 = vst.msk [vmem:[#allocation5 + $0xf0] sm:$0xff] %vm1971_vm3, %v9944_v45  ;;  %2003 = vst.msk [vmem:[#allocation5 + $0xf8] sm:$0xff] %vm1971_vm3, %v9944_v45  ;;  %v11475_v33 = vld [vmem:[%s14300_s3] ss:$0 sm:$0xff] }
 0x473   : > { %v2231_v32 = vpop.xlane.xlu1 %2230  ;;  %v2247_v47 = vmul.f32 0.03125, %v2228_v28  ;;  %v2271_v4 = vmul.f32 %v11184_v24, %v11184_v24  ;;  %2004 = vst.msk [vmem:[#allocation5 + $0x100] sm:$0xff] %vm1971_vm3, %v9944_v45  ;;  %2005 = vst.msk [vmem:[#allocation5 + $0x108] sm:$0xff] %vm1971_vm3, %v9944_v45 }
 0x474   : > { %v2248_v40 = vmul.f32 0.03125, %v2231_v32  ;;  %v2272_v36 = vmul.f32 %v11187_v53, %v11187_v53  ;;  %2006 = vst.msk [vmem:[#allocation5 + $0x110] sm:$0xff] %vm1971_vm3, %v9944_v45  ;;  %2007 = vst.msk [vmem:[#allocation5 + $0x118] sm:$0xff] %vm1971_vm3, %v9944_v45 }
 0x475   : > { %v11196_v6 = vsub.f32 %v11110_v8, %v2247_v47  ;;  %v2299_v7 = vsel %vm2183_vm2, %v2271_v4, 0.0  ;;  %2008 = vst.msk [vmem:[#allocation5 + $0x120] sm:$0xff] %vm1971_vm3, %v9944_v45  ;;  %2009 = vst.msk [vmem:[#allocation5 + $0x128] sm:$0xff] %vm1971_vm3, %v9944_v45 }
 0x476   : > { %v11199_v50 = vsub.f32 %v11113_v12, %v2248_v40  ;;  %2321 = vadd.xlane.f32.xlu1 %v2320_v21  ;;  %2300 = vadd.xlane.f32.xlu0 %v2299_v7  ;;  %v2302_v56 = vsel %vm2183_vm2, %v2272_v36, 0.0  ;;  %v9350_v12 = vld [vmem:[%s14306_s9] sm:$0xff]   ;;  %2010 = vst.msk [vmem:[#allocation5 + $0x130] sm:$0xff] %vm1971_vm3, %v9944_v45  ;;  %2011 = vst.msk [vmem:[#allocation5 + $0x138] sm:$0xff] %vm1971_vm3, %v9944_v45 }
 0x477   : > { %v2279_v37 = vmul.f32 %v11196_v6, %v11196_v6  ;;  %8730 = vmatprep.subr.bf16.mxu0 %v9350_v12  ;;  %9134 = vmatprep.subr.bf16.mxu1 %v9350_v12  ;;  %2012 = vst.msk [vmem:[#allocation5 + $0x140] sm:$0xff] %vm1971_vm3, %v9944_v45  ;;  %2013 = vst.msk [vmem:[#allocation5 + $0x148] sm:$0xff] %vm1971_vm3, %v9944_v45  ;;  %v11482_v36 = vld [vmem:[%s14494_s21] ss:$0 sm:$0xff] }
 0x478   : > { %v2280_v15 = vmul.f32 %v11199_v50, %v11199_v50  ;;  %8731 = vmatpush3.bf16.msra.mxu0 %v9350_v12  ;;  %9136 = vmatpush3.bf16.msra.mxu1 %v9350_v12  ;;  %2014 = vst.msk [vmem:[#allocation5 + $0x150] sm:$0xff] %vm1971_vm3, %v9944_v45  ;;  %2015 = vst.msk [vmem:[#allocation5 + $0x158] sm:$0xff] %vm1971_vm3, %v9944_v45 }
 0x479   : > { %v2323_v27 = vsel %vm2183_vm2, %v2279_v37, 0.0  ;;  %8732 = vmatprep.subr.bf16.mxu0 %v9351_v18  ;;  %9135 = vmatprep.subr.bf16.mxu1 %v9351_v18  ;;  %2016 = vst.msk [vmem:[#allocation5 + $0x160] sm:$0xff] %vm1971_vm3, %v9944_v45  ;;  %2017 = vst.msk [vmem:[#allocation5 + $0x168] sm:$0xff] %vm1971_vm3, %v9944_v45 }
 0x47a   : > { %2303 = vadd.xlane.f32.xlu1 %v2302_v56  ;;  %2324 = vadd.xlane.f32.xlu0 %v2323_v27  ;;  %v2326_v8 = vsel %vm2183_vm2, %v2280_v15, 0.0  ;;  %2018 = vst.msk [vmem:[#allocation5 + $0x170] sm:$0xff] %vm1971_vm3, %v9944_v45  ;;  %2019 = vst.msk [vmem:[#allocation5 + $0x178] sm:$0xff] %vm1971_vm3, %v9944_v45 }
 0x47b   : > { %2020 = vst.msk [vmem:[#allocation5 + $0x180] sm:$0xff] %vm1971_vm3, %v9944_v45  ;;  %2021 = vst.msk [vmem:[#allocation5 + $0x188] sm:$0xff] %vm1971_vm3, %v9944_v45 }
 0x47c   : > { %8733 = vmatpush3.bf16.msra.mxu0 %v9351_v18  ;;  %9137 = vmatpush3.bf16.msra.mxu1 %v9351_v18  ;;  %2022 = vst.msk [vmem:[#allocation5 + $0x190] sm:$0xff] %vm1971_vm3, %v9944_v45  ;;  %2023 = vst.msk [vmem:[#allocation5 + $0x198] sm:$0xff] %vm1971_vm3, %v9944_v45 }
 0x47d   : > { %2024 = vst.msk [vmem:[#allocation5 + $0x1a0] sm:$0xff] %vm1971_vm3, %v9944_v45  ;;  %2025 = vst.msk [vmem:[#allocation5 + $0x1a8] sm:$0xff] %vm1971_vm3, %v9944_v45 }
 0x47e   : > { %2327 = vadd.xlane.f32.xlu1 %v2326_v8  ;;  %2026 = vst.msk [vmem:[#allocation5 + $0x1b0] sm:$0xff] %vm1971_vm3, %v9944_v45  ;;  %2027 = vst.msk [vmem:[#allocation5 + $0x1b8] sm:$0xff] %vm1971_vm3, %v9944_v45 }
 0x47f   : > { %2028 = vst.msk [vmem:[#allocation5 + $0x1c0] sm:$0xff] %vm1971_vm3, %v9944_v45  ;;  %2029 = vst.msk [vmem:[#allocation5 + $0x1c8] sm:$0xff] %vm1971_vm3, %v9944_v45 }
 0x480   : > { %2030 = vst.msk [vmem:[#allocation5 + $0x1d0] sm:$0xff] %vm1971_vm3, %v9944_v45  ;;  %2031 = vst.msk [vmem:[#allocation5 + $0x1d8] sm:$0xff] %vm1971_vm3, %v9944_v45 }
 0x481   : > { %2032 = vst.msk [vmem:[#allocation5 + $0x1e0] sm:$0xff] %vm1971_vm3, %v9944_v45  ;;  %2033 = vst.msk [vmem:[#allocation5 + $0x1e8] sm:$0xff] %vm1971_vm3, %v9944_v45 }
 0x482   : > { %2034 = vst.msk [vmem:[#allocation5 + $0x1f0] sm:$0xff] %vm1971_vm3, %v9944_v45  ;;  %2035 = vst.msk [vmem:[#allocation5 + $0x1f8] sm:$0xff] %vm1971_vm3, %v9944_v45 }
 0x483   : > { %2036 = vst.msk [vmem:[#allocation6] sm:$0xff] %vm1971_vm3, %v9945_v60  ;;  %2037 = vst.msk [vmem:[#allocation6 + $0x8] sm:$0xff] %vm1971_vm3, %v9945_v60 }
 0x484   : > { %2038 = vst.msk [vmem:[#allocation6 + $0x10] sm:$0xff] %vm1971_vm3, %v9945_v60  ;;  %2039 = vst.msk [vmem:[#allocation6 + $0x18] sm:$0xff] %vm1971_vm3, %v9945_v60 }
 0x485   : > { %2040 = vst.msk [vmem:[#allocation6 + $0x20] sm:$0xff] %vm1971_vm3, %v9945_v60  ;;  %2041 = vst.msk [vmem:[#allocation6 + $0x28] sm:$0xff] %vm1971_vm3, %v9945_v60 }
 0x486   : > { %2042 = vst.msk [vmem:[#allocation6 + $0x30] sm:$0xff] %vm1971_vm3, %v9945_v60  ;;  %2043 = vst.msk [vmem:[#allocation6 + $0x38] sm:$0xff] %vm1971_vm3, %v9945_v60 }
 0x487   : > { %2044 = vst.msk [vmem:[#allocation6 + $0x40] sm:$0xff] %vm1971_vm3, %v9945_v60  ;;  %2045 = vst.msk [vmem:[#allocation6 + $0x48] sm:$0xff] %vm1971_vm3, %v9945_v60 }
 0x488   : > { %2046 = vst.msk [vmem:[#allocation6 + $0x50] sm:$0xff] %vm1971_vm3, %v9945_v60  ;;  %2047 = vst.msk [vmem:[#allocation6 + $0x58] sm:$0xff] %vm1971_vm3, %v9945_v60 }
 0x489   : > { %2048 = vst.msk [vmem:[#allocation6 + $0x60] sm:$0xff] %vm1971_vm3, %v9945_v60  ;;  %2049 = vst.msk [vmem:[#allocation6 + $0x68] sm:$0xff] %vm1971_vm3, %v9945_v60 }
 0x48a   : > { %2050 = vst.msk [vmem:[#allocation6 + $0x70] sm:$0xff] %vm1971_vm3, %v9945_v60  ;;  %2051 = vst.msk [vmem:[#allocation6 + $0x78] sm:$0xff] %vm1971_vm3, %v9945_v60 }
 0x48b   : > { %2052 = vst.msk [vmem:[#allocation6 + $0x80] sm:$0xff] %vm1971_vm3, %v9945_v60  ;;  %2053 = vst.msk [vmem:[#allocation6 + $0x88] sm:$0xff] %vm1971_vm3, %v9945_v60 }
 0x48c   : > { %2054 = vst.msk [vmem:[#allocation6 + $0x90] sm:$0xff] %vm1971_vm3, %v9945_v60  ;;  %2055 = vst.msk [vmem:[#allocation6 + $0x98] sm:$0xff] %vm1971_vm3, %v9945_v60 }
 0x48d   : > { %2056 = vst.msk [vmem:[#allocation6 + $0xa0] sm:$0xff] %vm1971_vm3, %v9945_v60  ;;  %2057 = vst.msk [vmem:[#allocation6 + $0xa8] sm:$0xff] %vm1971_vm3, %v9945_v60 }
 0x48e   : > { %2058 = vst.msk [vmem:[#allocation6 + $0xb0] sm:$0xff] %vm1971_vm3, %v9945_v60  ;;  %2059 = vst.msk [vmem:[#allocation6 + $0xb8] sm:$0xff] %vm1971_vm3, %v9945_v60 }
 0x48f   : > { %2060 = vst.msk [vmem:[#allocation6 + $0xc0] sm:$0xff] %vm1971_vm3, %v9945_v60  ;;  %2061 = vst.msk [vmem:[#allocation6 + $0xc8] sm:$0xff] %vm1971_vm3, %v9945_v60 }
 0x490   : > { %2062 = vst.msk [vmem:[#allocation6 + $0xd0] sm:$0xff] %vm1971_vm3, %v9945_v60  ;;  %2063 = vst.msk [vmem:[#allocation6 + $0xd8] sm:$0xff] %vm1971_vm3, %v9945_v60 }
 0x491   : > { %2064 = vst.msk [vmem:[#allocation6 + $0xe0] sm:$0xff] %vm1971_vm3, %v9945_v60  ;;  %2065 = vst.msk [vmem:[#allocation6 + $0xe8] sm:$0xff] %vm1971_vm3, %v9945_v60 }
 0x492   : > { %2066 = vst.msk [vmem:[#allocation6 + $0xf0] sm:$0xff] %vm1971_vm3, %v9945_v60  ;;  %2067 = vst.msk [vmem:[#allocation6 + $0xf8] sm:$0xff] %vm1971_vm3, %v9945_v60 }
 0x493   : > { %2068 = vst.msk [vmem:[#allocation6 + $0x100] sm:$0xff] %vm1971_vm3, %v9945_v60  ;;  %2069 = vst.msk [vmem:[#allocation6 + $0x108] sm:$0xff] %vm1971_vm3, %v9945_v60 }
 0x494   : > { %2070 = vst.msk [vmem:[#allocation6 + $0x110] sm:$0xff] %vm1971_vm3, %v9945_v60  ;;  %2071 = vst.msk [vmem:[#allocation6 + $0x118] sm:$0xff] %vm1971_vm3, %v9945_v60 }
 0x495   : > { %2072 = vst.msk [vmem:[#allocation6 + $0x120] sm:$0xff] %vm1971_vm3, %v9945_v60  ;;  %2073 = vst.msk [vmem:[#allocation6 + $0x128] sm:$0xff] %vm1971_vm3, %v9945_v60 }
 0x496   : > { %2074 = vst.msk [vmem:[#allocation6 + $0x130] sm:$0xff] %vm1971_vm3, %v9945_v60  ;;  %2075 = vst.msk [vmem:[#allocation6 + $0x138] sm:$0xff] %vm1971_vm3, %v9945_v60 }
 0x497   : > { %2076 = vst.msk [vmem:[#allocation6 + $0x140] sm:$0xff] %vm1971_vm3, %v9945_v60  ;;  %2077 = vst.msk [vmem:[#allocation6 + $0x148] sm:$0xff] %vm1971_vm3, %v9945_v60 }
 0x498   : > { %2078 = vst.msk [vmem:[#allocation6 + $0x150] sm:$0xff] %vm1971_vm3, %v9945_v60  ;;  %2079 = vst.msk [vmem:[#allocation6 + $0x158] sm:$0xff] %vm1971_vm3, %v9945_v60 }
 0x499   : > { %2080 = vst.msk [vmem:[#allocation6 + $0x160] sm:$0xff] %vm1971_vm3, %v9945_v60  ;;  %2081 = vst.msk [vmem:[#allocation6 + $0x168] sm:$0xff] %vm1971_vm3, %v9945_v60 }
 0x49a   : > { %2082 = vst.msk [vmem:[#allocation6 + $0x170] sm:$0xff] %vm1971_vm3, %v9945_v60  ;;  %2083 = vst.msk [vmem:[#allocation6 + $0x178] sm:$0xff] %vm1971_vm3, %v9945_v60 }
 0x49b   : > { %2084 = vst.msk [vmem:[#allocation6 + $0x180] sm:$0xff] %vm1971_vm3, %v9945_v60  ;;  %2085 = vst.msk [vmem:[#allocation6 + $0x188] sm:$0xff] %vm1971_vm3, %v9945_v60 }
 0x49c   : > { %2086 = vst.msk [vmem:[#allocation6 + $0x190] sm:$0xff] %vm1971_vm3, %v9945_v60  ;;  %2087 = vst.msk [vmem:[#allocation6 + $0x198] sm:$0xff] %vm1971_vm3, %v9945_v60 }
 0x49d   : > { %2088 = vst.msk [vmem:[#allocation6 + $0x1a0] sm:$0xff] %vm1971_vm3, %v9945_v60  ;;  %2089 = vst.msk [vmem:[#allocation6 + $0x1a8] sm:$0xff] %vm1971_vm3, %v9945_v60 }
 0x49e   : > { %2090 = vst.msk [vmem:[#allocation6 + $0x1b0] sm:$0xff] %vm1971_vm3, %v9945_v60  ;;  %2091 = vst.msk [vmem:[#allocation6 + $0x1b8] sm:$0xff] %vm1971_vm3, %v9945_v60 }
 0x49f   : > { %2092 = vst.msk [vmem:[#allocation6 + $0x1c0] sm:$0xff] %vm1971_vm3, %v9945_v60  ;;  %2093 = vst.msk [vmem:[#allocation6 + $0x1c8] sm:$0xff] %vm1971_vm3, %v9945_v60 }
 0x4a0   : > { %2094 = vst.msk [vmem:[#allocation6 + $0x1d0] sm:$0xff] %vm1971_vm3, %v9945_v60  ;;  %2095 = vst.msk [vmem:[#allocation6 + $0x1d8] sm:$0xff] %vm1971_vm3, %v9945_v60 }
 0x4a1   : > { %2096 = vst.msk [vmem:[#allocation6 + $0x1e0] sm:$0xff] %vm1971_vm3, %v9945_v60  ;;  %2097 = vst.msk [vmem:[#allocation6 + $0x1e8] sm:$0xff] %vm1971_vm3, %v9945_v60 }
 0x4a2   : > { %2098 = vst.msk [vmem:[#allocation6 + $0x1f0] sm:$0xff] %vm1971_vm3, %v9945_v60  ;;  %2099 = vst.msk [vmem:[#allocation6 + $0x1f8] sm:$0xff] %vm1971_vm3, %v9945_v60 }
 0x4a3   : > { %2101 = vst.msk [vmem:[#allocation7] sm:$0xff] %vm2100_vm4, %v9945_v60  ;;  %2102 = vst.msk [vmem:[#allocation7 + $0x8] sm:$0xff] %vm2100_vm4, %v9945_v60 }
 0x4a4   : > { %2103 = vst.msk [vmem:[#allocation7 + $0x10] sm:$0xff] %vm2100_vm4, %v9945_v60  ;;  %2104 = vst.msk [vmem:[#allocation7 + $0x18] sm:$0xff] %vm2100_vm4, %v9945_v60 }
 0x4a5   : > { %2105 = vst.msk [vmem:[#allocation7 + $0x20] sm:$0xff] %vm2100_vm4, %v9945_v60  ;;  %2106 = vst.msk [vmem:[#allocation7 + $0x28] sm:$0xff] %vm2100_vm4, %v9945_v60 }
 0x4a6   : > { %2107 = vst.msk [vmem:[#allocation7 + $0x30] sm:$0xff] %vm2100_vm4, %v9945_v60  ;;  %2108 = vst.msk [vmem:[#allocation7 + $0x38] sm:$0xff] %vm2100_vm4, %v9945_v60 }
 0x4a7   : > { %2109 = vst.msk [vmem:[#allocation7 + $0x40] sm:$0xff] %vm2100_vm4, %v9945_v60  ;;  %2110 = vst.msk [vmem:[#allocation7 + $0x48] sm:$0xff] %vm2100_vm4, %v9945_v60 }
 0x4a8   : > { %2111 = vst.msk [vmem:[#allocation7 + $0x50] sm:$0xff] %vm2100_vm4, %v9945_v60  ;;  %2112 = vst.msk [vmem:[#allocation7 + $0x58] sm:$0xff] %vm2100_vm4, %v9945_v60 }
 0x4a9   : > { %2113 = vst.msk [vmem:[#allocation7 + $0x60] sm:$0xff] %vm2100_vm4, %v9945_v60  ;;  %2114 = vst.msk [vmem:[#allocation7 + $0x68] sm:$0xff] %vm2100_vm4, %v9945_v60 }
 0x4aa   : > { %2115 = vst.msk [vmem:[#allocation7 + $0x70] sm:$0xff] %vm2100_vm4, %v9945_v60  ;;  %2116 = vst.msk [vmem:[#allocation7 + $0x78] sm:$0xff] %vm2100_vm4, %v9945_v60 }
 0x4ab   : > { %2117 = vst.msk [vmem:[#allocation7 + $0x80] sm:$0xff] %vm2100_vm4, %v9945_v60  ;;  %2118 = vst.msk [vmem:[#allocation7 + $0x88] sm:$0xff] %vm2100_vm4, %v9945_v60 }
 0x4ac   : > { %2119 = vst.msk [vmem:[#allocation7 + $0x90] sm:$0xff] %vm2100_vm4, %v9945_v60  ;;  %2120 = vst.msk [vmem:[#allocation7 + $0x98] sm:$0xff] %vm2100_vm4, %v9945_v60 }
 0x4ad   : > { %2121 = vst.msk [vmem:[#allocation7 + $0xa0] sm:$0xff] %vm2100_vm4, %v9945_v60  ;;  %2122 = vst.msk [vmem:[#allocation7 + $0xa8] sm:$0xff] %vm2100_vm4, %v9945_v60 }
 0x4ae   : > { %2123 = vst.msk [vmem:[#allocation7 + $0xb0] sm:$0xff] %vm2100_vm4, %v9945_v60  ;;  %2124 = vst.msk [vmem:[#allocation7 + $0xb8] sm:$0xff] %vm2100_vm4, %v9945_v60 }
 0x4af   : > { %2125 = vst.msk [vmem:[#allocation7 + $0xc0] sm:$0xff] %vm2100_vm4, %v9945_v60  ;;  %2126 = vst.msk [vmem:[#allocation7 + $0xc8] sm:$0xff] %vm2100_vm4, %v9945_v60 }
 0x4b0   : > { %2127 = vst.msk [vmem:[#allocation7 + $0xd0] sm:$0xff] %vm2100_vm4, %v9945_v60  ;;  %2128 = vst.msk [vmem:[#allocation7 + $0xd8] sm:$0xff] %vm2100_vm4, %v9945_v60 }
 0x4b1   : > { %2129 = vst.msk [vmem:[#allocation7 + $0xe0] sm:$0xff] %vm2100_vm4, %v9945_v60  ;;  %2130 = vst.msk [vmem:[#allocation7 + $0xe8] sm:$0xff] %vm2100_vm4, %v9945_v60 }
 0x4b2   : > { %2131 = vst.msk [vmem:[#allocation7 + $0xf0] sm:$0xff] %vm2100_vm4, %v9945_v60  ;;  %2132 = vst.msk [vmem:[#allocation7 + $0xf8] sm:$0xff] %vm2100_vm4, %v9945_v60 }
 0x4b3   : > { %2133 = vst.msk [vmem:[#allocation7 + $0x100] sm:$0xff] %vm2100_vm4, %v9945_v60  ;;  %2134 = vst.msk [vmem:[#allocation7 + $0x108] sm:$0xff] %vm2100_vm4, %v9945_v60 }
 0x4b4   : > { %2135 = vst.msk [vmem:[#allocation7 + $0x110] sm:$0xff] %vm2100_vm4, %v9945_v60  ;;  %2136 = vst.msk [vmem:[#allocation7 + $0x118] sm:$0xff] %vm2100_vm4, %v9945_v60 }
 0x4b5   : > { %2137 = vst.msk [vmem:[#allocation7 + $0x120] sm:$0xff] %vm2100_vm4, %v9945_v60  ;;  %2138 = vst.msk [vmem:[#allocation7 + $0x128] sm:$0xff] %vm2100_vm4, %v9945_v60 }
 0x4b6   : > { %2139 = vst.msk [vmem:[#allocation7 + $0x130] sm:$0xff] %vm2100_vm4, %v9945_v60  ;;  %2140 = vst.msk [vmem:[#allocation7 + $0x138] sm:$0xff] %vm2100_vm4, %v9945_v60 }
 0x4b7   : > { %2141 = vst.msk [vmem:[#allocation7 + $0x140] sm:$0xff] %vm2100_vm4, %v9945_v60  ;;  %2142 = vst.msk [vmem:[#allocation7 + $0x148] sm:$0xff] %vm2100_vm4, %v9945_v60 }
 0x4b8   : > { %2143 = vst.msk [vmem:[#allocation7 + $0x150] sm:$0xff] %vm2100_vm4, %v9945_v60  ;;  %2144 = vst.msk [vmem:[#allocation7 + $0x158] sm:$0xff] %vm2100_vm4, %v9945_v60 }
 0x4b9   : > { %2145 = vst.msk [vmem:[#allocation7 + $0x160] sm:$0xff] %vm2100_vm4, %v9945_v60  ;;  %2146 = vst.msk [vmem:[#allocation7 + $0x168] sm:$0xff] %vm2100_vm4, %v9945_v60 }
 0x4ba   : > { %2147 = vst.msk [vmem:[#allocation7 + $0x170] sm:$0xff] %vm2100_vm4, %v9945_v60  ;;  %2148 = vst.msk [vmem:[#allocation7 + $0x178] sm:$0xff] %vm2100_vm4, %v9945_v60 }
 0x4bb   : > { %2149 = vst.msk [vmem:[#allocation7 + $0x180] sm:$0xff] %vm2100_vm4, %v9945_v60  ;;  %2150 = vst.msk [vmem:[#allocation7 + $0x188] sm:$0xff] %vm2100_vm4, %v9945_v60 }
 0x4bc   : > { %2151 = vst.msk [vmem:[#allocation7 + $0x190] sm:$0xff] %vm2100_vm4, %v9945_v60  ;;  %2152 = vst.msk [vmem:[#allocation7 + $0x198] sm:$0xff] %vm2100_vm4, %v9945_v60 }
 0x4bd   : > { %2153 = vst.msk [vmem:[#allocation7 + $0x1a0] sm:$0xff] %vm2100_vm4, %v9945_v60  ;;  %2154 = vst.msk [vmem:[#allocation7 + $0x1a8] sm:$0xff] %vm2100_vm4, %v9945_v60 }
 0x4be   : > { %2155 = vst.msk [vmem:[#allocation7 + $0x1b0] sm:$0xff] %vm2100_vm4, %v9945_v60  ;;  %2156 = vst.msk [vmem:[#allocation7 + $0x1b8] sm:$0xff] %vm2100_vm4, %v9945_v60 }
 0x4bf   : > { %2157 = vst.msk [vmem:[#allocation7 + $0x1c0] sm:$0xff] %vm2100_vm4, %v9945_v60  ;;  %2158 = vst.msk [vmem:[#allocation7 + $0x1c8] sm:$0xff] %vm2100_vm4, %v9945_v60 }
 0x4c0   : > { %2159 = vst.msk [vmem:[#allocation7 + $0x1d0] sm:$0xff] %vm2100_vm4, %v9945_v60  ;;  %2160 = vst.msk [vmem:[#allocation7 + $0x1d8] sm:$0xff] %vm2100_vm4, %v9945_v60 }
 0x4c1   : > { %2161 = vst.msk [vmem:[#allocation7 + $0x1e0] sm:$0xff] %vm2100_vm4, %v9945_v60  ;;  %2162 = vst.msk [vmem:[#allocation7 + $0x1e8] sm:$0xff] %vm2100_vm4, %v9945_v60 }
 0x4c2   : > { %2163 = vst.msk [vmem:[#allocation7 + $0x1f0] sm:$0xff] %vm2100_vm4, %v9945_v60  ;;  %2164 = vst.msk [vmem:[#allocation7 + $0x1f8] sm:$0xff] %vm2100_vm4, %v9945_v60 }
 0x4eb   : > { %v2283_v61 = vpop.xlane.xlu0 %2282 }
 0x4ec   : > { %v2329_v25 = vmul.f32 0.03125, %v2283_v61 }
 0x4ee   : > { %v2345_v13 = vadd.f32 1e-05, %v2329_v25 }
 0x4ef   : > { %v2286_v2 = vpop.xlane.xlu1 %2285  ;;  %v2307_v23 = vpop.xlane.xlu0 %2306 }
 0x4f0   : > { %9352 = vrsqrt.f32 %v2345_v13  ;;  %v2330_v41 = vmul.f32 0.03125, %v2286_v2  ;;  %v2337_v0 = vmul.f32 0.03125, %v2307_v23 }
 0x4f2   : > { %v2346_v16 = vadd.f32 1e-05, %v2330_v41  ;;  %v2353_v14 = vadd.f32 1e-05, %v2337_v0 }
 0x4f3   : > { %v2310_v10 = vpop.xlane.xlu1 %2309  ;;  %v2289_v30 = vpop.xlane.xlu0 %2288 }
 0x4f4   : > { %9354 = vrsqrt.f32 %v2346_v16  ;;  %v2338_v48 = vmul.f32 0.03125, %v2310_v10  ;;  %v2331_v22 = vmul.f32 0.03125, %v2289_v30 }
 0x4f5   : > { %9356 = vrsqrt.f32 %v2353_v14 }
 0x4f6   : > { %v2354_v49 = vadd.f32 1e-05, %v2338_v48  ;;  %v2347_v34 = vadd.f32 1e-05, %v2331_v22 }
 0x4f7   : > { %v2292_v29 = vpop.xlane.xlu1 %2291  ;;  %v2313_v42 = vpop.xlane.xlu0 %2312 }
 0x4f8   : > { %9358 = vrsqrt.f32 %v2354_v49  ;;  %v2332_v35 = vmul.f32 0.03125, %v2292_v29  ;;  %v2339_v17 = vmul.f32 0.03125, %v2313_v42 }
 0x4f9   : > { %9360 = vrsqrt.f32 %v2347_v34 }
 0x4fa   : > { %v9353_v39 = vpop.eup %9352  ;;  %v2348_v26 = vadd.f32 1e-05, %v2332_v35  ;;  %v2355_v55 = vadd.f32 1e-05, %v2339_v17 }
 0x4fb   : > { %v2316_v43 = vpop.xlane.xlu1 %2315  ;;  %v2295_v51 = vpop.xlane.xlu0 %2294  ;;  %v2377_v54 = vmul.f32 %v9353_v39, %v11119_v57 }
 0x4fc   : > { %9362 = vrsqrt.f32 %v2348_v26  ;;  %v2340_v52 = vmul.f32 0.03125, %v2316_v43  ;;  %v2333_v11 = vmul.f32 0.03125, %v2295_v51 }
 0x4fd   : > { %9364 = vrsqrt.f32 %v2355_v55  ;;  %v2399_v40 = vmul.f32 %v11475_v33, %v2377_v54 }
 0x4fe   : > { %v9355_v58 = vpop.eup %9354  ;;  %v2356_v20 = vadd.f32 1e-05, %v2340_v52  ;;  %v2349_v62 = vadd.f32 1e-05, %v2333_v11 }
 0x4ff   : > { %v9357_v28 = vpop.eup %9356  ;;  %v2298_v32 = vpop.xlane.xlu1 %2297  ;;  %v2378_v47 = vmul.f32 %v9355_v58, %v11127_v3  ;;  %v2421_v18 = vadd.f32 %v11482_v36, %v2399_v40 }
 0x500   : > { %v2319_v21 = vpop.xlane.xlu0 %2318  ;;  %9366 = vrsqrt.f32 %v2356_v20  ;;  %v2334_v57 = vmul.f32 0.03125, %v2298_v32  ;;  %v2385_v7 = vmul.f32 %v9357_v28, %v11121_v9 }
 0x501   : > { %v2341_v4 = vmul.f32 0.03125, %v2319_v21  ;;  %9368 = vrsqrt.f32 %v2349_v62  ;;  %v2400_v56 = vmul.f32 %v11475_v33, %v2378_v47 }
 0x502   : > { %v9359_v37 = vpop.eup %9358  ;;  %v2350_v15 = vadd.f32 1e-05, %v2334_v57  ;;  %v2407_v25 = vmul.f32 %v11475_v33, %v2385_v7 }
 0x503   : > { %v2357_v27 = vadd.f32 1e-05, %v2341_v4  ;;  %v9361_v8 = vpop.eup %9360  ;;  %v2322_v3 = vpop.xlane.xlu1 %2321  ;;  %v2422_v45 = vadd.f32 %v11482_v36, %v2400_v56  ;;  %v2386_v61 = vmul.f32 %v9359_v37, %v11129_v59 }
 0x504   : > { %v2301_v12 = vpop.xlane.xlu0 %2300  ;;  %v2379_v13 = vmul.f32 %v9361_v8, %v11137_v63  ;;  %9370 = vrsqrt.f32 %v2350_v15  ;;  %v2342_v9 = vmul.f32 0.03125, %v2322_v3  ;;  %v2429_v22 = vadd.f32 %v11482_v36, %v2407_v25 }
 0x505   : > { %v2335_v2 = vmul.f32 0.03125, %v2301_v12  ;;  %9372 = vrsqrt.f32 %v2357_v27  ;;  %v2437_v23 = vpack.c.bf16 %v2422_v45, %v2421_v18  ;;  %v2408_v41 = vmul.f32 %v11475_v33, %v2386_v61 }
 0x506   : > { %v9363_v0 = vpop.eup %9362  ;;  %v2358_v16 = vadd.f32 1e-05, %v2342_v9  ;;  %v2401_v49 = vmul.f32 %v11475_v33, %v2379_v13 }
 0x507   : > { %v2351_v14 = vadd.f32 1e-05, %v2335_v2  ;;  %v9365_v10 = vpop.eup %9364  ;;  %v2380_v30 = vmul.f32 %v9363_v0, %v11139_v44  ;;  %v2304_v48 = vpop.xlane.xlu1 %2303  ;;  %8734 = vmatprep.mubr.msk.bf16.mxu0 %vm2183_vm2, %v2437_v23  ;;  %v2430_v63 = vadd.f32 %v11482_v36, %v2408_v41 }
 0x508   : > { %v2325_v59 = vpop.xlane.xlu0 %2324  ;;  %v2387_v34 = vmul.f32 %v9365_v10, %v11148_v1  ;;  %9374 = vrsqrt.f32 %v2358_v16  ;;  %v2336_v29 = vmul.f32 0.03125, %v2304_v48  ;;  %v2423_v54 = vadd.f32 %v11482_v36, %v2401_v49 }
 0x509   : > { %v2343_v42 = vmul.f32 0.03125, %v2325_v59  ;;  %9376 = vrsqrt.f32 %v2351_v14  ;;  %v2441_v35 = vpack.c.bf16 %v2430_v63, %v2429_v22  ;;  %v2402_v17 = vmul.f32 %v11475_v33, %v2380_v30 }
 0x50a   : > { %v9367_v44 = vpop.eup %9366  ;;  %v2352_v39 = vadd.f32 1e-05, %v2336_v29  ;;  %v2409_v52 = vmul.f32 %v11475_v33, %v2387_v34 }
 0x50b   : > { %v2359_v26 = vadd.f32 1e-05, %v2343_v42  ;;  %v9369_v55 = vpop.eup %9368  ;;  %v2388_v43 = vmul.f32 %v9367_v44, %v11151_v19  ;;  %v2328_v51 = vpop.xlane.xlu1 %2327  ;;  %8742 = vmatprep.mubr.msk.bf16.mxu1 %vm2183_vm2, %v2441_v35  ;;  %v2424_v1 = vadd.f32 %v11482_v36, %v2402_v17 }
 0x50c   : > { %v2381_v11 = vmul.f32 %v9369_v55, %v11160_v5  ;;  %9378 = vrsqrt.f32 %v2352_v39  ;;  %v2344_v58 = vmul.f32 0.03125, %v2328_v51  ;;  %v2431_v47 = vadd.f32 %v11482_v36, %v2409_v52 }
 0x50d   : > { %9380 = vrsqrt.f32 %v2359_v26  ;;  %v2438_v20 = vpack.c.bf16 %v2424_v1, %v2423_v54  ;;  %v2410_v62 = vmul.f32 %v11475_v33, %v2388_v43 }
 0x50e   : > { %v9371_v28 = vpop.eup %9370  ;;  %v2360_v32 = vadd.f32 1e-05, %v2344_v58  ;;  %v2403_v57 = vmul.f32 %v11475_v33, %v2381_v11 }
 0x50f   : > { %v9373_v19 = vpop.eup %9372  ;;  %v2382_v21 = vmul.f32 %v9371_v28, %v11163_v38  ;;  %8735 = vmatmul.mubr.msk.bf16.vlgmr.msra.gmra.mrb[0].mxu0 %vm2183_vm2, %v2438_v20  ;;  %v2432_v40 = vadd.f32 %v11482_v36, %v2410_v62 }
 0x510   : > { %v2389_v5 = vmul.f32 %v9373_v19, %v11172_v46  ;;  %9382 = vrsqrt.f32 %v2360_v32  ;;  %v2425_v38 = vadd.f32 %v11482_v36, %v2403_v57 }
 0x511   : > { %v2442_v4 = vpack.c.bf16 %v2432_v40, %v2431_v47  ;;  %v2404_v7 = vmul.f32 %v11475_v33, %v2382_v21 }
 0x512   : > { %v9375_v56 = vpop.eup %9374  ;;  %v2411_v8 = vmul.f32 %v11475_v33, %v2389_v5 }
 0x513   : > { %v9377_v37 = vpop.eup %9376  ;;  %v2390_v15 = vmul.f32 %v9375_v56, %v11175_v31  ;;  %8743 = vmatmul.mubr.msk.bf16.vlgmr.msra.gmra.mrb[0].mxu1 %vm2183_vm2, %v2442_v4  ;;  %v2426_v27 = vadd.f32 %v11482_v36, %v2404_v7 }
 0x514   : > { %v2383_v3 = vmul.f32 %v9377_v37, %v11184_v24  ;;  %v2433_v31 = vadd.f32 %v11482_v36, %v2411_v8 }
 0x515   : > { %v2439_v12 = vpack.c.bf16 %v2426_v27, %v2425_v38  ;;  %v2412_v46 = vmul.f32 %v11475_v33, %v2390_v15 }
 0x516   : > { %v9379_v18 = vpop.eup %9378  ;;  %v2405_v13 = vmul.f32 %v11475_v33, %v2383_v3 }
 0x517   : > { %v9381_v45 = vpop.eup %9380  ;;  %v2384_v61 = vmul.f32 %v9379_v18, %v11187_v53  ;;  %8738 = vmatprep.mubr.msk.bf16.mxu0 %vm2183_vm2, %v2439_v12  ;;  %v2434_v25 = vadd.f32 %v11482_v36, %v2412_v46 }
 0x518   : > { %v2391_v9 = vmul.f32 %v9381_v45, %v11196_v6  ;;  %v2427_v53 = vadd.f32 %v11482_v36, %v2405_v13 }
 0x519   : > { %v2443_v2 = vpack.c.bf16 %v2434_v25, %v2433_v31  ;;  %v2406_v24 = vmul.f32 %v11475_v33, %v2384_v61 }
 0x51a   : > { %v9383_v23 = vpop.eup %9382  ;;  %v2413_v16 = vmul.f32 %v11475_v33, %v2391_v9 }
 0x51b   : > { %v2392_v41 = vmul.f32 %v9383_v23, %v11199_v50  ;;  %8746 = vmatprep.mubr.msk.bf16.mxu1 %vm2183_vm2, %v2443_v2  ;;  %v2428_v0 = vadd.f32 %v11482_v36, %v2406_v24 }
 0x51c   : > { %v2435_v6 = vadd.f32 %v11482_v36, %v2413_v16 }
 0x51d   : > { %v2440_v14 = vpack.c.bf16 %v2428_v0, %v2427_v53  ;;  %v2414_v10 = vmul.f32 %v11475_v33, %v2392_v41 }
 0x51f   : > { %8739 = vmatmul.mubr.msk.bf16.gmra.mrb[4].mxu0 %vm2183_vm2, %v2440_v14  ;;  %v2436_v30 = vadd.f32 %v11482_v36, %v2414_v10 }
 0x521   : > { %v2444_v48 = vpack.c.bf16 %v2436_v30, %v2435_v6 }
 0x523   : > { %8747 = vmatmul.mubr.msk.bf16.gmra.mrb[4].mxu1 %vm2183_vm2, %v2444_v48 }
 0x5e2   : > { %v8736_v50 = vpop.f32.mrb[0].mxu0 }
 0x5e3   : > { %v2519_v33 = vpop.f32.mrb[1].mxu0 }
 0x5e4   : > { %v8737_v36 = vpop.f32.mrb[2].mxu0 }
 0x5e5   : > { %v2583_v59 = vpack.c.bf16 %v8737_v36, %v8736_v50  ;;  %v2522_v22 = vpop.f32.mrb[3].mxu0 }
 0x5e6   : > { %v2582_v63 = vpack.c.bf16 %v2522_v22, %v2519_v33  ;;  %v8744_v49 = vpop.f32.mrb[0].mxu1 }
 0x5e7   : > { %2591 = vst.msk [vmem:[#allocation2 + $0x8] sm:$0xff] %vm2100_vm4, %v2583_v59  ;;  %2608 = vrot.lane.b32.xlu1 %v2583_v59, %s9946_s13  ;;  %v2551_v34 = vpop.f32.mrb[1].mxu1 }
 0x5e8   : > { %2590 = vst.msk [vmem:[#allocation2] sm:$0xff] %vm2100_vm4, %v2582_v63  ;;  %2606 = vrot.lane.b32.xlu0 %v2582_v63, %s9946_s13  ;;  %v8745_v29 = vpop.f32.mrb[2].mxu1 }
 0x5e9   : > { %v2587_v42 = vpack.c.bf16 %v8745_v29, %v8744_v49  ;;  %v2554_v60 = vpop.f32.mrb[3].mxu1 }
 0x5ea   : > { %v2586_v35 = vpack.c.bf16 %v2554_v60, %v2551_v34 }
 0x5eb   : > { %2595 = vst.msk [vmem:[#allocation2 + $0x28] sm:$0xff] %vm2100_vm4, %v2587_v42  ;;  %2616 = vrot.lane.b32.xlu1 %v2587_v42, %s9946_s13 }
 0x5ec   : > { %2594 = vst.msk [vmem:[#allocation2 + $0x20] sm:$0xff] %vm2100_vm4, %v2586_v35  ;;  %2614 = vrot.lane.b32.xlu0 %v2586_v35, %s9946_s13 }
 0x5ef   : > { %2641 = vrot.lane.b32.xlu1 %v2583_v59, %s9947_s14 }
 0x5f0   : > { %2639 = vrot.lane.b32.xlu0 %v2582_v63, %s9947_s14 }
 0x5f2   : > { %v8740_v17 = vpop.f32.mrb[4].mxu0 }
 0x5f3   : > { %2649 = vrot.lane.b32.xlu1 %v2587_v42, %s9947_s14  ;;  %v2535_v44 = vpop.f32.mrb[5].mxu0 }
 0x5f4   : > { %2647 = vrot.lane.b32.xlu0 %v2586_v35, %s9947_s14  ;;  %v8741_v39 = vpop.f32.mrb[6].mxu0 }
 0x5f5   : > { %v2585_v26 = vpack.c.bf16 %v8741_v39, %v8740_v17  ;;  %v2538_v55 = vpop.f32.mrb[7].mxu0 }
 0x5f6   : > { %v2584_v43 = vpack.c.bf16 %v2538_v55, %v2535_v44  ;;  %v8748_v51 = vpop.f32.mrb[4].mxu1 }
 0x5f7   : > { %2593 = vst.msk [vmem:[#allocation2 + $0x18] sm:$0xff] %vm2100_vm4, %v2585_v26  ;;  %2674 = vrot.lane.b32.xlu1 %v2583_v59, %s9948_s16  ;;  %v2567_v54 = vpop.f32.mrb[5].mxu1 }
 0x5f8   : > { %2592 = vst.msk [vmem:[#allocation2 + $0x10] sm:$0xff] %vm2100_vm4, %v2584_v43  ;;  %2672 = vrot.lane.b32.xlu0 %v2582_v63, %s9948_s16  ;;  %v8749_v1 = vpop.f32.mrb[6].mxu1 }
 0x5f9   : > { %v2589_v52 = vpack.c.bf16 %v8749_v1, %v8748_v51  ;;  %v2570_v11 = vpop.f32.mrb[7].mxu1 }
 0x5fa   : > { %v2588_v58 = vpack.c.bf16 %v2570_v11, %v2567_v54 }
 0x5fb   : > { %2597 = vst.msk [vmem:[#allocation2 + $0x38] sm:$0xff] %vm2100_vm4, %v2589_v52  ;;  %2682 = vrot.lane.b32.xlu1 %v2587_v42, %s9948_s16 }
 0x5fc   : > { %2596 = vst.msk [vmem:[#allocation2 + $0x30] sm:$0xff] %vm2100_vm4, %v2588_v58  ;;  %2680 = vrot.lane.b32.xlu0 %v2586_v35, %s9948_s16 }
 0x5ff   : > { %2612 = vrot.lane.b32.xlu1 %v2585_v26, %s9946_s13 }
 0x600   : > { %2618 = vrot.lane.b32.xlu0 %v2588_v58, %s9946_s13 }
 0x603   : > { %2620 = vrot.lane.b32.xlu1 %v2589_v52, %s9946_s13 }
 0x604   : > { %2643 = vrot.lane.b32.xlu0 %v2584_v43, %s9947_s14 }
 0x607   : > { %2645 = vrot.lane.b32.xlu1 %v2585_v26, %s9947_s14 }
 0x608   : > { %2651 = vrot.lane.b32.xlu0 %v2588_v58, %s9947_s14 }
 0x60b   : > { %2653 = vrot.lane.b32.xlu1 %v2589_v52, %s9947_s14 }
 0x60c   : > { %2676 = vrot.lane.b32.xlu0 %v2584_v43, %s9948_s16 }
 0x60f   : > { %2678 = vrot.lane.b32.xlu1 %v2585_v26, %s9948_s16 }
 0x610   : > { %2684 = vrot.lane.b32.xlu0 %v2588_v58, %s9948_s16 }
 0x613   : > { %2610 = vrot.lane.b32.xlu1 %v2584_v43, %s9946_s13 }
 0x617   : > { %2686 = vrot.lane.b32.xlu1 %v2589_v52, %s9948_s16 }
 0x659   : > { %v2609_v20 = vpop.permute.xlu1 %2608 }
 0x65a   : > { %2632 = vst.msk [vmem:[#allocation2 + $0x48] sm:$0xff] %vm2100_vm4, %v2609_v20  ;;  %v2607_v62 = vpop.permute.xlu0 %2606 }
 0x65b   : > { %2631 = vst.msk [vmem:[#allocation2 + $0x40] sm:$0xff] %vm2100_vm4, %v2607_v62 }
 0x65d   : > { %v2617_v28 = vpop.permute.xlu1 %2616 }
 0x65e   : > { %2636 = vst.msk [vmem:[#allocation2 + $0x68] sm:$0xff] %vm2100_vm4, %v2617_v28  ;;  %v2615_v32 = vpop.permute.xlu0 %2614 }
 0x65f   : > { %2635 = vst.msk [vmem:[#allocation2 + $0x60] sm:$0xff] %vm2100_vm4, %v2615_v32 }
 0x661   : > { %v2642_v19 = vpop.permute.xlu1 %2641 }
 0x662   : > { %2665 = vst.msk [vmem:[#allocation2 + $0x88] sm:$0xff] %vm2100_vm4, %v2642_v19  ;;  %v2640_v21 = vpop.permute.xlu0 %2639 }
 0x663   : > { %2664 = vst.msk [vmem:[#allocation2 + $0x80] sm:$0xff] %vm2100_vm4, %v2640_v21 }
 0x665   : > { %v2650_v47 = vpop.permute.xlu1 %2649 }
 0x666   : > { %2669 = vst.msk [vmem:[#allocation2 + $0xa8] sm:$0xff] %vm2100_vm4, %v2650_v47  ;;  %v2648_v40 = vpop.permute.xlu0 %2647 }
 0x667   : > { %2668 = vst.msk [vmem:[#allocation2 + $0xa0] sm:$0xff] %vm2100_vm4, %v2648_v40 }
 0x669   : > { %v2675_v57 = vpop.permute.xlu1 %2674 }
 0x66a   : > { %2698 = vst.msk [vmem:[#allocation2 + $0xc8] sm:$0xff] %vm2100_vm4, %v2675_v57  ;;  %v2673_v5 = vpop.permute.xlu0 %2672 }
 0x66b   : > { %2697 = vst.msk [vmem:[#allocation2 + $0xc0] sm:$0xff] %vm2100_vm4, %v2673_v5 }
 0x66d   : > { %v2683_v4 = vpop.permute.xlu1 %2682 }
 0x66e   : > { %2702 = vst.msk [vmem:[#allocation2 + $0xe8] sm:$0xff] %vm2100_vm4, %v2683_v4  ;;  %v2681_v7 = vpop.permute.xlu0 %2680 }
 0x66f   : > { %2701 = vst.msk [vmem:[#allocation2 + $0xe0] sm:$0xff] %vm2100_vm4, %v2681_v7 }
 0x671   : > { %v2613_v56 = vpop.permute.xlu1 %2612 }
 0x672   : > { %2634 = vst.msk [vmem:[#allocation2 + $0x58] sm:$0xff] %vm2100_vm4, %v2613_v56  ;;  %v2619_v37 = vpop.permute.xlu0 %2618 }
 0x673   : > { %2637 = vst.msk [vmem:[#allocation2 + $0x70] sm:$0xff] %vm2100_vm4, %v2619_v37 }
 0x675   : > { %v2621_v15 = vpop.permute.xlu1 %2620 }
 0x676   : > { %2638 = vst.msk [vmem:[#allocation2 + $0x78] sm:$0xff] %vm2100_vm4, %v2621_v15  ;;  %v2644_v38 = vpop.permute.xlu0 %2643 }
 0x677   : > { %2666 = vst.msk [vmem:[#allocation2 + $0x90] sm:$0xff] %vm2100_vm4, %v2644_v38 }
 0x679   : > { %v2646_v27 = vpop.permute.xlu1 %2645 }
 0x67a   : > { %2667 = vst.msk [vmem:[#allocation2 + $0x98] sm:$0xff] %vm2100_vm4, %v2646_v27  ;;  %v2652_v8 = vpop.permute.xlu0 %2651 }
 0x67b   : > { %2670 = vst.msk [vmem:[#allocation2 + $0xb0] sm:$0xff] %vm2100_vm4, %v2652_v8 }
 0x67d   : > { %v2654_v3 = vpop.permute.xlu1 %2653 }
 0x67e   : > { %2671 = vst.msk [vmem:[#allocation2 + $0xb8] sm:$0xff] %vm2100_vm4, %v2654_v3  ;;  %v2677_v12 = vpop.permute.xlu0 %2676 }
 0x67f   : > { %2699 = vst.msk [vmem:[#allocation2 + $0xd0] sm:$0xff] %vm2100_vm4, %v2677_v12 }
 0x681   : > { %v2679_v46 = vpop.permute.xlu1 %2678 }
 0x682   : > { %2700 = vst.msk [vmem:[#allocation2 + $0xd8] sm:$0xff] %vm2100_vm4, %v2679_v46  ;;  %v2685_v18 = vpop.permute.xlu0 %2684 }
 0x683   : > { %2703 = vst.msk [vmem:[#allocation2 + $0xf0] sm:$0xff] %vm2100_vm4, %v2685_v18 }
 0x685   : > { %v2611_v45 = vpop.permute.xlu1 %2610 }
 0x686   : > { %2633 = vst.msk [vmem:[#allocation2 + $0x50] sm:$0xff] %vm2100_vm4, %v2611_v45 }
 0x689   : > { %v2687_v61 = vpop.permute.xlu1 %2686 }
 0x68a   : > { %2704 = vst.msk [vmem:[#allocation2 + $0xf8] sm:$0xff] %vm2100_vm4, %v2687_v61 }
 0x68b PF: > { %s8222_s12 = sshll.u32 %s9904_s27, 7  ;;  %vm2936_vm5 = vcmask 64512   ;;  %v2776_v31 = vld [vmem:[#allocation2] sm:$0xff]  ;;  %v2777_v1 = vld [vmem:[#allocation2 + $0x8] sm:$0xff]  ;;  %v2778_v28 = vld [vmem:[#allocation2 + $0x10] sm:$0xff]  ;;  %vm4925_vm6 = vcmask 7168  }
 0x68c   : > { %v2784_v25 = vld [vmem:[#allocation2 + $0x40] sm:$0xff]  ;;  %s11714_s7 = sshra.s32 %s8222_s12, 4  ;;  %8766 = vmatprep.mubr.msk.bf16.mxu0 %vm2936_vm5, %v2776_v31  ;;  %v2785_v52 = vld [vmem:[#allocation2 + $0x48] sm:$0xff]  ;;  %v2779_v19 = vld [vmem:[#allocation2 + $0x18] sm:$0xff]  ;;  %p8257_p6 = scmp.ne.s32.totalorder %s9904_s27, 1 }
 0x68d   : > { %8798 = vmatprep.mubr.msk.bf16.mxu1 %vm2936_vm5, %v2784_v25  ;;  %s8223_s15 = sshll.u32 %s11714_s7, 3  ;;  %v2786_v32 = vld [vmem:[#allocation2 + $0x50] sm:$0xff]  ;;  %v2787_v21 = vld [vmem:[#allocation2 + $0x58] sm:$0xff]  ;;  %v2780_v4 = vld [vmem:[#allocation2 + $0x20] sm:$0xff]  ;;  %vm6706_vm7 = vcmask (!%p8257_p6), 1043456   ;;  %s14853_s29 = sld [smem:[#allocation150_spill]] (!%p8257_p6) }
 0x68e   : > { %s11721_s30 = scalar_lea.vmem [#allocation3], %s8223_s15  ;;  %v2788_v7 = vld [vmem:[#allocation2 + $0x60] sm:$0xff]  ;;  %v2781_v56 = vld [vmem:[#allocation2 + $0x28] sm:$0xff]  ;;  %v2782_v3 = vld [vmem:[#allocation2 + $0x30] sm:$0xff]  ;;  %vm7179_vm8 = vcmask (!%p8257_p6), 261120   ;;  %s14855_s16 = sld [smem:[#allocation151_spill]] (!%p8257_p6) }
 0x68f   : > { %v2710_v13 = vld [vmem:[%s11721_s30] sm:$0xff]  ;;  %v2711_v2 = vld [vmem:[%s11721_s30 + $0x8] sm:$0xff]  ;;  %v2712_v16 = vld [vmem:[%s11721_s30 + $0x10] sm:$0xff]  ;;  %s14856_s7 = sld [smem:[#allocation152_spill]] (!%p8257_p6)  ;;  %s14857_s1 = sld [smem:[#allocation154_spill]] (!%p8257_p6) }
 0x690   : > { %v2718_v9 = vld [vmem:[%s11721_s30 + $0x80] sm:$0xff]  ;;  %9138 = vmatprep.subr.msk.bf16.mxu0 %vm2936_vm5, %v2710_v13  ;;  %v2962_v24 = vsel %vm2936_vm5, %v2710_v13, 0  ;;  %v2719_v41 = vld [vmem:[%s11721_s30 + $0x88] sm:$0xff]  ;;  %v2965_v53 = vsel %vm2936_vm5, %v2711_v2, 0  ;;  %v2720_v14 = vld [vmem:[%s11721_s30 + $0x90] sm:$0xff]  ;;  %v2968_v10 = vsel %vm2936_vm5, %v2712_v16, 0 }
 0x691   : > { %9146 = vmatprep.subr.msk.bf16.mxu1 %vm2936_vm5, %v2718_v9  ;;  %v3107_v23 = vsel %vm2936_vm5, %v2718_v9, 0  ;;  %8751 = vmatpush3.bf16.xpose.msra.mxu0 %v2962_v24  ;;  %v3110_v0 = vsel %vm2936_vm5, %v2719_v41, 0  ;;  %v3113_v6 = vsel %vm2936_vm5, %v2720_v14, 0  ;;  %v2713_v30 = vld [vmem:[%s11721_s30 + $0x18] sm:$0xff]  ;;  %v2714_v36 = vld [vmem:[%s11721_s30 + $0x20] sm:$0xff]  ;;  %v2715_v49 = vld [vmem:[%s11721_s30 + $0x28] sm:$0xff] }
 0x692   : > { %8783 = vmatpush3.bf16.xpose.msra.mxu1 %v3107_v23  ;;  %9139 = vmatprep.subr.msk.bf16.mxu0 %vm2936_vm5, %v2711_v2  ;;  %v2721_v48 = vld [vmem:[%s11721_s30 + $0x98] sm:$0xff]  ;;  %v2971_v50 = vsel %vm2936_vm5, %v2713_v30, 0  ;;  %v2722_v59 = vld [vmem:[%s11721_s30 + $0xa0] sm:$0xff]  ;;  %v2974_v22 = vsel %vm2936_vm5, %v2714_v36, 0  ;;  %v2723_v34 = vld [vmem:[%s11721_s30 + $0xa8] sm:$0xff]  ;;  %v2977_v29 = vsel %vm2936_vm5, %v2715_v49, 0 }
 0x693   : > { %9147 = vmatprep.subr.msk.bf16.mxu1 %vm2936_vm5, %v2719_v41  ;;  %v3116_v33 = vsel %vm2936_vm5, %v2721_v48, 0  ;;  %v3119_v63 = vsel %vm2936_vm5, %v2722_v59, 0  ;;  %v3122_v42 = vsel %vm2936_vm5, %v2723_v34, 0  ;;  %v2716_v60 = vld [vmem:[%s11721_s30 + $0x30] sm:$0xff]  ;;  %v2717_v39 = vld [vmem:[%s11721_s30 + $0x38] sm:$0xff]  ;;  %v2726_v51 = vld [vmem:[%s11721_s30 + $0x100] sm:$0xff]  ;;  %s14854_s22 = smov (!%p8257_p6), %s14853_s29 }
 0x694   : > { %v2724_v35 = vld [vmem:[%s11721_s30 + $0xb0] sm:$0xff]  ;;  %v2980_v17 = vsel %vm2936_vm5, %v2716_v60, 0  ;;  %v2725_v26 = vld [vmem:[%s11721_s30 + $0xb8] sm:$0xff]  ;;  %v2983_v55 = vsel %vm2936_vm5, %v2717_v39, 0  ;;  %v2734_v54 = vld [vmem:[%s11721_s30 + $0x180] sm:$0xff]  ;;  %v3252_v11 = vsel %vm2936_vm5, %v2726_v51, 0 }
 0x695   : > { %v3125_v44 = vsel %vm2936_vm5, %v2724_v35, 0  ;;  %v3128_v43 = vsel %vm2936_vm5, %v2725_v26, 0  ;;  %v3397_v58 = vsel %vm2936_vm5, %v2734_v54, 0  ;;  %v2727_v20 = vld [vmem:[%s11721_s30 + $0x108] sm:$0xff]  ;;  %v2728_v57 = vld [vmem:[%s11721_s30 + $0x110] sm:$0xff]  ;;  %v2729_v27 = vld [vmem:[%s11721_s30 + $0x118] sm:$0xff] }
 0x696   : > { %v2735_v62 = vld [vmem:[%s11721_s30 + $0x188] sm:$0xff]  ;;  %v3255_v47 = vsel %vm2936_vm5, %v2727_v20, 0  ;;  %v2736_v5 = vld [vmem:[%s11721_s30 + $0x190] sm:$0xff]  ;;  %v3258_v15 = vsel %vm2936_vm5, %v2728_v57, 0  ;;  %v2737_v8 = vld [vmem:[%s11721_s30 + $0x198] sm:$0xff]  ;;  %v3261_v45 = vsel %vm2936_vm5, %v2729_v27, 0 }
 0x697   : > { %v3400_v40 = vsel %vm2936_vm5, %v2735_v62, 0  ;;  %v2789_v37 = vld [vmem:[#allocation2 + $0x68] sm:$0xff]  ;;  %v3403_v38 = vsel %vm2936_vm5, %v2736_v5, 0  ;;  %v2790_v12 = vld [vmem:[#allocation2 + $0x70] sm:$0xff]  ;;  %v2783_v46 = vld [vmem:[#allocation2 + $0x38] sm:$0xff]  ;;  %v3406_v61 = vsel %vm2936_vm5, %v2737_v8, 0 }
 0x698   : > { %v2791_v18 = vld [vmem:[#allocation2 + $0x78] sm:$0xff]  ;;  %v2730_v31 = vld [vmem:[%s11721_s30 + $0x120] sm:$0xff]  ;;  %v2731_v23 = vld [vmem:[%s11721_s30 + $0x128] sm:$0xff]  ;;  %s14858_s23 = sld [smem:[#allocation148_spill]] (!%p8257_p6)  ;;  %s14859_s13 = sld [smem:[#allocation149_spill]] (!%p8257_p6) }
 0x699   : > { %8753 = vmatpush3.bf16.xpose.msra.mxu0 %v2965_v53  ;;  %v2738_v25 = vld [vmem:[%s11721_s30 + $0x1a0] sm:$0xff]  ;;  %v3264_v2 = vsel %vm2936_vm5, %v2730_v31, 0  ;;  %v2739_v41 = vld [vmem:[%s11721_s30 + $0x1a8] sm:$0xff]  ;;  %v3267_v53 = vsel %vm2936_vm5, %v2731_v23, 0  ;;  %s14860_s21 = sld [smem:[#allocation153_spill]] (!%p8257_p6) }
 0x69a   : > { %8785 = vmatpush3.bf16.xpose.msra.mxu1 %v3110_v0  ;;  %9140 = vmatprep.subr.msk.bf16.mxu0 %vm2936_vm5, %v2712_v16  ;;  %v2792_v13 = vld [vmem:[#allocation2 + $0x80] sm:$0xff]  ;;  %v3409_v24 = vsel %vm2936_vm5, %v2738_v25, 0  ;;  %v3412_v0 = vsel %vm2936_vm5, %v2739_v41, 0  ;;  %v2732_v16 = vld [vmem:[%s11721_s30 + $0x130] sm:$0xff] }
 0x69b   : > { %9148 = vmatprep.subr.msk.bf16.mxu1 %vm2936_vm5, %v2720_v14  ;;  %v2800_v9 = vld [vmem:[#allocation2 + $0xc0] sm:$0xff]  ;;  %v2740_v14 = vld [vmem:[%s11721_s30 + $0x1b0] sm:$0xff] }
 0x6a1   : > { %8755 = vmatpush3.bf16.xpose.msra.mxu0 %v2968_v10  ;;  %v3270_v10 = vsel %vm2936_vm5, %v2732_v16, 0 }
 0x6a2   : > { %8787 = vmatpush3.bf16.xpose.msra.mxu1 %v3113_v6  ;;  %9141 = vmatprep.subr.msk.bf16.mxu0 %vm2936_vm5, %v2713_v30  ;;  %v3415_v6 = vsel %vm2936_vm5, %v2740_v14, 0  ;;  %v2733_v30 = vld [vmem:[%s11721_s30 + $0x138] sm:$0xff] }
 0x6a3   : > { %9149 = vmatprep.subr.msk.bf16.mxu1 %vm2936_vm5, %v2721_v48  ;;  %v2741_v48 = vld [vmem:[%s11721_s30 + $0x1b8] sm:$0xff] }
 0x6a9   : > { %8757 = vmatpush3.bf16.xpose.msra.mxu0 %v2971_v50  ;;  %v3273_v50 = vsel %vm2936_vm5, %v2733_v30, 0 }
 0x6aa   : > { %8789 = vmatpush3.bf16.xpose.msra.mxu1 %v3116_v33  ;;  %9142 = vmatprep.subr.msk.bf16.mxu0 %vm2936_vm5, %v2714_v36  ;;  %v3418_v33 = vsel %vm2936_vm5, %v2741_v48, 0  ;;  %v2793_v36 = vld [vmem:[#allocation2 + $0x88] sm:$0xff] }
 0x6ab   : > { %9150 = vmatprep.subr.msk.bf16.mxu1 %vm2936_vm5, %v2722_v59  ;;  %v2801_v59 = vld [vmem:[#allocation2 + $0xc8] sm:$0xff] }
 0x6b1   : > { %8759 = vmatpush3.bf16.xpose.msra.mxu0 %v2974_v22  ;;  %v2794_v22 = vld [vmem:[#allocation2 + $0x90] sm:$0xff] }
 0x6b2   : > { %8791 = vmatpush3.bf16.xpose.msra.mxu1 %v3119_v63  ;;  %9143 = vmatprep.subr.msk.bf16.mxu0 %vm2936_vm5, %v2715_v49  ;;  %v2802_v63 = vld [vmem:[#allocation2 + $0xd0] sm:$0xff]  ;;  %v2795_v49 = vld [vmem:[#allocation2 + $0x98] sm:$0xff] }
 0x6b3   : > { %9151 = vmatprep.subr.msk.bf16.mxu1 %vm2936_vm5, %v2723_v34  ;;  %v2803_v34 = vld [vmem:[#allocation2 + $0xd8] sm:$0xff] }
 0x6b9   : > { %8761 = vmatpush3.bf16.xpose.msra.mxu0 %v2977_v29  ;;  %v2796_v29 = vld [vmem:[#allocation2 + $0xa0] sm:$0xff] }
 0x6ba   : > { %8793 = vmatpush3.bf16.xpose.msra.mxu1 %v3122_v42  ;;  %9144 = vmatprep.subr.msk.bf16.mxu0 %vm2936_vm5, %v2716_v60  ;;  %v2804_v42 = vld [vmem:[#allocation2 + $0xe0] sm:$0xff]  ;;  %v2797_v60 = vld [vmem:[#allocation2 + $0xa8] sm:$0xff] }
 0x6bb   : > { %9152 = vmatprep.subr.msk.bf16.mxu1 %vm2936_vm5, %v2724_v35  ;;  %v2805_v35 = vld [vmem:[#allocation2 + $0xe8] sm:$0xff] }
 0x6c1   : > { %8763 = vmatpush3.bf16.xpose.msra.mxu0 %v2980_v17  ;;  %v2798_v17 = vld [vmem:[#allocation2 + $0xb0] sm:$0xff] }
 0x6c2   : > { %8795 = vmatpush3.bf16.xpose.msra.mxu1 %v3125_v44  ;;  %9145 = vmatprep.subr.msk.bf16.mxu0 %vm2936_vm5, %v2717_v39  ;;  %v2806_v44 = vld [vmem:[#allocation2 + $0xf0] sm:$0xff]  ;;  %v2799_v39 = vld [vmem:[#allocation2 + $0xb8] sm:$0xff] }
 0x6c3   : > { %9153 = vmatprep.subr.msk.bf16.mxu1 %vm2936_vm5, %v2725_v26  ;;  %v2807_v26 = vld [vmem:[#allocation2 + $0xf8] sm:$0xff] }
 0x6c9   : > { %8765 = vmatpush3.bf16.xpose.msra.mxu0 %v2983_v55  ;;  %v8453_v55 = vld [vmem:[%s10150_s8 + $0x48] sm:$0xff]  }
 0x6ca   : > { %8797 = vmatpush3.bf16.xpose.msra.mxu1 %v3128_v43  ;;  %9154 = vmatprep.subr.msk.bf16.mxu0 %vm2936_vm5, %v2726_v51  ;;  %v8445_v43 = vld [vmem:[%s10150_s8 + $0x8] sm:$0xff]   ;;  %v8355_v51 = vunpack.c.l.bf16 %v8453_v55 }
 0x6cb   : > { %9162 = vmatprep.subr.msk.bf16.mxu1 %vm2936_vm5, %v2734_v54  ;;  %v8323_v54 = vunpack.c.l.bf16 %v8445_v43 }
 0x6d0   : > { %8767 = vmatmul.mubr.msk.bf16.vlgmr.msra.gmra.mrb[0].mxu0 %vm2936_vm5, %v2777_v1  ;;  %v8318_v1 = vld [vmem:[%s10150_s8] sm:$0xff]  }
 0x6d1   : > { %8799 = vmatmul.mubr.msk.bf16.vlgmr.msra.gmra.mrb[0].mxu1 %vm2936_vm5, %v2785_v52  ;;  %8815 = vmatpush3.bf16.xpose.msra.mxu0 %v3252_v11 }
 0x6d2   : > { %8847 = vmatpush3.bf16.xpose.msra.mxu1 %v3397_v58  ;;  %9155 = vmatprep.subr.msk.bf16.mxu0 %vm2936_vm5, %v2727_v20 }
 0x6d3   : > { %9163 = vmatprep.subr.msk.bf16.mxu1 %vm2936_vm5, %v2735_v62  ;;  %8770 = vmatprep.mubr.msk.bf16.mxu0 %vm2936_vm5, %v2778_v28 }
 0x6d4   : > { %8802 = vmatprep.mubr.msk.bf16.mxu1 %vm2936_vm5, %v2786_v32 }
 0x6d8   : > { %8771 = vmatmul.mubr.msk.bf16.gmra.mrb[4].mxu0 %vm2936_vm5, %v2779_v19 }
 0x6d9   : > { %8803 = vmatmul.mubr.msk.bf16.gmra.mrb[4].mxu1 %vm2936_vm5, %v2787_v21  ;;  %8817 = vmatpush3.bf16.xpose.msra.mxu0 %v3255_v47  ;;  %v8319_v21 = vunpack.c.l.bf16 %v8318_v1  ;;  %v8324_v47 = vunpack.c.h.bf16 %v8445_v43 }
 0x6da   : > { %8849 = vmatpush3.bf16.xpose.msra.mxu1 %v3400_v40  ;;  %9156 = vmatprep.subr.msk.bf16.mxu0 %vm2936_vm5, %v2728_v57  ;;  %v8452_v40 = vld [vmem:[%s10150_s8 + $0x40] sm:$0xff]  }
 0x6db   : > { %9164 = vmatprep.subr.msk.bf16.mxu1 %vm2936_vm5, %v2736_v5  ;;  %8774 = vmatprep.mubr.msk.bf16.mxu0 %vm2936_vm5, %v2780_v4 }
 0x6dc   : > { %8806 = vmatprep.mubr.msk.bf16.mxu1 %vm2936_vm5, %v2788_v7 }
 0x6e0   : > { %8775 = vmatmul.mubr.msk.bf16.gmra.mrb[8].mxu0 %vm2936_vm5, %v2781_v56 }
 0x6e1   : > { %8807 = vmatmul.mubr.msk.bf16.gmra.mrb[8].mxu1 %vm2936_vm5, %v2789_v37  ;;  %8819 = vmatpush3.bf16.xpose.msra.mxu0 %v3258_v15  ;;  %v8351_v15 = vunpack.c.l.bf16 %v8452_v40 }
 0x6e2   : > { %8851 = vmatpush3.bf16.xpose.msra.mxu1 %v3403_v38  ;;  %9157 = vmatprep.subr.msk.bf16.mxu0 %vm2936_vm5, %v2729_v27  ;;  %v8356_v38 = vunpack.c.h.bf16 %v8453_v55  ;;  %v8446_v55 = vld [vmem:[%s10150_s8 + $0x10] sm:$0xff]  }
 0x6e3   : > { %9165 = vmatprep.subr.msk.bf16.mxu1 %vm2936_vm5, %v2737_v8  ;;  %8778 = vmatprep.mubr.msk.bf16.mxu0 %vm2936_vm5, %v2782_v3 }
 0x6e4   : > { %8810 = vmatprep.mubr.msk.bf16.mxu1 %vm2936_vm5, %v2790_v12 }
 0x6e8   : > { %8779 = vmatmul.mubr.msk.bf16.gmra.mrb[12].mxu0 %vm2936_vm5, %v2783_v46 }
 0x6e9   : > { %8811 = vmatmul.mubr.msk.bf16.gmra.mrb[12].mxu1 %vm2936_vm5, %v2791_v18  ;;  %8821 = vmatpush3.bf16.xpose.msra.mxu0 %v3261_v45 }
 0x6ea   : > { %8853 = vmatpush3.bf16.xpose.msra.mxu1 %v3406_v61  ;;  %9158 = vmatprep.subr.msk.bf16.mxu0 %vm2936_vm5, %v2730_v31 }
 0x6eb   : > { %9166 = vmatprep.subr.msk.bf16.mxu1 %vm2936_vm5, %v2738_v25  ;;  %8830 = vmatprep.mubr.msk.bf16.mxu0 %vm2936_vm5, %v2792_v13  ;;  %v8352_v25 = vunpack.c.h.bf16 %v8452_v40  ;;  %v8320_v13 = vunpack.c.h.bf16 %v8318_v1  ;;  %v8449_v40 = vld [vmem:[%s10150_s8 + $0x28] sm:$0xff]  }
 0x6ec   : > { %8862 = vmatprep.mubr.msk.bf16.mxu1 %vm2936_vm5, %v2800_v9 }
 0x6f1   : > { %8823 = vmatpush3.bf16.xpose.msra.mxu0 %v3264_v2  ;;  %v8447_v2 = vld [vmem:[%s10150_s8 + $0x18] sm:$0xff]  }
 0x6f2   : > { %8855 = vmatpush3.bf16.xpose.msra.mxu1 %v3409_v24  ;;  %9159 = vmatprep.subr.msk.bf16.mxu0 %vm2936_vm5, %v2731_v23 }
 0x6f3   : > { %9167 = vmatprep.subr.msk.bf16.mxu1 %vm2936_vm5, %v2739_v41 }
 0x6f9   : > { %8825 = vmatpush3.bf16.xpose.msra.mxu0 %v3267_v53 }
 0x6fa   : > { %8857 = vmatpush3.bf16.xpose.msra.mxu1 %v3412_v0  ;;  %9160 = vmatprep.subr.msk.bf16.mxu0 %vm2936_vm5, %v2732_v16 }
 0x6fb   : > { %9168 = vmatprep.subr.msk.bf16.mxu1 %vm2936_vm5, %v2740_v14 }
 0x701   : > { %8827 = vmatpush3.bf16.xpose.msra.mxu0 %v3270_v10 }
 0x702   : > { %8859 = vmatpush3.bf16.xpose.msra.mxu1 %v3415_v6  ;;  %9161 = vmatprep.subr.msk.bf16.mxu0 %vm2936_vm5, %v2733_v30  ;;  %v8331_v6 = vunpack.c.l.bf16 %v8447_v2  ;;  %v8332_v30 = vunpack.c.h.bf16 %v8447_v2 }
 0x703   : > { %9169 = vmatprep.subr.msk.bf16.mxu1 %vm2936_vm5, %v2741_v48  ;;  %v8455_v48 = vld [vmem:[%s10150_s8 + $0x58] sm:$0xff]  }
 0x709   : > { %8829 = vmatpush3.bf16.xpose.msra.mxu0 %v3273_v50 }
 0x70a   : > { %8861 = vmatpush3.bf16.xpose.msra.mxu1 %v3418_v33 }
 0x710   : > { %8831 = vmatmul.mubr.msk.bf16.vlgmr.msra.gmra.mrb[16].mxu0 %vm2936_vm5, %v2793_v36  ;;  %v8363_v36 = vunpack.c.l.bf16 %v8455_v48 }
 0x711   : > { %8863 = vmatmul.mubr.msk.bf16.vlgmr.msra.gmra.mrb[16].mxu1 %vm2936_vm5, %v2801_v59  ;;  %8834 = vmatprep.mubr.msk.bf16.mxu0 %vm2936_vm5, %v2794_v22  ;;  %v8364_v59 = vunpack.c.h.bf16 %v8455_v48 }
 0x712   : > { %8866 = vmatprep.mubr.msk.bf16.mxu1 %vm2936_vm5, %v2802_v63 }
 0x718   : > { %8835 = vmatmul.mubr.msk.bf16.gmra.mrb[20].mxu0 %vm2936_vm5, %v2795_v49 }
 0x719   : > { %8867 = vmatmul.mubr.msk.bf16.gmra.mrb[20].mxu1 %vm2936_vm5, %v2803_v34  ;;  %8838 = vmatprep.mubr.msk.bf16.mxu0 %vm2936_vm5, %v2796_v29 }
 0x71a   : > { %8870 = vmatprep.mubr.msk.bf16.mxu1 %vm2936_vm5, %v2804_v42 }
 0x720   : > { %8839 = vmatmul.mubr.msk.bf16.gmra.mrb[24].mxu0 %vm2936_vm5, %v2797_v60 }
 0x721   : > { %8871 = vmatmul.mubr.msk.bf16.gmra.mrb[24].mxu1 %vm2936_vm5, %v2805_v35  ;;  %8842 = vmatprep.mubr.msk.bf16.mxu0 %vm2936_vm5, %v2798_v17 }
 0x722   : > { %8874 = vmatprep.mubr.msk.bf16.mxu1 %vm2936_vm5, %v2806_v44 }
 0x728   : > { %8843 = vmatmul.mubr.msk.bf16.gmra.mrb[28].mxu0 %vm2936_vm5, %v2799_v39 }
 0x729   : > { %8875 = vmatmul.mubr.msk.bf16.gmra.mrb[28].mxu1 %vm2936_vm5, %v2807_v26 }
 0x7a3   : > { %v8768_v52 = vpop.f32.mrb[0].mxu0 }
 0x7a4   : > { %v8800_v11 = vpop.f32.mrb[0].mxu1  ;;  %v3519_v58 = vmul.f32 0.35355338, %v8768_v52  ;;  %v3019_v62 = vpop.f32.mrb[1].mxu0 }
 0x7a5   : > { %v3535_v20 = vmul.f32 0.35355338, %v8800_v11  ;;  %v3164_v28 = vpop.f32.mrb[1].mxu1  ;;  %v8769_v32 = vpop.f32.mrb[2].mxu0  ;;  %v3517_v57 = vmul.f32 0.35355338, %v3019_v62  ;;  %v8327_v11 = vunpack.c.l.bf16 %v8446_v55 }
 0x7a6   : > { %v8801_v19 = vpop.f32.mrb[2].mxu1  ;;  %v3520_v5 = vmul.f32 0.35355338, %v8769_v32  ;;  %v3022_v4 = vpop.f32.mrb[3].mxu0  ;;  %v11855_v37 = vadd.f32 %v8323_v54, %v3519_v58  ;;  %v3533_v27 = vmul.f32 0.35355338, %v3164_v28  ;;  %v8328_v58 = vunpack.c.h.bf16 %v8446_v55 }
 0x7a7   : > { %v3167_v7 = vpop.f32.mrb[3].mxu1  ;;  %v11853_v56 = vadd.f32 %v8355_v51, %v3535_v20  ;;  %v3536_v8 = vmul.f32 0.35355338, %v8801_v19  ;;  %v11859_v3 = vadd.f32 %v8319_v21, %v3517_v57  ;;  %v3518_v24 = vmul.f32 0.35355338, %v3022_v4  ;;  %v8454_v20 = vld [vmem:[%s10150_s8 + $0x50] sm:$0xff]  }
 0x7a8   : > { %3713 = vmax.xlane.f32.xlu1 %v11855_v37  ;;  %v11861_v12 = vadd.f32 %v8324_v47, %v3520_v5  ;;  %v3534_v23 = vmul.f32 0.35355338, %v3167_v7  ;;  %v11866_v41 = vadd.f32 %v8351_v15, %v3533_v27  ;;  %v9949_v54 = vmov 0  }
 0x7a9   : > { %3745 = vmax.xlane.f32.xlu0 %v11853_v56  ;;  %v11868_v53 = vadd.f32 %v8356_v38, %v3536_v8  ;;  %v11875_v33 = vadd.f32 %v8320_v13, %v3518_v24  ;;  %9384 = vset.pattern.permute.xlu1 %v9949_v54  ;;  %v8359_v21 = vunpack.c.l.bf16 %v8454_v20  ;;  %v8360_v47 = vunpack.c.h.bf16 %v8454_v20 }
 0x7aa   : > { %v11873_v50 = vadd.f32 %v8352_v25, %v3534_v23  ;;  %9385 = vset.pattern.permute.xlu0 %v9949_v54  ;;  %v8457_v25 = vld [vmem:[%s10150_s8 + $0x68] sm:$0xff]  }
 0x7ab   : > { %v8772_v46 = vpop.f32.mrb[4].mxu0  ;;  %v8372_v2 = vunpack.c.h.bf16 %v8457_v25 }
 0x7ac   : > { %v8804_v18 = vpop.f32.mrb[4].mxu1  ;;  %3715 = vmax.xlane.f32.xlu1 %v11861_v12  ;;  %v3035_v45 = vpop.f32.mrb[5].mxu0  ;;  %v3523_v14 = vmul.f32 0.35355338, %v8772_v46 }
 0x7ad   : > { %3709 = vmax.xlane.f32.xlu0 %v11859_v3  ;;  %v3180_v61 = vpop.f32.mrb[5].mxu1  ;;  %v8773_v31 = vpop.f32.mrb[6].mxu0  ;;  %v3539_v49 = vmul.f32 0.35355338, %v8804_v18  ;;  %v3521_v1 = vmul.f32 0.35355338, %v3035_v45  ;;  %v8339_v45 = vunpack.c.l.bf16 %v8449_v40 }
 0x7ae   : > { %v8805_v9 = vpop.f32.mrb[6].mxu1  ;;  %v3038_v0 = vpop.f32.mrb[7].mxu0  ;;  %v3524_v10 = vmul.f32 0.35355338, %v8773_v31  ;;  %v11879_v29 = vadd.f32 %v8331_v6, %v3523_v14  ;;  %v3537_v4 = vmul.f32 0.35355338, %v3180_v61  ;;  %v8340_v31 = vunpack.c.h.bf16 %v8449_v40 }
 0x7af   : > { %v3183_v16 = vpop.f32.mrb[7].mxu1  ;;  %v3540_v34 = vmul.f32 0.35355338, %v8805_v9  ;;  %v11890_v43 = vadd.f32 %v8363_v36, %v3539_v49  ;;  %v3522_v52 = vmul.f32 0.35355338, %v3038_v0  ;;  %v11904_v15 = vadd.f32 %v8327_v11, %v3521_v1  ;;  %v8448_v14 = vld [vmem:[%s10150_s8 + $0x20] sm:$0xff]  }
 0x7b0   : > { %3747 = vmax.xlane.f32.xlu1 %v11868_v53  ;;  %14495 = vst [vmem:[#allocation20_spill] sm:$0xff] %v11879_v29  ;;  %v11881_v42 = vadd.f32 %v8332_v30, %v3524_v10  ;;  %v3538_v7 = vmul.f32 0.35355338, %v3183_v16  ;;  %v11913_v13 = vadd.f32 %v8359_v21, %v3537_v4  ;;  %v8371_v9 = vunpack.c.l.bf16 %v8457_v25  ;;  %v8459_v11 = vld [vmem:[%s10150_s8 + $0x78] sm:$0xff]  }
 0x7b1   : > { %3741 = vmax.xlane.f32.xlu0 %v11866_v41  ;;  %v11892_v51 = vadd.f32 %v8364_v59, %v3540_v34  ;;  %14498 = vst [vmem:[#allocation23_spill] sm:$0xff] %v11904_v15  ;;  %v11906_v38 = vadd.f32 %v8328_v58, %v3522_v52  ;;  %v8335_v36 = vunpack.c.l.bf16 %v8448_v14  ;;  %v8336_v59 = vunpack.c.h.bf16 %v8448_v14  ;;  %v8451_v34 = vld [vmem:[%s10150_s8 + $0x38] sm:$0xff]  }
 0x7b2   : > { %14496 = vst [vmem:[#allocation21_spill] sm:$0xff] %v11881_v42  ;;  %14500 = vst [vmem:[#allocation25_spill] sm:$0xff] %v11913_v13  ;;  %v11915_v61 = vadd.f32 %v8360_v47, %v3538_v7  ;;  %v8347_v1 = vunpack.c.l.bf16 %v8451_v34  ;;  %v8348_v52 = vunpack.c.h.bf16 %v8451_v34 }
 0x7b3   : > { %v8776_v22 = vpop.f32.mrb[8].mxu0  ;;  %14497 = vst [vmem:[#allocation22_spill] sm:$0xff] %v11892_v51  ;;  %14499 = vst [vmem:[#allocation24_spill] sm:$0xff] %v11906_v38 }
 0x7b4   : > { %v8808_v63 = vpop.f32.mrb[8].mxu1  ;;  %3743 = vmax.xlane.f32.xlu1 %v11873_v50  ;;  %v3051_v60 = vpop.f32.mrb[9].mxu0  ;;  %v3527_v46 = vmul.f32 0.35355338, %v8776_v22  ;;  %v8456_v22 = vld [vmem:[%s10150_s8 + $0x60] sm:$0xff]  }
 0x7b5   : > { %3711 = vmax.xlane.f32.xlu0 %v11875_v33  ;;  %v11883_v35 = vpop.f32.mrb[9].mxu1  ;;  %v8777_v17 = vpop.f32.mrb[10].mxu0  ;;  %v3543_v24 = vmul.f32 0.35355338, %v8808_v63  ;;  %v3525_v30 = vmul.f32 0.35355338, %v3051_v60  ;;  %v8367_v63 = vunpack.c.l.bf16 %v8456_v22  ;;  %v8368_v49 = vunpack.c.h.bf16 %v8456_v22 }
 0x7b6   : > { %v8809_v44 = vpop.f32.mrb[10].mxu1  ;;  %v3054_v39 = vpop.f32.mrb[11].mxu0  ;;  %v3528_v18 = vmul.f32 0.35355338, %v8777_v17  ;;  %v11919_v0 = vadd.f32 %v8339_v45, %v3527_v46  ;;  %v3541_v17 = vmul.f32 0.35355338, %v11883_v35  ;;  %v8379_v35 = vunpack.c.l.bf16 %v8459_v11 }
 0x7b7   : > { %v11885_v26 = vpop.f32.mrb[11].mxu1  ;;  %v3544_v23 = vmul.f32 0.35355338, %v8809_v44  ;;  %v11926_v10 = vadd.f32 %v8371_v9, %v3543_v24  ;;  %v3526_v48 = vmul.f32 0.35355338, %v3054_v39  ;;  %v11936_v55 = vadd.f32 %v8335_v36, %v3525_v30  ;;  %v8458_v45 = vld [vmem:[%s10150_s8 + $0x70] sm:$0xff]  }
 0x7b8   : > { %3723 = vmax.xlane.f32.xlu1 %v11881_v42  ;;  %14501 = vst [vmem:[#allocation26_spill] sm:$0xff] %v11919_v0  ;;  %v11921_v16 = vadd.f32 %v8340_v31, %v3528_v18  ;;  %v3542_v44 = vmul.f32 0.35355338, %v11885_v26  ;;  %v11943_v58 = vadd.f32 %v8367_v63, %v3541_v17  ;;  %v8380_v26 = vunpack.c.h.bf16 %v8459_v11  ;;  %v12386_v42 = vld [vmem:[#allocation5 + $0xe8] sm:$0xff] }
 0x7b9   : > { %3721 = vmax.xlane.f32.xlu0 %v11879_v29  ;;  %14503 = vst [vmem:[#allocation28_spill] sm:$0xff] %v11926_v10  ;;  %v11928_v6 = vadd.f32 %v8372_v2, %v3544_v23  ;;  %14505 = vst [vmem:[#allocation30_spill] sm:$0xff] %v11936_v55  ;;  %v11938_v54 = vadd.f32 %v8336_v59, %v3526_v48  ;;  %v8375_v31 = vunpack.c.l.bf16 %v8458_v45  ;;  %v8376_v25 = vunpack.c.h.bf16 %v8458_v45  ;;  %v12368_v29 = vld [vmem:[#allocation5 + $0x68] sm:$0xff] }
 0x7ba   : > { %14502 = vst [vmem:[#allocation27_spill] sm:$0xff] %v11921_v16  ;;  %14507 = vst [vmem:[#allocation32_spill] sm:$0xff] %v11943_v58  ;;  %v11945_v20 = vadd.f32 %v8368_v49, %v3542_v44 }
 0x7bb   : > { %v8780_v62 = vpop.f32.mrb[12].mxu0  ;;  %14504 = vst [vmem:[#allocation29_spill] sm:$0xff] %v11928_v6  ;;  %14506 = vst [vmem:[#allocation31_spill] sm:$0xff] %v11938_v54 }
 0x7bc   : > { %v11895_v28 = vpop.f32.mrb[12].mxu1  ;;  %3755 = vmax.xlane.f32.xlu1 %v11892_v51  ;;  %v11899_v32 = vpop.f32.mrb[13].mxu0  ;;  %v3531_v60 = vmul.f32 0.35355338, %v8780_v62  ;;  %14508 = vst [vmem:[#allocation33_spill] sm:$0xff] %v11945_v20 }
 0x7bd   : > { %3753 = vmax.xlane.f32.xlu0 %v11890_v43  ;;  %v11901_v19 = vpop.f32.mrb[13].mxu1  ;;  %v8781_v57 = vpop.f32.mrb[14].mxu0  ;;  %v3547_v21 = vmul.f32 0.35355338, %v11895_v28  ;;  %v3529_v46 = vmul.f32 0.35355338, %v11899_v32 }
 0x7be   : > { %v8813_v5 = vpop.f32.mrb[14].mxu1  ;;  %v3070_v27 = vpop.f32.mrb[15].mxu0  ;;  %v3532_v39 = vmul.f32 0.35355338, %v8781_v57  ;;  %v11950_v40 = vadd.f32 %v8347_v1, %v3531_v60  ;;  %v8450_v57 = vld [vmem:[%s10150_s8 + $0x30] sm:$0xff]   ;;  %v8461_v32 = vld [vmem:[%s10150_s8 + $0x88] sm:$0xff]  }
 0x7bf   : > { %v11908_v8 = vpop.f32.mrb[15].mxu1  ;;  %v3548_v47 = vmul.f32 0.35355338, %v8813_v5  ;;  %v11957_v4 = vadd.f32 %v8379_v35, %v3547_v21  ;;  %v3530_v18 = vmul.f32 0.35355338, %v3070_v27  ;;  %v8343_v28 = vunpack.c.l.bf16 %v8450_v57  ;;  %v8469_v27 = vld [vmem:[%s10150_s8 + $0xc8] sm:$0xff]  }
 0x7c0   : > { %3719 = vmax.xlane.f32.xlu1 %v11906_v38  ;;  %14509 = vst [vmem:[#allocation34_spill] sm:$0xff] %v11950_v40  ;;  %v11952_v62 = vadd.f32 %v8348_v52, %v3532_v39  ;;  %v8344_v5 = vunpack.c.h.bf16 %v8450_v57  ;;  %v3545_v9 = vmul.f32 0.35355338, %v11901_v19  ;;  %v3546_v2 = vmul.f32 0.35355338, %v11908_v8  ;;  %v12366_v38 = vld [vmem:[#allocation5 + $0x60] sm:$0xff] }
 0x7c1   : > { %3717 = vmax.xlane.f32.xlu0 %v11904_v15  ;;  %14511 = vst [vmem:[#allocation36_spill] sm:$0xff] %v11957_v4  ;;  %v11959_v7 = vadd.f32 %v8380_v26, %v3548_v47  ;;  %v11967_v24 = vadd.f32 %v8343_v28, %v3529_v46  ;;  %v8387_v48 = vunpack.c.l.bf16 %v8461_v32  ;;  %v8388_v49 = vunpack.c.h.bf16 %v8461_v32  ;;  %v8460_v26 = vld [vmem:[%s10150_s8 + $0x80] sm:$0xff]   ;;  %v12404_v15 = vld [vmem:[#allocation5 + $0x110] sm:$0xff] }
 0x7c2   : > { %14510 = vst [vmem:[#allocation35_spill] sm:$0xff] %v11952_v62  ;;  %v11969_v23 = vadd.f32 %v8344_v5, %v3530_v18  ;;  %v11975_v14 = vadd.f32 %v8375_v31, %v3545_v9  ;;  %v11977_v30 = vadd.f32 %v8376_v25, %v3546_v2  ;;  %v8419_v34 = vunpack.c.l.bf16 %v8469_v27  ;;  %v8468_v5 = vld [vmem:[%s10150_s8 + $0xc0] sm:$0xff]   ;;  %14556 = vst [vmem:[#allocation81_spill] sm:$0xff] %v12404_v15 }
 0x7c3   : > { %14512 = vst [vmem:[#allocation37_spill] sm:$0xff] %v11959_v7  ;;  %14513 = vst [vmem:[#allocation38_spill] sm:$0xff] %v11967_v24  ;;  %v8420_v35 = vunpack.c.h.bf16 %v8469_v27  ;;  %v8383_v18 = vunpack.c.l.bf16 %v8460_v26  ;;  %v8384_v25 = vunpack.c.h.bf16 %v8460_v26 }
 0x7c4   : > { %3751 = vmax.xlane.f32.xlu1 %v11915_v61  ;;  %14514 = vst [vmem:[#allocation39_spill] sm:$0xff] %v11969_v23  ;;  %14515 = vst [vmem:[#allocation40_spill] sm:$0xff] %v11975_v14 }
 0x7c5   : > { %3749 = vmax.xlane.f32.xlu0 %v11913_v13  ;;  %14516 = vst [vmem:[#allocation41_spill] sm:$0xff] %v11977_v30 }
 0x7c8   : > { %3731 = vmax.xlane.f32.xlu1 %v11921_v16  ;;  %v12346_v16 = vld [vmem:[#allocation5 + $0xf0] sm:$0xff] }
 0x7c9   : > { %3729 = vmax.xlane.f32.xlu0 %v11919_v0 }
 0x7cc   : > { %3763 = vmax.xlane.f32.xlu1 %v11928_v6 }
 0x7cd   : > { %3761 = vmax.xlane.f32.xlu0 %v11926_v10 }
 0x7d0   : > { %3727 = vmax.xlane.f32.xlu1 %v11938_v54  ;;  %v12348_v54 = vld [vmem:[#allocation5 + $0xf8] sm:$0xff] }
 0x7d1   : > { %3725 = vmax.xlane.f32.xlu0 %v11936_v55  ;;  %v12326_v55 = vld [vmem:[#allocation5 + $0x70] sm:$0xff] }
 0x7d4   : > { %3759 = vmax.xlane.f32.xlu1 %v11945_v20  ;;  %v12328_v20 = vld [vmem:[#allocation5 + $0x78] sm:$0xff] }
 0x7d5   : > { %3757 = vmax.xlane.f32.xlu0 %v11943_v58  ;;  %v12308_v58 = vld [vmem:[#allocation5 + $0xc8] sm:$0xff] }
 0x7d8   : > { %3739 = vmax.xlane.f32.xlu1 %v11952_v62  ;;  %v12249_v62 = vld [vmem:[#allocation5 + $0x58] sm:$0xff] }
 0x7d9   : > { %3737 = vmax.xlane.f32.xlu0 %v11950_v40  ;;  %v12270_v40 = vld [vmem:[#allocation5 + $0xd8] sm:$0xff] }
 0x7dc   : > { %3771 = vmax.xlane.f32.xlu1 %v11959_v7  ;;  %v8473_v7 = vld [vmem:[%s10150_s8 + $0xe8] sm:$0xff]  }
 0x7dd   : > { %3769 = vmax.xlane.f32.xlu0 %v11957_v4  ;;  %v12247_v4 = vld [vmem:[#allocation5 + $0x50] sm:$0xff] }
 0x7e0   : > { %3735 = vmax.xlane.f32.xlu1 %v11969_v23  ;;  %v12268_v23 = vld [vmem:[#allocation5 + $0xd0] sm:$0xff] }
 0x7e1   : > { %3733 = vmax.xlane.f32.xlu0 %v11967_v24  ;;  %v12228_v24 = vld [vmem:[#allocation5 + $0xa0] sm:$0xff] }
 0x7e3   : > { %v8832_v36 = vpop.f32.mrb[16].mxu0 }
 0x7e4   : > { %v8864_v59 = vpop.f32.mrb[16].mxu1  ;;  %v3551_v19 = vmul.f32 0.35355338, %v8832_v36  ;;  %3767 = vmax.xlane.f32.xlu1 %v11977_v30  ;;  %v3309_v8 = vpop.f32.mrb[17].mxu0 }
 0x7e5   : > { %3765 = vmax.xlane.f32.xlu0 %v11975_v14  ;;  %v3567_v22 = vmul.f32 0.35355338, %v8864_v59  ;;  %v3454_v63 = vpop.f32.mrb[17].mxu1  ;;  %v8833_v17 = vpop.f32.mrb[18].mxu0  ;;  %v3549_v57 = vmul.f32 0.35355338, %v3309_v8 }
 0x7e6   : > { %v8865_v44 = vpop.f32.mrb[18].mxu1  ;;  %v3552_v60 = vmul.f32 0.35355338, %v8833_v17  ;;  %v3312_v39 = vpop.f32.mrb[19].mxu0  ;;  %v11981_v11 = vadd.f32 %v8387_v48, %v3551_v19  ;;  %v8463_v48 = vld [vmem:[%s10150_s8 + $0x98] sm:$0xff]   ;;  %v8415_v19 = vunpack.c.l.bf16 %v8468_v5 }
 0x7e7   : > { %v3568_v1 = vmul.f32 0.35355338, %v8865_v44  ;;  %v3457_v52 = vpop.f32.mrb[19].mxu1  ;;  %v11987_v47 = vadd.f32 %v8419_v34, %v3567_v22  ;;  %v3550_v31 = vmul.f32 0.35355338, %v3312_v39  ;;  %v11996_v59 = vadd.f32 %v8383_v18, %v3549_v57  ;;  %v8471_v39 = vld [vmem:[%s10150_s8 + $0xd8] sm:$0xff]  }
 0x7e8   : > { %14517 = vst [vmem:[#allocation42_spill] sm:$0xff] %v11981_v11  ;;  %v11985_v21 = vadd.f32 %v8388_v49, %v3552_v60  ;;  %v3565_v36 = vmul.f32 0.35355338, %v3454_v63  ;;  %v8416_v49 = vunpack.c.h.bf16 %v8468_v5  ;;  %v3566_v34 = vmul.f32 0.35355338, %v3457_v52 }
 0x7e9   : > { %3777 = vmax.xlane.f32.xlu0 %v11981_v11  ;;  %14519 = vst [vmem:[#allocation44_spill] sm:$0xff] %v11987_v47  ;;  %v11990_v46 = vadd.f32 %v8420_v35, %v3568_v1  ;;  %14521 = vst [vmem:[#allocation46_spill] sm:$0xff] %v11996_v59  ;;  %v11999_v44 = vadd.f32 %v8384_v25, %v3550_v31  ;;  %v8395_v60 = vunpack.c.l.bf16 %v8463_v48  ;;  %v8396_v35 = vunpack.c.h.bf16 %v8463_v48 }
 0x7ea   : > { %14518 = vst [vmem:[#allocation43_spill] sm:$0xff] %v11985_v21  ;;  %3779 = vmax.xlane.f32.xlu1 %v11985_v21  ;;  %v12003_v63 = vadd.f32 %v8415_v19, %v3565_v36  ;;  %v12006_v52 = vadd.f32 %v8416_v49, %v3566_v34  ;;  %v8428_v19 = vunpack.c.h.bf16 %v8471_v39 }
 0x7eb   : > { %14520 = vst [vmem:[#allocation45_spill] sm:$0xff] %v11990_v46  ;;  %v8836_v28 = vpop.f32.mrb[20].mxu0  ;;  %14522 = vst [vmem:[#allocation47_spill] sm:$0xff] %v11999_v44 }
 0x7ec   : > { %v8868_v45 = vpop.f32.mrb[20].mxu1  ;;  %v3325_v9 = vpop.f32.mrb[21].mxu0  ;;  %v3555_v17 = vmul.f32 0.35355338, %v8836_v28  ;;  %14523 = vst [vmem:[#allocation48_spill] sm:$0xff] %v12003_v63  ;;  %14524 = vst [vmem:[#allocation49_spill] sm:$0xff] %v12006_v52  ;;  %v8427_v28 = vunpack.c.l.bf16 %v8471_v39 }
 0x7ed   : > { %3809 = vmax.xlane.f32.xlu0 %v11987_v47  ;;  %v3470_v2 = vpop.f32.mrb[21].mxu1  ;;  %v8837_v32 = vpop.f32.mrb[22].mxu0  ;;  %v3571_v18 = vmul.f32 0.35355338, %v8868_v45  ;;  %v8462_v45 = vld [vmem:[%s10150_s8 + $0x90] sm:$0xff]  }
 0x7ee   : > { %v8869_v27 = vpop.f32.mrb[22].mxu1  ;;  %3811 = vmax.xlane.f32.xlu1 %v11990_v46  ;;  %v3328_v8 = vpop.f32.mrb[23].mxu0  ;;  %v3556_v1 = vmul.f32 0.35355338, %v8837_v32  ;;  %v12008_v5 = vadd.f32 %v8395_v60, %v3555_v17  ;;  %v3553_v34 = vmul.f32 0.35355338, %v3325_v9  ;;  %v8391_v60 = vunpack.c.l.bf16 %v8462_v45 }
 0x7ef   : > { %v3473_v22 = vpop.f32.mrb[23].mxu1  ;;  %v3572_v48 = vmul.f32 0.35355338, %v8869_v27  ;;  %v12017_v49 = vadd.f32 %v8427_v28, %v3571_v18  ;;  %v8470_v47 = vld [vmem:[%s10150_s8 + $0xd0] sm:$0xff]   ;;  %v8392_v39 = vunpack.c.h.bf16 %v8462_v45  ;;  %v8465_v18 = vld [vmem:[%s10150_s8 + $0xa8] sm:$0xff]  }
 0x7f0   : > { %14525 = vst [vmem:[#allocation50_spill] sm:$0xff] %v12008_v5  ;;  %v12013_v36 = vadd.f32 %v8396_v35, %v3556_v1  ;;  %v3554_v1 = vmul.f32 0.35355338, %v3328_v8  ;;  %v3570_v45 = vmul.f32 0.35355338, %v3473_v22  ;;  %v8403_v14 = vunpack.c.l.bf16 %v8465_v18 }
 0x7f1   : > { %3773 = vmax.xlane.f32.xlu0 %v11996_v59  ;;  %14527 = vst [vmem:[#allocation52_spill] sm:$0xff] %v12017_v49  ;;  %v12020_v17 = vadd.f32 %v8428_v19, %v3572_v48  ;;  %v12030_v48 = vadd.f32 %v8391_v60, %v3553_v34  ;;  %v8423_v19 = vunpack.c.l.bf16 %v8470_v47  ;;  %v8404_v60 = vunpack.c.h.bf16 %v8465_v18 }
 0x7f2   : > { %3775 = vmax.xlane.f32.xlu1 %v11999_v44  ;;  %14526 = vst [vmem:[#allocation51_spill] sm:$0xff] %v12013_v36  ;;  %v12037_v44 = vadd.f32 %v8392_v39, %v3554_v1 }
 0x7f3   : > { %v8840_v26 = vpop.f32.mrb[24].mxu0  ;;  %14528 = vst [vmem:[#allocation53_spill] sm:$0xff] %v12020_v17  ;;  %14529 = vst [vmem:[#allocation54_spill] sm:$0xff] %v12030_v48 }
 0x7f4   : > { %v8872_v57 = vpop.f32.mrb[24].mxu1  ;;  %v3341_v31 = vpop.f32.mrb[25].mxu0  ;;  %v3559_v11 = vmul.f32 0.35355338, %v8840_v26  ;;  %14530 = vst [vmem:[#allocation55_spill] sm:$0xff] %v12037_v44  ;;  %v8435_v26 = vunpack.c.l.bf16 %v8473_v7 }
 0x7f5   : > { %3805 = vmax.xlane.f32.xlu0 %v12003_v63  ;;  %v12010_v25 = vpop.f32.mrb[25].mxu1  ;;  %v8841_v46 = vpop.f32.mrb[26].mxu0  ;;  %v3557_v18 = vmul.f32 0.35355338, %v3341_v31 }
 0x7f6   : > { %v8873_v32 = vpop.f32.mrb[26].mxu1  ;;  %3807 = vmax.xlane.f32.xlu1 %v12006_v52  ;;  %v3344_v59 = vpop.f32.mrb[27].mxu0  ;;  %v12046_v22 = vadd.f32 %v8403_v14, %v3559_v11  ;;  %v8472_v11 = vld [vmem:[%s10150_s8 + $0xe0] sm:$0xff]  }
 0x7f7   : > { %v3489_v63 = vpop.f32.mrb[27].mxu1  ;;  %v3576_v1 = vmul.f32 0.35355338, %v8873_v32  ;;  %v8432_v31 = vunpack.c.h.bf16 %v8472_v11 }
 0x7f8   : > { %14533 = vst [vmem:[#allocation58_spill] sm:$0xff] %v12046_v22 }
 0x7f9   : > { %3785 = vmax.xlane.f32.xlu0 %v12008_v5  ;;  %v3569_v5 = vmul.f32 0.35355338, %v3470_v2  ;;  %v3560_v2 = vmul.f32 0.35355338, %v8841_v46  ;;  %v8464_v46 = vld [vmem:[%s10150_s8 + $0xa0] sm:$0xff]  }
 0x7fa   : > { %3787 = vmax.xlane.f32.xlu1 %v12013_v36  ;;  %v8399_v14 = vunpack.c.l.bf16 %v8464_v46  ;;  %v8400_v32 = vunpack.c.h.bf16 %v8464_v46 }
 0x7fb   : > { %v8844_v52 = vpop.f32.mrb[28].mxu0  ;;  %v12041_v34 = vadd.f32 %v8423_v19, %v3569_v5  ;;  %v12049_v39 = vadd.f32 %v8404_v60, %v3560_v2  ;;  %v8467_v19 = vld [vmem:[%s10150_s8 + $0xb8] sm:$0xff]   ;;  %v3574_v2 = vmul.f32 0.35355338, %v3489_v63 }
 0x7fc   : > { %v8876_v27 = vpop.f32.mrb[28].mxu1  ;;  %v12024_v35 = vpop.f32.mrb[29].mxu0 }
 0x7fd   : > { %3817 = vmax.xlane.f32.xlu0 %v12017_v49  ;;  %v12026_v21 = vpop.f32.mrb[29].mxu1  ;;  %v8845_v28 = vpop.f32.mrb[30].mxu0  ;;  %v8424_v49 = vunpack.c.h.bf16 %v8470_v47  ;;  %14531 = vst [vmem:[#allocation56_spill] sm:$0xff] %v12041_v34  ;;  %14534 = vst [vmem:[#allocation59_spill] sm:$0xff] %v12049_v39 }
 0x7fe   : > { %v8877_v9 = vpop.f32.mrb[30].mxu1  ;;  %3819 = vmax.xlane.f32.xlu1 %v12020_v17  ;;  %v12032_v36 = vpop.f32.mrb[31].mxu0  ;;  %v3575_v17 = vmul.f32 0.35355338, %v8872_v57 }
 0x7ff   : > { %v12034_v8 = vpop.f32.mrb[31].mxu1  ;;  %v12044_v47 = vadd.f32 %v8424_v49, %v3570_v45  ;;  %v3558_v49 = vmul.f32 0.35355338, %v3344_v59  ;;  %v12063_v45 = vadd.f32 %v8399_v14, %v3557_v18  ;;  %v8411_v59 = vunpack.c.l.bf16 %v8467_v19 }
 0x800   : > { %v12053_v5 = vadd.f32 %v8435_v26, %v3575_v17  ;;  %v8431_v17 = vunpack.c.l.bf16 %v8472_v11  ;;  %v8475_v26 = vld [vmem:[%s10150_s8 + $0xf8] sm:$0xff]   ;;  %v3579_v18 = vmul.f32 0.35355338, %v8876_v27  ;;  %v12073_v14 = vadd.f32 %v8432_v31, %v3574_v2 }
 0x801   : > { %3781 = vmax.xlane.f32.xlu0 %v12030_v48  ;;  %14532 = vst [vmem:[#allocation57_spill] sm:$0xff] %v12044_v47  ;;  %v8436_v48 = vunpack.c.h.bf16 %v8473_v7  ;;  %v3573_v7 = vmul.f32 0.35355338, %v12010_v25  ;;  %14537 = vst [vmem:[#allocation62_spill] sm:$0xff] %v12063_v45  ;;  %v12066_v60 = vadd.f32 %v8400_v32, %v3558_v49  ;;  %v8412_v25 = vunpack.c.h.bf16 %v8467_v19 }
 0x802   : > { %3783 = vmax.xlane.f32.xlu1 %v12037_v44  ;;  %14535 = vst [vmem:[#allocation60_spill] sm:$0xff] %v12053_v5  ;;  %14540 = vst [vmem:[#allocation65_spill] sm:$0xff] %v12073_v14  ;;  %v3580_v11 = vmul.f32 0.35355338, %v8877_v9  ;;  %v8444_v32 = vunpack.c.h.bf16 %v8475_v26  ;;  %v3561_v19 = vmul.f32 0.35355338, %v12024_v35 }
 0x803   : > { %v12056_v57 = vadd.f32 %v8436_v48, %v3576_v1  ;;  %v3563_v48 = vmul.f32 0.35355338, %v8844_v52  ;;  %14538 = vst [vmem:[#allocation63_spill] sm:$0xff] %v12066_v60  ;;  %v3564_v1 = vmul.f32 0.35355338, %v8845_v28  ;;  %v12070_v46 = vadd.f32 %v8431_v17, %v3573_v7  ;;  %v8474_v17 = vld [vmem:[%s10150_s8 + $0xf0] sm:$0xff]  }
 0x804   : > { %v8443_v52 = vunpack.c.l.bf16 %v8475_v26  ;;  %v12086_v27 = vadd.f32 %v8444_v32, %v3580_v11  ;;  %v3562_v31 = vmul.f32 0.35355338, %v12032_v36  ;;  %v3577_v2 = vmul.f32 0.35355338, %v12026_v21 }
 0x805   : > { %3813 = vmax.xlane.f32.xlu0 %v12041_v34  ;;  %14536 = vst [vmem:[#allocation61_spill] sm:$0xff] %v12056_v57  ;;  %14539 = vst [vmem:[#allocation64_spill] sm:$0xff] %v12070_v46  ;;  %v12075_v63 = vadd.f32 %v8411_v59, %v3563_v48  ;;  %v12078_v49 = vadd.f32 %v8412_v25, %v3564_v1  ;;  %v8439_v59 = vunpack.c.l.bf16 %v8474_v17  ;;  %v3578_v35 = vmul.f32 0.35355338, %v12034_v8  ;;  %v12108_v25 = vld [vmem:[#allocation5 + $0x10] sm:$0xff]  ;;  %v12208_v34 = vld [vmem:[#allocation5 + $0x20] sm:$0xff] }
 0x806   : > { %3815 = vmax.xlane.f32.xlu1 %v12044_v47  ;;  %v12082_v28 = vadd.f32 %v8443_v52, %v3579_v18  ;;  %14544 = vst [vmem:[#allocation69_spill] sm:$0xff] %v12086_v27  ;;  %v8440_v1 = vunpack.c.h.bf16 %v8474_v17  ;;  %v12210_v47 = vld [vmem:[#allocation5 + $0x28] sm:$0xff] }
 0x807   : > { %14541 = vst [vmem:[#allocation66_spill] sm:$0xff] %v12075_v63  ;;  %14542 = vst [vmem:[#allocation67_spill] sm:$0xff] %v12078_v49  ;;  %v12100_v36 = vadd.f32 %v8439_v59, %v3577_v2 }
 0x808   : > { %14543 = vst [vmem:[#allocation68_spill] sm:$0xff] %v12082_v28  ;;  %v12103_v21 = vadd.f32 %v8440_v1, %v3578_v35  ;;  %v12136_v1 = vld [vmem:[#allocation5 + $0x80] sm:$0xff] }
 0x809   : > { %3793 = vmax.xlane.f32.xlu0 %v12046_v22  ;;  %14547 = vst [vmem:[#allocation72_spill] sm:$0xff] %v12100_v36 }
 0x80a   : > { %3795 = vmax.xlane.f32.xlu1 %v12049_v39  ;;  %14548 = vst [vmem:[#allocation73_spill] sm:$0xff] %v12103_v21  ;;  %v12191_v39 = vld [vmem:[#allocation5 + $0xb8] sm:$0xff] }
 0x80d   : > { %3825 = vmax.xlane.f32.xlu0 %v12053_v5 }
 0x80e   : > { %3827 = vmax.xlane.f32.xlu1 %v12056_v57  ;;  %v8466_v57 = vld [vmem:[%s10150_s8 + $0xb0] sm:$0xff]   ;;  %s12118_s8 = scalar_lea.vmem [#allocation4], %s8223_s15 }
 0x80f   : > { %v8407_v7 = vunpack.c.l.bf16 %v8466_v57  ;;  %v8408_v9 = vunpack.c.h.bf16 %v8466_v57  ;;  %v12106_v57 = vld [vmem:[#allocation5 + $0x90] sm:$0xff]  ;;  %v2752_v32 = vld [vmem:[%s12118_s8 + $0x80] sm:$0xff]  ;;  %v2753_v35 = vld [vmem:[%s12118_s8 + $0x88] sm:$0xff] }
 0x810   : > { %8910 = vmatprep.subr.bf16.mxu1 %v2752_v32  ;;  %v2744_v59 = vld [vmem:[%s12118_s8] sm:$0xff]  ;;  %v2758_v44 = vld [vmem:[%s12118_s8 + $0xb0] sm:$0xff]  ;;  %v2759_v30 = vld [vmem:[%s12118_s8 + $0xb8] sm:$0xff] }
 0x811   : > { %3789 = vmax.xlane.f32.xlu0 %v12063_v45  ;;  %v12093_v48 = vadd.f32 %v8407_v7, %v3561_v19  ;;  %v12097_v26 = vadd.f32 %v8408_v9, %v3562_v31  ;;  %v12121_v19 = vld [vmem:[#allocation5] sm:$0xff]  ;;  %v12123_v7 = vld [vmem:[#allocation5 + $0x18] sm:$0xff]  ;;  %8911 = vmatpush3.bf16.msra.mxu1 %v2752_v32 }
 0x812   : > { %3791 = vmax.xlane.f32.xlu1 %v12066_v60  ;;  %8878 = vmatprep.subr.bf16.mxu0 %v2744_v59  ;;  %v2747_v45 = vld [vmem:[%s12118_s8 + $0x18] sm:$0xff]  ;;  %v2756_v5 = vld [vmem:[%s12118_s8 + $0xa0] sm:$0xff]  ;;  %v2757_v60 = vld [vmem:[%s12118_s8 + $0xa8] sm:$0xff] }
 0x813   : > { %14545 = vst [vmem:[#allocation70_spill] sm:$0xff] %v12093_v48  ;;  %14546 = vst [vmem:[#allocation71_spill] sm:$0xff] %v12097_v26  ;;  %8912 = vmatprep.subr.bf16.mxu1 %v2753_v35  ;;  %8879 = vmatpush3.bf16.msra.mxu0 %v2744_v59  ;;  %v2748_v22 = vld [vmem:[%s12118_s8 + $0x20] sm:$0xff] }
 0x815   : > { %3821 = vmax.xlane.f32.xlu0 %v12070_v46  ;;  %8913 = vmatpush3.bf16.msra.mxu1 %v2753_v35 }
 0x816   : > { %3823 = vmax.xlane.f32.xlu1 %v12073_v14  ;;  %v12189_v14 = vld [vmem:[#allocation5 + $0xb0] sm:$0xff] }
 0x819   : > { %3801 = vmax.xlane.f32.xlu0 %v12075_v63  ;;  %v12170_v63 = vld [vmem:[#allocation5 + $0x30] sm:$0xff] }
 0x81a   : > { %3803 = vmax.xlane.f32.xlu1 %v12078_v49  ;;  %v2755_v49 = vld [vmem:[%s12118_s8 + $0x98] sm:$0xff] }
 0x81d   : > { %3833 = vmax.xlane.f32.xlu0 %v12082_v28  ;;  %v12154_v28 = vld [vmem:[#allocation5 + $0x8] sm:$0xff] }
 0x81e   : > { %3835 = vmax.xlane.f32.xlu1 %v12086_v27  ;;  %v2754_v27 = vld [vmem:[%s12118_s8 + $0x90] sm:$0xff] }
 0x81f   : > { %8914 = vmatprep.subr.bf16.mxu1 %v2754_v27 }
 0x820   : > { %8915 = vmatpush3.bf16.msra.mxu1 %v2754_v27 }
 0x821   : > { %3797 = vmax.xlane.f32.xlu0 %v12093_v48  ;;  %v12152_v48 = vld [vmem:[#allocation5 + $0x88] sm:$0xff]  ;;  %8916 = vmatprep.subr.bf16.mxu1 %v2755_v49 }
 0x822   : > { %3799 = vmax.xlane.f32.xlu1 %v12097_v26  ;;  %v12172_v26 = vld [vmem:[#allocation5 + $0x38] sm:$0xff] }
 0x824   : > { %8917 = vmatpush3.bf16.msra.mxu1 %v2755_v49 }
 0x825   : > { %3829 = vmax.xlane.f32.xlu0 %v12100_v36  ;;  %v2745_v36 = vld [vmem:[%s12118_s8 + $0x8] sm:$0xff]  ;;  %8918 = vmatprep.subr.bf16.mxu1 %v2756_v5 }
 0x826   : > { %3831 = vmax.xlane.f32.xlu1 %v12103_v21  ;;  %8880 = vmatprep.subr.bf16.mxu0 %v2745_v36  ;;  %v2746_v21 = vld [vmem:[%s12118_s8 + $0x10] sm:$0xff] }
 0x827   : > { %8881 = vmatpush3.bf16.msra.mxu0 %v2745_v36 }
 0x828   : > { %8882 = vmatprep.subr.bf16.mxu0 %v2746_v21  ;;  %8919 = vmatpush3.bf16.msra.mxu1 %v2756_v5 }
 0x829   : > { %8920 = vmatprep.subr.bf16.mxu1 %v2757_v60 }
 0x82b   : > { %8883 = vmatpush3.bf16.msra.mxu0 %v2746_v21 }
 0x82c   : > { %8884 = vmatprep.subr.bf16.mxu0 %v2747_v45  ;;  %8921 = vmatpush3.bf16.msra.mxu1 %v2757_v60 }
 0x82d   : > { %8922 = vmatprep.subr.bf16.mxu1 %v2758_v44 }
 0x82f   : > { %8885 = vmatpush3.bf16.msra.mxu0 %v2747_v45 }
 0x830   : > { %8886 = vmatprep.subr.bf16.mxu0 %v2748_v22  ;;  %8923 = vmatpush3.bf16.msra.mxu1 %v2758_v44 }
 0x831   : > { %8924 = vmatprep.subr.bf16.mxu1 %v2759_v30 }
 0x833   : > { %8887 = vmatpush3.bf16.msra.mxu0 %v2748_v22 }
 0x834   : > { %8925 = vmatpush3.bf16.msra.mxu1 %v2759_v30 }
 0x835   : > { %v3714_v18 = vpop.xlane.xlu1 %3713 }
 0x836   : > { %v3746_v8 = vpop.xlane.xlu0 %3745  ;;  %v12114_v11 = vmax.f32 %v12108_v25, %v3714_v18 }
 0x837   : > { %v12111_v52 = vmax.f32 %v12106_v57, %v3746_v8  ;;  %v12138_v8 = vld [vmem:[#allocation5 + $0x98] sm:$0xff] }
 0x838   : > { %5988 = vst.msk [vmem:[#allocation5 + $0x10] sm:$0xff] %vm4925_vm6, %v12114_v11  ;;  %4105 = vperm.xlu1 %9384, %v12114_v11   ;;  %v3903_v22 = vsub.f32 %v12108_v25, %v12114_v11 }
 0x839   : > { %6004 = vst.msk [vmem:[#allocation5 + $0x90] sm:$0xff] %vm4925_vm6, %v12111_v52  ;;  %v3716_v31 = vpop.xlane.xlu1 %3715  ;;  %v3919_v44 = vsub.f32 %v12106_v57, %v12111_v52 }
 0x83a   : > { %v3710_v17 = vpop.xlane.xlu0 %3709  ;;  %v12132_v2 = vmax.f32 %v12123_v7, %v3716_v31  ;;  %v3969_v25 = vmul.f32 1.442695, %v3903_v22 }
 0x83b   : > { %v3837_v9 = vmax.f32 %v12121_v19, %v3710_v17  ;;  %v4001_v30 = vmul.f32 1.442695, %v3919_v44 }
 0x83c   : > { %5989 = vst.msk [vmem:[#allocation5 + $0x18] sm:$0xff] %vm4925_vm6, %v12132_v2  ;;  %4185 = vperm.xlu1 %9384, %v12111_v52   ;;  %v3904_v21 = vsub.f32 %v12123_v7, %v12132_v2 }
 0x83d   : > { %5986 = vst.msk [vmem:[#allocation5] sm:$0xff] %vm4925_vm6, %v3837_v9  ;;  %4095 = vperm.xlu0 %9385, %v3837_v9   ;;  %v3748_v32 = vpop.xlane.xlu1 %3747  ;;  %v3901_v27 = vsub.f32 %v12121_v19, %v3837_v9 }
 0x83e   : > { %v3742_v18 = vpop.xlane.xlu0 %3741  ;;  %v12148_v31 = vmax.f32 %v12138_v8, %v3748_v32  ;;  %v3971_v5 = vmul.f32 1.442695, %v3904_v21 }
 0x83f   : > { %v12145_v17 = vmax.f32 %v12136_v1, %v3742_v18  ;;  %v3965_v49 = vmul.f32 1.442695, %v3901_v27 }
 0x840   : > { %6005 = vst.msk [vmem:[#allocation5 + $0x98] sm:$0xff] %vm4925_vm6, %v12148_v31  ;;  %v3920_v45 = vsub.f32 %v12138_v8, %v12148_v31 }
 0x841   : > { %6002 = vst.msk [vmem:[#allocation5 + $0x80] sm:$0xff] %vm4925_vm6, %v12145_v17  ;;  %4190 = vperm.xlu0 %9385, %v12148_v31   ;;  %4175 = vperm.xlu1 %9384, %v12145_v17   ;;  %v3744_v59 = vpop.xlane.xlu1 %3743  ;;  %9386 = vpow2.f32 %v3965_v49  ;;  %v12230_v49 = vld [vmem:[#allocation5 + $0xa8] sm:$0xff] }
 0x842   : > { %v3712_v35 = vpop.xlane.xlu0 %3711  ;;  %v12163_v18 = vmax.f32 %v12152_v48, %v3744_v59  ;;  %9388 = vpow2.f32 %v3971_v5  ;;  %v4003_v60 = vmul.f32 1.442695, %v3920_v45 }
 0x843   : > { %v12166_v32 = vmax.f32 %v12154_v28, %v3712_v35 }
 0x844   : > { %6003 = vst.msk [vmem:[#allocation5 + $0x88] sm:$0xff] %vm4925_vm6, %v12163_v18  ;;  %9390 = vpow2.f32 %v4003_v60  ;;  %v3918_v57 = vsub.f32 %v12152_v48, %v12163_v18 }
 0x845   : > { %5987 = vst.msk [vmem:[#allocation5 + $0x8] sm:$0xff] %vm4925_vm6, %v12166_v32  ;;  %4180 = vperm.xlu0 %9385, %v12163_v18   ;;  %4110 = vperm.xlu1 %9384, %v12132_v2   ;;  %v3724_v59 = vpop.xlane.xlu1 %3723  ;;  %9392 = vpow2.f32 %v3969_v25 }
 0x846   : > { %v3722_v36 = vpop.xlane.xlu0 %3721  ;;  %v12185_v46 = vmax.f32 %v12172_v26, %v3724_v59  ;;  %9394 = vpow2.f32 %v4001_v30  ;;  %v3999_v48 = vmul.f32 1.442695, %v3918_v57  ;;  %v3917_v30 = vsub.f32 %v12136_v1, %v12145_v17 }
 0x847   : > { %v12182_v35 = vmax.f32 %v12170_v63, %v3722_v36 }
 0x848   : > { %5993 = vst.msk [vmem:[#allocation5 + $0x38] sm:$0xff] %vm4925_vm6, %v12185_v46  ;;  %9396 = vpow2.f32 %v3999_v48  ;;  %v3997_v1 = vmul.f32 1.442695, %v3917_v30  ;;  %v3908_v17 = vsub.f32 %v12172_v26, %v12185_v46 }
 0x849   : > { %5992 = vst.msk [vmem:[#allocation5 + $0x30] sm:$0xff] %vm4925_vm6, %v12182_v35  ;;  %4100 = vperm.xlu1 %9384, %v12166_v32   ;;  %v3756_v9 = vpop.xlane.xlu1 %3755 }
 0x84a   : > { %v3754_v19 = vpop.xlane.xlu0 %3753  ;;  %v12204_v59 = vmax.f32 %v12191_v39, %v3756_v9  ;;  %v2749_v9 = vld [vmem:[%s12118_s8 + $0x28] sm:$0xff]  ;;  %9398 = vpow2.f32 %v3997_v1 }
 0x84b   : > { %v12201_v36 = vmax.f32 %v12189_v14, %v3754_v19  ;;  %8888 = vmatprep.subr.bf16.mxu0 %v2749_v9 }
 0x84c   : > { %6009 = vst.msk [vmem:[#allocation5 + $0xb8] sm:$0xff] %vm4925_vm6, %v12204_v59  ;;  %4210 = vperm.xlu0 %9385, %v12204_v59   ;;  %8889 = vmatpush3.bf16.msra.mxu0 %v2749_v9  ;;  %v3924_v26 = vsub.f32 %v12191_v39, %v12204_v59  ;;  %v3902_v39 = vsub.f32 %v12154_v28, %v12166_v32 }
 0x84d   : > { %6008 = vst.msk [vmem:[#allocation5 + $0xb0] sm:$0xff] %vm4925_vm6, %v12201_v36  ;;  %4125 = vperm.xlu1 %9384, %v12182_v35   ;;  %v3720_v2 = vpop.xlane.xlu1 %3719  ;;  %v3907_v32 = vsub.f32 %v12170_v63, %v12182_v35  ;;  %v3923_v13 = vsub.f32 %v12189_v14, %v12201_v36 }
 0x84e   : > { %v3718_v7 = vpop.xlane.xlu0 %3717  ;;  %v12224_v19 = vmax.f32 %v12210_v47, %v3720_v2  ;;  %v2750_v2 = vld [vmem:[%s12118_s8 + $0x30] sm:$0xff]  ;;  %v4011_v59 = vmul.f32 1.442695, %v3924_v26  ;;  %v3967_v28 = vmul.f32 1.442695, %v3902_v39 }
 0x84f   : > { %v12221_v27 = vmax.f32 %v12208_v34, %v3718_v7  ;;  %8890 = vmatprep.subr.bf16.mxu0 %v2750_v2  ;;  %v3977_v63 = vmul.f32 1.442695, %v3907_v32  ;;  %v4009_v51 = vmul.f32 1.442695, %v3923_v13  ;;  %v12476_v13 = vld [vmem:[#allocation5 + $0x188] sm:$0xff] }
 0x850   : > { %5991 = vst.msk [vmem:[#allocation5 + $0x28] sm:$0xff] %vm4925_vm6, %v12224_v19  ;;  %8891 = vmatpush3.bf16.msra.mxu0 %v2750_v2  ;;  %v3906_v35 = vsub.f32 %v12210_v47, %v12224_v19  ;;  %14565 = vst [vmem:[#allocation90_spill] sm:$0xff] %v12476_v13 }
 0x851   : > { %5990 = vst.msk [vmem:[#allocation5 + $0x20] sm:$0xff] %vm4925_vm6, %v12221_v27  ;;  %4205 = vperm.xlu1 %9384, %v12201_v36   ;;  %v3752_v31 = vpop.xlane.xlu1 %3751 }
 0x852   : > { %v3750_v8 = vpop.xlane.xlu0 %3749  ;;  %v12243_v7 = vmax.f32 %v12230_v49, %v3752_v31  ;;  %v12266_v31 = vpop.eup %9386  ;;  %v3975_v47 = vmul.f32 1.442695, %v3906_v35 }
 0x853   : > { %v12240_v21 = vmax.f32 %v12228_v24, %v3750_v8  ;;  %v2751_v8 = vld [vmem:[%s12118_s8 + $0x38] sm:$0xff]  ;;  %14549 = vst [vmem:[#allocation74_spill] sm:$0xff] %v12266_v31 }
 0x854   : > { %6007 = vst.msk [vmem:[#allocation5 + $0xa8] sm:$0xff] %vm4925_vm6, %v12243_v7  ;;  %4200 = vperm.xlu0 %9385, %v12243_v7   ;;  %8892 = vmatprep.subr.bf16.mxu0 %v2751_v8 }
 0x855   : > { %6006 = vst.msk [vmem:[#allocation5 + $0xa0] sm:$0xff] %vm4925_vm6, %v12240_v21  ;;  %4115 = vperm.xlu1 %9384, %v12221_v27   ;;  %v3732_v5 = vpop.xlane.xlu1 %3731  ;;  %8893 = vmatpush3.bf16.msra.mxu0 %v2751_v8 }
 0x856   : > { %v3730_v11 = vpop.xlane.xlu0 %3729  ;;  %v12263_v9 = vmax.f32 %v12249_v62, %v3732_v5  ;;  %v12288_v5 = vld [vmem:[#allocation5 + $0x40] sm:$0xff] }
 0x857   : > { %v12260_v45 = vmax.f32 %v12247_v4, %v3730_v11  ;;  %v12286_v11 = vpop.eup %9388 }
 0x858   : > { %5997 = vst.msk [vmem:[#allocation5 + $0x58] sm:$0xff] %vm4925_vm6, %v12263_v9  ;;  %5056 = vperm.xlu0 %9385, %v12266_v31   ;;  %14550 = vst [vmem:[#allocation75_spill] sm:$0xff] %v12286_v11  ;;  %v12290_v31 = vld [vmem:[#allocation5 + $0x48] sm:$0xff] }
 0x859   : > { %5996 = vst.msk [vmem:[#allocation5 + $0x50] sm:$0xff] %vm4925_vm6, %v12260_v45  ;;  %4195 = vperm.xlu1 %9384, %v12240_v21   ;;  %v3764_v22 = vpop.xlane.xlu1 %3763 }
 0x85a   : > { %v3762_v52 = vpop.xlane.xlu0 %3761  ;;  %v12284_v2 = vmax.f32 %v12270_v40, %v3764_v22  ;;  %v12306_v22 = vld [vmem:[#allocation5 + $0xc0] sm:$0xff] }
 0x85b   : > { %v12281_v60 = vmax.f32 %v12268_v23, %v3762_v52  ;;  %v12304_v52 = vpop.eup %9390 }
 0x85c   : > { %6013 = vst.msk [vmem:[#allocation5 + $0xd8] sm:$0xff] %vm4925_vm6, %v12284_v2  ;;  %5071 = vperm.xlu0 %9385, %v12286_v11   ;;  %14551 = vst [vmem:[#allocation76_spill] sm:$0xff] %v12304_v52  ;;  %v12324_v6 = vpop.eup %9392 }
 0x85d   : > { %6012 = vst.msk [vmem:[#allocation5 + $0xd0] sm:$0xff] %vm4925_vm6, %v12281_v60  ;;  %4130 = vperm.xlu1 %9384, %v12185_v46   ;;  %v3728_v44 = vpop.xlane.xlu1 %3727  ;;  %14552 = vst [vmem:[#allocation77_spill] sm:$0xff] %v12324_v6  ;;  %v12344_v10 = vpop.eup %9394  ;;  %v3979_v46 = vmul.f32 1.442695, %v3908_v17 }
 0x85e   : > { %v3726_v18 = vpop.xlane.xlu0 %3725  ;;  %v12302_v8 = vmax.f32 %v12290_v31, %v3728_v44  ;;  %14553 = vst [vmem:[#allocation78_spill] sm:$0xff] %v12344_v10  ;;  %v12364_v0 = vpop.eup %9396 }
 0x85f   : > { %v12299_v25 = vmax.f32 %v12288_v5, %v3726_v18  ;;  %14554 = vst [vmem:[#allocation79_spill] sm:$0xff] %v12364_v0  ;;  %9400 = vpow2.f32 %v3979_v46 }
 0x860   : > { %5995 = vst.msk [vmem:[#allocation5 + $0x48] sm:$0xff] %vm4925_vm6, %v12302_v8  ;;  %5151 = vperm.xlu0 %9385, %v12304_v52   ;;  %9402 = vpow2.f32 %v4011_v59  ;;  %v12416_v59 = vld [vmem:[#allocation5 + $0x118] sm:$0xff] }
 0x861   : > { %5994 = vst.msk [vmem:[#allocation5 + $0x40] sm:$0xff] %vm4925_vm6, %v12299_v25  ;;  %4120 = vperm.xlu1 %9384, %v12224_v19   ;;  %v3760_v18 = vpop.xlane.xlu1 %3759  ;;  %9404 = vpow2.f32 %v3967_v28  ;;  %14557 = vst [vmem:[#allocation82_spill] sm:$0xff] %v12416_v59  ;;  %v3922_v19 = vsub.f32 %v12230_v49, %v12243_v7 }
 0x862   : > { %v3758_v57 = vpop.xlane.xlu0 %3757  ;;  %v12322_v11 = vmax.f32 %v12308_v58, %v3760_v18  ;;  %9406 = vpow2.f32 %v3977_v63  ;;  %v12445_v63 = vld [vmem:[#allocation5 + $0x100] sm:$0xff] }
 0x863   : > { %v12319_v44 = vmax.f32 %v12306_v22, %v3758_v57  ;;  %14562 = vst [vmem:[#allocation87_spill] sm:$0xff] %v12445_v63  ;;  %9408 = vpow2.f32 %v4009_v51  ;;  %v4007_v7 = vmul.f32 1.442695, %v3922_v19  ;;  %v3905_v19 = vsub.f32 %v12208_v34, %v12221_v27 }
 0x864   : > { %6011 = vst.msk [vmem:[#allocation5 + $0xc8] sm:$0xff] %vm4925_vm6, %v12322_v11  ;;  %4150 = vperm.xlu0 %9385, %v12263_v9   ;;  %9410 = vpow2.f32 %v3975_v47  ;;  %v3921_v34 = vsub.f32 %v12228_v24, %v12240_v21 }
 0x865   : > { %6010 = vst.msk [vmem:[#allocation5 + $0xc0] sm:$0xff] %vm4925_vm6, %v12319_v44  ;;  %5066 = vperm.xlu1 %9384, %v12324_v6   ;;  %v3740_v57 = vpop.xlane.xlu1 %3739  ;;  %9412 = vpow2.f32 %v4007_v7  ;;  %v3973_v7 = vmul.f32 1.442695, %v3905_v19 }
 0x866   : > { %v3738_v48 = vpop.xlane.xlu0 %3737  ;;  %v12342_v52 = vmax.f32 %v12328_v20, %v3740_v57 }
 0x867   : > { %v12339_v18 = vmax.f32 %v12326_v55, %v3738_v48  ;;  %9414 = vpow2.f32 %v3973_v7  ;;  %v12535_v7 = vld [vmem:[#allocation5 + $0x120] sm:$0xff] }
 0x868   : > { %6001 = vst.msk [vmem:[#allocation5 + $0x78] sm:$0xff] %vm4925_vm6, %v12342_v52  ;;  %4230 = vperm.xlu0 %9385, %v12284_v2  }
 0x869   : > { %6000 = vst.msk [vmem:[#allocation5 + $0x70] sm:$0xff] %vm4925_vm6, %v12339_v18  ;;  %5146 = vperm.xlu1 %9384, %v12344_v10   ;;  %v3772_v48 = vpop.xlane.xlu1 %3771  ;;  %v12384_v10 = vld [vmem:[#allocation5 + $0xe0] sm:$0xff] }
 0x86a   : > { %v3770_v30 = vpop.xlane.xlu0 %3769  ;;  %v12362_v6 = vmax.f32 %v12348_v54, %v3772_v48 }
 0x86b   : > { %v12359_v57 = vmax.f32 %v12346_v16, %v3770_v30 }
 0x86c   : > { %6017 = vst.msk [vmem:[#allocation5 + $0xf8] sm:$0xff] %vm4925_vm6, %v12362_v6  ;;  %5141 = vperm.xlu0 %9385, %v12364_v0   ;;  %v12402_v0 = vpop.eup %9398 }
 0x86d   : > { %6016 = vst.msk [vmem:[#allocation5 + $0xf0] sm:$0xff] %vm4925_vm6, %v12359_v57  ;;  %4145 = vperm.xlu1 %9384, %v12260_v45   ;;  %v3736_v17 = vpop.xlane.xlu1 %3735  ;;  %14555 = vst [vmem:[#allocation80_spill] sm:$0xff] %v12402_v0  ;;  %v12421_v36 = vpop.eup %9400 }
 0x86e   : > { %v3734_v1 = vpop.xlane.xlu0 %3733  ;;  %v12382_v48 = vmax.f32 %v12368_v29, %v3736_v17  ;;  %14558 = vst [vmem:[#allocation83_spill] sm:$0xff] %v12421_v36 }
 0x86f   : > { %v12379_v30 = vmax.f32 %v12366_v38, %v3734_v1 }
 0x870   : > { %5999 = vst.msk [vmem:[#allocation5 + $0x68] sm:$0xff] %vm4925_vm6, %v12382_v48  ;;  %4140 = vperm.xlu0 %9385, %v12302_v8  }
 0x871   : > { %5998 = vst.msk [vmem:[#allocation5 + $0x60] sm:$0xff] %vm4925_vm6, %v12379_v30  ;;  %4225 = vperm.xlu1 %9384, %v12281_v60   ;;  %v3768_v26 = vpop.xlane.xlu1 %3767 }
 0x872   : > { %v3766_v46 = vpop.xlane.xlu0 %3765  ;;  %v12400_v17 = vmax.f32 %v12386_v42, %v3768_v26  ;;  %v12423_v26 = vld [vmem:[#allocation5 + $0x190] sm:$0xff] }
 0x873   : > { %v12397_v1 = vmax.f32 %v12384_v10, %v3766_v46  ;;  %14559 = vst [vmem:[#allocation84_spill] sm:$0xff] %v12423_v26 }
 0x874   : > { %6015 = vst.msk [vmem:[#allocation5 + $0xe8] sm:$0xff] %vm4925_vm6, %v12400_v17  ;;  %4220 = vperm.xlu0 %9385, %v12322_v11  }
 0x875   : > { %6014 = vst.msk [vmem:[#allocation5 + $0xe0] sm:$0xff] %vm4925_vm6, %v12397_v1  ;;  %5136 = vperm.xlu1 %9384, %v12402_v0  }
 0x876   : > { %v3778_v39 = vpop.xlane.xlu0 %3777 }
 0x877   : > { %v12419_v14 = vmax.f32 %v12404_v15, %v3778_v39  ;;  %v3780_v46 = vpop.xlane.xlu1 %3779  ;;  %v12434_v39 = vld [vmem:[#allocation5 + $0x198] sm:$0xff] }
 0x878   : > { %v12428_v28 = vmax.f32 %v12416_v59, %v3780_v46  ;;  %5091 = vperm.xlu0 %9385, %v12421_v36   ;;  %14560 = vst [vmem:[#allocation85_spill] sm:$0xff] %v12434_v39  ;;  %v12443_v36 = vpop.eup %9402 }
 0x879   : > { %6020 = vst.msk [vmem:[#allocation5 + $0x110] sm:$0xff] %vm4925_vm6, %v12419_v14  ;;  %4135 = vperm.xlu1 %9384, %v12299_v25   ;;  %14561 = vst [vmem:[#allocation86_spill] sm:$0xff] %v12443_v36 }
 0x87a   : > { %v3810_v32 = vpop.xlane.xlu0 %3809  ;;  %6021 = vst.msk [vmem:[#allocation5 + $0x118] sm:$0xff] %vm4925_vm6, %v12428_v28 }
 0x87b   : > { %v12441_v46 = vmax.f32 %v12423_v26, %v3810_v32  ;;  %v3812_v0 = vpop.xlane.xlu1 %3811  ;;  %v12454_v32 = vld [vmem:[#allocation5 + $0x108] sm:$0xff] }
 0x87c   : > { %v12450_v49 = vmax.f32 %v12434_v39, %v3812_v0  ;;  %5171 = vperm.xlu0 %9385, %v12443_v36   ;;  %v12463_v0 = vpop.eup %9404  ;;  %v12465_v36 = vld [vmem:[#allocation5 + $0x180] sm:$0xff] }
 0x87d   : > { %6036 = vst.msk [vmem:[#allocation5 + $0x190] sm:$0xff] %vm4925_vm6, %v12441_v46  ;;  %4215 = vperm.xlu1 %9384, %v12319_v44   ;;  %14563 = vst [vmem:[#allocation88_spill] sm:$0xff] %v12463_v0  ;;  %v12485_v59 = vpop.eup %9406 }
 0x87e   : > { %v3774_v35 = vpop.xlane.xlu0 %3773  ;;  %6037 = vst.msk [vmem:[#allocation5 + $0x198] sm:$0xff] %vm4925_vm6, %v12450_v49  ;;  %14564 = vst [vmem:[#allocation89_spill] sm:$0xff] %v12465_v36 }
 0x87f   : > { %v12461_v51 = vmax.f32 %v12445_v63, %v3774_v35  ;;  %v3776_v26 = vpop.xlane.xlu1 %3775  ;;  %14566 = vst [vmem:[#allocation91_spill] sm:$0xff] %v12485_v59  ;;  %v12502_v63 = vpop.eup %9408 }
 0x880   : > { %v12470_v47 = vmax.f32 %v12454_v32, %v3776_v26  ;;  %4170 = vperm.xlu0 %9385, %v12342_v52   ;;  %14569 = vst [vmem:[#allocation94_spill] sm:$0xff] %v12502_v63  ;;  %v12511_v21 = vpop.eup %9410 }
 0x881   : > { %6018 = vst.msk [vmem:[#allocation5 + $0x100] sm:$0xff] %vm4925_vm6, %v12461_v51  ;;  %5061 = vperm.xlu1 %9384, %v12463_v0   ;;  %v12487_v0 = vld [vmem:[#allocation5 + $0x130] sm:$0xff]  ;;  %14570 = vst [vmem:[#allocation95_spill] sm:$0xff] %v12511_v21 }
 0x882   : > { %v3806_v35 = vpop.xlane.xlu0 %3805  ;;  %6019 = vst.msk [vmem:[#allocation5 + $0x108] sm:$0xff] %vm4925_vm6, %v12470_v47  ;;  %14567 = vst [vmem:[#allocation92_spill] sm:$0xff] %v12487_v0 }
 0x883   : > { %v12483_v26 = vmax.f32 %v12465_v36, %v3806_v35  ;;  %v3808_v15 = vpop.xlane.xlu1 %3807  ;;  %v3912_v35 = vsub.f32 %v12249_v62, %v12263_v9  ;;  %v12500_v36 = vld [vmem:[#allocation5 + $0x138] sm:$0xff]  ;;  %v4005_v62 = vmul.f32 1.442695, %v3921_v34  ;;  %v12546_v34 = vld [vmem:[#allocation5 + $0x128] sm:$0xff] }
 0x884   : > { %v12494_v27 = vmax.f32 %v12476_v13, %v3808_v15  ;;  %4250 = vperm.xlu0 %9385, %v12362_v6   ;;  %14568 = vst [vmem:[#allocation93_spill] sm:$0xff] %v12500_v36  ;;  %v12524_v13 = vld [vmem:[#allocation5 + $0x1b8] sm:$0xff] }
 0x885   : > { %6034 = vst.msk [vmem:[#allocation5 + $0x180] sm:$0xff] %vm4925_vm6, %v12483_v26  ;;  %5086 = vperm.xlu1 %9384, %v12485_v59   ;;  %v12513_v59 = vld [vmem:[#allocation5 + $0x1b0] sm:$0xff]  ;;  %v3987_v24 = vmul.f32 1.442695, %v3912_v35  ;;  %14572 = vst [vmem:[#allocation97_spill] sm:$0xff] %v12524_v13  ;;  %9416 = vpow2.f32 %v4005_v62  ;;  %v12568_v62 = vld [vmem:[#allocation5 + $0x1a8] sm:$0xff] }
 0x886   : > { %v3786_v39 = vpop.xlane.xlu0 %3785  ;;  %6035 = vst.msk [vmem:[#allocation5 + $0x188] sm:$0xff] %vm4925_vm6, %v12494_v27  ;;  %14571 = vst [vmem:[#allocation96_spill] sm:$0xff] %v12513_v59 }
 0x887   : > { %v12509_v15 = vmax.f32 %v12487_v0, %v3786_v39  ;;  %v3788_v19 = vpop.xlane.xlu1 %3787  ;;  %v3928_v39 = vsub.f32 %v12270_v40, %v12284_v2  ;;  %9418 = vpow2.f32 %v3987_v24  ;;  %v3911_v24 = vsub.f32 %v12247_v4, %v12260_v45 }
 0x888   : > { %v12518_v9 = vmax.f32 %v12500_v36, %v3788_v19  ;;  %5081 = vperm.xlu0 %9385, %v12511_v21   ;;  %v12533_v21 = vpop.eup %9412  ;;  %v3916_v4 = vsub.f32 %v12328_v20, %v12342_v52  ;;  %v3909_v52 = vsub.f32 %v12288_v5, %v12299_v25  ;;  %v3914_v5 = vsub.f32 %v12368_v29, %v12382_v48 }
 0x889   : > { %6024 = vst.msk [vmem:[#allocation5 + $0x130] sm:$0xff] %vm4925_vm6, %v12509_v15  ;;  %5166 = vperm.xlu1 %9384, %v12502_v63   ;;  %14573 = vst [vmem:[#allocation98_spill] sm:$0xff] %v12533_v21  ;;  %v4019_v2 = vmul.f32 1.442695, %v3928_v39  ;;  %v3926_v39 = vsub.f32 %v12308_v58, %v12322_v11  ;;  %v3927_v58 = vsub.f32 %v12268_v23, %v12281_v60 }
 0x88a   : > { %v3818_v0 = vpop.xlane.xlu0 %3817  ;;  %6025 = vst.msk [vmem:[#allocation5 + $0x138] sm:$0xff] %vm4925_vm6, %v12518_v9  ;;  %v3915_v29 = vsub.f32 %v12326_v55, %v12339_v18 }
 0x88b   : > { %v12531_v19 = vmax.f32 %v12513_v59, %v3818_v0  ;;  %v3820_v63 = vpop.xlane.xlu1 %3819  ;;  %v3910_v0 = vsub.f32 %v12290_v31, %v12302_v8  ;;  %v12555_v59 = vld [vmem:[#allocation5 + $0x1a0] sm:$0xff]  ;;  %9420 = vpow2.f32 %v4019_v2  ;;  %v12579_v2 = vld [vmem:[#allocation5 + $0x150] sm:$0xff]  ;;  %v4017_v20 = vmul.f32 1.442695, %v3927_v58  ;;  %v12618_v58 = vld [vmem:[#allocation5 + $0x1d8] sm:$0xff] }
 0x88c   : > { %v12540_v40 = vmax.f32 %v12524_v13, %v3820_v63  ;;  %5161 = vperm.xlu0 %9385, %v12533_v21   ;;  %14574 = vst [vmem:[#allocation99_spill] sm:$0xff] %v12555_v59  ;;  %14576 = vst [vmem:[#allocation101_spill] sm:$0xff] %v12579_v2 }
 0x88d   : > { %6040 = vst.msk [vmem:[#allocation5 + $0x1b0] sm:$0xff] %vm4925_vm6, %v12531_v19  ;;  %4165 = vperm.xlu1 %9384, %v12339_v18   ;;  %v3983_v8 = vmul.f32 1.442695, %v3910_v0  ;;  %v3985_v0 = vmul.f32 1.442695, %v3911_v24  ;;  %v12592_v24 = vld [vmem:[#allocation5 + $0x158] sm:$0xff] }
 0x88e   : > { %v3782_v35 = vpop.xlane.xlu0 %3781  ;;  %6041 = vst.msk [vmem:[#allocation5 + $0x1b8] sm:$0xff] %vm4925_vm6, %v12540_v40  ;;  %14580 = vst [vmem:[#allocation105_spill] sm:$0xff] %v12618_v58 }
 0x88f   : > { %v12553_v63 = vmax.f32 %v12535_v7, %v3782_v35  ;;  %v3784_v21 = vpop.xlane.xlu1 %3783  ;;  %9422 = vpow2.f32 %v3983_v8 }
 0x890   : > { %v12562_v31 = vmax.f32 %v12546_v34, %v3784_v21  ;;  %4160 = vperm.xlu0 %9385, %v12382_v48   ;;  %v12577_v21 = vpop.eup %9414  ;;  %9424 = vpow2.f32 %v3985_v0 }
 0x891   : > { %6022 = vst.msk [vmem:[#allocation5 + $0x120] sm:$0xff] %vm4925_vm6, %v12553_v63  ;;  %4245 = vperm.xlu1 %9384, %v12359_v57   ;;  %14575 = vst [vmem:[#allocation100_spill] sm:$0xff] %v12577_v21  ;;  %v12594_v36 = vpop.eup %9416 }
 0x892   : > { %v3814_v35 = vpop.xlane.xlu0 %3813  ;;  %6023 = vst.msk [vmem:[#allocation5 + $0x128] sm:$0xff] %vm4925_vm6, %v12562_v31  ;;  %14577 = vst [vmem:[#allocation102_spill] sm:$0xff] %v12594_v36 }
 0x893   : > { %v12575_v45 = vmax.f32 %v12555_v59, %v3814_v35  ;;  %v3816_v13 = vpop.xlane.xlu1 %3815  ;;  %v4015_v35 = vmul.f32 1.442695, %v3926_v39  ;;  %v12605_v39 = vld [vmem:[#allocation5 + $0x1d0] sm:$0xff] }
 0x894   : > { %v12586_v11 = vmax.f32 %v12568_v62, %v3816_v13  ;;  %4240 = vperm.xlu0 %9385, %v12400_v17   ;;  %v12603_v13 = vpop.eup %9418  ;;  %14579 = vst [vmem:[#allocation104_spill] sm:$0xff] %v12605_v39 }
 0x895   : > { %6038 = vst.msk [vmem:[#allocation5 + $0x1a0] sm:$0xff] %vm4925_vm6, %v12575_v45  ;;  %5076 = vperm.xlu1 %9384, %v12577_v21   ;;  %14578 = vst [vmem:[#allocation103_spill] sm:$0xff] %v12603_v13  ;;  %9426 = vpow2.f32 %v4015_v35  ;;  %v3932_v21 = vsub.f32 %v12348_v54, %v12362_v6  ;;  %v12629_v35 = vld [vmem:[#allocation5 + $0x140] sm:$0xff]  ;;  %v3925_v6 = vsub.f32 %v12306_v22, %v12319_v44 }
 0x896   : > { %v3794_v59 = vpop.xlane.xlu0 %3793  ;;  %6039 = vst.msk [vmem:[#allocation5 + $0x1a8] sm:$0xff] %vm4925_vm6, %v12586_v11  ;;  %14582 = vst [vmem:[#allocation107_spill] sm:$0xff] %v12629_v35  ;;  %9428 = vpow2.f32 %v4017_v20  ;;  %v3930_v22 = vsub.f32 %v12386_v42, %v12400_v17  ;;  %v3931_v17 = vsub.f32 %v12346_v16, %v12359_v57 }
 0x897   : > { %v12601_v60 = vmax.f32 %v12579_v2, %v3794_v59  ;;  %v3796_v8 = vpop.xlane.xlu1 %3795  ;;  %v3995_v59 = vmul.f32 1.442695, %v3916_v4  ;;  %v3981_v4 = vmul.f32 1.442695, %v3909_v52  ;;  %v12642_v52 = vld [vmem:[#allocation5 + $0x148] sm:$0xff] }
 0x898   : > { %v12612_v23 = vmax.f32 %v12592_v24, %v3796_v8  ;;  %5111 = vperm.xlu0 %9385, %v12603_v13   ;;  %v12627_v8 = vpop.eup %9420  ;;  %14583 = vst [vmem:[#allocation108_spill] sm:$0xff] %v12642_v52  ;;  %v4025_v57 = vmul.f32 1.442695, %v3931_v17  ;;  %v3929_v17 = vsub.f32 %v12384_v10, %v12397_v1 }
 0x899   : > { %6028 = vst.msk [vmem:[#allocation5 + $0x150] sm:$0xff] %vm4925_vm6, %v12601_v60  ;;  %5156 = vperm.xlu1 %9384, %v12594_v36   ;;  %14581 = vst [vmem:[#allocation106_spill] sm:$0xff] %v12627_v8  ;;  %9430 = vpow2.f32 %v3995_v59  ;;  %v12653_v59 = vld [vmem:[#allocation5 + $0x1c0] sm:$0xff] }
 0x89a   : > { %v3826_v0 = vpop.xlane.xlu0 %3825  ;;  %6029 = vst.msk [vmem:[#allocation5 + $0x158] sm:$0xff] %vm4925_vm6, %v12612_v23  ;;  %14585 = vst [vmem:[#allocation110_spill] sm:$0xff] %v12653_v59  ;;  %9432 = vpow2.f32 %v3981_v4 }
 0x89b   : > { %v12625_v25 = vmax.f32 %v12605_v39, %v3826_v0  ;;  %v3828_v13 = vpop.xlane.xlu1 %3827  ;;  %v4027_v0 = vmul.f32 1.442695, %v3932_v21  ;;  %v4013_v21 = vmul.f32 1.442695, %v3925_v6  ;;  %v12666_v6 = vld [vmem:[#allocation5 + $0x1c8] sm:$0xff] }
 0x89c   : > { %v12636_v54 = vmax.f32 %v12618_v58, %v3828_v13  ;;  %5191 = vperm.xlu0 %9385, %v12627_v8   ;;  %v12651_v13 = vpop.eup %9422  ;;  %14586 = vst [vmem:[#allocation111_spill] sm:$0xff] %v12666_v6 }
 0x89d   : > { %6044 = vst.msk [vmem:[#allocation5 + $0x1d0] sm:$0xff] %vm4925_vm6, %v12625_v25  ;;  %4155 = vperm.xlu1 %9384, %v12379_v30   ;;  %14584 = vst [vmem:[#allocation109_spill] sm:$0xff] %v12651_v13  ;;  %9434 = vpow2.f32 %v4027_v0  ;;  %v12668_v36 = vpop.eup %9424  ;;  %v4023_v0 = vmul.f32 1.442695, %v3930_v22  ;;  %v3913_v22 = vsub.f32 %v12366_v38, %v12379_v30 }
 0x89e   : > { %v3790_v20 = vpop.xlane.xlu0 %3789  ;;  %6045 = vst.msk [vmem:[#allocation5 + $0x1d8] sm:$0xff] %vm4925_vm6, %v12636_v54  ;;  %14587 = vst [vmem:[#allocation112_spill] sm:$0xff] %v12668_v36  ;;  %9436 = vpow2.f32 %v4013_v21 }
 0x89f   : > { %v12649_v44 = vmax.f32 %v12629_v35, %v3790_v20  ;;  %v3792_v8 = vpop.xlane.xlu1 %3791  ;;  %v3991_v20 = vmul.f32 1.442695, %v3914_v5  ;;  %v12675_v18 = vpop.eup %9426  ;;  %v3993_v5 = vmul.f32 1.442695, %v3915_v29  ;;  %v3989_v30 = vmul.f32 1.442695, %v3913_v22 }
 0x8a0   : > { %v12660_v48 = vmax.f32 %v12642_v52, %v3792_v8  ;;  %5101 = vperm.xlu0 %9385, %v12651_v13   ;;  %14588 = vst [vmem:[#allocation113_spill] sm:$0xff] %v12675_v18  ;;  %v12677_v13 = vld [vmem:[#allocation5 + $0x170] sm:$0xff]  ;;  %v12690_v21 = vpop.eup %9428  ;;  %v12752_v22 = vld [vmem:[#allocation5 + $0x1e8] sm:$0xff]  ;;  %v2768_v35 = vld [vmem:[%s12118_s8 + $0x180] sm:$0xff] }
 0x8a1   : > { %6026 = vst.msk [vmem:[#allocation5 + $0x140] sm:$0xff] %vm4925_vm6, %v12649_v44  ;;  %4235 = vperm.xlu1 %9384, %v12397_v1   ;;  %14589 = vst [vmem:[#allocation114_spill] sm:$0xff] %v12677_v13  ;;  %9438 = vpow2.f32 %v3991_v20  ;;  %v4021_v1 = vmul.f32 1.442695, %v3929_v17  ;;  %8974 = vmatprep.subr.bf16.mxu1 %v2768_v35 }
 0x8a2   : > { %v3822_v4 = vpop.xlane.xlu0 %3821  ;;  %6027 = vst.msk [vmem:[#allocation5 + $0x148] sm:$0xff] %vm4925_vm6, %v12660_v48  ;;  %14591 = vst [vmem:[#allocation116_spill] sm:$0xff] %v12690_v21  ;;  %9440 = vpow2.f32 %v3993_v5 }
 0x8a3   : > { %v12673_v55 = vmax.f32 %v12653_v59, %v3822_v4  ;;  %v3824_v8 = vpop.xlane.xlu1 %3823  ;;  %v12688_v59 = vld [vmem:[#allocation5 + $0x178] sm:$0xff]  ;;  %9442 = vpow2.f32 %v4023_v0  ;;  %14603 = vst [vmem:[#allocation128_spill] sm:$0xff] %v12752_v22 }
 0x8a4   : > { %v12682_v42 = vmax.f32 %v12666_v6, %v3824_v8  ;;  %5181 = vperm.xlu0 %9385, %v12675_v18   ;;  %14590 = vst [vmem:[#allocation115_spill] sm:$0xff] %v12688_v59  ;;  %v12697_v8 = vpop.eup %9430  ;;  %9444 = vpow2.f32 %v4025_v57 }
 0x8a5   : > { %6042 = vst.msk [vmem:[#allocation5 + $0x1c0] sm:$0xff] %vm4925_vm6, %v12673_v55  ;;  %5106 = vperm.xlu1 %9384, %v12668_v36   ;;  %14592 = vst [vmem:[#allocation117_spill] sm:$0xff] %v12697_v8  ;;  %v12699_v36 = vld [vmem:[#allocation5 + $0x1f0] sm:$0xff]  ;;  %9446 = vpow2.f32 %v3989_v30 }
 0x8a6   : > { %v3802_v4 = vpop.xlane.xlu0 %3801  ;;  %6043 = vst.msk [vmem:[#allocation5 + $0x1c8] sm:$0xff] %vm4925_vm6, %v12682_v42  ;;  %14593 = vst [vmem:[#allocation118_spill] sm:$0xff] %v12699_v36  ;;  %9448 = vpow2.f32 %v4021_v1  ;;  %v12781_v1 = vld [vmem:[%s12118_s8 + $0x100] sm:$0xff] }
 0x8a7   : > { %v12695_v29 = vmax.f32 %v12677_v13, %v3802_v4  ;;  %v3804_v18 = vpop.xlane.xlu1 %3803  ;;  %v12710_v4 = vld [vmem:[#allocation5 + $0x1f8] sm:$0xff]  ;;  %v12712_v13 = vpop.eup %9432  ;;  %8942 = vmatprep.subr.bf16.mxu0 %v12781_v1 }
 0x8a8   : > { %v12704_v16 = vmax.f32 %v12688_v59, %v3804_v18  ;;  %5131 = vperm.xlu0 %9385, %v12697_v8   ;;  %14594 = vst [vmem:[#allocation119_spill] sm:$0xff] %v12710_v4  ;;  %14595 = vst [vmem:[#allocation120_spill] sm:$0xff] %v12712_v13  ;;  %v12719_v5 = vpop.eup %9434 }
 0x8a9   : > { %6032 = vst.msk [vmem:[#allocation5 + $0x170] sm:$0xff] %vm4925_vm6, %v12695_v29  ;;  %5186 = vperm.xlu1 %9384, %v12690_v21   ;;  %14596 = vst [vmem:[#allocation121_spill] sm:$0xff] %v12719_v5  ;;  %v12721_v21 = vld [vmem:[#allocation5 + $0x160] sm:$0xff] }
 0x8aa   : > { %v3834_v20 = vpop.xlane.xlu0 %3833  ;;  %6033 = vst.msk [vmem:[#allocation5 + $0x178] sm:$0xff] %vm4925_vm6, %v12704_v16  ;;  %14597 = vst [vmem:[#allocation122_spill] sm:$0xff] %v12721_v21 }
 0x8ab   : > { %v12717_v18 = vmax.f32 %v12699_v36, %v3834_v20  ;;  %v3836_v8 = vpop.xlane.xlu1 %3835  ;;  %v12732_v20 = vld [vmem:[#allocation5 + $0x168] sm:$0xff]  ;;  %v12734_v36 = vpop.eup %9436 }
 0x8ac   : > { %v12726_v38 = vmax.f32 %v12710_v4, %v3836_v8  ;;  %5211 = vperm.xlu0 %9385, %v12719_v5   ;;  %14599 = vst [vmem:[#allocation124_spill] sm:$0xff] %v12732_v20  ;;  %14600 = vst [vmem:[#allocation125_spill] sm:$0xff] %v12734_v36  ;;  %v12741_v4 = vpop.eup %9438 }
 0x8ad   : > { %6048 = vst.msk [vmem:[#allocation5 + $0x1f0] sm:$0xff] %vm4925_vm6, %v12717_v18  ;;  %5096 = vperm.xlu1 %9384, %v12712_v13   ;;  %14601 = vst [vmem:[#allocation126_spill] sm:$0xff] %v12741_v4  ;;  %v12743_v13 = vld [vmem:[#allocation5 + $0x1e0] sm:$0xff] }
 0x8ae   : > { %14598 = vst [vmem:[#allocation123_spill] sm:$0xff] %v12726_v38  ;;  %v3798_v0 = vpop.xlane.xlu0 %3797  ;;  %6049 = vst.msk [vmem:[#allocation5 + $0x1f8] sm:$0xff] %vm4925_vm6, %v12726_v38 }
 0x8af   : > { %v12739_v8 = vmax.f32 %v12721_v21, %v3798_v0  ;;  %v3800_v5 = vpop.xlane.xlu1 %3799  ;;  %14602 = vst [vmem:[#allocation127_spill] sm:$0xff] %v12743_v13  ;;  %v12754_v0 = vpop.eup %9440 }
 0x8b0   : > { %v12748_v10 = vmax.f32 %v12732_v20, %v3800_v5  ;;  %5121 = vperm.xlu0 %9385, %v12741_v4   ;;  %14604 = vst [vmem:[#allocation129_spill] sm:$0xff] %v12754_v0  ;;  %v12761_v59 = vpop.eup %9442 }
 0x8b1   : > { %6030 = vst.msk [vmem:[#allocation5 + $0x160] sm:$0xff] %vm4925_vm6, %v12739_v8  ;;  %5176 = vperm.xlu1 %9384, %v12734_v36   ;;  %14605 = vst [vmem:[#allocation130_spill] sm:$0xff] %v12761_v59  ;;  %v12772_v17 = vpop.eup %9444 }
 0x8b2   : > { %v3830_v57 = vpop.xlane.xlu0 %3829  ;;  %6031 = vst.msk [vmem:[#allocation5 + $0x168] sm:$0xff] %vm4925_vm6, %v12748_v10  ;;  %14606 = vst [vmem:[#allocation131_spill] sm:$0xff] %v12772_v17  ;;  %v12776_v4 = vpop.eup %9446 }
 0x8b3   : > { %v12759_v21 = vmax.f32 %v12743_v13, %v3830_v57  ;;  %v3832_v5 = vpop.xlane.xlu1 %3831  ;;  %14607 = vst [vmem:[#allocation132_spill] sm:$0xff] %v12776_v4 }
 0x8b4   : > { %v12766_v30 = vmax.f32 %v12752_v22, %v3832_v5  ;;  %5201 = vperm.xlu0 %9385, %v12761_v59   ;;  %v12783_v59 = vpop.eup %9448 }
 0x8b5   : > { %6046 = vst.msk [vmem:[#allocation5 + $0x1e0] sm:$0xff] %vm4925_vm6, %v12759_v21  ;;  %5126 = vperm.xlu1 %9384, %v12754_v0   ;;  %14608 = vst [vmem:[#allocation133_spill] sm:$0xff] %v12783_v59 }
 0x8b6   : > { %6047 = vst.msk [vmem:[#allocation5 + $0x1e8] sm:$0xff] %vm4925_vm6, %v12766_v30 }
 0x8b7   : > { %v4106_v57 = vpop.permute.xlu1 %4105 }
 0x8b8   : > { %4270 = vperm.xlu0 %9385, %v12428_v28  }
 0x8b9   : > { %5206 = vperm.xlu1 %9384, %v12772_v17  }
 0x8bb   : > { %v4186_v5 = vpop.permute.xlu1 %4185 }
 0x8bc   : > { %v4096_v36 = vpop.permute.xlu0 %4095  ;;  %4350 = vperm.xlu0 %9385, %v12450_v49   ;;  %v4431_v20 = vsub.f32 %v11853_v56, %v4186_v5 }
 0x8bd   : > { %5116 = vperm.xlu1 %9384, %v12776_v4   ;;  %v4413_v4 = vsub.f32 %v11859_v3, %v4096_v36 }
 0x8bf   : > { %v4477_v56 = vmul.f32 1.442695, %v4413_v4 }
 0x8c0   : > { %v4191_v0 = vpop.permute.xlu0 %4190  ;;  %v4176_v13 = vpop.permute.xlu1 %4175  ;;  %4260 = vperm.xlu0 %9385, %v12470_v47  }
 0x8c1   : > { %v4432_v22 = vsub.f32 %v11868_v53, %v4191_v0  ;;  %v4429_v17 = vsub.f32 %v11866_v41, %v4176_v13  ;;  %5196 = vperm.xlu1 %9384, %v12783_v59   ;;  %v4415_v41 = vsub.f32 %v11855_v37, %v4106_v57  ;;  %v4513_v13 = vmul.f32 1.442695, %v4431_v20 }
 0x8c3   : > { %v4515_v6 = vmul.f32 1.442695, %v4432_v22  ;;  %v4509_v39 = vmul.f32 1.442695, %v4429_v17 }
 0x8c4   : > { %v4181_v2 = vpop.permute.xlu0 %4180  ;;  %v4111_v52 = vpop.permute.xlu1 %4110  ;;  %4340 = vperm.xlu0 %9385, %v12494_v27  }
 0x8c5   : > { %v4430_v58 = vsub.f32 %v11873_v50, %v4181_v2  ;;  %v4416_v53 = vsub.f32 %v11861_v12, %v4111_v52  ;;  %4265 = vperm.xlu1 %9384, %v12419_v14   ;;  %9450 = vpow2.f32 %v4515_v6  ;;  %v4481_v12 = vmul.f32 1.442695, %v4415_v41 }
 0x8c6   : > { %9452 = vpow2.f32 %v4509_v39  ;;  %v14609_v52 = vsub.f32 %v12454_v32, %v12470_v47  ;;  %v14611_v47 = vld [vmem:[#allocation22_spill] sm:$0xff] }
 0x8c7   : > { %v4511_v3 = vmul.f32 1.442695, %v4430_v58  ;;  %v4483_v36 = vmul.f32 1.442695, %v4416_v53 }
 0x8c8   : > { %v4101_v22 = vpop.permute.xlu1 %4100  ;;  %4290 = vperm.xlu0 %9385, %v12518_v9   ;;  %v4031_v6 = vmul.f32 1.442695, %v14609_v52  ;;  %v14613_v52 = vld [vmem:[#allocation25_spill] sm:$0xff] }
 0x8c9   : > { %9454 = vpow2.f32 %v4511_v3  ;;  %v4414_v0 = vsub.f32 %v11875_v33, %v4101_v22  ;;  %4345 = vperm.xlu1 %9384, %v12441_v46   ;;  %v2769_v22 = vld [vmem:[%s12118_s8 + $0x188] sm:$0xff] }
 0x8ca   : > { %9456 = vpow2.f32 %v4513_v13 }
 0x8cb   : > { %9458 = vpow2.f32 %v4477_v56  ;;  %v4479_v50 = vmul.f32 1.442695, %v4414_v0  ;;  %v4211_v2 = vpop.permute.xlu0 %4210 }
 0x8cc   : > { %9460 = vpow2.f32 %v4483_v36  ;;  %v12801_v37 = vpop.permute.xlu1 %4125  ;;  %4370 = vperm.xlu0 %9385, %v12540_v40   ;;  %v4436_v56 = vsub.f32 %v14611_v47, %v4211_v2 }
 0x8cd   : > { %9462 = vpow2.f32 %v4479_v50  ;;  %4255 = vperm.xlu1 %9384, %v12461_v51  }
 0x8ce   : > { %9464 = vpow2.f32 %v4481_v12 }
 0x8cf   : > { %v12805_v33 = vpop.eup %9450  ;;  %9466 = vpow2.f32 %v4031_v6 }
 0x8d0   : > { %v4206_v39 = vpop.permute.xlu1 %4205  ;;  %4280 = vperm.xlu0 %9385, %v12562_v31   ;;  %v12809_v58 = vpop.eup %9452 }
 0x8d1   : > { %4335 = vperm.xlu1 %9384, %v12483_v26   ;;  %v4435_v20 = vsub.f32 %v11890_v43, %v4206_v39 }
 0x8d3   : > { %v12814_v4 = vpop.eup %9454  ;;  %v4201_v57 = vpop.permute.xlu0 %4200  ;;  %v4521_v36 = vmul.f32 1.442695, %v4435_v20  ;;  %v14614_v20 = vld [vmem:[#allocation87_spill] sm:$0xff] }
 0x8d4   : > { %14610 = vst [vmem:[#allocation134_spill] sm:$0xff] %v12814_v4  ;;  %v12817_v17 = vpop.eup %9456  ;;  %v4116_v5 = vpop.permute.xlu1 %4115  ;;  %v5446_v53 = vpack.c.bf16 %v12814_v4, %v12809_v58  ;;  %v4434_v13 = vsub.f32 %v11915_v61, %v4201_v57  ;;  %4360 = vperm.xlu0 %9385, %v12586_v11   ;;  %v3933_v57 = vsub.f32 %v14614_v20, %v12461_v51  ;;  %v14617_v51 = vld [vmem:[#allocation21_spill] sm:$0xff] }
 0x8d5   : > { %v12821_v41 = vpop.eup %9458  ;;  %4285 = vperm.xlu1 %9384, %v12509_v15   ;;  %v5447_v32 = vpack.c.bf16 %v12805_v33, %v12817_v17  ;;  %9468 = vpow2.f32 %v4521_v36  ;;  %v14618_v36 = vld [vmem:[#allocation20_spill] sm:$0xff] }
 0x8d6   : > { %v12828_v43 = vpop.eup %9460  ;;  %8926 = vmatprep.mubr.bf16.mxu1 %v5446_v53  ;;  %v4519_v61 = vmul.f32 1.442695, %v4434_v13  ;;  %v4523_v53 = vmul.f32 1.442695, %v4436_v56  ;;  %v14615_v13 = vld [vmem:[#allocation23_spill] sm:$0xff] }
 0x8d7   : > { %v12831_v3 = vpop.eup %9462  ;;  %8927 = vmatmul.mubr.bf16.vlgmr.msra.gmra.mrb[32].mxu1 %v5447_v32  ;;  %v12836_v12 = vpop.permute.xlu0 %5056  ;;  %v4417_v32 = vsub.f32 %v14615_v13, %v4116_v5  ;;  %v4029_v5 = vmul.f32 1.442695, %v3933_v57  ;;  %v14621_v57 = vld [vmem:[#allocation24_spill] sm:$0xff] }
 0x8d8   : > { %v12834_v0 = vpop.eup %9464  ;;  %14612 = vst [vmem:[#allocation22_spill] sm:$0xff] %v12836_v12  ;;  %v4196_v50 = vpop.permute.xlu1 %4195  ;;  %v5438_v39 = vpack.c.bf16 %v12831_v3, %v12821_v41  ;;  %8975 = vmatpush3.bf16.msra.mxu1 %v2768_v35  ;;  %4310 = vperm.xlu0 %9385, %v12612_v23   ;;  %v2761_v35 = vld [vmem:[%s12118_s8 + $0x108] sm:$0xff]  ;;  %9470 = vpow2.f32 %v4519_v61 }
 0x8d9   : > { %v4433_v2 = vsub.f32 %v14613_v52, %v4196_v50  ;;  %4365 = vperm.xlu1 %9384, %v12531_v19   ;;  %v5439_v6 = vpack.c.bf16 %v12828_v43, %v12834_v0  ;;  %8976 = vmatprep.subr.bf16.mxu1 %v2769_v22  ;;  %v2770_v50 = vld [vmem:[%s12118_s8 + $0x190] sm:$0xff]  ;;  %v4485_v61 = vmul.f32 1.442695, %v4417_v32  ;;  %v2763_v32 = vld [vmem:[%s12118_s8 + $0x118] sm:$0xff] }
 0x8da   : > { %8894 = vmatprep.mubr.bf16.mxu0 %v5438_v39  ;;  %v4419_v39 = vsub.f32 %v14618_v36, %v12801_v37  ;;  %v2764_v36 = vld [vmem:[%s12118_s8 + $0x120] sm:$0xff] }
 0x8db   : > { %v4517_v47 = vmul.f32 1.442695, %v4433_v2  ;;  %8895 = vmatmul.mubr.bf16.vlgmr.msra.gmra.mrb[32].mxu0 %v5439_v6  ;;  %v12850_v52 = vpop.permute.xlu0 %5071  ;;  %v2762_v2 = vld [vmem:[%s12118_s8 + $0x110] sm:$0xff]  ;;  %v2771_v6 = vld [vmem:[%s12118_s8 + $0x198] sm:$0xff] }
 0x8dc   : > { %14616 = vst [vmem:[#allocation25_spill] sm:$0xff] %v12850_v52  ;;  %v4131_v59 = vpop.permute.xlu1 %4130  ;;  %8943 = vmatpush3.bf16.msra.mxu0 %v12781_v1  ;;  %8977 = vmatpush3.bf16.msra.mxu1 %v2769_v22  ;;  %v12860_v1 = vpop.eup %9466  ;;  %v4489_v37 = vmul.f32 1.442695, %v4419_v39 }
 0x8dd   : > { %9472 = vpow2.f32 %v4517_v47  ;;  %v4420_v56 = vsub.f32 %v14617_v51, %v4131_v59  ;;  %4390 = vperm.xlu0 %9385, %v12636_v54   ;;  %4275 = vperm.xlu1 %9384, %v12553_v63   ;;  %14619 = vst [vmem:[#allocation87_spill] sm:$0xff] %v12860_v1  ;;  %v2772_v47 = vld [vmem:[%s12118_s8 + $0x1a0] sm:$0xff] }
 0x8de   : > { %9474 = vpow2.f32 %v4523_v53  ;;  %8944 = vmatprep.subr.bf16.mxu0 %v2761_v35  ;;  %8978 = vmatprep.subr.bf16.mxu1 %v2770_v50 }
 0x8df   : > { %v4491_v22 = vmul.f32 1.442695, %v4420_v56  ;;  %v12862_v59 = vpop.permute.xlu0 %5151  ;;  %9476 = vpow2.f32 %v4029_v5 }
 0x8e0   : > { %14620 = vst [vmem:[#allocation23_spill] sm:$0xff] %v12862_v59  ;;  %v4121_v20 = vpop.permute.xlu1 %4120  ;;  %8945 = vmatpush3.bf16.msra.mxu0 %v2761_v35  ;;  %8979 = vmatpush3.bf16.msra.mxu1 %v2770_v50  ;;  %9478 = vpow2.f32 %v4485_v61  ;;  %v12873_v50 = vpop.eup %9468 }
 0x8e1   : > { %v4418_v53 = vsub.f32 %v14621_v57, %v4121_v20  ;;  %5221 = vperm.xlu0 %9385, %v12860_v1   ;;  %4355 = vperm.xlu1 %9384, %v12575_v45   ;;  %9480 = vpow2.f32 %v4491_v22  ;;  %v2773_v22 = vld [vmem:[%s12118_s8 + $0x1a8] sm:$0xff] }
 0x8e2   : > { %8946 = vmatprep.subr.bf16.mxu0 %v2762_v2  ;;  %8980 = vmatprep.subr.bf16.mxu1 %v2771_v6  ;;  %v12877_v56 = vpop.eup %9470  ;;  %v2765_v57 = vld [vmem:[%s12118_s8 + $0x128] sm:$0xff] }
 0x8e3   : > { %v4487_v13 = vmul.f32 1.442695, %v4418_v53  ;;  %v12869_v51 = vpop.permute.xlu0 %4150  ;;  %14623 = vst [vmem:[#allocation20_spill] sm:$0xff] %v12877_v56  ;;  %v2774_v53 = vld [vmem:[%s12118_s8 + $0x1b0] sm:$0xff]  ;;  %v14629_v1 = vld [vmem:[#allocation81_spill] sm:$0xff] }
 0x8e4   : > { %v12871_v35 = vpop.permute.xlu1 %5066  ;;  %8947 = vmatpush3.bf16.msra.mxu0 %v2762_v2  ;;  %8981 = vmatpush3.bf16.msra.mxu1 %v2771_v6  ;;  %v3935_v52 = vsub.f32 %v14629_v1, %v12419_v14  ;;  %v2775_v1 = vld [vmem:[%s12118_s8 + $0x1b8] sm:$0xff] }
 0x8e5   : > { %14622 = vst [vmem:[#allocation21_spill] sm:$0xff] %v12871_v35  ;;  %9482 = vpow2.f32 %v4487_v13  ;;  %4300 = vperm.xlu0 %9385, %v12660_v48   ;;  %4305 = vperm.xlu1 %9384, %v12601_v60  }
 0x8e6   : > { %9484 = vpow2.f32 %v4489_v37  ;;  %8948 = vmatprep.subr.bf16.mxu0 %v2763_v32  ;;  %8982 = vmatprep.subr.bf16.mxu1 %v2772_v47 }
 0x8e7   : > { %v12879_v5 = vpop.eup %9472  ;;  %v12884_v61 = vpop.permute.xlu0 %4230 }
 0x8e8   : > { %14624 = vst [vmem:[#allocation24_spill] sm:$0xff] %v12879_v5  ;;  %v12882_v39 = vpop.eup %9474  ;;  %v12886_v2 = vpop.permute.xlu1 %5146  ;;  %v5448_v6 = vpack.c.bf16 %v12877_v56, %v12879_v5  ;;  %8949 = vmatpush3.bf16.msra.mxu0 %v2763_v32  ;;  %8983 = vmatpush3.bf16.msra.mxu1 %v2772_v47 }
 0x8e9   : > { %14625 = vst [vmem:[#allocation135_spill] sm:$0xff] %v12882_v39  ;;  %14626 = vst [vmem:[#allocation136_spill] sm:$0xff] %v12886_v2  ;;  %4380 = vperm.xlu0 %9385, %v12682_v42   ;;  %4385 = vperm.xlu1 %9384, %v12625_v25   ;;  %v5449_v20 = vpack.c.bf16 %v12882_v39, %v12873_v50  ;;  %v12897_v37 = vpop.eup %9476  ;;  %v2767_v39 = vld [vmem:[%s12118_s8 + $0x138] sm:$0xff] }
 0x8ea   : > { %8930 = vmatprep.mubr.bf16.mxu1 %v5448_v6  ;;  %8950 = vmatprep.subr.bf16.mxu0 %v2764_v36  ;;  %14627 = vst [vmem:[#allocation137_spill] sm:$0xff] %v12897_v37  ;;  %v12901_v47 = vpop.eup %9478 }
 0x8eb   : > { %8931 = vmatmul.mubr.bf16.gmra.mrb[36].mxu1 %v5449_v20  ;;  %8984 = vmatprep.subr.bf16.mxu1 %v2773_v22  ;;  %v12899_v13 = vpop.permute.xlu0 %5141  ;;  %v12907_v6 = vpop.eup %9480  ;;  %v14631_v20 = vld [vmem:[#allocation82_spill] sm:$0xff] }
 0x8ec   : > { %14628 = vst [vmem:[#allocation138_spill] sm:$0xff] %v12899_v13  ;;  %v4146_v32 = vpop.permute.xlu1 %4145  ;;  %8951 = vmatpush3.bf16.msra.mxu0 %v2764_v36  ;;  %8985 = vmatpush3.bf16.msra.mxu1 %v2773_v22  ;;  %14630 = vst [vmem:[#allocation81_spill] sm:$0xff] %v12907_v6  ;;  %v14632_v12 = vsub.f32 %v14631_v20, %v12428_v28  ;;  %v2766_v22 = vld [vmem:[%s12118_s8 + $0x130] sm:$0xff]  ;;  %v14634_v20 = vsub.f32 %v12546_v34, %v12562_v31  ;;  %v14641_v31 = vld [vmem:[#allocation93_spill] sm:$0xff] }
 0x8ed   : > { %4330 = vperm.xlu0 %9385, %v12704_v16   ;;  %5216 = vperm.xlu1 %9384, %v12897_v37   ;;  %v4033_v37 = vmul.f32 1.442695, %v3935_v52 }
 0x8ee   : > { %v4035_v35 = vmul.f32 1.442695, %v14632_v12  ;;  %8952 = vmatprep.subr.bf16.mxu0 %v2765_v57  ;;  %8986 = vmatprep.subr.bf16.mxu1 %v2774_v53  ;;  %v3937_v12 = vsub.f32 %v12535_v7, %v12553_v63  ;;  %v4039_v56 = vmul.f32 1.442695, %v14634_v20  ;;  %v14640_v7 = vld [vmem:[#allocation31_spill] sm:$0xff] }
 0x8ef   : > { %v12912_v36 = vpop.eup %9482  ;;  %v4141_v59 = vpop.permute.xlu0 %4140 }
 0x8f0   : > { %14633 = vst [vmem:[#allocation82_spill] sm:$0xff] %v12912_v36  ;;  %v12915_v13 = vpop.eup %9484  ;;  %v4226_v2 = vpop.permute.xlu1 %4225  ;;  %v5440_v14 = vpack.c.bf16 %v12912_v36, %v12901_v47  ;;  %8953 = vmatpush3.bf16.msra.mxu0 %v2765_v57  ;;  %8987 = vmatpush3.bf16.msra.mxu1 %v2774_v53  ;;  %9486 = vpow2.f32 %v4035_v35  ;;  %v14635_v57 = vld [vmem:[#allocation85_spill] sm:$0xff]  ;;  %v4422_v63 = vsub.f32 %v14640_v7, %v4141_v59 }
 0x8f1   : > { %4410 = vperm.xlu0 %9385, %v12726_v38   ;;  %4295 = vperm.xlu1 %9384, %v12649_v44   ;;  %v5441_v28 = vpack.c.bf16 %v12907_v6, %v12915_v13  ;;  %v14636_v52 = vsub.f32 %v14635_v57, %v12450_v49  ;;  %v14637_v38 = vld [vmem:[#allocation26_spill] sm:$0xff]  ;;  %9488 = vpow2.f32 %v4033_v37  ;;  %v14642_v49 = vsub.f32 %v14641_v31, %v12518_v9 }
 0x8f2   : > { %8898 = vmatprep.mubr.bf16.mxu0 %v5440_v14  ;;  %8954 = vmatprep.subr.bf16.mxu0 %v2766_v22  ;;  %v4423_v36 = vsub.f32 %v14637_v38, %v4146_v32  ;;  %v14638_v6 = vld [vmem:[#allocation90_spill] sm:$0xff]  ;;  %v4037_v38 = vmul.f32 1.442695, %v3937_v12  ;;  %9490 = vpow2.f32 %v4039_v56  ;;  %v4495_v37 = vmul.f32 1.442695, %v4422_v63  ;;  %v14647_v56 = vld [vmem:[#allocation29_spill] sm:$0xff] }
 0x8f3   : > { %v4067_v53 = vmul.f32 1.442695, %v14636_v52  ;;  %8899 = vmatmul.mubr.bf16.gmra.mrb[36].mxu0 %v5441_v28  ;;  %8988 = vmatprep.subr.bf16.mxu1 %v2775_v1  ;;  %v14639_v35 = vsub.f32 %v14638_v6, %v12494_v27  ;;  %v4221_v5 = vpop.permute.xlu0 %4220  ;;  %v4043_v14 = vmul.f32 1.442695, %v14642_v49  ;;  %v14643_v27 = vld [vmem:[#allocation27_spill] sm:$0xff]  ;;  %v14644_v6 = vld [vmem:[#allocation28_spill] sm:$0xff] }
 0x8f4   : > { %v12938_v34 = vpop.permute.xlu1 %5136  ;;  %8955 = vmatpush3.bf16.msra.mxu0 %v2766_v22  ;;  %8989 = vmatpush3.bf16.msra.mxu1 %v2775_v1  ;;  %v4424_v32 = vsub.f32 %v14643_v27, %v12869_v51  ;;  %v4497_v59 = vmul.f32 1.442695, %v4423_v36  ;;  %v4439_v22 = vsub.f32 %v14644_v6, %v4226_v2  ;;  %v14645_v1 = vld [vmem:[#allocation33_spill] sm:$0xff]  ;;  %v14646_v57 = vld [vmem:[#allocation30_spill] sm:$0xff]  ;;  %v4440_v2 = vsub.f32 %v14647_v56, %v12884_v61  ;;  %v14650_v63 = vld [vmem:[#allocation32_spill] sm:$0xff] }
 0x8f5   : > { %v4063_v4 = vmul.f32 1.442695, %v14639_v35  ;;  %4320 = vperm.xlu0 %9385, %v12748_v10   ;;  %4375 = vperm.xlu1 %9384, %v12673_v55   ;;  %9492 = vpow2.f32 %v4067_v53  ;;  %v4438_v28 = vsub.f32 %v14645_v1, %v4221_v5  ;;  %v14649_v35 = vld [vmem:[#allocation92_spill] sm:$0xff]  ;;  %v14656_v1 = vsub.f32 %v12568_v62, %v12586_v11  ;;  %v14660_v11 = vld [vmem:[#allocation97_spill] sm:$0xff] }
 0x8f6   : > { %8956 = vmatprep.subr.bf16.mxu0 %v2767_v39  ;;  %v4499_v51 = vmul.f32 1.442695, %v4424_v32  ;;  %v3939_v7 = vsub.f32 %v14649_v35, %v12509_v15  ;;  %v4531_v61 = vmul.f32 1.442695, %v4440_v2  ;;  %v14659_v56 = vld [vmem:[#allocation84_spill] sm:$0xff] }
 0x8f7   : > { %9494 = vpow2.f32 %v4063_v4  ;;  %v12949_v9 = vpop.permute.xlu0 %5091  ;;  %v4529_v4 = vmul.f32 1.442695, %v4439_v22  ;;  %v4527_v52 = vmul.f32 1.442695, %v4438_v28  ;;  %v4071_v28 = vmul.f32 1.442695, %v14656_v1 }
 0x8f8   : > { %v4136_v20 = vpop.permute.xlu1 %4135  ;;  %8957 = vmatpush3.bf16.msra.mxu0 %v2767_v39  ;;  %9496 = vpow2.f32 %v4043_v14  ;;  %v4041_v22 = vmul.f32 1.442695, %v3939_v7  ;;  %v3951_v2 = vsub.f32 %v14659_v56, %v12441_v46 }
 0x8f9   : > { %v4421_v12 = vsub.f32 %v14646_v57, %v4136_v20  ;;  %4400 = vperm.xlu0 %9385, %v12766_v30   ;;  %4325 = vperm.xlu1 %9384, %v12695_v29   ;;  %9498 = vpow2.f32 %v4037_v38 }
 0x8fa   : > { %9500 = vpow2.f32 %v4497_v59  ;;  %v12956_v5 = vpop.eup %9486  ;;  %v14654_v59 = vld [vmem:[#allocation89_spill] sm:$0xff] }
 0x8fb   : > { %v4493_v36 = vmul.f32 1.442695, %v4421_v12  ;;  %14648 = vst [vmem:[#allocation85_spill] sm:$0xff] %v12956_v5  ;;  %9502 = vpow2.f32 %v4495_v37  ;;  %v12958_v39 = vpop.permute.xlu0 %5171  ;;  %v12965_v49 = vpop.eup %9488  ;;  %v3949_v6 = vsub.f32 %v14654_v59, %v12483_v26 }
 0x8fc   : > { %v4216_v53 = vpop.permute.xlu1 %4215  ;;  %14651 = vst [vmem:[#allocation26_spill] sm:$0xff] %v12965_v49  ;;  %v12967_v38 = vpop.eup %9490 }
 0x8fd   : > { %9504 = vpow2.f32 %v4493_v36  ;;  %v4437_v31 = vsub.f32 %v14650_v63, %v4216_v53  ;;  %5231 = vperm.xlu0 %9385, %v12956_v5   ;;  %4405 = vperm.xlu1 %9384, %v12717_v18   ;;  %14652 = vst [vmem:[#allocation90_spill] sm:$0xff] %v12967_v38  ;;  %v14661_v36 = vsub.f32 %v14660_v11, %v12540_v40  ;;  %v14664_v11 = vld [vmem:[#allocation96_spill] sm:$0xff] }
 0x8fe   : > { %9506 = vpow2.f32 %v4499_v51 }
 0x8ff   : > { %9508 = vpow2.f32 %v4529_v4  ;;  %v4525_v14 = vmul.f32 1.442695, %v4437_v31  ;;  %v12969_v27 = vpop.permute.xlu0 %4170  ;;  %v12973_v15 = vpop.eup %9492  ;;  %v4061_v4 = vmul.f32 1.442695, %v3949_v6 }
 0x900   : > { %9510 = vpow2.f32 %v4527_v52  ;;  %v12971_v32 = vpop.permute.xlu1 %5061  ;;  %14653 = vst [vmem:[#allocation31_spill] sm:$0xff] %v12973_v15  ;;  %v4075_v52 = vmul.f32 1.442695, %v14661_v36  ;;  %v3955_v36 = vsub.f32 %v14664_v11, %v12531_v19  ;;  %v14669_v19 = vld [vmem:[#allocation101_spill] sm:$0xff] }
 0x901   : > { %9512 = vpow2.f32 %v4525_v14  ;;  %5241 = vperm.xlu0 %9385, %v12967_v38   ;;  %4315 = vperm.xlu1 %9384, %v12739_v8   ;;  %v12979_v37 = vpop.eup %9494  ;;  %v14662_v14 = vld [vmem:[#allocation99_spill] sm:$0xff]  ;;  %v14671_v38 = vld [vmem:[#allocation104_spill] sm:$0xff] }
 0x902   : > { %14655 = vst [vmem:[#allocation93_spill] sm:$0xff] %v12979_v37  ;;  %9514 = vpow2.f32 %v4531_v61  ;;  %v12984_v20 = vpop.eup %9496  ;;  %v4065_v61 = vmul.f32 1.442695, %v3951_v2  ;;  %v3953_v40 = vsub.f32 %v14662_v14, %v12575_v45 }
 0x903   : > { %14657 = vst [vmem:[#allocation27_spill] sm:$0xff] %v12984_v20  ;;  %v12986_v57 = vpop.eup %9498  ;;  %v12988_v12 = vpop.permute.xlu0 %4250  ;;  %9516 = vpow2.f32 %v4041_v22  ;;  %v14663_v22 = vsub.f32 %v12592_v24, %v12612_v23  ;;  %v14665_v23 = vld [vmem:[#allocation105_spill] sm:$0xff] }
 0x904   : > { %14658 = vst [vmem:[#allocation28_spill] sm:$0xff] %v12986_v57  ;;  %v12990_v26 = vpop.permute.xlu1 %5086  ;;  %v12992_v51 = vpop.eup %9500  ;;  %9518 = vpow2.f32 %v4071_v28 }
 0x905   : > { %5251 = vperm.xlu0 %9385, %v12984_v20   ;;  %4395 = vperm.xlu1 %9384, %v12759_v21   ;;  %v12998_v62 = vpop.eup %9502  ;;  %9520 = vpow2.f32 %v4061_v4  ;;  %v4051_v1 = vmul.f32 1.442695, %v14663_v22  ;;  %v3959_v20 = vsub.f32 %v14671_v38, %v12625_v25  ;;  %v14675_v25 = vld [vmem:[#allocation110_spill] sm:$0xff] }
 0x906   : > { %9522 = vpow2.f32 %v4075_v52  ;;  %v4069_v52 = vmul.f32 1.442695, %v3953_v40  ;;  %v3943_v40 = vsub.f32 %v14669_v19, %v12601_v60  ;;  %v14673_v60 = vld [vmem:[#allocation111_spill] sm:$0xff]  ;;  %v3957_v38 = vsub.f32 %v14675_v25, %v12673_v55  ;;  %v14681_v25 = vld [vmem:[#allocation34_spill] sm:$0xff] }
 0x907   : > { %v13003_v53 = vpop.eup %9504  ;;  %v13007_v7 = vpop.permute.xlu0 %5081  ;;  %9524 = vpow2.f32 %v4065_v61 }
 0x908   : > { %v13005_v35 = vpop.eup %9506  ;;  %v13009_v46 = vpop.permute.xlu1 %5166  ;;  %v5442_v63 = vpack.c.bf16 %v12998_v62, %v13003_v53  ;;  %9526 = vpow2.f32 %v4051_v1 }
 0x909   : > { %v13013_v31 = vpop.eup %9508  ;;  %5301 = vperm.xlu0 %9385, %v12979_v37   ;;  %5226 = vperm.xlu1 %9384, %v12965_v49   ;;  %v5443_v59 = vpack.c.bf16 %v13005_v35, %v12992_v51  ;;  %9528 = vpow2.f32 %v4069_v52  ;;  %v4081_v52 = vmul.f32 1.442695, %v3959_v20 }
 0x90a   : > { %v13021_v6 = vpop.eup %9510  ;;  %8902 = vmatprep.mubr.bf16.mxu0 %v5442_v63  ;;  %v14666_v63 = vsub.f32 %v14665_v23, %v12636_v54  ;;  %v14672_v54 = vld [vmem:[#allocation107_spill] sm:$0xff] }
 0x90b   : > { %v13026_v28 = vpop.eup %9512  ;;  %8903 = vmatmul.mubr.bf16.gmra.mrb[40].mxu0 %v5443_v59  ;;  %v13030_v45 = vpop.permute.xlu0 %5161  ;;  %v14667_v59 = vld [vmem:[#allocation108_spill] sm:$0xff]  ;;  %v3941_v23 = vsub.f32 %v14672_v54, %v12649_v44  ;;  %v14677_v44 = vld [vmem:[#allocation115_spill] sm:$0xff] }
 0x90c   : > { %v13028_v56 = vpop.eup %9514  ;;  %v4166_v2 = vpop.permute.xlu1 %4165  ;;  %v5450_v4 = vpack.c.bf16 %v13021_v6, %v13026_v28  ;;  %v4083_v14 = vmul.f32 1.442695, %v14666_v63  ;;  %v3942_v22 = vsub.f32 %v14667_v59, %v12660_v48  ;;  %v4049_v63 = vmul.f32 1.442695, %v3943_v40  ;;  %v14679_v40 = vld [vmem:[#allocation128_spill] sm:$0xff] }
 0x90d   : > { %5311 = vperm.xlu0 %9385, %v12973_v15   ;;  %5236 = vperm.xlu1 %9384, %v12986_v57   ;;  %v5451_v24 = vpack.c.bf16 %v13028_v56, %v13013_v31  ;;  %v13045_v61 = vpop.eup %9516  ;;  %v4073_v57 = vmul.f32 1.442695, %v3955_v36  ;;  %v3948_v59 = vsub.f32 %v14677_v44, %v12704_v16  ;;  %v3962_v20 = vsub.f32 %v14679_v40, %v12766_v30 }
 0x90e   : > { %8934 = vmatprep.mubr.bf16.mxu1 %v5450_v4  ;;  %14668 = vst [vmem:[#allocation33_spill] sm:$0xff] %v13045_v61  ;;  %v13049_v11 = vpop.eup %9518  ;;  %9530 = vpow2.f32 %v4083_v14  ;;  %v4047_v48 = vmul.f32 1.442695, %v3942_v22  ;;  %v3958_v4 = vsub.f32 %v14673_v60, %v12682_v42  ;;  %v4045_v14 = vmul.f32 1.442695, %v3941_v23  ;;  %v14678_v22 = vld [vmem:[#allocation124_spill] sm:$0xff] }
 0x90f   : > { %8935 = vmatmul.mubr.bf16.gmra.mrb[40].mxu1 %v5451_v24  ;;  %14670 = vst [vmem:[#allocation30_spill] sm:$0xff] %v13049_v11  ;;  %v4161_v1 = vpop.permute.xlu0 %4160  ;;  %v13059_v24 = vpop.eup %9520  ;;  %9532 = vpow2.f32 %v4073_v57  ;;  %v3946_v42 = vsub.f32 %v14678_v22, %v12748_v10  ;;  %v4077_v16 = vmul.f32 1.442695, %v3957_v38  ;;  %v4427_v44 = vsub.f32 %v14681_v25, %v4166_v2  ;;  %v14683_v10 = vld [vmem:[#allocation39_spill] sm:$0xff] }
 0x910   : > { %v4246_v37 = vpop.permute.xlu1 %4245  ;;  %14674 = vst [vmem:[#allocation29_spill] sm:$0xff] %v13059_v24  ;;  %v13063_v36 = vpop.eup %9522  ;;  %9534 = vpow2.f32 %v4047_v48  ;;  %v4079_v55 = vmul.f32 1.442695, %v3958_v4  ;;  %v4059_v23 = vmul.f32 1.442695, %v3948_v59  ;;  %v4426_v22 = vsub.f32 %v14683_v10, %v4161_v1  ;;  %v14685_v2 = vld [vmem:[#allocation35_spill] sm:$0xff] }
 0x911   : > { %5321 = vperm.xlu0 %9385, %v13049_v11   ;;  %5246 = vperm.xlu1 %9384, %v13045_v61   ;;  %14676 = vst [vmem:[#allocation92_spill] sm:$0xff] %v13063_v36  ;;  %v13075_v60 = vpop.eup %9524  ;;  %9536 = vpow2.f32 %v4049_v63  ;;  %v4055_v48 = vmul.f32 1.442695, %v3946_v42  ;;  %v4087_v30 = vmul.f32 1.442695, %v3962_v20  ;;  %v4428_v4 = vsub.f32 %v14685_v2, %v12969_v27  ;;  %v14687_v1 = vld [vmem:[#allocation36_spill] sm:$0xff] }
 0x912   : > { %14680 = vst [vmem:[#allocation32_spill] sm:$0xff] %v13075_v60  ;;  %v13078_v57 = vpop.eup %9526  ;;  %9538 = vpow2.f32 %v4081_v52  ;;  %v4505_v38 = vmul.f32 1.442695, %v4427_v44  ;;  %v4443_v52 = vsub.f32 %v14687_v1, %v4246_v37  ;;  %v14689_v42 = vld [vmem:[#allocation41_spill] sm:$0xff] }
 0x913   : > { %v4241_v19 = vpop.permute.xlu0 %4240  ;;  %14682 = vst [vmem:[#allocation89_spill] sm:$0xff] %v13078_v57  ;;  %9540 = vpow2.f32 %v4045_v14  ;;  %v13089_v63 = vpop.eup %9528  ;;  %v4503_v14 = vmul.f32 1.442695, %v4426_v22  ;;  %v4507_v27 = vmul.f32 1.442695, %v4428_v4  ;;  %v14692_v37 = vld [vmem:[#allocation37_spill] sm:$0xff] }
 0x914   : > { %v13067_v54 = vpop.permute.xlu1 %5076  ;;  %9542 = vpow2.f32 %v4079_v55  ;;  %14686 = vst [vmem:[#allocation97_spill] sm:$0xff] %v13089_v63  ;;  %v4442_v40 = vsub.f32 %v14689_v42, %v4241_v19  ;;  %v14691_v55 = vld [vmem:[#allocation38_spill] sm:$0xff] }
 0x915   : > { %5331 = vperm.xlu0 %9385, %v13063_v36   ;;  %5296 = vperm.xlu1 %9384, %v13059_v24   ;;  %9544 = vpow2.f32 %v4077_v16  ;;  %v4444_v16 = vsub.f32 %v14692_v37, %v12988_v12 }
 0x916   : > { %9546 = vpow2.f32 %v4059_v23  ;;  %v4537_v23 = vmul.f32 1.442695, %v4443_v52 }
 0x917   : > { %v13081_v11 = vpop.permute.xlu0 %5111  ;;  %9548 = vpow2.f32 %v4055_v48  ;;  %v4535_v48 = vmul.f32 1.442695, %v4442_v40 }
 0x918   : > { %14684 = vst [vmem:[#allocation84_spill] sm:$0xff] %v13081_v11  ;;  %v13083_v36 = vpop.permute.xlu1 %5156  ;;  %v13092_v59 = vpop.eup %9530  ;;  %9550 = vpow2.f32 %v4087_v30  ;;  %v14697_v30 = vld [vmem:[#allocation40_spill] sm:$0xff]  ;;  %v14730_v11 = vld [vmem:[#allocation45_spill] sm:$0xff] }
 0x919   : > { %5271 = vperm.xlu0 %9385, %v13078_v57   ;;  %5306 = vperm.xlu1 %9384, %v13075_v60   ;;  %14688 = vst [vmem:[#allocation99_spill] sm:$0xff] %v13092_v59  ;;  %v13102_v44 = vpop.eup %9532  ;;  %9552 = vpow2.f32 %v4505_v38  ;;  %v14699_v38 = vld [vmem:[#allocation114_spill] sm:$0xff] }
 0x91a   : > { %14693 = vst [vmem:[#allocation105_spill] sm:$0xff] %v13102_v44  ;;  %v13104_v22 = vpop.eup %9534  ;;  %9554 = vpow2.f32 %v4503_v14  ;;  %v3947_v52 = vsub.f32 %v14699_v38, %v12695_v29  ;;  %v4539_v14 = vmul.f32 1.442695, %v4444_v16  ;;  %v14706_v16 = vld [vmem:[#allocation122_spill] sm:$0xff] }
 0x91b   : > { %v13095_v25 = vpop.permute.xlu0 %5191  ;;  %14694 = vst [vmem:[#allocation108_spill] sm:$0xff] %v13104_v22  ;;  %v13108_v42 = vpop.eup %9536 }
 0x91c   : > { %14690 = vst [vmem:[#allocation96_spill] sm:$0xff] %v13095_v25  ;;  %v4156_v10 = vpop.permute.xlu1 %4155  ;;  %14696 = vst [vmem:[#allocation104_spill] sm:$0xff] %v13108_v42  ;;  %v13113_v12 = vpop.eup %9538  ;;  %v14728_v25 = vld [vmem:[#allocation44_spill] sm:$0xff] }
 0x91d   : > { %v4425_v20 = vsub.f32 %v14691_v55, %v4156_v10  ;;  %5351 = vperm.xlu0 %9385, %v13092_v59   ;;  %5316 = vperm.xlu1 %9384, %v13089_v63   ;;  %14698 = vst [vmem:[#allocation107_spill] sm:$0xff] %v13113_v12  ;;  %v13117_v40 = vpop.eup %9540 }
 0x91e   : > { %14700 = vst [vmem:[#allocation111_spill] sm:$0xff] %v13117_v40  ;;  %v13119_v55 = vpop.eup %9542 }
 0x91f   : > { %v4501_v19 = vmul.f32 1.442695, %v4425_v20  ;;  %v13106_v2 = vpop.permute.xlu0 %5101  ;;  %14701 = vst [vmem:[#allocation110_spill] sm:$0xff] %v13119_v55 }
 0x920   : > { %14695 = vst [vmem:[#allocation101_spill] sm:$0xff] %v13106_v2  ;;  %v4236_v1 = vpop.permute.xlu1 %4235 }
 0x921   : > { %9556 = vpow2.f32 %v4501_v19  ;;  %v4441_v4 = vsub.f32 %v14697_v30, %v4236_v1  ;;  %5261 = vperm.xlu0 %9385, %v13104_v22   ;;  %5326 = vperm.xlu1 %9384, %v13102_v44   ;;  %v13125_v19 = vpop.eup %9544 }
 0x922   : > { %9558 = vpow2.f32 %v4507_v27  ;;  %14704 = vst [vmem:[#allocation128_spill] sm:$0xff] %v13125_v19  ;;  %v13129_v29 = vpop.eup %9546  ;;  %v4057_v27 = vmul.f32 1.442695, %v3947_v52 }
 0x923   : > { %9560 = vpow2.f32 %v4537_v23  ;;  %v4533_v10 = vmul.f32 1.442695, %v4441_v4  ;;  %v13121_v20 = vpop.permute.xlu0 %5181  ;;  %14705 = vst [vmem:[#allocation34_spill] sm:$0xff] %v13129_v29  ;;  %v3945_v23 = vsub.f32 %v14706_v16, %v12739_v8  ;;  %v13133_v1 = vpop.eup %9548  ;;  %v14711_v8 = vld [vmem:[#allocation127_spill] sm:$0xff] }
 0x924   : > { %9562 = vpow2.f32 %v4535_v48  ;;  %14702 = vst [vmem:[#allocation115_spill] sm:$0xff] %v13121_v20  ;;  %v13123_v37 = vpop.permute.xlu1 %5106  ;;  %14707 = vst [vmem:[#allocation39_spill] sm:$0xff] %v13133_v1  ;;  %v13135_v48 = vpop.eup %9550 }
 0x925   : > { %14703 = vst [vmem:[#allocation124_spill] sm:$0xff] %v13123_v37  ;;  %9564 = vpow2.f32 %v4533_v10  ;;  %5341 = vperm.xlu0 %9385, %v13119_v55   ;;  %5266 = vperm.xlu1 %9384, %v13108_v42   ;;  %14708 = vst [vmem:[#allocation35_spill] sm:$0xff] %v13135_v48  ;;  %v13141_v38 = vpop.eup %9552  ;;  %v4053_v52 = vmul.f32 1.442695, %v3945_v23  ;;  %v14749_v37 = vld [vmem:[#allocation62_spill] sm:$0xff] }
 0x926   : > { %9566 = vpow2.f32 %v4539_v14  ;;  %v13145_v10 = vpop.eup %9554  ;;  %v3961_v14 = vsub.f32 %v14711_v8, %v12759_v21 }
 0x927   : > { %v13137_v30 = vpop.permute.xlu0 %5131  ;;  %9568 = vpow2.f32 %v4057_v27 }
 0x928   : > { %14709 = vst [vmem:[#allocation36_spill] sm:$0xff] %v13137_v30  ;;  %v13139_v4 = vpop.permute.xlu1 %5186  ;;  %9570 = vpow2.f32 %v4053_v52  ;;  %v4085_v23 = vmul.f32 1.442695, %v3961_v14  ;;  %v14727_v30 = vld [vmem:[#allocation49_spill] sm:$0xff] }
 0x929   : > { %14710 = vst [vmem:[#allocation41_spill] sm:$0xff] %v13139_v4  ;;  %5291 = vperm.xlu0 %9385, %v13129_v29   ;;  %5346 = vperm.xlu1 %9384, %v13113_v12  }
 0x92a   : > { %9572 = vpow2.f32 %v4085_v23 }
 0x92b   : > { %v13149_v16 = vpop.eup %9556  ;;  %v13153_v22 = vpop.permute.xlu0 %5211 }
 0x92c   : > { %v13151_v55 = vpop.eup %9558  ;;  %14712 = vst [vmem:[#allocation38_spill] sm:$0xff] %v13153_v22  ;;  %v13155_v59 = vpop.permute.xlu1 %5096  ;;  %v5444_v29 = vpack.c.bf16 %v13145_v10, %v13149_v16 }
 0x92d   : > { %14713 = vst [vmem:[#allocation37_spill] sm:$0xff] %v13155_v59  ;;  %v13159_v57 = vpop.eup %9560  ;;  %5281 = vperm.xlu0 %9385, %v13133_v1   ;;  %5256 = vperm.xlu1 %9384, %v13117_v40   ;;  %v5445_v21 = vpack.c.bf16 %v13151_v55, %v13141_v38 }
 0x92e   : > { %v13165_v27 = vpop.eup %9562  ;;  %8906 = vmatprep.mubr.bf16.mxu0 %v5444_v29 }
 0x92f   : > { %v13167_v8 = vpop.eup %9564  ;;  %8907 = vmatmul.mubr.bf16.gmra.mrb[44].mxu0 %v5445_v21  ;;  %v13171_v42 = vpop.permute.xlu0 %5121 }
 0x930   : > { %v13169_v12 = vpop.eup %9566  ;;  %14714 = vst [vmem:[#allocation40_spill] sm:$0xff] %v13171_v42  ;;  %v13173_v63 = vpop.permute.xlu1 %5176  ;;  %v5452_v1 = vpack.c.bf16 %v13165_v27, %v13167_v8 }
 0x931   : > { %14715 = vst [vmem:[#allocation114_spill] sm:$0xff] %v13173_v63  ;;  %5361 = vperm.xlu0 %9385, %v13135_v48   ;;  %5336 = vperm.xlu1 %9384, %v13125_v19   ;;  %v5453_v52 = vpack.c.bf16 %v13169_v12, %v13159_v57  ;;  %v13181_v29 = vpop.eup %9568 }
 0x932   : > { %8938 = vmatprep.mubr.bf16.mxu1 %v5452_v1  ;;  %14716 = vst [vmem:[#allocation122_spill] sm:$0xff] %v13181_v29  ;;  %v13188_v40 = vpop.eup %9570 }
 0x933   : > { %8939 = vmatmul.mubr.bf16.gmra.mrb[44].mxu1 %v5453_v52  ;;  %v13183_v14 = vpop.permute.xlu0 %5201  ;;  %14719 = vst [vmem:[#allocation140_spill] sm:$0xff] %v13188_v40 }
 0x934   : > { %14717 = vst [vmem:[#allocation127_spill] sm:$0xff] %v13183_v14  ;;  %v13185_v21 = vpop.permute.xlu1 %5126  ;;  %v13193_v19 = vpop.eup %9572  ;;  %v14725_v14 = vld [vmem:[#allocation42_spill] sm:$0xff] }
 0x935   : > { %14718 = vst [vmem:[#allocation139_spill] sm:$0xff] %v13185_v21  ;;  %5286 = vperm.xlu1 %9384, %v13181_v29   ;;  %14721 = vst [vmem:[#allocation142_spill] sm:$0xff] %v13193_v19  ;;  %v14724_v29 = vld [vmem:[#allocation47_spill] sm:$0xff] }
 0x937   : > { %v4271_v15 = vpop.permute.xlu0 %4270 }
 0x938   : > { %v13190_v48 = vpop.permute.xlu1 %5206 }
 0x939   : > { %14720 = vst [vmem:[#allocation141_spill] sm:$0xff] %v13190_v48  ;;  %5276 = vperm.xlu1 %9384, %v13188_v40   ;;  %v14726_v48 = vld [vmem:[#allocation43_spill] sm:$0xff] }
 0x93a   : > { %v4448_v40 = vsub.f32 %v14726_v48, %v4271_v15 }
 0x93b   : > { %v4351_v23 = vpop.permute.xlu0 %4350 }
 0x93c   : > { %v13195_v1 = vpop.permute.xlu1 %5116  ;;  %v4547_v2 = vmul.f32 1.442695, %v4448_v40 }
 0x93d   : > { %14722 = vst [vmem:[#allocation143_spill] sm:$0xff] %v13195_v1  ;;  %5356 = vperm.xlu1 %9384, %v13193_v19  }
 0x93f   : > { %v4261_v52 = vpop.permute.xlu0 %4260 }
 0x940   : > { %v13198_v44 = vpop.permute.xlu1 %5196  ;;  %v4446_v24 = vsub.f32 %v14724_v29, %v4261_v52  ;;  %v4464_v29 = vsub.f32 %v14730_v11, %v4351_v23 }
 0x941   : > { %14723 = vst [vmem:[#allocation144_spill] sm:$0xff] %v13198_v44  ;;  %v14729_v44 = vld [vmem:[#allocation46_spill] sm:$0xff] }
 0x942   : > { %v4543_v42 = vmul.f32 1.442695, %v4446_v24  ;;  %v14731_v24 = vld [vmem:[#allocation48_spill] sm:$0xff] }
 0x943   : > { %v4341_v5 = vpop.permute.xlu0 %4340 }
 0x944   : > { %v4266_v61 = vpop.permute.xlu1 %4265  ;;  %v4462_v21 = vsub.f32 %v14727_v30, %v4341_v5  ;;  %9574 = vpow2.f32 %v4543_v42 }
 0x945   : > { %v4447_v22 = vsub.f32 %v14725_v14, %v4266_v61  ;;  %v14735_v14 = vld [vmem:[#allocation57_spill] sm:$0xff] }
 0x946   : > { %v4575_v59 = vmul.f32 1.442695, %v4462_v21 }
 0x947   : > { %v4291_v60 = vpop.permute.xlu0 %4290  ;;  %v4545_v19 = vmul.f32 1.442695, %v4447_v22  ;;  %v4579_v22 = vmul.f32 1.442695, %v4464_v29 }
 0x948   : > { %v4346_v49 = vpop.permute.xlu1 %4345 }
 0x949   : > { %v4463_v63 = vsub.f32 %v14728_v25, %v4346_v49  ;;  %9576 = vpow2.f32 %v4545_v19 }
 0x94b   : > { %v13204_v20 = vpop.permute.xlu0 %4370  ;;  %v4577_v5 = vmul.f32 1.442695, %v4463_v63 }
 0x94c   : > { %v4256_v1 = vpop.permute.xlu1 %4255 }
 0x94d   : > { %v4445_v4 = vsub.f32 %v14729_v44, %v4256_v1  ;;  %v14732_v44 = vld [vmem:[#allocation51_spill] sm:$0xff] }
 0x94e   : > { %v4452_v42 = vsub.f32 %v14732_v44, %v4291_v60  ;;  %v14736_v60 = vld [vmem:[#allocation52_spill] sm:$0xff] }
 0x94f   : > { %v4541_v52 = vmul.f32 1.442695, %v4445_v4  ;;  %v4281_v61 = vpop.permute.xlu0 %4280  ;;  %v13218_v4 = vpop.eup %9574 }
 0x950   : > { %4737 = vadd.xlane.f32.xlu0 %v12834_v0  ;;  %v4336_v15 = vpop.permute.xlu1 %4335  ;;  %v14733_v0 = vld [vmem:[#allocation55_spill] sm:$0xff] }
 0x951   : > { %v4461_v48 = vsub.f32 %v14731_v24, %v4336_v15  ;;  %9578 = vpow2.f32 %v4541_v52  ;;  %v4450_v40 = vsub.f32 %v14733_v0, %v4281_v61 }
 0x952   : > { %9580 = vpow2.f32 %v4547_v2  ;;  %v14734_v2 = vld [vmem:[#allocation50_spill] sm:$0xff] }
 0x953   : > { %v4573_v49 = vmul.f32 1.442695, %v4461_v48  ;;  %9582 = vpow2.f32 %v4575_v59  ;;  %v4361_v25 = vpop.permute.xlu0 %4360  ;;  %v13220_v59 = vpop.eup %9576  ;;  %v4551_v1 = vmul.f32 1.442695, %v4450_v40 }
 0x954   : > { %4769 = vadd.xlane.f32.xlu0 %v12817_v17  ;;  %v4286_v11 = vpop.permute.xlu1 %4285  ;;  %9584 = vpow2.f32 %v4577_v5  ;;  %v4555_v17 = vmul.f32 1.442695, %v4452_v42  ;;  %v4466_v21 = vsub.f32 %v14735_v14, %v4361_v25  ;;  %v14737_v5 = vld [vmem:[#allocation54_spill] sm:$0xff] }
 0x955   : > { %9586 = vpow2.f32 %v4573_v49  ;;  %v4451_v30 = vsub.f32 %v14734_v2, %v4286_v11  ;;  %v14738_v49 = vld [vmem:[#allocation53_spill] sm:$0xff] }
 0x956   : > { %9588 = vpow2.f32 %v4579_v22  ;;  %v4468_v25 = vsub.f32 %v14738_v49, %v13204_v20 }
 0x957   : > { %v13214_v19 = vpop.permute.xlu0 %4310  ;;  %v4553_v15 = vmul.f32 1.442695, %v4451_v30  ;;  %9590 = vpow2.f32 %v4555_v17  ;;  %v14740_v30 = vld [vmem:[#allocation56_spill] sm:$0xff] }
 0x958   : > { %4765 = vadd.xlane.f32.xlu0 %v12809_v58  ;;  %v4366_v63 = vpop.permute.xlu1 %4365  ;;  %9592 = vpow2.f32 %v4551_v1 }
 0x959   : > { %v4467_v29 = vsub.f32 %v14736_v60, %v4366_v63  ;;  %9594 = vpow2.f32 %v4553_v15 }
 0x95b   : > { %v13223_v23 = vpop.eup %9578  ;;  %v4585_v40 = vmul.f32 1.442695, %v4467_v29 }
 0x95c   : > { %v13226_v52 = vpop.permute.xlu0 %4390  ;;  %4735 = vadd.xlane.f32.xlu0 %v12831_v3  ;;  %v4276_v58 = vpop.permute.xlu1 %4275  ;;  %v5454_v48 = vpack.c.bf16 %v13218_v4, %v13223_v23  ;;  %v4583_v3 = vmul.f32 1.442695, %v4466_v21  ;;  %v4587_v21 = vmul.f32 1.442695, %v4468_v25 }
 0x95d   : > { %v13229_v61 = vpop.eup %9580  ;;  %v4449_v24 = vsub.f32 %v14737_v5, %v4276_v58 }
 0x95e   : > { %v13234_v22 = vpop.eup %9582  ;;  %v5455_v11 = vpack.c.bf16 %v13229_v61, %v13220_v59  ;;  %8958 = vmatprep.mubr.bf16.mxu0 %v5454_v48 }
 0x95f   : > { %v13240_v44 = vpop.eup %9584  ;;  %v4549_v42 = vmul.f32 1.442695, %v4449_v24 }
 0x960   : > { %v13242_v0 = vpop.eup %9586  ;;  %8959 = vmatmul.mubr.bf16.vlgmr.msra.gmra.mrb[48].mxu0 %v5455_v11  ;;  %v13244_v63 = vpop.permute.xlu0 %5221  ;;  %4745 = vadd.xlane.f32.xlu0 %v12915_v13 }
 0x961   : > { %14739 = vst [vmem:[#allocation47_spill] sm:$0xff] %v13244_v63  ;;  %v4356_v2 = vpop.permute.xlu1 %4355  ;;  %v13247_v20 = vpop.eup %9588  ;;  %4733 = vadd.xlane.f32.xlu1 %v12821_v41  ;;  %v5462_v17 = vpack.c.bf16 %v13234_v22, %v13242_v0  ;;  %9596 = vpow2.f32 %v4549_v42  ;;  %v14748_v63 = vld [vmem:[#allocation60_spill] sm:$0xff] }
 0x962   : > { %v4465_v14 = vsub.f32 %v14740_v30, %v4356_v2  ;;  %v5463_v1 = vpack.c.bf16 %v13247_v20, %v13240_v44  ;;  %9598 = vpow2.f32 %v4583_v3  ;;  %v13258_v15 = vpop.eup %9590  ;;  %v14744_v3 = vld [vmem:[#allocation58_spill] sm:$0xff] }
 0x963   : > { %8990 = vmatprep.mubr.bf16.mxu1 %v5462_v17  ;;  %9600 = vpow2.f32 %v4585_v40  ;;  %v13261_v5 = vpop.eup %9592  ;;  %v14745_v40 = vld [vmem:[#allocation134_spill] sm:$0xff]  ;;  %v14746_v17 = vld [vmem:[#allocation59_spill] sm:$0xff] }
 0x964   : > { %v4581_v60 = vmul.f32 1.442695, %v4465_v14  ;;  %8991 = vmatmul.mubr.bf16.vlgmr.msra.gmra.mrb[48].mxu1 %v5463_v1  ;;  %v4301_v13 = vpop.permute.xlu0 %4300  ;;  %4777 = vadd.xlane.f32.xlu0 %v12873_v50  ;;  %v13263_v24 = vpop.eup %9594  ;;  %v14741_v50 = vld [vmem:[#allocation63_spill] sm:$0xff] }
 0x965   : > { %v4306_v29 = vpop.permute.xlu1 %4305  ;;  %4739 = vadd.xlane.f32.xlu1 %v12828_v43  ;;  %v4454_v49 = vsub.f32 %v14741_v50, %v4301_v13  ;;  %v14742_v43 = vld [vmem:[#allocation24_spill] sm:$0xff]  ;;  %v5457_v30 = vpack.c.bf16 %v13258_v15, %v13263_v24  ;;  %v14747_v13 = vld [vmem:[#allocation65_spill] sm:$0xff] }
 0x966   : > { %9602 = vpow2.f32 %v4581_v60  ;;  %v4455_v42 = vsub.f32 %v14744_v3, %v4306_v29 }
 0x967   : > { %9604 = vpow2.f32 %v4587_v21  ;;  %v4456_v21 = vsub.f32 %v14746_v17, %v13214_v19  ;;  %v4559_v60 = vmul.f32 1.442695, %v4454_v49 }
 0x968   : > { %v4381_v41 = vpop.permute.xlu0 %4380  ;;  %4741 = vadd.xlane.f32.xlu0 %v12901_v47 }
 0x969   : > { %v4386_v58 = vpop.permute.xlu1 %4385  ;;  %4771 = vadd.xlane.f32.xlu1 %v12805_v33  ;;  %v4470_v29 = vsub.f32 %v14747_v13, %v4381_v41  ;;  %v4563_v41 = vmul.f32 1.442695, %v4456_v21  ;;  %9606 = vpow2.f32 %v4559_v60  ;;  %v14754_v60 = vld [vmem:[#allocation82_spill] sm:$0xff] }
 0x96b   : > { %v13265_v48 = vpop.eup %9596  ;;  %v4591_v13 = vmul.f32 1.442695, %v4470_v29 }
 0x96c   : > { %v13268_v25 = vpop.permute.xlu0 %4330  ;;  %4773 = vadd.xlane.f32.xlu0 %v14742_v43  ;;  %v13273_v47 = vpop.eup %9598  ;;  %v5456_v33 = vpack.c.bf16 %v13261_v5, %v13265_v48 }
 0x96d   : > { %v13271_v11 = vpop.permute.xlu1 %5216  ;;  %4767 = vadd.xlane.f32.xlu1 %v14745_v40  ;;  %v13279_v2 = vpop.eup %9600  ;;  %v4561_v40 = vmul.f32 1.442695, %v4455_v42 }
 0x96e   : > { %14743 = vst [vmem:[#allocation42_spill] sm:$0xff] %v13271_v11  ;;  %8962 = vmatprep.mubr.bf16.mxu0 %v5456_v33  ;;  %v4471_v11 = vsub.f32 %v14748_v63, %v4386_v58  ;;  %v14750_v33 = vld [vmem:[#allocation81_spill] sm:$0xff] }
 0x96f   : > { %8963 = vmatmul.mubr.bf16.gmra.mrb[52].mxu0 %v5457_v30  ;;  %v14751_v30 = vld [vmem:[#allocation61_spill] sm:$0xff]  ;;  %9608 = vpow2.f32 %v4561_v40  ;;  %v14756_v40 = vld [vmem:[#allocation66_spill] sm:$0xff] }
 0x970   : > { %v13283_v14 = vpop.eup %9602  ;;  %v13290_v50 = vpop.permute.xlu0 %4410  ;;  %4753 = vadd.xlane.f32.xlu0 %v12992_v51  ;;  %v4472_v17 = vsub.f32 %v14751_v30, %v13226_v52  ;;  %v4593_v63 = vmul.f32 1.442695, %v4471_v11 }
 0x971   : > { %v13287_v1 = vpop.eup %9604  ;;  %v4296_v43 = vpop.permute.xlu1 %4295  ;;  %v5464_v3 = vpack.c.bf16 %v13273_v47, %v13283_v14  ;;  %4747 = vadd.xlane.f32.xlu1 %v14750_v33 }
 0x972   : > { %v4453_v19 = vsub.f32 %v14749_v37, %v4296_v43  ;;  %v5465_v49 = vpack.c.bf16 %v13287_v1, %v13279_v2  ;;  %v14752_v37 = vld [vmem:[#allocation64_spill] sm:$0xff]  ;;  %v14753_v43 = vld [vmem:[#allocation135_spill] sm:$0xff]  ;;  %v4595_v21 = vmul.f32 1.442695, %v4472_v17 }
 0x973   : > { %8994 = vmatprep.mubr.bf16.mxu1 %v5464_v3  ;;  %v13311_v30 = vpop.eup %9606 }
 0x974   : > { %v4557_v51 = vmul.f32 1.442695, %v4453_v19  ;;  %8995 = vmatmul.mubr.bf16.gmra.mrb[52].mxu1 %v5465_v49  ;;  %4785 = vadd.xlane.f32.xlu0 %v13013_v31  ;;  %v4321_v33 = vpop.permute.xlu0 %4320  ;;  %v14755_v31 = vld [vmem:[#allocation71_spill] sm:$0xff] }
 0x975   : > { %v4376_v42 = vpop.permute.xlu1 %4375  ;;  %4779 = vadd.xlane.f32.xlu1 %v14753_v43  ;;  %v4458_v11 = vsub.f32 %v14755_v31, %v4321_v33  ;;  %v14760_v43 = vld [vmem:[#allocation68_spill] sm:$0xff] }
 0x976   : > { %v4469_v58 = vsub.f32 %v14752_v37, %v4376_v42  ;;  %9610 = vpow2.f32 %v4557_v51  ;;  %v14759_v42 = vld [vmem:[#allocation73_spill] sm:$0xff] }
 0x977   : > { %9612 = vpow2.f32 %v4563_v41  ;;  %v14757_v41 = vld [vmem:[#allocation20_spill] sm:$0xff] }
 0x978   : > { %v4589_v3 = vmul.f32 1.442695, %v4469_v58  ;;  %9614 = vpow2.f32 %v4591_v13  ;;  %4749 = vadd.xlane.f32.xlu0 %v13003_v53  ;;  %v4401_v29 = vpop.permute.xlu0 %4400  ;;  %v14758_v53 = vld [vmem:[#allocation67_spill] sm:$0xff]  ;;  %v4567_v13 = vmul.f32 1.442695, %v4458_v11  ;;  %v14762_v11 = vld [vmem:[#allocation69_spill] sm:$0xff] }
 0x979   : > { %v4326_v52 = vpop.permute.xlu1 %4325  ;;  %9616 = vpow2.f32 %v4593_v63  ;;  %4743 = vadd.xlane.f32.xlu1 %v14754_v60  ;;  %v4460_v17 = vsub.f32 %v14758_v53, %v13268_v25  ;;  %v13315_v51 = vpop.eup %9608  ;;  %v4474_v63 = vsub.f32 %v14759_v42, %v4401_v29  ;;  %v4476_v29 = vsub.f32 %v14762_v11, %v13290_v50  ;;  %v14763_v50 = vld [vmem:[#allocation72_spill] sm:$0xff] }
 0x97a   : > { %9618 = vpow2.f32 %v4589_v3  ;;  %v4459_v19 = vsub.f32 %v14756_v40, %v4326_v52  ;;  %v14761_v3 = vld [vmem:[#allocation70_spill] sm:$0xff] }
 0x97b   : > { %9620 = vpow2.f32 %v4595_v21  ;;  %v4571_v31 = vmul.f32 1.442695, %v4460_v17 }
 0x97c   : > { %4781 = vadd.xlane.f32.xlu0 %v13026_v28  ;;  %v4569_v58 = vmul.f32 1.442695, %v4459_v19  ;;  %9622 = vpow2.f32 %v4567_v13  ;;  %v4599_v19 = vmul.f32 1.442695, %v4474_v63  ;;  %v4603_v63 = vmul.f32 1.442695, %v4476_v29 }
 0x97d   : > { %v4406_v49 = vpop.permute.xlu1 %4405  ;;  %4775 = vadd.xlane.f32.xlu1 %v14757_v41 }
 0x97e   : > { %v4475_v33 = vsub.f32 %v14760_v43, %v4406_v49  ;;  %9624 = vpow2.f32 %v4569_v58 }
 0x980   : > { %v13318_v37 = vpop.eup %9610  ;;  %4761 = vadd.xlane.f32.xlu0 %v13141_v38 }
 0x981   : > { %v4316_v28 = vpop.permute.xlu1 %4315  ;;  %v13322_v21 = vpop.eup %9612  ;;  %4755 = vadd.xlane.f32.xlu1 %v13005_v35  ;;  %v5458_v25 = vpack.c.bf16 %v13311_v30, %v13318_v37  ;;  %v4601_v35 = vmul.f32 1.442695, %v4475_v33 }
 0x982   : > { %v4457_v52 = vsub.f32 %v14761_v3, %v4316_v28  ;;  %v13328_v60 = vpop.eup %9614  ;;  %v5459_v40 = vpack.c.bf16 %v13322_v21, %v13315_v51 }
 0x983   : > { %v13334_v38 = vpop.eup %9616  ;;  %8966 = vmatprep.mubr.bf16.mxu0 %v5458_v25 }
 0x984   : > { %v4565_v49 = vmul.f32 1.442695, %v4457_v52  ;;  %v13336_v41 = vpop.eup %9618  ;;  %8967 = vmatmul.mubr.bf16.gmra.mrb[56].mxu0 %v5459_v40  ;;  %4793 = vadd.xlane.f32.xlu0 %v13159_v57 }
 0x985   : > { %v4396_v53 = vpop.permute.xlu1 %4395  ;;  %v13339_v17 = vpop.eup %9620  ;;  %4787 = vadd.xlane.f32.xlu1 %v13028_v56  ;;  %v5466_v13 = vpack.c.bf16 %v13328_v60, %v13336_v41 }
 0x986   : > { %9626 = vpow2.f32 %v4565_v49  ;;  %v4473_v42 = vsub.f32 %v14763_v50, %v4396_v53  ;;  %v5467_v58 = vpack.c.bf16 %v13339_v17, %v13334_v38  ;;  %v13349_v56 = vpop.permute.xlu0 %5231  ;;  %v13352_v57 = vpop.eup %9622  ;;  %v4990_v50 = vld [vmem:[#allocation7] sm:$0xff] }
 0x987   : > { %9628 = vpow2.f32 %v4571_v31  ;;  %8998 = vmatprep.mubr.bf16.mxu1 %v5466_v13 }
 0x988   : > { %9630 = vpow2.f32 %v4599_v19  ;;  %v4597_v43 = vmul.f32 1.442695, %v4473_v42  ;;  %8999 = vmatmul.mubr.bf16.gmra.mrb[56].mxu1 %v5467_v58  ;;  %4757 = vadd.xlane.f32.xlu0 %v13149_v16  ;;  %v13355_v33 = vpop.eup %9624  ;;  %v5009_v19 = vld [vmem:[#allocation7 + $0x98] sm:$0xff] }
 0x989   : > { %9632 = vpow2.f32 %v4601_v35  ;;  %4751 = vadd.xlane.f32.xlu1 %v12998_v62  ;;  %v13387_v29 = vpop.permute.xlu1 %5226  ;;  %v4993_v58 = vld [vmem:[#allocation7 + $0x18] sm:$0xff] }
 0x98a   : > { %9634 = vpow2.f32 %v4597_v43  ;;  %v13366_v52 = vpop.permute.xlu0 %5241  ;;  %v14766_v43 = vld [vmem:[#allocation138_spill] sm:$0xff] }
 0x98b   : > { %9636 = vpow2.f32 %v4603_v63 }
 0x98c   : > { %4789 = vadd.xlane.f32.xlu0 %v13167_v8 }
 0x98d   : > { %4783 = vadd.xlane.f32.xlu1 %v13021_v6 }
 0x98e   : > { %v13383_v11 = vpop.permute.xlu0 %5251 }
 0x990   : > { %v13357_v28 = vpop.eup %9626  ;;  %4801 = vadd.xlane.f32.xlu0 %v13220_v59 }
 0x991   : > { %v13359_v3 = vpop.eup %9628  ;;  %v5460_v62 = vpack.c.bf16 %v13352_v57, %v13357_v28  ;;  %4763 = vadd.xlane.f32.xlu1 %v13151_v55 }
 0x992   : > { %v13364_v16 = vpop.eup %9630  ;;  %v5461_v6 = vpack.c.bf16 %v13359_v3, %v13355_v33 }
 0x993   : > { %v13371_v8 = vpop.eup %9632  ;;  %8970 = vmatprep.mubr.bf16.mxu0 %v5460_v62 }
 0x994   : > { %v13373_v25 = vpop.eup %9634  ;;  %8971 = vmatmul.mubr.bf16.gmra.mrb[60].mxu0 %v5461_v6  ;;  %4833 = vadd.xlane.f32.xlu0 %v13240_v44  ;;  %v13390_v44 = vpop.permute.xlu0 %5301 }
 0x995   : > { %v13375_v31 = vpop.eup %9636  ;;  %v5468_v59 = vpack.c.bf16 %v13364_v16, %v13373_v25  ;;  %4795 = vadd.xlane.f32.xlu1 %v13169_v12  ;;  %v13395_v12 = vpop.permute.xlu1 %5236 }
 0x996   : > { %v5469_v55 = vpack.c.bf16 %v13375_v31, %v13371_v8 }
 0x997   : > { %9002 = vmatprep.mubr.bf16.mxu1 %v5468_v59  ;;  %v14767_v59 = vld [vmem:[#allocation21_spill] sm:$0xff] }
 0x998   : > { %9003 = vmatmul.mubr.bf16.gmra.mrb[60].mxu1 %v5469_v55  ;;  %4797 = vadd.xlane.f32.xlu0 %v13223_v23  ;;  %v13397_v40 = vpop.permute.xlu0 %5311  ;;  %v5006_v23 = vld [vmem:[#allocation7 + $0x80] sm:$0xff] }
 0x999   : > { %4759 = vadd.xlane.f32.xlu1 %v13145_v10  ;;  %v5008_v10 = vld [vmem:[#allocation7 + $0x90] sm:$0xff]  ;;  %v5390_v53 = vmul.f32 %v12938_v34, %v5006_v23 }
 0x99a   : > { %v14768_v23 = vld [vmem:[#allocation22_spill] sm:$0xff] }
 0x99c   : > { %4829 = vadd.xlane.f32.xlu0 %v13242_v0  ;;  %v13401_v0 = vpop.permute.xlu1 %5246  ;;  %v13405_v35 = vpop.permute.xlu0 %5321 }
 0x99d   : > { %4791 = vadd.xlane.f32.xlu1 %v13165_v27  ;;  %v14764_v27 = vld [vmem:[#allocation136_spill] sm:$0xff] }
 0x99e   : > { %v5392_v49 = vmul.f32 %v14764_v27, %v5008_v10  ;;  %v4991_v10 = vld [vmem:[#allocation7 + $0x8] sm:$0xff] }
 0x9a0   : > { %4809 = vadd.xlane.f32.xlu0 %v13263_v24  ;;  %v5007_v24 = vld [vmem:[#allocation7 + $0x88] sm:$0xff]  ;;  %v13416_v27 = vpop.permute.xlu1 %5296 }
 0x9a1   : > { %4803 = vadd.xlane.f32.xlu1 %v13229_v61  ;;  %v4992_v61 = vld [vmem:[#allocation7 + $0x10] sm:$0xff]  ;;  %v5391_v62 = vmul.f32 %v14766_v43, %v5007_v24 }
 0x9a2   : > { %v5376_v55 = vmul.f32 %v14767_v59, %v4992_v61 }
 0x9a4   : > { %4841 = vadd.xlane.f32.xlu0 %v13279_v2  ;;  %v13430_v43 = vpop.permute.xlu1 %5306 }
 0x9a5   : > { %4835 = vadd.xlane.f32.xlu1 %v13247_v20  ;;  %v14765_v20 = vld [vmem:[#allocation23_spill] sm:$0xff] }
 0x9a6   : > { %v5393_v42 = vmul.f32 %v14765_v20, %v5009_v19  ;;  %v5374_v19 = vmul.f32 %v14768_v23, %v4990_v50 }
 0x9a8   : > { %4805 = vadd.xlane.f32.xlu0 %v13265_v48 }
 0x9a9   : > { %4799 = vadd.xlane.f32.xlu1 %v13218_v4 }
 0x9aa   : > { %v8928_v2 = vpop.f32.mrb[32].mxu1 }
 0x9ab   : > { %v5876_v13 = vadd.f32 %v8928_v2, %v5392_v49  ;;  %v5601_v63 = vpop.f32.mrb[33].mxu1 }
 0x9ac   : > { %v5874_v48 = vadd.f32 %v5601_v63, %v5390_v53  ;;  %v8929_v6 = vpop.f32.mrb[34].mxu1  ;;  %4837 = vadd.xlane.f32.xlu0 %v13283_v14  ;;  %v14769_v53 = vld [vmem:[#allocation25_spill] sm:$0xff]  ;;  %v13420_v14 = vpop.permute.xlu0 %5331 }
 0x9ad   : > { %5940 = vst.msk [vmem:[#allocation7 + $0x90] sm:$0xff] %vm2936_vm5, %v5876_v13  ;;  %v5877_v4 = vadd.f32 %v8929_v6, %v5393_v42  ;;  %v5604_v34 = vpop.f32.mrb[35].mxu1  ;;  %4831 = vadd.xlane.f32.xlu1 %v13234_v22  ;;  %v5377_v2 = vmul.f32 %v14769_v53, %v4993_v58  ;;  %v5375_v42 = vmul.f32 %v12971_v32, %v4991_v10  ;;  %v5013_v6 = vld [vmem:[#allocation7 + $0xb8] sm:$0xff] }
 0x9ae   : > { %5938 = vst.msk [vmem:[#allocation7 + $0x80] sm:$0xff] %vm2936_vm5, %v5874_v48  ;;  %v5875_v49 = vadd.f32 %v5604_v34, %v5391_v62  ;;  %v8896_v24 = vpop.f32.mrb[32].mxu0  ;;  %v5010_v62 = vld [vmem:[#allocation7 + $0xa0] sm:$0xff] }
 0x9af   : > { %5941 = vst.msk [vmem:[#allocation7 + $0x98] sm:$0xff] %vm2936_vm5, %v5877_v4  ;;  %v5860_v61 = vadd.f32 %v8896_v24, %v5376_v55  ;;  %v5504_v20 = vpop.f32.mrb[33].mxu0  ;;  %v4995_v24 = vld [vmem:[#allocation7 + $0x28] sm:$0xff] }
 0x9b0   : > { %5939 = vst.msk [vmem:[#allocation7 + $0x88] sm:$0xff] %vm2936_vm5, %v5875_v49  ;;  %v5858_v22 = vadd.f32 %v5504_v20, %v5374_v19  ;;  %v8897_v50 = vpop.f32.mrb[34].mxu0  ;;  %4817 = vadd.xlane.f32.xlu0 %v13315_v51  ;;  %v13434_v32 = vpop.permute.xlu0 %5271  ;;  %v4994_v49 = vld [vmem:[#allocation7 + $0x20] sm:$0xff] }
 0x9b1   : > { %5924 = vst.msk [vmem:[#allocation7 + $0x10] sm:$0xff] %vm2936_vm5, %v5860_v61  ;;  %v5861_v13 = vadd.f32 %v8897_v50, %v5377_v2  ;;  %v5507_v63 = vpop.f32.mrb[35].mxu0  ;;  %4811 = vadd.xlane.f32.xlu1 %v13258_v15  ;;  %v5012_v15 = vld [vmem:[#allocation7 + $0xb0] sm:$0xff]  ;;  %v13439_v51 = vpop.permute.xlu1 %5316  ;;  %v5378_v53 = vmul.f32 %v13067_v54, %v4994_v49  ;;  %v5379_v50 = vmul.f32 %v13007_v7, %v4995_v24  ;;  %v5014_v24 = vld [vmem:[#allocation7 + $0xc0] sm:$0xff] }
 0x9b2   : > { %5922 = vst.msk [vmem:[#allocation7] sm:$0xff] %vm2936_vm5, %v5858_v22  ;;  %v5859_v58 = vadd.f32 %v5507_v63, %v5375_v42  ;;  %v5396_v59 = vmul.f32 %v13009_v46, %v5012_v15  ;;  %v14771_v63 = vld [vmem:[#allocation119_spill] sm:$0xff] }
 0x9b3   : > { %5925 = vst.msk [vmem:[#allocation7 + $0x18] sm:$0xff] %vm2936_vm5, %v5861_v13 }
 0x9b4   : > { %5923 = vst.msk [vmem:[#allocation7 + $0x8] sm:$0xff] %vm2936_vm5, %v5859_v58  ;;  %4849 = vadd.xlane.f32.xlu0 %v13334_v38  ;;  %v13441_v48 = vpop.permute.xlu0 %5351  ;;  %v5011_v38 = vld [vmem:[#allocation7 + $0xa8] sm:$0xff] }
 0x9b5   : > { %4843 = vadd.xlane.f32.xlu1 %v13287_v1  ;;  %v5394_v1 = vmul.f32 %v13083_v36, %v5010_v62  ;;  %v5395_v4 = vmul.f32 %v13030_v45, %v5011_v38  ;;  %v13449_v34 = vpop.permute.xlu1 %5326  ;;  %v4996_v36 = vld [vmem:[#allocation7 + $0x30] sm:$0xff]  ;;  %v4997_v45 = vld [vmem:[#allocation7 + $0x38] sm:$0xff] }
 0x9b6   : > { %v5381_v61 = vmul.f32 %v12949_v9, %v4997_v45  ;;  %v14772_v38 = vld [vmem:[#allocation118_spill] sm:$0xff] }
 0x9b8   : > { %4813 = vadd.xlane.f32.xlu0 %v13318_v37  ;;  %v5397_v37 = vmul.f32 %v12958_v39, %v5013_v6 }
 0x9b9   : > { %4807 = vadd.xlane.f32.xlu1 %v13261_v5 }
 0x9bc   : > { %4845 = vadd.xlane.f32.xlu0 %v13336_v41  ;;  %v13452_v41 = vpop.permute.xlu0 %5261 }
 0x9bd   : > { %4839 = vadd.xlane.f32.xlu1 %v13273_v47 }
 0x9be   : > { %v8932_v55 = vpop.f32.mrb[36].mxu1 }
 0x9bf   : > { %v5880_v5 = vadd.f32 %v8932_v55, %v5396_v59  ;;  %v5617_v10 = vpop.f32.mrb[37].mxu1  ;;  %v5000_v59 = vld [vmem:[#allocation7 + $0x50] sm:$0xff]  ;;  %v5001_v55 = vld [vmem:[#allocation7 + $0x58] sm:$0xff] }
 0x9c0   : > { %v5878_v23 = vadd.f32 %v5617_v10, %v5394_v1  ;;  %v8933_v19 = vpop.f32.mrb[38].mxu1  ;;  %4825 = vadd.xlane.f32.xlu0 %v13355_v33  ;;  %v5380_v33 = vmul.f32 %v12990_v26, %v4996_v36  ;;  %v13466_v20 = vpop.permute.xlu0 %5341  ;;  %v3963_v1 = vsub.f32 %v14772_v38, %v12717_v18  ;;  %v4999_v10 = vld [vmem:[#allocation7 + $0x48] sm:$0xff]  ;;  %v14776_v18 = vld [vmem:[#allocation84_spill] sm:$0xff] }
 0x9c1   : > { %5944 = vst.msk [vmem:[#allocation7 + $0xb0] sm:$0xff] %vm2936_vm5, %v5880_v5  ;;  %v5881_v46 = vadd.f32 %v8933_v19, %v5397_v37  ;;  %v5620_v47 = vpop.f32.mrb[39].mxu1  ;;  %4819 = vadd.xlane.f32.xlu1 %v13322_v21  ;;  %v13463_v21 = vpop.permute.xlu1 %5266  ;;  %v14773_v37 = vld [vmem:[#allocation77_spill] sm:$0xff]  ;;  %v4623_v19 = vld [vmem:[#allocation6 + $0x90] sm:$0xff] }
 0x9c2   : > { %5942 = vst.msk [vmem:[#allocation7 + $0xa0] sm:$0xff] %vm2936_vm5, %v5878_v23  ;;  %v5879_v39 = vadd.f32 %v5620_v47, %v5395_v4  ;;  %v14774_v4 = vld [vmem:[#allocation124_spill] sm:$0xff]  ;;  %v14775_v47 = vld [vmem:[#allocation37_spill] sm:$0xff]  ;;  %v4089_v45 = vmul.f32 1.442695, %v3963_v1 }
 0x9c3   : > { %5945 = vst.msk [vmem:[#allocation7 + $0xb8] sm:$0xff] %vm2936_vm5, %v5881_v46  ;;  %v5384_v23 = vmul.f32 %v14774_v4, %v5000_v59  ;;  %v5016_v46 = vld [vmem:[#allocation7 + $0xd0] sm:$0xff] }
 0x9c4   : > { %5943 = vst.msk [vmem:[#allocation7 + $0xa8] sm:$0xff] %vm2936_vm5, %v5879_v39  ;;  %4857 = vadd.xlane.f32.xlu0 %v13371_v8  ;;  %v13478_v7 = vpop.permute.xlu0 %5291  ;;  %v14780_v59 = vld [vmem:[#allocation114_spill] sm:$0xff] }
 0x9c5   : > { %4851 = vadd.xlane.f32.xlu1 %v13339_v17  ;;  %v13474_v9 = vpop.permute.xlu1 %5346  ;;  %v5398_v38 = vmul.f32 %v14780_v59, %v5014_v24 }
 0x9c6   : > { %v8900_v2 = vpop.f32.mrb[36].mxu0 }
 0x9c7   : > { %v5864_v42 = vadd.f32 %v8900_v2, %v5380_v33  ;;  %v5520_v22 = vpop.f32.mrb[37].mxu0  ;;  %v5385_v33 = vmul.f32 %v14776_v18, %v5001_v55 }
 0x9c8   : > { %v5862_v13 = vadd.f32 %v5520_v22, %v5378_v53  ;;  %v8901_v8 = vpop.f32.mrb[38].mxu0  ;;  %4821 = vadd.xlane.f32.xlu0 %v13357_v28  ;;  %v14770_v28 = vld [vmem:[#allocation123_spill] sm:$0xff]  ;;  %v13486_v62 = vpop.permute.xlu0 %5281 }
 0x9c9   : > { %5928 = vst.msk [vmem:[#allocation7 + $0x30] sm:$0xff] %vm2936_vm5, %v5864_v42  ;;  %v5865_v26 = vadd.f32 %v8901_v8, %v5381_v61  ;;  %v5523_v17 = vpop.f32.mrb[39].mxu0  ;;  %4815 = vadd.xlane.f32.xlu1 %v13311_v30  ;;  %v3964_v58 = vsub.f32 %v14771_v63, %v14770_v28  ;;  %v13484_v30 = vpop.permute.xlu1 %5256  ;;  %v5017_v61 = vld [vmem:[#allocation7 + $0xd8] sm:$0xff]  ;;  %v14777_v42 = vld [vmem:[#allocation101_spill] sm:$0xff] }
 0x9ca   : > { %5926 = vst.msk [vmem:[#allocation7 + $0x20] sm:$0xff] %vm2936_vm5, %v5862_v13  ;;  %v5863_v54 = vadd.f32 %v5523_v17, %v5379_v50  ;;  %v5383_v22 = vmul.f32 %v14777_v42, %v4999_v10  ;;  %v14778_v13 = vld [vmem:[#allocation78_spill] sm:$0xff]  ;;  %v5015_v17 = vld [vmem:[#allocation7 + $0xc8] sm:$0xff] }
 0x9cb   : > { %5929 = vst.msk [vmem:[#allocation7 + $0x38] sm:$0xff] %vm2936_vm5, %v5865_v26  ;;  %v4091_v15 = vmul.f32 1.442695, %v3964_v58  ;;  %v4687_v8 = vmul.f32 %v14778_v13, %v4623_v19  ;;  %v4605_v13 = vld [vmem:[#allocation6] sm:$0xff] }
 0x9cc   : > { %5927 = vst.msk [vmem:[#allocation7 + $0x28] sm:$0xff] %vm2936_vm5, %v5863_v54  ;;  %4853 = vadd.xlane.f32.xlu0 %v13373_v25  ;;  %v13491_v25 = vpop.permute.xlu0 %5361  ;;  %v14779_v54 = vld [vmem:[#allocation41_spill] sm:$0xff] }
 0x9cd   : > { %4847 = vadd.xlane.f32.xlu1 %v13328_v60  ;;  %9638 = vpow2.f32 %v4091_v15  ;;  %v13489_v6 = vpop.permute.xlu1 %5336  ;;  %v4607_v60 = vld [vmem:[#allocation6 + $0x10] sm:$0xff]  ;;  %v5400_v28 = vmul.f32 %v14779_v54, %v5016_v46 }
 0x9ce   : > { %v4671_v5 = vmul.f32 %v14773_v37, %v4607_v60  ;;  %v4621_v60 = vld [vmem:[#allocation6 + $0x80] sm:$0xff]  ;;  %9640 = vpow2.f32 %v4089_v45 }
 0x9cf   : > { %v14781_v37 = vld [vmem:[#allocation96_spill] sm:$0xff] }
 0x9d1   : > { %4827 = vadd.xlane.f32.xlu1 %v13359_v3  ;;  %v4998_v3 = vld [vmem:[#allocation7 + $0x40] sm:$0xff] }
 0x9d2   : > { %v5382_v36 = vmul.f32 %v14775_v47, %v4998_v3 }
 0x9d5   : > { %4859 = vadd.xlane.f32.xlu1 %v13375_v31 }
 0x9d7   : > { %v13506_v26 = vpop.eup %9638 }
 0x9d8   : > { %v13531_v54 = vpop.eup %9640 }
 0x9d9   : > { %4823 = vadd.xlane.f32.xlu1 %v13352_v57  ;;  %v13500_v57 = vpop.permute.xlu1 %5286 }
 0x9dd   : > { %v4738_v31 = vpop.xlane.xlu0 %4737  ;;  %4855 = vadd.xlane.f32.xlu1 %v13364_v16  ;;  %v13516_v19 = vpop.permute.xlu1 %5276 }
 0x9de   : > { %v4863_v39 = vadd.f32 %v4738_v31, %v4671_v5  ;;  %v8904_v49 = vpop.f32.mrb[40].mxu0  ;;  %v5401_v5 = vmul.f32 %v14781_v37, %v5017_v61 }
 0x9df   : > { %v5868_v53 = vadd.f32 %v8904_v49, %v5384_v23  ;;  %v5536_v2 = vpop.f32.mrb[41].mxu0  ;;  %v14782_v23 = vld [vmem:[#allocation115_spill] sm:$0xff] }
 0x9e0   : > { %4928 = vst.msk [vmem:[#allocation6 + $0x10] sm:$0xff] %vm4925_vm6, %v4863_v39  ;;  %v5866_v16 = vadd.f32 %v5536_v2, %v5382_v36  ;;  %v8905_v50 = vpop.f32.mrb[42].mxu0  ;;  %v5399_v31 = vmul.f32 %v14782_v23, %v5015_v17  ;;  %v14783_v36 = vld [vmem:[#allocation80_spill] sm:$0xff] }
 0x9e1   : > { %5932 = vst.msk [vmem:[#allocation7 + $0x50] sm:$0xff] %vm2936_vm5, %v5868_v53  ;;  %v5869_v63 = vadd.f32 %v8905_v50, %v5385_v33  ;;  %v4770_v58 = vpop.xlane.xlu0 %4769  ;;  %v5539_v15 = vpop.f32.mrb[43].mxu0  ;;  %v4685_v39 = vmul.f32 %v14783_v36, %v4621_v60  ;;  %v4606_v33 = vld [vmem:[#allocation6 + $0x8] sm:$0xff]  ;;  %v14784_v2 = vld [vmem:[#allocation88_spill] sm:$0xff] }
 0x9e2   : > { %5930 = vst.msk [vmem:[#allocation7 + $0x40] sm:$0xff] %vm2936_vm5, %v5866_v16  ;;  %v4879_v1 = vadd.f32 %v4770_v58, %v4687_v8  ;;  %v5867_v3 = vadd.f32 %v5539_v15, %v5383_v22  ;;  %v8936_v55 = vpop.f32.mrb[40].mxu1  ;;  %5371 = vperm.xlu0 %9385, %v13506_v26   ;;  %v4670_v61 = vmul.f32 %v14784_v2, %v4606_v33  ;;  %v4611_v22 = vld [vmem:[#allocation6 + $0x30] sm:$0xff]  ;;  %v13527_v16 = vpop.permute.xlu1 %5356  ;;  %v14785_v8 = vld [vmem:[#allocation91_spill] sm:$0xff]  ;;  %v14789_v36 = vld [vmem:[#allocation100_spill] sm:$0xff] }
 0x9e3   : > { %5933 = vst.msk [vmem:[#allocation7 + $0x58] sm:$0xff] %vm2936_vm5, %v5869_v63  ;;  %v5884_v10 = vadd.f32 %v8936_v55, %v5400_v28  ;;  %v5633_v4 = vpop.f32.mrb[41].mxu1  ;;  %v4675_v17 = vmul.f32 %v14785_v8, %v4611_v22  ;;  %v14786_v63 = vld [vmem:[#allocation74_spill] sm:$0xff]  ;;  %v4625_v33 = vld [vmem:[#allocation6 + $0xa0] sm:$0xff]  ;;  %v4622_v2 = vld [vmem:[#allocation6 + $0x88] sm:$0xff] }
 0x9e4   : > { %4944 = vst.msk [vmem:[#allocation6 + $0x90] sm:$0xff] %vm4925_vm6, %v4879_v1  ;;  %v5882_v46 = vadd.f32 %v5633_v4, %v5398_v38  ;;  %v8937_v47 = vpop.f32.mrb[42].mxu1  ;;  %v4669_v58 = vmul.f32 %v14786_v63, %v4605_v13  ;;  %v4627_v15 = vld [vmem:[#allocation6 + $0xb0] sm:$0xff]  ;;  %v4608_v38 = vld [vmem:[#allocation6 + $0x18] sm:$0xff]  ;;  %v4609_v4 = vld [vmem:[#allocation6 + $0x20] sm:$0xff] }
 0x9e5   : > { %5931 = vst.msk [vmem:[#allocation7 + $0x48] sm:$0xff] %vm2936_vm5, %v5867_v3  ;;  %5948 = vst.msk [vmem:[#allocation7 + $0xd0] sm:$0xff] %vm2936_vm5, %v5884_v10  ;;  %v5885_v49 = vadd.f32 %v8937_v47, %v5401_v5  ;;  %v4766_v45 = vpop.xlane.xlu0 %4765  ;;  %v5636_v18 = vpop.f32.mrb[43].mxu1  ;;  %v14787_v3 = vld [vmem:[#allocation94_spill] sm:$0xff]  ;;  %v14788_v5 = vld [vmem:[#allocation75_spill] sm:$0xff] }
 0x9e6   : > { %5946 = vst.msk [vmem:[#allocation7 + $0xc0] sm:$0xff] %vm2936_vm5, %v5882_v46  ;;  %v4877_v24 = vadd.f32 %v4766_v45, %v4685_v39  ;;  %v5883_v53 = vadd.f32 %v5636_v18, %v5399_v31  ;;  %v4691_v55 = vmul.f32 %v14787_v3, %v4627_v15  ;;  %v4672_v10 = vmul.f32 %v14788_v5, %v4608_v38  ;;  %v4624_v46 = vld [vmem:[#allocation6 + $0x98] sm:$0xff]  ;;  %v14790_v45 = vld [vmem:[#allocation76_spill] sm:$0xff] }
 0x9e7   : > { %5949 = vst.msk [vmem:[#allocation7 + $0xd8] sm:$0xff] %vm2936_vm5, %v5885_v49  ;;  %v4673_v39 = vmul.f32 %v14789_v36, %v4609_v4  ;;  %v4688_v18 = vmul.f32 %v14790_v45, %v4624_v46  ;;  %v14792_v13 = vld [vmem:[#allocation79_spill] sm:$0xff] }
 0x9e8   : > { %4942 = vst.msk [vmem:[#allocation6 + $0x80] sm:$0xff] %vm4925_vm6, %v4877_v24  ;;  %v4686_v8 = vmul.f32 %v14792_v13, %v4622_v2  ;;  %v4628_v4 = vld [vmem:[#allocation6 + $0xb8] sm:$0xff]  ;;  %v5020_v2 = vld [vmem:[#allocation7 + $0xf0] sm:$0xff] }
 0x9e9   : > { %5947 = vst.msk [vmem:[#allocation7 + $0xc8] sm:$0xff] %vm2936_vm5, %v5883_v53  ;;  %v4736_v42 = vpop.xlane.xlu0 %4735  ;;  %v5005_v46 = vld [vmem:[#allocation7 + $0x78] sm:$0xff] }
 0x9ea   : > { %v4862_v50 = vadd.f32 %v4736_v42, %v4670_v61  ;;  %v14791_v42 = vld [vmem:[#allocation102_spill] sm:$0xff] }
 0x9eb   : > { %v4689_v22 = vmul.f32 %v14791_v42, %v4625_v33  ;;  %v14797_v33 = vld [vmem:[#allocation86_spill] sm:$0xff] }
 0x9ec   : > { %4927 = vst.msk [vmem:[#allocation6 + $0x8] sm:$0xff] %vm4925_vm6, %v4862_v50 }
 0x9ed   : > { %v4746_v28 = vpop.xlane.xlu0 %4745 }
 0x9ee   : > { %v4867_v60 = vadd.f32 %v4746_v28, %v4675_v17  ;;  %5366 = vperm.xlu1 %9384, %v13531_v54   ;;  %v4734_v59 = vpop.xlane.xlu1 %4733  ;;  %v4615_v17 = vld [vmem:[#allocation6 + $0x50] sm:$0xff] }
 0x9ef   : > { %v4861_v1 = vadd.f32 %v4734_v59, %v4669_v58  ;;  %v4612_v58 = vld [vmem:[#allocation6 + $0x38] sm:$0xff] }
 0x9f0   : > { %4932 = vst.msk [vmem:[#allocation6 + $0x30] sm:$0xff] %vm4925_vm6, %v4867_v60  ;;  %v14793_v60 = vld [vmem:[#allocation112_spill] sm:$0xff] }
 0x9f1   : > { %4926 = vst.msk [vmem:[#allocation6] sm:$0xff] %vm4925_vm6, %v4861_v1  ;;  %v4778_v37 = vpop.xlane.xlu0 %4777  ;;  %v4679_v59 = vmul.f32 %v14793_v60, %v4615_v17  ;;  %v14794_v1 = vld [vmem:[#allocation83_spill] sm:$0xff]  ;;  %v14799_v17 = vld [vmem:[#allocation36_spill] sm:$0xff] }
 0x9f2   : > { %v4883_v23 = vadd.f32 %v4778_v37, %v4691_v55  ;;  %v4740_v31 = vpop.xlane.xlu1 %4739  ;;  %v4676_v3 = vmul.f32 %v14794_v1, %v4612_v58  ;;  %v4631_v55 = vld [vmem:[#allocation6 + $0xd0] sm:$0xff] }
 0x9f3   : > { %v4864_v47 = vadd.f32 %v4740_v31, %v4672_v10  ;;  %v5004_v37 = vld [vmem:[#allocation7 + $0x70] sm:$0xff] }
 0x9f4   : > { %4948 = vst.msk [vmem:[#allocation6 + $0xb0] sm:$0xff] %vm4925_vm6, %v4883_v23  ;;  %v5002_v23 = vld [vmem:[#allocation7 + $0x60] sm:$0xff] }
 0x9f5   : > { %4929 = vst.msk [vmem:[#allocation6 + $0x18] sm:$0xff] %vm4925_vm6, %v4864_v47  ;;  %v4742_v49 = vpop.xlane.xlu0 %4741  ;;  %v14795_v47 = vld [vmem:[#allocation116_spill] sm:$0xff] }
 0x9f6   : > { %v4865_v24 = vadd.f32 %v4742_v49, %v4673_v39  ;;  %v4772_v53 = vpop.xlane.xlu1 %4771  ;;  %v4695_v36 = vmul.f32 %v14795_v47, %v4631_v55  ;;  %v5003_v39 = vld [vmem:[#allocation7 + $0x68] sm:$0xff]  ;;  %v14796_v49 = vld [vmem:[#allocation139_spill] sm:$0xff] }
 0x9f7   : > { %v4880_v61 = vadd.f32 %v4772_v53, %v4688_v18  ;;  %v5388_v45 = vmul.f32 %v14796_v49, %v5004_v37  ;;  %v4613_v53 = vld [vmem:[#allocation6 + $0x40] sm:$0xff] }
 0x9f8   : > { %4930 = vst.msk [vmem:[#allocation6 + $0x20] sm:$0xff] %vm4925_vm6, %v4865_v24  ;;  %v4692_v24 = vmul.f32 %v14797_v33, %v4628_v4  ;;  %v14801_v37 = vld [vmem:[#allocation120_spill] sm:$0xff]  ;;  %v14802_v4 = vld [vmem:[#allocation141_spill] sm:$0xff] }
 0x9f9   : > { %4945 = vst.msk [vmem:[#allocation6 + $0x98] sm:$0xff] %vm4925_vm6, %v4880_v61  ;;  %v4774_v50 = vpop.xlane.xlu0 %4773  ;;  %v14798_v61 = vld [vmem:[#allocation143_spill] sm:$0xff] }
 0x9fa   : > { %v4881_v28 = vadd.f32 %v4774_v50, %v4689_v22  ;;  %v4768_v63 = vpop.xlane.xlu1 %4767  ;;  %v5386_v42 = vmul.f32 %v14798_v61, %v5002_v23  ;;  %v5404_v23 = vmul.f32 %v14802_v4, %v5020_v2  ;;  %v14805_v2 = vld [vmem:[#allocation38_spill] sm:$0xff] }
 0x9fb   : > { %v4878_v15 = vadd.f32 %v4768_v63, %v4686_v8  ;;  %v4610_v8 = vld [vmem:[#allocation6 + $0x28] sm:$0xff]  ;;  %v5018_v63 = vld [vmem:[#allocation7 + $0xe0] sm:$0xff] }
 0x9fc   : > { %4946 = vst.msk [vmem:[#allocation6 + $0xa0] sm:$0xff] %vm4925_vm6, %v4881_v28  ;;  %v5389_v28 = vmul.f32 %v14799_v17, %v5005_v46 }
 0x9fd   : > { %4943 = vst.msk [vmem:[#allocation6 + $0x88] sm:$0xff] %vm4925_vm6, %v4878_v15  ;;  %v4754_v38 = vpop.xlane.xlu0 %4753 }
 0x9fe   : > { %v4871_v5 = vadd.f32 %v4754_v38, %v4679_v59  ;;  %v4748_v10 = vpop.xlane.xlu1 %4747  ;;  %v5021_v59 = vld [vmem:[#allocation7 + $0xf8] sm:$0xff]  ;;  %v14800_v38 = vld [vmem:[#allocation40_spill] sm:$0xff] }
 0x9ff   : > { %v4868_v31 = vadd.f32 %v4748_v10, %v4676_v3  ;;  %v5387_v1 = vmul.f32 %v14800_v38, %v5003_v39  ;;  %v5019_v10 = vld [vmem:[#allocation7 + $0xe8] sm:$0xff]  ;;  %v14804_v39 = vld [vmem:[#allocation144_spill] sm:$0xff] }
 0xa00   : > { %4936 = vst.msk [vmem:[#allocation6 + $0x50] sm:$0xff] %vm4925_vm6, %v4871_v5  ;;  %v4677_v5 = vmul.f32 %v14801_v37, %v4613_v53  ;;  %v4619_v37 = vld [vmem:[#allocation6 + $0x70] sm:$0xff] }
 0xa01   : > { %4933 = vst.msk [vmem:[#allocation6 + $0x38] sm:$0xff] %vm4925_vm6, %v4868_v31  ;;  %v4786_v18 = vpop.xlane.xlu0 %4785 }
 0xa02   : > { %v4887_v22 = vadd.f32 %v4786_v18, %v4695_v36  ;;  %v8908_v50 = vpop.f32.mrb[44].mxu0  ;;  %v4780_v13 = vpop.xlane.xlu1 %4779  ;;  %v14803_v36 = vld [vmem:[#allocation95_spill] sm:$0xff]  ;;  %v5402_v18 = vmul.f32 %v14804_v39, %v5018_v63  ;;  %v4635_v39 = vld [vmem:[#allocation6 + $0xf0] sm:$0xff] }
 0xa03   : > { %v5872_v58 = vadd.f32 %v8908_v50, %v5388_v45  ;;  %v4884_v15 = vadd.f32 %v4780_v13, %v4692_v24  ;;  %v5552_v60 = vpop.f32.mrb[45].mxu0  ;;  %v4674_v49 = vmul.f32 %v14803_v36, %v4610_v8  ;;  %v4629_v45 = vld [vmem:[#allocation6 + $0xc0] sm:$0xff] }
 0xa04   : > { %4952 = vst.msk [vmem:[#allocation6 + $0xd0] sm:$0xff] %vm4925_vm6, %v4887_v22  ;;  %v5870_v3 = vadd.f32 %v5552_v60, %v5386_v42  ;;  %v8909_v55 = vpop.f32.mrb[46].mxu0  ;;  %v4626_v42 = vld [vmem:[#allocation6 + $0xa8] sm:$0xff]  ;;  %v5405_v22 = vmul.f32 %v14805_v2, %v5021_v59 }
 0xa05   : > { %5936 = vst.msk [vmem:[#allocation7 + $0x70] sm:$0xff] %vm2936_vm5, %v5872_v58  ;;  %v5873_v31 = vadd.f32 %v8909_v55, %v5389_v28  ;;  %v4750_v46 = vpop.xlane.xlu0 %4749  ;;  %v5555_v47 = vpop.f32.mrb[47].mxu0  ;;  %v14806_v28 = vld [vmem:[#allocation127_spill] sm:$0xff] }
 0xa06   : > { %4949 = vst.msk [vmem:[#allocation6 + $0xb8] sm:$0xff] %vm4925_vm6, %v4884_v15  ;;  %v4869_v33 = vadd.f32 %v4750_v46, %v4677_v5  ;;  %v5871_v24 = vadd.f32 %v5555_v47, %v5387_v1  ;;  %v8940_v53 = vpop.f32.mrb[44].mxu1  ;;  %v4744_v61 = vpop.xlane.xlu1 %4743  ;;  %v5403_v58 = vmul.f32 %v14806_v28, %v5019_v10  ;;  %v14807_v15 = vld [vmem:[#allocation125_spill] sm:$0xff] }
 0xa07   : > { %5934 = vst.msk [vmem:[#allocation7 + $0x60] sm:$0xff] %vm2936_vm5, %v5870_v3  ;;  %5937 = vst.msk [vmem:[#allocation7 + $0x78] sm:$0xff] %vm2936_vm5, %v5873_v31  ;;  %v5888_v50 = vadd.f32 %v8940_v53, %v5404_v23  ;;  %v4866_v13 = vadd.f32 %v4744_v61, %v4674_v49  ;;  %v5649_v17 = vpop.f32.mrb[45].mxu1  ;;  %v4693_v60 = vmul.f32 %v14807_v15, %v4629_v45  ;;  %v14808_v3 = vld [vmem:[#allocation98_spill] sm:$0xff]  ;;  %v4616_v23 = vld [vmem:[#allocation6 + $0x58] sm:$0xff] }
 0xa08   : > { %4934 = vst.msk [vmem:[#allocation6 + $0x40] sm:$0xff] %vm4925_vm6, %v4869_v33  ;;  %v5886_v8 = vadd.f32 %v5649_v17, %v5402_v18  ;;  %v8941_v63 = vpop.f32.mrb[46].mxu1  ;;  %v4690_v55 = vmul.f32 %v14808_v3, %v4626_v42  ;;  %v14809_v46 = vld [vmem:[#allocation129_spill] sm:$0xff]  ;;  %v14810_v49 = vld [vmem:[#allocation103_spill] sm:$0xff] }
 0xa09   : > { %5935 = vst.msk [vmem:[#allocation7 + $0x68] sm:$0xff] %vm2936_vm5, %v5871_v24  ;;  %5952 = vst.msk [vmem:[#allocation7 + $0xf0] sm:$0xff] %vm2936_vm5, %v5888_v50  ;;  %v5889_v59 = vadd.f32 %v8941_v63, %v5405_v22  ;;  %v4782_v38 = vpop.xlane.xlu0 %4781  ;;  %v5652_v1 = vpop.f32.mrb[47].mxu1  ;;  %v4683_v47 = vmul.f32 %v14809_v46, %v4619_v37  ;;  %v4680_v45 = vmul.f32 %v14810_v49, %v4616_v23  ;;  %v4632_v24 = vld [vmem:[#allocation6 + $0xd8] sm:$0xff]  ;;  %v14812_v22 = vld [vmem:[#allocation106_spill] sm:$0xff] }
 0xa0a   : > { %4931 = vst.msk [vmem:[#allocation6 + $0x28] sm:$0xff] %vm4925_vm6, %v4866_v13  ;;  %v4885_v5 = vadd.f32 %v4782_v38, %v4693_v60  ;;  %v5887_v10 = vadd.f32 %v5652_v1, %v5403_v58  ;;  %v4776_v4 = vpop.xlane.xlu1 %4775  ;;  %v14811_v61 = vld [vmem:[#allocation131_spill] sm:$0xff]  ;;  %v4696_v50 = vmul.f32 %v14812_v22, %v4632_v24  ;;  %v4617_v13 = vld [vmem:[#allocation6 + $0x60] sm:$0xff]  ;;  %v4614_v58 = vld [vmem:[#allocation6 + $0x48] sm:$0xff] }
 0xa0b   : > { %5950 = vst.msk [vmem:[#allocation7 + $0xe0] sm:$0xff] %vm2936_vm5, %v5886_v8  ;;  %5953 = vst.msk [vmem:[#allocation7 + $0xf8] sm:$0xff] %vm2936_vm5, %v5889_v59  ;;  %v4882_v31 = vadd.f32 %v4776_v4, %v4690_v55  ;;  %v4699_v42 = vmul.f32 %v14811_v61, %v4635_v39  ;;  %v14813_v63 = vld [vmem:[#allocation132_spill] sm:$0xff]  ;;  %v14814_v59 = vld [vmem:[#allocation109_spill] sm:$0xff] }
 0xa0c   : > { %4950 = vst.msk [vmem:[#allocation6 + $0xc0] sm:$0xff] %vm4925_vm6, %v4885_v5  ;;  %v4681_v15 = vmul.f32 %v14813_v63, %v4617_v13  ;;  %v4678_v38 = vmul.f32 %v14814_v59, %v4614_v58  ;;  %v4633_v1 = vld [vmem:[#allocation6 + $0xe0] sm:$0xff]  ;;  %v4630_v37 = vld [vmem:[#allocation6 + $0xc8] sm:$0xff] }
 0xa0d   : > { %5951 = vst.msk [vmem:[#allocation7 + $0xe8] sm:$0xff] %vm2936_vm5, %v5887_v10  ;;  %v4762_v36 = vpop.xlane.xlu0 %4761  ;;  %v14815_v10 = vld [vmem:[#allocation133_spill] sm:$0xff] }
 0xa0e   : > { %4947 = vst.msk [vmem:[#allocation6 + $0xa8] sm:$0xff] %vm4925_vm6, %v4882_v31  ;;  %v4875_v18 = vadd.f32 %v4762_v36, %v4683_v47  ;;  %v4756_v33 = vpop.xlane.xlu1 %4755  ;;  %v4697_v4 = vmul.f32 %v14815_v10, %v4633_v1  ;;  %v14816_v31 = vld [vmem:[#allocation113_spill] sm:$0xff]  ;;  %v4639_v47 = vld [vmem:[#allocation6 + $0x110] sm:$0xff] }
 0xa0f   : > { %v4872_v53 = vadd.f32 %v4756_v33, %v4680_v45  ;;  %v4694_v46 = vmul.f32 %v14816_v31, %v4630_v37  ;;  %v4620_v45 = vld [vmem:[#allocation6 + $0x78] sm:$0xff] }
 0xa10   : > { %4940 = vst.msk [vmem:[#allocation6 + $0x70] sm:$0xff] %vm4925_vm6, %v4875_v18  ;;  %v14817_v18 = vld [vmem:[#allocation26_spill] sm:$0xff] }
 0xa11   : > { %4937 = vst.msk [vmem:[#allocation6 + $0x58] sm:$0xff] %vm4925_vm6, %v4872_v53  ;;  %v4794_v2 = vpop.xlane.xlu0 %4793  ;;  %v4703_v33 = vmul.f32 %v14817_v18, %v4639_v47  ;;  %v14818_v53 = vld [vmem:[#allocation117_spill] sm:$0xff] }
 0xa12   : > { %v4891_v17 = vadd.f32 %v4794_v2, %v4699_v42  ;;  %v4788_v28 = vpop.xlane.xlu1 %4787  ;;  %v4684_v61 = vmul.f32 %v14818_v53, %v4620_v45  ;;  %v4655_v42 = vld [vmem:[#allocation6 + $0x190] sm:$0xff] }
 0xa13   : > { %v4888_v8 = vadd.f32 %v4788_v28, %v4696_v50  ;;  %v4636_v50 = vld [vmem:[#allocation6 + $0xf8] sm:$0xff] }
 0xa14   : > { %4956 = vst.msk [vmem:[#allocation6 + $0xf0] sm:$0xff] %vm4925_vm6, %v4891_v17  ;;  %v14819_v17 = vld [vmem:[#allocation32_spill] sm:$0xff] }
 0xa15   : > { %4953 = vst.msk [vmem:[#allocation6 + $0xd8] sm:$0xff] %vm4925_vm6, %v4888_v8  ;;  %v4758_v60 = vpop.xlane.xlu0 %4757  ;;  %v4719_v28 = vmul.f32 %v14819_v17, %v4655_v42  ;;  %v14820_v8 = vld [vmem:[#allocation121_spill] sm:$0xff] }
 0xa16   : > { %v4873_v3 = vadd.f32 %v4758_v60, %v4681_v15  ;;  %v4752_v55 = vpop.xlane.xlu1 %4751  ;;  %v4700_v63 = vmul.f32 %v14820_v8, %v4636_v50  ;;  %v4637_v15 = vld [vmem:[#allocation6 + $0x100] sm:$0xff] }
 0xa17   : > { %v4870_v5 = vadd.f32 %v4752_v55, %v4678_v38  ;;  %v4618_v38 = vld [vmem:[#allocation6 + $0x68] sm:$0xff] }
 0xa18   : > { %4938 = vst.msk [vmem:[#allocation6 + $0x60] sm:$0xff] %vm4925_vm6, %v4873_v3  ;;  %v14821_v3 = vld [vmem:[#allocation137_spill] sm:$0xff] }
 0xa19   : > { %4935 = vst.msk [vmem:[#allocation6 + $0x48] sm:$0xff] %vm4925_vm6, %v4870_v5  ;;  %v4790_v23 = vpop.xlane.xlu0 %4789  ;;  %v4701_v55 = vmul.f32 %v14821_v3, %v4637_v15  ;;  %v14822_v5 = vld [vmem:[#allocation126_spill] sm:$0xff]  ;;  %v5025_v3 = vld [vmem:[#allocation7 + $0x118] sm:$0xff] }
 0xa1a   : > { %v4889_v36 = vadd.f32 %v4790_v23, %v4697_v4  ;;  %v4784_v49 = vpop.xlane.xlu1 %4783  ;;  %v4682_v10 = vmul.f32 %v14822_v5, %v4618_v38  ;;  %v4653_v4 = vld [vmem:[#allocation6 + $0x180] sm:$0xff]  ;;  %v5024_v15 = vld [vmem:[#allocation7 + $0x110] sm:$0xff]  ;;  %v14827_v38 = vld [vmem:[#allocation105_spill] sm:$0xff] }
 0xa1b   : > { %v4886_v39 = vadd.f32 %v4784_v49, %v4694_v46  ;;  %v4634_v46 = vld [vmem:[#allocation6 + $0xe8] sm:$0xff] }
 0xa1c   : > { %4954 = vst.msk [vmem:[#allocation6 + $0xe0] sm:$0xff] %vm4925_vm6, %v4889_v36  ;;  %v14823_v36 = vld [vmem:[#allocation29_spill] sm:$0xff] }
 0xa1d   : > { %4951 = vst.msk [vmem:[#allocation6 + $0xc8] sm:$0xff] %vm4925_vm6, %v4886_v39  ;;  %v4802_v24 = vpop.xlane.xlu0 %4801  ;;  %v4717_v49 = vmul.f32 %v14823_v36, %v4653_v4  ;;  %v14824_v39 = vld [vmem:[#allocation130_spill] sm:$0xff]  ;;  %v5023_v4 = vld [vmem:[#allocation7 + $0x108] sm:$0xff] }
 0xa1e   : > { %v4895_v2 = vadd.f32 %v4802_v24, %v4703_v33  ;;  %v4764_v22 = vpop.xlane.xlu1 %4763  ;;  %v4698_v18 = vmul.f32 %v14824_v39, %v4634_v46  ;;  %v4643_v33 = vld [vmem:[#allocation6 + $0x130] sm:$0xff] }
 0xa1f   : > { %v4876_v13 = vadd.f32 %v4764_v22, %v4684_v61  ;;  %v4640_v61 = vld [vmem:[#allocation6 + $0x118] sm:$0xff]  ;;  %v14829_v36 = vld [vmem:[#allocation42_spill] sm:$0xff] }
 0xa20   : > { %4960 = vst.msk [vmem:[#allocation6 + $0x110] sm:$0xff] %vm4925_vm6, %v4895_v2  ;;  %v14825_v2 = vld [vmem:[#allocation33_spill] sm:$0xff] }
 0xa21   : > { %4941 = vst.msk [vmem:[#allocation6 + $0x78] sm:$0xff] %vm4925_vm6, %v4876_v13  ;;  %v4834_v58 = vpop.xlane.xlu0 %4833  ;;  %v4707_v22 = vmul.f32 %v14825_v2, %v4643_v33  ;;  %v14826_v13 = vld [vmem:[#allocation85_spill] sm:$0xff]  ;;  %v5409_v33 = vmul.f32 %v13349_v56, %v5025_v3 }
 0xa22   : > { %v4911_v60 = vadd.f32 %v4834_v58, %v4719_v28  ;;  %v4796_v59 = vpop.xlane.xlu1 %4795  ;;  %v4704_v17 = vmul.f32 %v14826_v13, %v4640_v61  ;;  %v4659_v28 = vld [vmem:[#allocation6 + $0x1b0] sm:$0xff]  ;;  %v4654_v3 = vld [vmem:[#allocation6 + $0x188] sm:$0xff] }
 0xa23   : > { %v4892_v1 = vadd.f32 %v4796_v59, %v4700_v63  ;;  %v4656_v63 = vld [vmem:[#allocation6 + $0x198] sm:$0xff]  ;;  %v5022_v59 = vld [vmem:[#allocation7 + $0x100] sm:$0xff] }
 0xa24   : > { %4976 = vst.msk [vmem:[#allocation6 + $0x190] sm:$0xff] %vm4925_vm6, %v4911_v60 }
 0xa25   : > { %4957 = vst.msk [vmem:[#allocation6 + $0xf8] sm:$0xff] %vm4925_vm6, %v4892_v1  ;;  %v4798_v37 = vpop.xlane.xlu0 %4797  ;;  %v4723_v1 = vmul.f32 %v14827_v38, %v4659_v28 }
 0xa26   : > { %v4893_v23 = vadd.f32 %v4798_v37, %v4701_v55  ;;  %v4760_v31 = vpop.xlane.xlu1 %4759  ;;  %v14828_v37 = vld [vmem:[#allocation31_spill] sm:$0xff] }
 0xa27   : > { %v4874_v47 = vadd.f32 %v4760_v31, %v4682_v10  ;;  %v4720_v5 = vmul.f32 %v14828_v37, %v4656_v63  ;;  %v4641_v10 = vld [vmem:[#allocation6 + $0x120] sm:$0xff] }
 0xa28   : > { %4958 = vst.msk [vmem:[#allocation6 + $0x100] sm:$0xff] %vm4925_vm6, %v4893_v23  ;;  %v5408_v23 = vmul.f32 %v13387_v29, %v5024_v15  ;;  %v5041_v29 = vld [vmem:[#allocation7 + $0x198] sm:$0xff]  ;;  %v4657_v63 = vld [vmem:[#allocation6 + $0x1a0] sm:$0xff]  ;;  %v5039_v15 = vld [vmem:[#allocation7 + $0x188] sm:$0xff] }
 0xa29   : > { %4939 = vst.msk [vmem:[#allocation6 + $0x68] sm:$0xff] %vm4925_vm6, %v4874_v47  ;;  %v4830_v45 = vpop.xlane.xlu0 %4829  ;;  %v4638_v47 = vld [vmem:[#allocation6 + $0x108] sm:$0xff] }
 0xa2a   : > { %v4909_v24 = vadd.f32 %v4830_v45, %v4717_v49  ;;  %v4792_v53 = vpop.xlane.xlu1 %4791  ;;  %v5406_v49 = vmul.f32 %v14829_v36, %v5022_v59  ;;  %v5040_v45 = vld [vmem:[#allocation7 + $0x190] sm:$0xff] }
 0xa2b   : > { %v4890_v42 = vadd.f32 %v4792_v53, %v4698_v18  ;;  %v5424_v56 = vmul.f32 %v13430_v43, %v5040_v45  ;;  %v14834_v45 = vld [vmem:[#allocation93_spill] sm:$0xff] }
 0xa2c   : > { %4974 = vst.msk [vmem:[#allocation6 + $0x180] sm:$0xff] %vm4925_vm6, %v4909_v24  ;;  %v5038_v24 = vld [vmem:[#allocation7 + $0x180] sm:$0xff] }
 0xa2d   : > { %4955 = vst.msk [vmem:[#allocation6 + $0xe8] sm:$0xff] %vm4925_vm6, %v4890_v42  ;;  %v4810_v50 = vpop.xlane.xlu0 %4809  ;;  %v14830_v42 = vld [vmem:[#allocation28_spill] sm:$0xff] }
 0xa2e   : > { %v4899_v58 = vadd.f32 %v4810_v50, %v4707_v22  ;;  %v4804_v8 = vpop.xlane.xlu1 %4803  ;;  %v4705_v2 = vmul.f32 %v14830_v42, %v4641_v10  ;;  %v14831_v22 = vld [vmem:[#allocation47_spill] sm:$0xff] }
 0xa2f   : > { %v4896_v60 = vadd.f32 %v4804_v8, %v4704_v17  ;;  %v5407_v50 = vmul.f32 %v14831_v22, %v5023_v4  ;;  %v5425_v4 = vmul.f32 %v13397_v40, %v5041_v29  ;;  %v4647_v40 = vld [vmem:[#allocation6 + $0x150] sm:$0xff]  ;;  %v14836_v29 = vld [vmem:[#allocation27_spill] sm:$0xff] }
 0xa30   : > { %4964 = vst.msk [vmem:[#allocation6 + $0x130] sm:$0xff] %vm4925_vm6, %v4899_v58  ;;  %v14832_v58 = vld [vmem:[#allocation87_spill] sm:$0xff] }
 0xa31   : > { %4961 = vst.msk [vmem:[#allocation6 + $0x118] sm:$0xff] %vm4925_vm6, %v4896_v60  ;;  %v4842_v55 = vpop.xlane.xlu0 %4841  ;;  %v4702_v8 = vmul.f32 %v14832_v58, %v4638_v47  ;;  %v5423_v47 = vmul.f32 %v13390_v44, %v5039_v15 }
 0xa32   : > { %v4915_v31 = vadd.f32 %v4842_v55, %v4723_v1  ;;  %v4836_v46 = vpop.xlane.xlu1 %4835  ;;  %v5422_v55 = vmul.f32 %v13416_v27, %v5038_v24 }
 0xa33   : > { %v8960_v39 = vpop.f32.mrb[48].mxu0  ;;  %v4912_v18 = vadd.f32 %v4836_v46, %v4720_v5 }
 0xa34   : > { %4980 = vst.msk [vmem:[#allocation6 + $0x1b0] sm:$0xff] %vm4925_vm6, %v4915_v31  ;;  %v5892_v53 = vadd.f32 %v8960_v39, %v5408_v23  ;;  %v5698_v61 = vpop.f32.mrb[49].mxu0  ;;  %v14833_v31 = vld [vmem:[#allocation97_spill] sm:$0xff]  ;;  %v4718_v39 = vmul.f32 %v14834_v45, %v4654_v3  ;;  %v14838_v3 = vld [vmem:[#allocation92_spill] sm:$0xff]  ;;  %v5045_v45 = vld [vmem:[#allocation7 + $0x1b8] sm:$0xff] }
 0xa35   : > { %4977 = vst.msk [vmem:[#allocation6 + $0x198] sm:$0xff] %vm4925_vm6, %v4912_v18  ;;  %v5890_v13 = vadd.f32 %v5698_v61, %v5406_v49  ;;  %v8961_v17 = vpop.f32.mrb[50].mxu0  ;;  %v4806_v28 = vpop.xlane.xlu0 %4805  ;;  %v4721_v46 = vmul.f32 %v14833_v31, %v4657_v63  ;;  %v4644_v61 = vld [vmem:[#allocation6 + $0x138] sm:$0xff]  ;;  %v5028_v63 = vld [vmem:[#allocation7 + $0x130] sm:$0xff] }
 0xa36   : > { %5956 = vst.msk [vmem:[#allocation7 + $0x110] sm:$0xff] %vm2936_vm5, %v5892_v53  ;;  %v5893_v60 = vadd.f32 %v8961_v17, %v5409_v33  ;;  %v5701_v59 = vpop.f32.mrb[51].mxu0  ;;  %v4897_v38 = vadd.f32 %v4806_v28, %v4705_v2  ;;  %v4800_v1 = vpop.xlane.xlu1 %4799  ;;  %v14835_v2 = vld [vmem:[#allocation104_spill] sm:$0xff]  ;;  %v4663_v17 = vld [vmem:[#allocation6 + $0x1d0] sm:$0xff] }
 0xa37   : > { %5954 = vst.msk [vmem:[#allocation7 + $0x100] sm:$0xff] %vm2936_vm5, %v5890_v13  ;;  %v5891_v37 = vadd.f32 %v5701_v59, %v5407_v50  ;;  %v8992_v5 = vpop.f32.mrb[48].mxu1  ;;  %v4894_v10 = vadd.f32 %v4800_v1, %v4702_v8  ;;  %v4711_v22 = vmul.f32 %v14835_v2, %v4647_v40  ;;  %v4708_v13 = vmul.f32 %v14836_v29, %v4644_v61  ;;  %v4660_v8 = vld [vmem:[#allocation6 + $0x1b8] sm:$0xff] }
 0xa38   : > { %5957 = vst.msk [vmem:[#allocation7 + $0x118] sm:$0xff] %vm2936_vm5, %v5893_v60  ;;  %v5908_v43 = vadd.f32 %v8992_v5, %v5424_v56  ;;  %v5795_v23 = vpop.f32.mrb[49].mxu1  ;;  %v5026_v56 = vld [vmem:[#allocation7 + $0x120] sm:$0xff]  ;;  %v14837_v60 = vld [vmem:[#allocation107_spill] sm:$0xff]  ;;  %v5027_v5 = vld [vmem:[#allocation7 + $0x128] sm:$0xff] }
 0xa39   : > { %4962 = vst.msk [vmem:[#allocation6 + $0x120] sm:$0xff] %vm4925_vm6, %v4897_v38  ;;  %4959 = vst.msk [vmem:[#allocation6 + $0x108] sm:$0xff] %vm4925_vm6, %v4894_v10  ;;  %v5906_v27 = vadd.f32 %v5795_v23, %v5422_v55  ;;  %v8993_v36 = vpop.f32.mrb[50].mxu1  ;;  %v4838_v49 = vpop.xlane.xlu0 %4837  ;;  %v4727_v59 = vmul.f32 %v14837_v60, %v4663_v17  ;;  %v5029_v38 = vld [vmem:[#allocation7 + $0x138] sm:$0xff]  ;;  %v4724_v55 = vmul.f32 %v14838_v3, %v4660_v8 }
 0xa3a   : > { %5955 = vst.msk [vmem:[#allocation7 + $0x108] sm:$0xff] %vm2936_vm5, %v5891_v37  ;;  %5972 = vst.msk [vmem:[#allocation7 + $0x190] sm:$0xff] %vm2936_vm5, %v5908_v43  ;;  %v5909_v18 = vadd.f32 %v8993_v36, %v5425_v4  ;;  %v5798_v33 = vpop.f32.mrb[51].mxu1  ;;  %v4913_v24 = vadd.f32 %v4838_v49, %v4721_v46  ;;  %v4832_v53 = vpop.xlane.xlu1 %4831  ;;  %v4645_v37 = vld [vmem:[#allocation6 + $0x140] sm:$0xff]  ;;  %v5412_v10 = vmul.f32 %v13401_v0, %v5028_v63  ;;  %v5044_v4 = vld [vmem:[#allocation7 + $0x1b0] sm:$0xff] }
 0xa3b   : > { %5970 = vst.msk [vmem:[#allocation7 + $0x180] sm:$0xff] %vm2936_vm5, %v5906_v27  ;;  %v5907_v44 = vadd.f32 %v5798_v33, %v5423_v47  ;;  %v4910_v42 = vadd.f32 %v4832_v53, %v4718_v39  ;;  %v5410_v31 = vmul.f32 %v13395_v12, %v5026_v56  ;;  %v5042_v46 = vld [vmem:[#allocation7 + $0x1a0] sm:$0xff]  ;;  %v4642_v36 = vld [vmem:[#allocation6 + $0x128] sm:$0xff]  ;;  %v5413_v49 = vmul.f32 %v13383_v11, %v5029_v38 }
 0xa3c   : > { %5973 = vst.msk [vmem:[#allocation7 + $0x198] sm:$0xff] %vm2936_vm5, %v5909_v18  ;;  %v14839_v18 = vld [vmem:[#allocation111_spill] sm:$0xff]  ;;  %v5411_v0 = vmul.f32 %v13366_v52, %v5027_v5  ;;  %v5428_v53 = vmul.f32 %v13449_v34, %v5044_v4  ;;  %v5426_v11 = vmul.f32 %v13439_v51, %v5042_v46  ;;  %v5429_v52 = vmul.f32 %v13420_v14, %v5045_v45  ;;  %v4658_v63 = vld [vmem:[#allocation6 + $0x1a8] sm:$0xff]  ;;  %v14842_v5 = vld [vmem:[#allocation30_spill] sm:$0xff] }
 0xa3d   : > { %4978 = vst.msk [vmem:[#allocation6 + $0x1a0] sm:$0xff] %vm4925_vm6, %v4913_v24  ;;  %4975 = vst.msk [vmem:[#allocation6 + $0x188] sm:$0xff] %vm4925_vm6, %v4910_v42  ;;  %v4818_v50 = vpop.xlane.xlu0 %4817  ;;  %v4709_v33 = vmul.f32 %v14839_v18, %v4645_v37  ;;  %v5043_v24 = vld [vmem:[#allocation7 + $0x1a8] sm:$0xff]  ;;  %v4661_v42 = vld [vmem:[#allocation6 + $0x1c0] sm:$0xff] }
 0xa3e   : > { %5971 = vst.msk [vmem:[#allocation7 + $0x188] sm:$0xff] %vm2936_vm5, %v5907_v44  ;;  %v4903_v28 = vadd.f32 %v4818_v50, %v4711_v22  ;;  %v4812_v58 = vpop.xlane.xlu1 %4811 }
 0xa3f   : > { %v4900_v15 = vadd.f32 %v4812_v58, %v4708_v13  ;;  %v14840_v13 = vld [vmem:[#allocation90_spill] sm:$0xff] }
 0xa40   : > { %4968 = vst.msk [vmem:[#allocation6 + $0x150] sm:$0xff] %vm4925_vm6, %v4903_v28  ;;  %v4706_v17 = vmul.f32 %v14840_v13, %v4642_v36  ;;  %v5033_v13 = vld [vmem:[#allocation7 + $0x158] sm:$0xff] }
 0xa41   : > { %4965 = vst.msk [vmem:[#allocation6 + $0x138] sm:$0xff] %vm4925_vm6, %v4900_v15  ;;  %v4850_v1 = vpop.xlane.xlu0 %4849  ;;  %v5427_v15 = vmul.f32 %v13405_v35, %v5043_v24  ;;  %v4649_v24 = vld [vmem:[#allocation6 + $0x160] sm:$0xff] }
 0xa42   : > { %v4919_v43 = vadd.f32 %v4850_v1, %v4727_v59  ;;  %v4844_v23 = vpop.xlane.xlu1 %4843  ;;  %v8964_v47 = vpop.f32.mrb[52].mxu0  ;;  %v14841_v59 = vld [vmem:[#allocation128_spill] sm:$0xff] }
 0xa43   : > { %v4916_v27 = vadd.f32 %v4844_v23, %v4724_v55  ;;  %v5896_v39 = vadd.f32 %v8964_v47, %v5412_v10  ;;  %v5714_v40 = vpop.f32.mrb[53].mxu0  ;;  %v4725_v38 = vmul.f32 %v14841_v59, %v4661_v42  ;;  %v4651_v55 = vld [vmem:[#allocation6 + $0x170] sm:$0xff]  ;;  %v4722_v10 = vmul.f32 %v14842_v5, %v4658_v63 }
 0xa44   : > { %4984 = vst.msk [vmem:[#allocation6 + $0x1d0] sm:$0xff] %vm4925_vm6, %v4919_v43  ;;  %v5894_v12 = vadd.f32 %v5714_v40, %v5410_v31  ;;  %v8965_v61 = vpop.f32.mrb[54].mxu0  ;;  %v4648_v43 = vld [vmem:[#allocation6 + $0x158] sm:$0xff]  ;;  %v14843_v31 = vld [vmem:[#allocation122_spill] sm:$0xff]  ;;  %v5417_v59 = vmul.f32 %v13434_v32, %v5033_v13 }
 0xa45   : > { %4981 = vst.msk [vmem:[#allocation6 + $0x1b8] sm:$0xff] %vm4925_vm6, %v4916_v27  ;;  %v4814_v44 = vpop.xlane.xlu0 %4813  ;;  %v5897_v2 = vadd.f32 %v8965_v61, %v5413_v49  ;;  %v5717_v22 = vpop.f32.mrb[55].mxu0  ;;  %v4715_v46 = vmul.f32 %v14843_v31, %v4651_v55  ;;  %v4667_v27 = vld [vmem:[#allocation6 + $0x1f0] sm:$0xff]  ;;  %v14844_v49 = vld [vmem:[#allocation89_spill] sm:$0xff]  ;;  %v4664_v40 = vld [vmem:[#allocation6 + $0x1d8] sm:$0xff] }
 0xa46   : > { %5960 = vst.msk [vmem:[#allocation7 + $0x130] sm:$0xff] %vm2936_vm5, %v5896_v39  ;;  %v4901_v50 = vadd.f32 %v4814_v44, %v4709_v33  ;;  %5958 = vst.msk [vmem:[#allocation7 + $0x120] sm:$0xff] %vm2936_vm5, %v5894_v12  ;;  %v5895_v34 = vadd.f32 %v5717_v22, %v5411_v0  ;;  %v4808_v58 = vpop.xlane.xlu1 %4807  ;;  %v4712_v45 = vmul.f32 %v14844_v49, %v4648_v43  ;;  %v14845_v12 = vld [vmem:[#allocation99_spill] sm:$0xff]  ;;  %v5032_v44 = vld [vmem:[#allocation7 + $0x150] sm:$0xff] }
 0xa47   : > { %v8996_v29 = vpop.f32.mrb[52].mxu1  ;;  %5961 = vst.msk [vmem:[#allocation7 + $0x138] sm:$0xff] %vm2936_vm5, %v5897_v2  ;;  %v4898_v51 = vadd.f32 %v4808_v58, %v4706_v17  ;;  %v4731_v33 = vmul.f32 %v13531_v54, %v4667_v27  ;;  %v4728_v61 = vmul.f32 %v14845_v12, %v4664_v40  ;;  %v5030_v2 = vld [vmem:[#allocation7 + $0x140] sm:$0xff]  ;;  %v5031_v54 = vld [vmem:[#allocation7 + $0x148] sm:$0xff]  ;;  %v5048_v63 = vld [vmem:[#allocation7 + $0x1d0] sm:$0xff] }
 0xa48   : > { %v5912_v28 = vadd.f32 %v8996_v29, %v5428_v53  ;;  %v5811_v8 = vpop.f32.mrb[53].mxu1  ;;  %4966 = vst.msk [vmem:[#allocation6 + $0x140] sm:$0xff] %vm4925_vm6, %v4901_v50  ;;  %v14846_v50 = vld [vmem:[#allocation140_spill] sm:$0xff]  ;;  %v5432_v43 = vmul.f32 %v13474_v9, %v5048_v63  ;;  %v5037_v13 = vld [vmem:[#allocation7 + $0x178] sm:$0xff] }
 0xa49   : > { %v5910_v56 = vadd.f32 %v5811_v8, %v5426_v11  ;;  %v8997_v60 = vpop.f32.mrb[54].mxu1  ;;  %5959 = vst.msk [vmem:[#allocation7 + $0x128] sm:$0xff] %vm2936_vm5, %v5895_v34  ;;  %v4846_v3 = vpop.xlane.xlu0 %4845  ;;  %v4646_v11 = vld [vmem:[#allocation6 + $0x148] sm:$0xff]  ;;  %v4713_v29 = vmul.f32 %v14846_v50, %v4649_v24  ;;  %v5416_v34 = vmul.f32 %v13463_v21, %v5032_v44  ;;  %v14847_v58 = vld [vmem:[#allocation108_spill] sm:$0xff]  ;;  %v14848_v21 = vld [vmem:[#allocation142_spill] sm:$0xff]  ;;  %v5421_v63 = vmul.f32 %v13478_v7, %v5037_v13 }
 0xa4a   : > { %5976 = vst.msk [vmem:[#allocation7 + $0x1b0] sm:$0xff] %vm2936_vm5, %v5912_v28  ;;  %v5913_v14 = vadd.f32 %v8997_v60, %v5429_v52  ;;  %v5814_v1 = vpop.f32.mrb[55].mxu1  ;;  %v4917_v37 = vadd.f32 %v4846_v3, %v4725_v38  ;;  %v4840_v4 = vpop.xlane.xlu1 %4839  ;;  %v4665_v52 = vld [vmem:[#allocation6 + $0x1e0] sm:$0xff]  ;;  %v4710_v8 = vmul.f32 %v14847_v58, %v4646_v11  ;;  %v4662_v60 = vld [vmem:[#allocation6 + $0x1c8] sm:$0xff]  ;;  %v5036_v11 = vld [vmem:[#allocation7 + $0x170] sm:$0xff] }
 0xa4b   : > { %4963 = vst.msk [vmem:[#allocation6 + $0x128] sm:$0xff] %vm4925_vm6, %v4898_v51  ;;  %v5911_v35 = vadd.f32 %v5814_v1, %v5427_v15  ;;  %v4914_v23 = vadd.f32 %v4840_v4, %v4722_v10  ;;  %v5414_v15 = vmul.f32 %v13484_v30, %v5030_v2  ;;  %v5046_v38 = vld [vmem:[#allocation7 + $0x1c0] sm:$0xff]  ;;  %v4729_v55 = vmul.f32 %v14848_v21, %v4665_v52  ;;  %v5047_v30 = vld [vmem:[#allocation7 + $0x1c8] sm:$0xff]  ;;  %v14851_v58 = vld [vmem:[#allocation39_spill] sm:$0xff] }
 0xa4c   : > { %5974 = vst.msk [vmem:[#allocation7 + $0x1a0] sm:$0xff] %vm2936_vm5, %v5910_v56  ;;  %5977 = vst.msk [vmem:[#allocation7 + $0x1b8] sm:$0xff] %vm2936_vm5, %v5913_v14  ;;  %v5430_v27 = vmul.f32 %v13489_v6, %v5046_v38  ;;  %v5035_v52 = vld [vmem:[#allocation7 + $0x168] sm:$0xff]  ;;  %v5053_v38 = vld [vmem:[#allocation7 + $0x1f8] sm:$0xff] }
 0xa4d   : > { %5975 = vst.msk [vmem:[#allocation7 + $0x1a8] sm:$0xff] %vm2936_vm5, %v5911_v35  ;;  %v4826_v47 = vpop.xlane.xlu0 %4825  ;;  %v5049_v35 = vld [vmem:[#allocation7 + $0x1d8] sm:$0xff] }
 0xa4e   : > { %4982 = vst.msk [vmem:[#allocation6 + $0x1c0] sm:$0xff] %vm4925_vm6, %v4917_v37  ;;  %4979 = vst.msk [vmem:[#allocation6 + $0x1a8] sm:$0xff] %vm4925_vm6, %v4914_v23  ;;  %v4907_v36 = vadd.f32 %v4826_v47, %v4715_v46  ;;  %v4820_v39 = vpop.xlane.xlu1 %4819  ;;  %v5415_v37 = vmul.f32 %v13452_v41, %v5031_v54  ;;  %v14849_v46 = vld [vmem:[#allocation110_spill] sm:$0xff]  ;;  %v5420_v54 = vmul.f32 %v13500_v57, %v5036_v11 }
 0xa4f   : > { %v4904_v18 = vadd.f32 %v4820_v39, %v4712_v45  ;;  %v4726_v47 = vmul.f32 %v14849_v46, %v4662_v60  ;;  %v4652_v45 = vld [vmem:[#allocation6 + $0x178] sm:$0xff]  ;;  %v5433_v39 = vmul.f32 %v13441_v48, %v5049_v35  ;;  %v14850_v48 = vld [vmem:[#allocation34_spill] sm:$0xff]  ;;  %v4666_v60 = vld [vmem:[#allocation6 + $0x1e8] sm:$0xff] }
 0xa50   : > { %4972 = vst.msk [vmem:[#allocation6 + $0x170] sm:$0xff] %vm4925_vm6, %v4907_v36  ;;  %v4716_v12 = vmul.f32 %v14850_v48, %v4652_v45  ;;  %v6134_v45 = vld [vmem:[#allocation6] sm:$0xff] (!%p8257_p6)  ;;  %v6139_v48 = vld [vmem:[#allocation6 + $0x28] sm:$0xff] (!%p8257_p6)  ;;  %v6140_v11 = vld [vmem:[#allocation6 + $0x30] sm:$0xff] (!%p8257_p6) }
 0xa51   : > { %v4858_v0 = vpop.xlane.xlu0 %4857  ;;  %4969 = vst.msk [vmem:[#allocation6 + $0x158] sm:$0xff] %vm4925_vm6, %v4904_v18 }
 0xa52   : > { %v4923_v53 = vadd.f32 %v4858_v0, %v4731_v33  ;;  %v4852_v42 = vpop.xlane.xlu1 %4851  ;;  %v5431_v33 = vmul.f32 %v13466_v20, %v5047_v30 }
 0xa53   : > { %v4920_v22 = vadd.f32 %v4852_v42, %v4728_v61  ;;  %v4668_v42 = vld [vmem:[#allocation6 + $0x1f8] sm:$0xff] }
 0xa54   : > { %4988 = vst.msk [vmem:[#allocation6 + $0x1f0] sm:$0xff] %vm4925_vm6, %v4923_v53  ;;  %v4732_v2 = vmul.f32 %v13506_v26, %v4668_v42  ;;  %v6141_v42 = vld [vmem:[#allocation6 + $0x38] sm:$0xff] (!%p8257_p6) }
 0xa55   : > { %v4822_v17 = vpop.xlane.xlu0 %4821  ;;  %4985 = vst.msk [vmem:[#allocation6 + $0x1d8] sm:$0xff] %vm4925_vm6, %v4920_v22  ;;  %v5034_v22 = vld [vmem:[#allocation7 + $0x160] sm:$0xff] }
 0xa56   : > { %v4905_v28 = vadd.f32 %v4822_v17, %v4713_v29  ;;  %v4816_v56 = vpop.xlane.xlu1 %4815  ;;  %v4650_v29 = vld [vmem:[#allocation6 + $0x168] sm:$0xff] }
 0xa57   : > { %v8968_v51 = vpop.f32.mrb[56].mxu0  ;;  %v4902_v1 = vadd.f32 %v4816_v56, %v4710_v8  ;;  %v4714_v8 = vmul.f32 %v14851_v58, %v4650_v29  ;;  %v6154_v29 = vld [vmem:[#allocation6 + $0xa0] sm:$0xff] (!%p8257_p6)  ;;  %v6156_v58 = vld [vmem:[#allocation6 + $0xb0] sm:$0xff] (!%p8257_p6) }
 0xa58   : > { %4970 = vst.msk [vmem:[#allocation6 + $0x160] sm:$0xff] %vm4925_vm6, %v4905_v28  ;;  %v5900_v14 = vadd.f32 %v8968_v51, %v5416_v34  ;;  %v5730_v3 = vpop.f32.mrb[57].mxu0  ;;  %v5418_v34 = vmul.f32 %v13516_v19, %v5034_v22  ;;  %v5051_v19 = vld [vmem:[#allocation7 + $0x1e8] sm:$0xff] }
 0xa59   : > { %v5898_v5 = vadd.f32 %v5730_v3, %v5414_v15  ;;  %v8969_v10 = vpop.f32.mrb[58].mxu0  ;;  %v4854_v4 = vpop.xlane.xlu0 %4853  ;;  %4967 = vst.msk [vmem:[#allocation6 + $0x148] sm:$0xff] %vm4925_vm6, %v4902_v1  ;;  %v5050_v15 = vld [vmem:[#allocation7 + $0x1e0] sm:$0xff]  ;;  %v6155_v22 = vld [vmem:[#allocation6 + $0xa8] sm:$0xff] (!%p8257_p6) }
 0xa5a   : > { %5964 = vst.msk [vmem:[#allocation7 + $0x150] sm:$0xff] %vm2936_vm5, %v5900_v14  ;;  %v5901_v32 = vadd.f32 %v8969_v10, %v5417_v59  ;;  %v5733_v23 = vpop.f32.mrb[59].mxu0  ;;  %v4921_v31 = vadd.f32 %v4854_v4, %v4729_v55  ;;  %v4848_v49 = vpop.xlane.xlu1 %4847  ;;  %v5419_v59 = vmul.f32 %v13486_v62, %v5035_v52  ;;  %v5434_v35 = vmul.f32 %v13527_v16, %v5050_v15  ;;  %v6143_v15 = vld [vmem:[#allocation6 + $0x48] sm:$0xff] (!%p8257_p6) }
 0xa5b   : > { %5962 = vst.msk [vmem:[#allocation7 + $0x140] sm:$0xff] %vm2936_vm5, %v5898_v5  ;;  %v5899_v41 = vadd.f32 %v5733_v23, %v5415_v37  ;;  %v9000_v36 = vpop.f32.mrb[56].mxu1  ;;  %v4918_v40 = vadd.f32 %v4848_v49, %v4726_v47  ;;  %v14852_v5 = vld [vmem:[#allocation35_spill] sm:$0xff]  ;;  %v5052_v47 = vld [vmem:[#allocation7 + $0x1f0] sm:$0xff] }
 0xa5c   : > { %5965 = vst.msk [vmem:[#allocation7 + $0x158] sm:$0xff] %vm2936_vm5, %v5901_v32  ;;  %v5916_v9 = vadd.f32 %v9000_v36, %v5432_v43  ;;  %v5827_v18 = vpop.f32.mrb[57].mxu1  ;;  %v4730_v62 = vmul.f32 %v14852_v5, %v4666_v60  ;;  %v5435_v43 = vmul.f32 %v13491_v25, %v5051_v19  ;;  %v6136_v49 = vld [vmem:[#allocation6 + $0x10] sm:$0xff] (!%p8257_p6)  ;;  %v6145_v60 = vld [vmem:[#allocation6 + $0x58] sm:$0xff] (!%p8257_p6) }
 0xa5d   : > { %4986 = vst.msk [vmem:[#allocation6 + $0x1e0] sm:$0xff] %vm4925_vm6, %v4921_v31  ;;  %v5914_v6 = vadd.f32 %v5827_v18, %v5430_v27  ;;  %v9001_v0 = vpop.f32.mrb[58].mxu1  ;;  %4983 = vst.msk [vmem:[#allocation6 + $0x1c8] sm:$0xff] %vm4925_vm6, %v4918_v40  ;;  %9654 = vrcp.f32 (!%p8257_p6), %v6136_v49  ;;  %v6135_v40 = vld [vmem:[#allocation6 + $0x8] sm:$0xff] (!%p8257_p6) }
 0xa5e   : > { %5963 = vst.msk [vmem:[#allocation7 + $0x148] sm:$0xff] %vm2936_vm5, %v5899_v41  ;;  %5980 = vst.msk [vmem:[#allocation7 + $0x1d0] sm:$0xff] %vm2936_vm5, %v5916_v9  ;;  %v5917_v24 = vadd.f32 %v9001_v0, %v5433_v39  ;;  %v5830_v53 = vpop.f32.mrb[59].mxu1  ;;  %v4828_v44 = vpop.xlane.xlu1 %4827  ;;  %v6137_v39 = vld [vmem:[#allocation6 + $0x18] sm:$0xff] (!%p8257_p6)  ;;  %v9950_v9 = vmov (!%p8257_p6), 0   ;;  %9656 = vrcp.f32 (!%p8257_p6), %v6134_v45  ;;  %v6151_v18 = vld [vmem:[#allocation6 + $0x88] sm:$0xff] (!%p8257_p6) }
 0xa5f   : > { %5978 = vst.msk [vmem:[#allocation7 + $0x1c0] sm:$0xff] %vm2936_vm5, %v5914_v6  ;;  %v5915_v61 = vadd.f32 %v5830_v53, %v5431_v33  ;;  %v4908_v20 = vadd.f32 %v4828_v44, %v4716_v12  ;;  %9643 = vset.pattern.permute.xlu1 (!%p8257_p6), %v9950_v9  ;;  %9642 = vset.pattern.permute.xlu0 (!%p8257_p6), %v9950_v9  ;;  %9658 = vrcp.f32 (!%p8257_p6), %v6137_v39  ;;  %v6150_v33 = vld [vmem:[#allocation6 + $0x80] sm:$0xff] (!%p8257_p6)  ;;  %v6153_v6 = vld [vmem:[#allocation6 + $0x98] sm:$0xff] (!%p8257_p6)  ;;  %v6152_v0 = vld [vmem:[#allocation6 + $0x90] sm:$0xff] (!%p8257_p6) }
 0xa60   : > { %5981 = vst.msk [vmem:[#allocation7 + $0x1d8] sm:$0xff] %vm2936_vm5, %v5917_v24  ;;  %9660 = vrcp.f32 (!%p8257_p6), %v6135_v40  ;;  %v6166_v45 = vld [vmem:[#allocation6 + $0x100] sm:$0xff] (!%p8257_p6)  ;;  %v6169_v9 = vld [vmem:[#allocation6 + $0x118] sm:$0xff] (!%p8257_p6) }
 0xa61   : > { %5979 = vst.msk [vmem:[#allocation7 + $0x1c8] sm:$0xff] %vm2936_vm5, %v5915_v61  ;;  %v5372_v14 = vpop.permute.xlu0 %5371  ;;  %9662 = vrcp.f32 (!%p8257_p6), %v6151_v18  ;;  %v6138_v61 = vld [vmem:[#allocation6 + $0x20] sm:$0xff] (!%p8257_p6)  ;;  %v6168_v18 = vld [vmem:[#allocation6 + $0x110] sm:$0xff] (!%p8257_p6) }
 0xa62   : > { %4973 = vst.msk [vmem:[#allocation6 + $0x178] sm:$0xff] %vm4925_vm6, %v4908_v20  ;;  %v4860_v50 = vpop.xlane.xlu1 %4859  ;;  %v5437_v10 = vmul.f32 %v5372_v14, %v5053_v38  ;;  %9664 = vrcp.f32 (!%p8257_p6), %v6150_v33  ;;  %v6144_v38 = vld [vmem:[#allocation6 + $0x50] sm:$0xff] (!%p8257_p6) }
 0xa63   : > { %v4924_v17 = vadd.f32 %v4860_v50, %v4732_v2  ;;  %9666 = vrcp.f32 (!%p8257_p6), %v6153_v6  ;;  %v6183_v6 = vld [vmem:[#allocation6 + $0x188] sm:$0xff] (!%p8257_p6) }
 0xa64   : > { %9668 = vrcp.f32 (!%p8257_p6), %v6152_v0 }
 0xa65   : > { %4989 = vst.msk [vmem:[#allocation6 + $0x1f8] sm:$0xff] %vm4925_vm6, %v4924_v17  ;;  %9670 = vrcp.f32 (!%p8257_p6), %v6139_v48  ;;  %v6678_v17 = vld [vmem:[%s14853_s29] sm:$0xf] (!%p8257_p6)  ;;  %v6185_v48 = vld [vmem:[#allocation6 + $0x198] sm:$0xff] (!%p8257_p6) }
 0xa66   : > { %v4824_v26 = vpop.xlane.xlu1 %4823  ;;  %9672 = vrcp.f32 (!%p8257_p6), %v6138_v61  ;;  %9170 = vmatprep.subr.msk.bf16.mxu0 (!%p8257_p6), %vm6706_vm7, %v6678_v17  ;;  %v6708_v52 = vsel (!%p8257_p6), %vm6706_vm7, %v6678_v17, 0  ;;  %v6184_v61 = vld [vmem:[#allocation6 + $0x190] sm:$0xff] (!%p8257_p6) }
 0xa67   : > { %v8972_v28 = vpop.f32.mrb[60].mxu0  ;;  %v4906_v1 = vadd.f32 %v4824_v26, %v4714_v8  ;;  %v9655_v24 = vpop.eup (!%p8257_p6), %9654  ;;  %9674 = vrcp.f32 (!%p8257_p6), %v6141_v42  ;;  %9007 = vmatpush3.bf16.msra.mxu0 (!%p8257_p6), %v6708_v52  ;;  %v6171_v42 = vld [vmem:[#allocation6 + $0x128] sm:$0xff] (!%p8257_p6) }
 0xa68   : > { %v5904_v51 = vadd.f32 %v8972_v28, %v5420_v54  ;;  %v5746_v56 = vpop.f32.mrb[61].mxu0  ;;  %v9657_v53 = vpop.eup (!%p8257_p6), %9656  ;;  %6274 = vperm.xlu1 (!%p8257_p6), %9643, %v9655_v24   ;;  %9676 = vrcp.f32 (!%p8257_p6), %v6140_v11  ;;  %v6157_v54 = vld [vmem:[#allocation6 + $0xb8] sm:$0xff] (!%p8257_p6)  ;;  %v6182_v24 = vld [vmem:[#allocation6 + $0x180] sm:$0xff] (!%p8257_p6) }
 0xa69   : > { %v5902_v57 = vadd.f32 %v5746_v56, %v5418_v34  ;;  %v8973_v3 = vpop.f32.mrb[62].mxu0  ;;  %4971 = vst.msk [vmem:[#allocation6 + $0x168] sm:$0xff] %vm4925_vm6, %v4906_v1  ;;  %v9659_v12 = vpop.eup (!%p8257_p6), %9658  ;;  %6264 = vperm.xlu0 (!%p8257_p6), %9642, %v9657_v53   ;;  %9678 = vrcp.f32 (!%p8257_p6), %v6155_v22  ;;  %v6679_v34 = vld [vmem:[%s14854_s22 + $0x4] sm:$0xf] (!%p8257_p6)  ;;  %v6159_v1 = vld [vmem:[#allocation6 + $0xc8] sm:$0xff] (!%p8257_p6) }
 0xa6a   : > { %5968 = vst.msk [vmem:[#allocation7 + $0x170] sm:$0xff] %vm2936_vm5, %v5904_v51  ;;  %v5905_v21 = vadd.f32 %v8973_v3, %v5421_v63  ;;  %v5749_v55 = vpop.f32.mrb[63].mxu0  ;;  %v4856_v4 = vpop.xlane.xlu1 %4855  ;;  %9680 = vrcp.f32 (!%p8257_p6), %v6154_v29  ;;  %9171 = vmatprep.subr.msk.bf16.mxu1 (!%p8257_p6), %vm6706_vm7, %v6679_v34  ;;  %v6832_v8 = vsel (!%p8257_p6), %vm6706_vm7, %v6679_v34, 0  ;;  %v6142_v51 = vld [vmem:[#allocation6 + $0x40] sm:$0xff] (!%p8257_p6)  ;;  %v6680_v22 = vld [vmem:[%s14854_s22 + $0x8] sm:$0xf] (!%p8257_p6) }
 0xa6b   : > { %5966 = vst.msk [vmem:[#allocation7 + $0x160] sm:$0xff] %vm2936_vm5, %v5902_v57  ;;  %v5903_v7 = vadd.f32 %v5749_v55, %v5419_v59  ;;  %v9004_v37 = vpop.f32.mrb[60].mxu1  ;;  %v4922_v32 = vadd.f32 %v4856_v4, %v4730_v62  ;;  %v9661_v44 = vpop.eup (!%p8257_p6), %9660  ;;  %9025 = vmatpush3.bf16.msra.mxu1 (!%p8257_p6), %v6832_v8  ;;  %9682 = vrcp.f32 (!%p8257_p6), %v6157_v54  ;;  %v6158_v3 = vld [vmem:[#allocation6 + $0xc0] sm:$0xff] (!%p8257_p6)  ;;  %v6149_v4 = vld [vmem:[#allocation6 + $0x78] sm:$0xff] (!%p8257_p6)  ;;  %9172 = vmatprep.subr.msk.bf16.mxu0 (!%p8257_p6), %vm6706_vm7, %v6680_v22  ;;  %v13747_v17 = vsel (!%p8257_p6), %vm6706_vm7, %v6680_v22, 0  ;;  %v6187_v34 = vld [vmem:[#allocation6 + $0x1a8] sm:$0xff] (!%p8257_p6) }
 0xa6c   : > { %5969 = vst.msk [vmem:[#allocation7 + $0x178] sm:$0xff] %vm2936_vm5, %v5905_v21  ;;  %v5843_v30 = vpop.f32.mrb[61].mxu1  ;;  %6279 = vperm.xlu1 (!%p8257_p6), %9643, %v9659_v12   ;;  %v9663_v20 = vpop.eup (!%p8257_p6), %9662  ;;  %9684 = vrcp.f32 (!%p8257_p6), %v6156_v58  ;;  %v6161_v21 = vld [vmem:[#allocation6 + $0xd8] sm:$0xff] (!%p8257_p6)  ;;  %v6146_v62 = vld [vmem:[#allocation6 + $0x60] sm:$0xff] (!%p8257_p6)  ;;  %v6681_v54 = vld [vmem:[%s14854_s22 + $0xc] sm:$0xf] (!%p8257_p6) }
 0xa6d   : > { %5967 = vst.msk [vmem:[#allocation7 + $0x168] sm:$0xff] %vm2936_vm5, %v5903_v7  ;;  %v5918_v23 = vadd.f32 %v5843_v30, %v5434_v35  ;;  %v9005_v16 = vpop.f32.mrb[62].mxu1  ;;  %6053 = sbr.rel (%p8257_p6) target bundleno = 3919 (0xf4f), region = 104  ;;  %6269 = vperm.xlu0 (!%p8257_p6), %9642, %v9661_v44   ;;  %v9665_v2 = vpop.eup (!%p8257_p6), %9664  ;;  %9686 = vrcp.f32 (!%p8257_p6), %v6143_v15  ;;  %v6160_v35 = vld [vmem:[#allocation6 + $0xd0] sm:$0xff] (!%p8257_p6)  ;;  %v6170_v11 = vld [vmem:[#allocation6 + $0x120] sm:$0xff] (!%p8257_p6)  ;;  %9173 = vmatprep.subr.msk.bf16.mxu1 (!%p8257_p6), %vm6706_vm7, %v6681_v54  ;;  %v6189_v15 = vld [vmem:[#allocation6 + $0x1b8] sm:$0xff] (!%p8257_p6) }
 0xa6e   : > { %v5921_v31 = vadd.f32 %v9005_v16, %v5437_v10  ;;  %v5846_v46 = vpop.f32.mrb[63].mxu1  ;;  %4987 = vst.msk [vmem:[#allocation6 + $0x1e8] sm:$0xff] %vm4925_vm6, %v4922_v32  ;;  %v5367_v41 = vpop.permute.xlu1 %5366  ;;  %9688 = vrcp.f32 (!%p8257_p6), %v6142_v51  ;;  %v6186_v8 = vld [vmem:[#allocation6 + $0x1a0] sm:$0xff] (!%p8257_p6) }
 0xa6f   : > { %5982 = vst.msk [vmem:[#allocation7 + $0x1e0] sm:$0xff] %vm2936_vm5, %v5918_v23  ;;  %v5919_v27 = vadd.f32 %v5846_v46, %v5435_v43  ;;  %v5436_v36 = vmul.f32 %v5367_v41, %v5052_v47  ;;  %v9667_v50 = vpop.eup (!%p8257_p6), %9666  ;;  %9690 = vrcp.f32 (!%p8257_p6), %v6145_v60  ;;  %v6148_v43 = vld [vmem:[#allocation6 + $0x70] sm:$0xff] (!%p8257_p6)  ;;  %v6163_v23 = vld [vmem:[#allocation6 + $0xe8] sm:$0xff] (!%p8257_p6)  ;;  %v6165_v47 = vld [vmem:[#allocation6 + $0xf8] sm:$0xff] (!%p8257_p6) }
 0xa70   : > { %5985 = vst.msk [vmem:[#allocation7 + $0x1f8] sm:$0xff] %vm2936_vm5, %v5921_v31  ;;  %6349 = vperm.xlu1 (!%p8257_p6), %9643, %v9663_v20   ;;  %v9669_v13 = vpop.eup (!%p8257_p6), %9668  ;;  %9692 = vrcp.f32 (!%p8257_p6), %v6144_v38  ;;  %v6162_v31 = vld [vmem:[#allocation6 + $0xe0] sm:$0xff] (!%p8257_p6)  ;;  %v6164_v41 = vld [vmem:[#allocation6 + $0xf0] sm:$0xff] (!%p8257_p6)  ;;  %v6175_v60 = vld [vmem:[#allocation6 + $0x148] sm:$0xff] (!%p8257_p6) }
 0xa71   : > { %5983 = vst.msk [vmem:[#allocation7 + $0x1e8] sm:$0xff] %vm2936_vm5, %v5919_v27  ;;  %v5920_v25 = vadd.f32 %v9004_v37, %v5436_v36  ;;  %6344 = vperm.xlu0 (!%p8257_p6), %9642, %v9665_v2   ;;  %v9671_v28 = vpop.eup (!%p8257_p6), %9670  ;;  %9694 = vrcp.f32 (!%p8257_p6), %v6159_v1  ;;  %v6147_v37 = vld [vmem:[#allocation6 + $0x68] sm:$0xff] (!%p8257_p6)  ;;  %v6174_v38 = vld [vmem:[#allocation6 + $0x140] sm:$0xff] (!%p8257_p6)  ;;  %v6177_v1 = vld [vmem:[#allocation6 + $0x158] sm:$0xff] (!%p8257_p6) }
 0xa72   : > { %v9673_v63 = vpop.eup (!%p8257_p6), %9672  ;;  %9696 = vrcp.f32 (!%p8257_p6), %v6158_v3  ;;  %v6176_v3 = vld [vmem:[#allocation6 + $0x150] sm:$0xff] (!%p8257_p6) }
 0xa73   : > { %5984 = vst.msk [vmem:[#allocation7 + $0x1f0] sm:$0xff] %vm2936_vm5, %v5920_v25  ;;  %v9675_v26 = vpop.eup (!%p8257_p6), %9674  ;;  %9698 = vrcp.f32 (!%p8257_p6), %v6161_v21  ;;  %v6167_v25 = vld [vmem:[#allocation6 + $0x108] sm:$0xff] (!%p8257_p6) }
 0xa74   : > { %6359 = vperm.xlu1 %9643, %v9667_v50   ;;  %v9677_v56 = vpop.eup %9676  ;;  %9700 = vrcp.f32 %v6160_v35  ;;  %v6173_v50 = vld [vmem:[#allocation6 + $0x138] sm:$0xff]  ;;  %v6191_v21 = vld [vmem:[#allocation6 + $0x1c8] sm:$0xff]  ;;  %v6190_v35 = vld [vmem:[#allocation6 + $0x1c0] sm:$0xff] }
 0xa75   : > { %6354 = vperm.xlu0 %9642, %v9669_v13   ;;  %v9679_v59 = vpop.eup %9678  ;;  %9702 = vrcp.f32 %v6147_v37  ;;  %v6172_v13 = vld [vmem:[#allocation6 + $0x130] sm:$0xff]  ;;  %v6193_v37 = vld [vmem:[#allocation6 + $0x1d8] sm:$0xff] }
 0xa76   : > { %v9681_v14 = vpop.eup %9680  ;;  %9704 = vrcp.f32 %v6146_v62  ;;  %v6192_v62 = vld [vmem:[#allocation6 + $0x1d0] sm:$0xff] }
 0xa77   : > { %v9683_v57 = vpop.eup %9682  ;;  %9706 = vrcp.f32 %v6149_v4  ;;  %v6179_v4 = vld [vmem:[#allocation6 + $0x168] sm:$0xff] }
 0xa78   : > { %6289 = vperm.xlu1 %9643, %v9671_v28   ;;  %v9685_v19 = vpop.eup %9684  ;;  %9708 = vrcp.f32 %v6148_v43  ;;  %v13754_v28 = vsel %vm6706_vm7, %v6681_v54, 0  ;;  %v6178_v43 = vld [vmem:[#allocation6 + $0x160] sm:$0xff] }
 0xa79   : > { %6284 = vperm.xlu0 %9642, %v9673_v63   ;;  %v9687_v55 = vpop.eup %9686  ;;  %9710 = vrcp.f32 %v6163_v23  ;;  %v6181_v23 = vld [vmem:[#allocation6 + $0x178] sm:$0xff] }
 0xa7a   : > { %v9689_v7 = vpop.eup %9688  ;;  %9712 = vrcp.f32 %v6162_v31  ;;  %v6180_v31 = vld [vmem:[#allocation6 + $0x170] sm:$0xff] }
 0xa7b   : > { %v9691_v5 = vpop.eup %9690  ;;  %9714 = vrcp.f32 %v6165_v47  ;;  %v6195_v47 = vld [vmem:[#allocation6 + $0x1e8] sm:$0xff] }
 0xa7c   : > { %6299 = vperm.xlu1 %9643, %v9675_v26   ;;  %v9693_v10 = vpop.eup %9692  ;;  %9716 = vrcp.f32 %v6164_v41  ;;  %v6188_v26 = vld [vmem:[#allocation6 + $0x1b0] sm:$0xff]  ;;  %v6194_v41 = vld [vmem:[#allocation6 + $0x1e0] sm:$0xff] }
 0xa7d   : > { %6294 = vperm.xlu0 %9642, %v9677_v56   ;;  %v9695_v30 = vpop.eup %9694  ;;  %9718 = vrcp.f32 %v6167_v25  ;;  %v6197_v25 = vld [vmem:[#allocation6 + $0x1f8] sm:$0xff] }
 0xa7e   : > { %v9697_v32 = vpop.eup %9696  ;;  %9720 = vrcp.f32 %v6166_v45  ;;  %v6196_v45 = vld [vmem:[#allocation6 + $0x1f0] sm:$0xff] }
 0xa7f   : > { %v9699_v16 = vpop.eup %9698  ;;  %9722 = vrcp.f32 %v6169_v9 }
 0xa80   : > { %6369 = vperm.xlu1 %9643, %v9679_v59   ;;  %v9701_v46 = vpop.eup %9700  ;;  %9724 = vrcp.f32 %v6168_v18 }
 0xa81   : > { %6364 = vperm.xlu0 %9642, %v9681_v14   ;;  %v9703_v27 = vpop.eup %9702  ;;  %9726 = vrcp.f32 %v6183_v6 }
 0xa82   : > { %v9705_v36 = vpop.eup %9704  ;;  %9728 = vrcp.f32 %v6182_v24 }
 0xa83   : > { %v9707_v49 = vpop.eup %9706  ;;  %9730 = vrcp.f32 %v6185_v48  ;;  %v6072_v48 = vld [vmem:[#allocation7 + $0x10] sm:$0xff] }
 0xa84   : > { %6379 = vperm.xlu1 %9643, %v9683_v57   ;;  %v9709_v39 = vpop.eup %9708  ;;  %9732 = vrcp.f32 %v6184_v61  ;;  %v6070_v61 = vld [vmem:[#allocation7] sm:$0xff] }
 0xa85   : > { %6374 = vperm.xlu0 %9642, %v9685_v19   ;;  %v9711_v40 = vpop.eup %9710  ;;  %9734 = vrcp.f32 %v6171_v42 }
 0xa86   : > { %v9713_v33 = vpop.eup %9712  ;;  %9736 = vrcp.f32 %v6170_v11 }
 0xa87   : > { %v9715_v0 = vpop.eup %9714  ;;  %9738 = vrcp.f32 %v6173_v50 }
 0xa88   : > { %6309 = vperm.xlu1 %9643, %v9687_v55   ;;  %v9717_v53 = vpop.eup %9716  ;;  %9740 = vrcp.f32 %v6172_v13 }
 0xa89   : > { %6304 = vperm.xlu0 %9642, %v9689_v7   ;;  %v9719_v12 = vpop.eup %9718  ;;  %9742 = vrcp.f32 %v6187_v34 }
 0xa8a   : > { %v9721_v44 = vpop.eup %9720  ;;  %9744 = vrcp.f32 %v6186_v8 }
 0xa8b   : > { %v9723_v20 = vpop.eup %9722  ;;  %9746 = vrcp.f32 %v6189_v15  ;;  %v6089_v15 = vld [vmem:[#allocation7 + $0x98] sm:$0xff] }
 0xa8c   : > { %6319 = vperm.xlu1 %9643, %v9691_v5   ;;  %v9725_v2 = vpop.eup %9724  ;;  %9748 = vrcp.f32 %v6188_v26 }
 0xa8d   : > { %6314 = vperm.xlu0 %9642, %v9693_v10   ;;  %v9727_v29 = vpop.eup %9726  ;;  %9750 = vrcp.f32 %v6175_v60 }
 0xa8e   : > { %v9729_v52 = vpop.eup %9728  ;;  %9752 = vrcp.f32 %v6174_v38 }
 0xa8f   : > { %v9731_v58 = vpop.eup %9730  ;;  %9754 = vrcp.f32 %v6177_v1  ;;  %v6074_v1 = vld [vmem:[#allocation7 + $0x20] sm:$0xff] }
 0xa90   : > { %6389 = vperm.xlu1 %9643, %v9695_v30   ;;  %v9733_v63 = vpop.eup %9732  ;;  %9756 = vrcp.f32 %v6176_v3 }
 0xa91   : > { %6384 = vperm.xlu0 %9642, %v9697_v32   ;;  %v9735_v51 = vpop.eup %9734  ;;  %9758 = vrcp.f32 %v6191_v21 }
 0xa92   : > { %v9737_v56 = vpop.eup %9736  ;;  %9760 = vrcp.f32 %v6190_v35  ;;  %v6077_v35 = vld [vmem:[#allocation7 + $0x38] sm:$0xff] }
 0xa93   : > { %v9739_v59 = vpop.eup %9738  ;;  %9762 = vrcp.f32 %v6193_v37 }
 0xa94   : > { %6399 = vperm.xlu1 %9643, %v9699_v16   ;;  %v9741_v14 = vpop.eup %9740  ;;  %9764 = vrcp.f32 %v6192_v62 }
 0xa95   : > { %6394 = vperm.xlu0 %9642, %v9701_v46   ;;  %v9743_v57 = vpop.eup %9742  ;;  %9766 = vrcp.f32 %v6179_v4  ;;  %v6091_v4 = vld [vmem:[#allocation7 + $0xa8] sm:$0xff] }
 0xa96   : > { %v9745_v19 = vpop.eup %9744  ;;  %9768 = vrcp.f32 %v6178_v43 }
 0xa97   : > { %v9747_v55 = vpop.eup %9746  ;;  %9770 = vrcp.f32 %v6181_v23 }
 0xa98   : > { %6329 = vperm.xlu1 %9643, %v9703_v27   ;;  %v9749_v7 = vpop.eup %9748  ;;  %9772 = vrcp.f32 %v6180_v31 }
 0xa99   : > { %6324 = vperm.xlu0 %9642, %v9705_v36   ;;  %v9751_v5 = vpop.eup %9750  ;;  %9774 = vrcp.f32 %v6195_v47  ;;  %v6092_v47 = vld [vmem:[#allocation7 + $0xb0] sm:$0xff] }
 0xa9a   : > { %v9753_v10 = vpop.eup %9752  ;;  %9776 = vrcp.f32 %v6194_v41 }
 0xa9b   : > { %v9755_v30 = vpop.eup %9754  ;;  %9778 = vrcp.f32 %v6197_v25 }
 0xa9c   : > { %6339 = vperm.xlu1 %9643, %v9707_v49   ;;  %v9757_v32 = vpop.eup %9756  ;;  %9780 = vrcp.f32 %v6196_v45  ;;  %v6078_v45 = vld [vmem:[#allocation7 + $0x40] sm:$0xff] }
 0xa9d   : > { %6334 = vperm.xlu0 %9642, %v9709_v39   ;;  %v9759_v16 = vpop.eup %9758 }
 0xa9e   : > { %v9761_v46 = vpop.eup %9760 }
 0xa9f   : > { %v9763_v27 = vpop.eup %9762 }
 0xaa0   : > { %6409 = vperm.xlu1 %9643, %v9711_v40   ;;  %v9765_v36 = vpop.eup %9764 }
 0xaa1   : > { %6404 = vperm.xlu0 %9642, %v9713_v33   ;;  %v9767_v49 = vpop.eup %9766 }
 0xaa2   : > { %v9769_v39 = vpop.eup %9768 }
 0xaa3   : > { %v9771_v9 = vpop.eup %9770 }
 0xaa4   : > { %6419 = vperm.xlu1 %9643, %v9715_v0   ;;  %v9773_v40 = vpop.eup %9772 }
 0xaa5   : > { %6414 = vperm.xlu0 %9642, %v9717_v53   ;;  %v9775_v18 = vpop.eup %9774 }
 0xaa6   : > { %v9777_v33 = vpop.eup %9776 }
 0xaa7   : > { %v9779_v6 = vpop.eup %9778 }
 0xaa8   : > { %6429 = vperm.xlu1 %9643, %v9719_v12   ;;  %v9781_v0 = vpop.eup %9780  ;;  %v6073_v12 = vld [vmem:[#allocation7 + $0x18] sm:$0xff] }
 0xaa9   : > { %6424 = vperm.xlu0 %9642, %v9721_v44   ;;  %v6071_v44 = vld [vmem:[#allocation7 + $0x8] sm:$0xff] }
 0xaac   : > { %6439 = vperm.xlu1 %9643, %v9723_v20  }
 0xaad   : > { %6434 = vperm.xlu0 %9642, %v9725_v2  }
 0xab0   : > { %6509 = vperm.xlu1 %9643, %v9727_v29   ;;  %v6087_v29 = vld [vmem:[#allocation7 + $0x88] sm:$0xff] }
 0xab1   : > { %6504 = vperm.xlu0 %9642, %v9729_v52   ;;  %v6086_v52 = vld [vmem:[#allocation7 + $0x80] sm:$0xff] }
 0xab4   : > { %6519 = vperm.xlu1 %9643, %v9731_v58  }
 0xab5   : > { %6514 = vperm.xlu0 %9642, %v9733_v63  }
 0xab8   : > { %6449 = vperm.xlu1 %9643, %v9735_v51   ;;  %v6088_v51 = vld [vmem:[#allocation7 + $0x90] sm:$0xff] }
 0xab9   : > { %6444 = vperm.xlu0 %9642, %v9737_v56  }
 0xabc   : > { %6459 = vperm.xlu1 %9643, %v9739_v59  }
 0xabd   : > { %6454 = vperm.xlu0 %9642, %v9741_v14   ;;  %v6075_v14 = vld [vmem:[#allocation7 + $0x28] sm:$0xff] }
 0xac0   : > { %6529 = vperm.xlu1 %9643, %v9743_v57  }
 0xac1   : > { %6524 = vperm.xlu0 %9642, %v9745_v19  }
 0xac4   : > { %6539 = vperm.xlu1 %9643, %v9747_v55  }
 0xac5   : > { %6534 = vperm.xlu0 %9642, %v9749_v7   ;;  %v6076_v7 = vld [vmem:[#allocation7 + $0x30] sm:$0xff] }
 0xac8   : > { %6469 = vperm.xlu1 %9643, %v9751_v5  }
 0xac9   : > { %6464 = vperm.xlu0 %9642, %v9753_v10  }
 0xacc   : > { %6479 = vperm.xlu1 %9643, %v9755_v30   ;;  %v6090_v30 = vld [vmem:[#allocation7 + $0xa0] sm:$0xff] }
 0xacd   : > { %6474 = vperm.xlu0 %9642, %v9757_v32  }
 0xad0   : > { %6549 = vperm.xlu1 %9643, %v9759_v16  }
 0xad1   : > { %6544 = vperm.xlu0 %9642, %v9761_v46   ;;  %v6093_v46 = vld [vmem:[#allocation7 + $0xb8] sm:$0xff] }
 0xad4   : > { %6559 = vperm.xlu1 %9643, %v9763_v27  }
 0xad5   : > { %6554 = vperm.xlu0 %9642, %v9765_v36  }
 0xad8   : > { %6489 = vperm.xlu1 %9643, %v9767_v49   ;;  %v6079_v49 = vld [vmem:[#allocation7 + $0x48] sm:$0xff] }
 0xad9   : > { %6484 = vperm.xlu0 %9642, %v9769_v39  }
 0xadc   : > { %6499 = vperm.xlu1 %9643, %v9771_v9  }
 0xadd   : > { %6494 = vperm.xlu0 %9642, %v9773_v40  }
 0xae0   : > { %6569 = vperm.xlu1 %9643, %v9775_v18  }
 0xae1   : > { %6564 = vperm.xlu0 %9642, %v9777_v33  }
 0xae4   : > { %6579 = vperm.xlu1 %9643, %v9779_v6   ;;  %v6081_v6 = vld [vmem:[#allocation7 + $0x58] sm:$0xff] }
 0xae5   : > { %6574 = vperm.xlu0 %9642, %v9781_v0   ;;  %v6080_v0 = vld [vmem:[#allocation7 + $0x50] sm:$0xff] }
 0xae7   : > { %v6275_v24 = vpop.permute.xlu1 %6274 }
 0xae8   : > { %v6265_v53 = vpop.permute.xlu0 %6264  ;;  %v6584_v20 = vmul.f32 %v6275_v24, %v6072_v48 }
 0xae9   : > { %v6582_v22 = vmul.f32 %v6265_v53, %v6070_v61 }
 0xaeb   : > { %v6280_v42 = vpop.permute.xlu1 %6279 }
 0xaec   : > { %v6585_v11 = vmul.f32 %v6280_v42, %v6073_v12  ;;  %v6270_v2 = vpop.permute.xlu0 %6269  ;;  %v6094_v42 = vld [vmem:[#allocation7 + $0xc0] sm:$0xff] }
 0xaed   : > { %v6583_v50 = vmul.f32 %v6270_v2, %v6071_v44  ;;  %v6095_v44 = vld [vmem:[#allocation7 + $0xc8] sm:$0xff] }
 0xaee   : > { %v6647_v13 = vpack.c.bf16 %v6585_v11, %v6584_v20 }
 0xaef   : > { %v6350_v54 = vpop.permute.xlu1 %6349  ;;  %v6646_v34 = vpack.c.bf16 %v6583_v50, %v6582_v22 }
 0xaf0   : > { %v6599_v58 = vmul.f32 %v6350_v54, %v6087_v29  ;;  %v6345_v8 = vpop.permute.xlu0 %6344  ;;  %v6097_v29 = vld [vmem:[#allocation7 + $0xd8] sm:$0xff] }
 0xaf1   : > { %v6598_v63 = vmul.f32 %v6345_v8, %v6086_v52  ;;  %9008 = vmatprep.mubr.msk.bf16.mxu0 %vm2936_vm5, %v6646_v34 }
 0xaf2   : > { %9009 = vmatmul.mubr.msk.bf16.vlgmr.msra.gmra.mrb[0].mxu0 %vm2936_vm5, %v6647_v13  ;;  %v6096_v13 = vld [vmem:[#allocation7 + $0xd0] sm:$0xff] }
 0xaf3   : > { %v6360_v26 = vpop.permute.xlu1 %6359  ;;  %v6654_v56 = vpack.c.bf16 %v6599_v58, %v6598_v63  ;;  %9043 = vmatpush3.bf16.msra.mxu0 %v13747_v17  ;;  %v6083_v63 = vld [vmem:[#allocation7 + $0x68] sm:$0xff] }
 0xaf4   : > { %v6601_v60 = vmul.f32 %v6360_v26, %v6089_v15  ;;  %v6355_v59 = vpop.permute.xlu0 %6354  ;;  %v6082_v15 = vld [vmem:[#allocation7 + $0x60] sm:$0xff] }
 0xaf5   : > { %v6600_v38 = vmul.f32 %v6355_v59, %v6088_v51  ;;  %9026 = vmatprep.mubr.msk.bf16.mxu1 %vm2936_vm5, %v6654_v56 }
 0xaf7   : > { %v6655_v57 = vpack.c.bf16 %v6601_v60, %v6600_v38  ;;  %v6290_v3 = vpop.permute.xlu1 %6289  ;;  %v6085_v38 = vld [vmem:[#allocation7 + $0x78] sm:$0xff] }
 0xaf8   : > { %v6587_v19 = vmul.f32 %v6290_v3, %v6075_v14  ;;  %v6285_v21 = vpop.permute.xlu0 %6284  ;;  %v6084_v14 = vld [vmem:[#allocation7 + $0x70] sm:$0xff] }
 0xaf9   : > { %v6586_v55 = vmul.f32 %v6285_v21, %v6074_v1  ;;  %9027 = vmatmul.mubr.msk.bf16.vlgmr.msra.gmra.mrb[0].mxu1 %vm2936_vm5, %v6655_v57 }
 0xafa   : > { %9061 = vmatpush3.bf16.msra.mxu1 %v13754_v28 }
 0xafb   : > { %v6648_v37 = vpack.c.bf16 %v6587_v19, %v6586_v55  ;;  %v6300_v17 = vpop.permute.xlu1 %6299  ;;  %v6099_v55 = vld [vmem:[#allocation7 + $0xe8] sm:$0xff] }
 0xafc   : > { %v6589_v5 = vmul.f32 %v6300_v17, %v6077_v35  ;;  %v6295_v62 = vpop.permute.xlu0 %6294  ;;  %v6098_v35 = vld [vmem:[#allocation7 + $0xe0] sm:$0xff] }
 0xafd   : > { %v6588_v10 = vmul.f32 %v6295_v62, %v6076_v7  ;;  %9012 = vmatprep.mubr.msk.bf16.mxu0 %vm2936_vm5, %v6648_v37 }
 0xaff   : > { %v6649_v43 = vpack.c.bf16 %v6589_v5, %v6588_v10  ;;  %v6370_v32 = vpop.permute.xlu1 %6369  ;;  %v6101_v10 = vld [vmem:[#allocation7 + $0xf8] sm:$0xff] }
 0xb00   : > { %v6603_v23 = vmul.f32 %v6370_v32, %v6091_v4  ;;  %v6365_v16 = vpop.permute.xlu0 %6364  ;;  %v6100_v4 = vld [vmem:[#allocation7 + $0xf0] sm:$0xff] }
 0xb01   : > { %v6602_v31 = vmul.f32 %v6365_v16, %v6090_v30  ;;  %9013 = vmatmul.mubr.msk.bf16.gmra.mrb[4].mxu0 %vm2936_vm5, %v6649_v43 }
 0xb03   : > { %v6656_v27 = vpack.c.bf16 %v6603_v23, %v6602_v31  ;;  %v6380_v28 = vpop.permute.xlu1 %6379  ;;  %v6103_v31 = vld [vmem:[#allocation7 + $0x108] sm:$0xff] }
 0xb04   : > { %v6605_v41 = vmul.f32 %v6380_v28, %v6093_v46  ;;  %v6375_v36 = vpop.permute.xlu0 %6374  ;;  %v6102_v46 = vld [vmem:[#allocation7 + $0x100] sm:$0xff] }
 0xb05   : > { %v6604_v25 = vmul.f32 %v6375_v36, %v6092_v47  ;;  %9030 = vmatprep.mubr.msk.bf16.mxu1 %vm2936_vm5, %v6656_v27 }
 0xb07   : > { %v6657_v39 = vpack.c.bf16 %v6605_v41, %v6604_v25  ;;  %v6310_v9 = vpop.permute.xlu1 %6309  ;;  %v6105_v25 = vld [vmem:[#allocation7 + $0x118] sm:$0xff] }
 0xb08   : > { %v6591_v40 = vmul.f32 %v6310_v9, %v6079_v49  ;;  %v6305_v18 = vpop.permute.xlu0 %6304  ;;  %v6104_v49 = vld [vmem:[#allocation7 + $0x110] sm:$0xff] }
 0xb09   : > { %v6590_v33 = vmul.f32 %v6305_v18, %v6078_v45  ;;  %9031 = vmatmul.mubr.msk.bf16.gmra.mrb[4].mxu1 %vm2936_vm5, %v6657_v39 }
 0xb0b   : > { %v6650_v24 = vpack.c.bf16 %v6591_v40, %v6590_v33  ;;  %v6320_v53 = vpop.permute.xlu1 %6319  ;;  %v6119_v33 = vld [vmem:[#allocation7 + $0x188] sm:$0xff] }
 0xb0c   : > { %v6593_v48 = vmul.f32 %v6320_v53, %v6081_v6  ;;  %v6315_v12 = vpop.permute.xlu0 %6314  ;;  %v6118_v6 = vld [vmem:[#allocation7 + $0x180] sm:$0xff] }
 0xb0d   : > { %v6592_v61 = vmul.f32 %v6315_v12, %v6080_v0  ;;  %9016 = vmatprep.mubr.msk.bf16.mxu0 %vm2936_vm5, %v6650_v24 }
 0xb0f   : > { %v6651_v20 = vpack.c.bf16 %v6593_v48, %v6592_v61  ;;  %v6390_v11 = vpop.permute.xlu1 %6389  ;;  %v6121_v61 = vld [vmem:[#allocation7 + $0x198] sm:$0xff] }
 0xb10   : > { %v6607_v2 = vmul.f32 %v6390_v11, %v6095_v44  ;;  %v6385_v22 = vpop.permute.xlu0 %6384  ;;  %v6120_v44 = vld [vmem:[#allocation7 + $0x190] sm:$0xff] }
 0xb11   : > { %v6606_v50 = vmul.f32 %v6385_v22, %v6094_v42  ;;  %9017 = vmatmul.mubr.msk.bf16.gmra.mrb[8].mxu0 %vm2936_vm5, %v6651_v20 }
 0xb13   : > { %v6658_v52 = vpack.c.bf16 %v6607_v2, %v6606_v50  ;;  %v6400_v54 = vpop.permute.xlu1 %6399  ;;  %v6107_v50 = vld [vmem:[#allocation7 + $0x128] sm:$0xff] }
 0xb14   : > { %v6609_v34 = vmul.f32 %v6400_v54, %v6097_v29  ;;  %v6395_v58 = vpop.permute.xlu0 %6394  ;;  %v6106_v29 = vld [vmem:[#allocation7 + $0x120] sm:$0xff] }
 0xb15   : > { %v6608_v8 = vmul.f32 %v6395_v58, %v6096_v13  ;;  %9034 = vmatprep.mubr.msk.bf16.mxu1 %vm2936_vm5, %v6658_v52 }
 0xb17   : > { %v6659_v51 = vpack.c.bf16 %v6609_v34, %v6608_v8  ;;  %v6330_v26 = vpop.permute.xlu1 %6329  ;;  %v6109_v8 = vld [vmem:[#allocation7 + $0x138] sm:$0xff] }
 0xb18   : > { %v6595_v56 = vmul.f32 %v6330_v26, %v6083_v63  ;;  %v6325_v60 = vpop.permute.xlu0 %6324  ;;  %v6108_v63 = vld [vmem:[#allocation7 + $0x130] sm:$0xff] }
 0xb19   : > { %v6594_v59 = vmul.f32 %v6325_v60, %v6082_v15  ;;  %9035 = vmatmul.mubr.msk.bf16.gmra.mrb[8].mxu1 %vm2936_vm5, %v6659_v51 }
 0xb1b   : > { %v6652_v1 = vpack.c.bf16 %v6595_v56, %v6594_v59  ;;  %v6340_v57 = vpop.permute.xlu1 %6339  ;;  %v6123_v59 = vld [vmem:[#allocation7 + $0x1a8] sm:$0xff] }
 0xb1c   : > { %v6597_v3 = vmul.f32 %v6340_v57, %v6085_v38  ;;  %v6335_v19 = vpop.permute.xlu0 %6334  ;;  %v6122_v38 = vld [vmem:[#allocation7 + $0x1a0] sm:$0xff] }
 0xb1d   : > { %v6596_v21 = vmul.f32 %v6335_v19, %v6084_v14  ;;  %9020 = vmatprep.mubr.msk.bf16.mxu0 %vm2936_vm5, %v6652_v1 }
 0xb1f   : > { %v6653_v7 = vpack.c.bf16 %v6597_v3, %v6596_v21  ;;  %v6410_v37 = vpop.permute.xlu1 %6409  ;;  %v6125_v21 = vld [vmem:[#allocation7 + $0x1b8] sm:$0xff] }
 0xb20   : > { %v6611_v17 = vmul.f32 %v6410_v37, %v6099_v55  ;;  %v6405_v5 = vpop.permute.xlu0 %6404  ;;  %v6124_v55 = vld [vmem:[#allocation7 + $0x1b0] sm:$0xff] }
 0xb21   : > { %v6610_v62 = vmul.f32 %v6405_v5, %v6098_v35  ;;  %9021 = vmatmul.mubr.msk.bf16.gmra.mrb[12].mxu0 %vm2936_vm5, %v6653_v7 }
 0xb23   : > { %v6660_v30 = vpack.c.bf16 %v6611_v17, %v6610_v62  ;;  %v6420_v43 = vpop.permute.xlu1 %6419  ;;  %v6111_v62 = vld [vmem:[#allocation7 + $0x148] sm:$0xff] }
 0xb24   : > { %v6613_v32 = vmul.f32 %v6420_v43, %v6101_v10  ;;  %v6415_v23 = vpop.permute.xlu0 %6414  ;;  %v6110_v10 = vld [vmem:[#allocation7 + $0x140] sm:$0xff] }
 0xb25   : > { %v6612_v16 = vmul.f32 %v6415_v23, %v6100_v4  ;;  %9038 = vmatprep.mubr.msk.bf16.mxu1 %vm2936_vm5, %v6660_v30 }
 0xb27   : > { %v6661_v47 = vpack.c.bf16 %v6613_v32, %v6612_v16  ;;  %v6430_v27 = vpop.permute.xlu1 %6429  ;;  %v6113_v16 = vld [vmem:[#allocation7 + $0x158] sm:$0xff] }
 0xb28   : > { %v6615_v28 = vmul.f32 %v6430_v27, %v6103_v31  ;;  %v6425_v41 = vpop.permute.xlu0 %6424  ;;  %v6112_v31 = vld [vmem:[#allocation7 + $0x150] sm:$0xff] }
 0xb29   : > { %v6614_v36 = vmul.f32 %v6425_v41, %v6102_v46  ;;  %9039 = vmatmul.mubr.msk.bf16.gmra.mrb[12].mxu1 %vm2936_vm5, %v6661_v47 }
 0xb2b   : > { %v6662_v45 = vpack.c.bf16 %v6615_v28, %v6614_v36  ;;  %v6440_v39 = vpop.permute.xlu1 %6439  ;;  %v6127_v36 = vld [vmem:[#allocation7 + $0x1c8] sm:$0xff] }
 0xb2c   : > { %v6617_v9 = vmul.f32 %v6440_v39, %v6105_v25  ;;  %v6435_v40 = vpop.permute.xlu0 %6434  ;;  %v6126_v25 = vld [vmem:[#allocation7 + $0x1c0] sm:$0xff] }
 0xb2d   : > { %v6616_v18 = vmul.f32 %v6435_v40, %v6104_v49  ;;  %9044 = vmatprep.mubr.msk.bf16.mxu0 %vm2936_vm5, %v6662_v45 }
 0xb2f   : > { %v6663_v0 = vpack.c.bf16 %v6617_v9, %v6616_v18  ;;  %v6510_v24 = vpop.permute.xlu1 %6509  ;;  %v6129_v18 = vld [vmem:[#allocation7 + $0x1d8] sm:$0xff] }
 0xb30   : > { %v6631_v53 = vmul.f32 %v6510_v24, %v6119_v33  ;;  %v6505_v48 = vpop.permute.xlu0 %6504  ;;  %v6128_v33 = vld [vmem:[#allocation7 + $0x1d0] sm:$0xff] }
 0xb31   : > { %v6630_v12 = vmul.f32 %v6505_v48, %v6118_v6  ;;  %9045 = vmatmul.mubr.msk.bf16.vlgmr.msra.gmra.mrb[16].mxu0 %vm2936_vm5, %v6663_v0 }
 0xb33   : > { %v6670_v42 = vpack.c.bf16 %v6631_v53, %v6630_v12  ;;  %v6520_v20 = vpop.permute.xlu1 %6519  ;;  %v6115_v12 = vld [vmem:[#allocation7 + $0x168] sm:$0xff] }
 0xb34   : > { %v6633_v11 = vmul.f32 %v6520_v20, %v6121_v61  ;;  %v6515_v2 = vpop.permute.xlu0 %6514  ;;  %v6114_v61 = vld [vmem:[#allocation7 + $0x160] sm:$0xff] }
 0xb35   : > { %v6632_v22 = vmul.f32 %v6515_v2, %v6120_v44  ;;  %9062 = vmatprep.mubr.msk.bf16.mxu1 %vm2936_vm5, %v6670_v42 }
 0xb37   : > { %v6671_v13 = vpack.c.bf16 %v6633_v11, %v6632_v22  ;;  %v6450_v52 = vpop.permute.xlu1 %6449  ;;  %v6117_v22 = vld [vmem:[#allocation7 + $0x178] sm:$0xff] }
 0xb38   : > { %v6619_v54 = vmul.f32 %v6450_v52, %v6107_v50  ;;  %v6445_v34 = vpop.permute.xlu0 %6444  ;;  %v6116_v50 = vld [vmem:[#allocation7 + $0x170] sm:$0xff] }
 0xb39   : > { %v6618_v58 = vmul.f32 %v6445_v34, %v6106_v29  ;;  %9063 = vmatmul.mubr.msk.bf16.vlgmr.msra.gmra.mrb[16].mxu1 %vm2936_vm5, %v6671_v13 }
 0xb3b   : > { %v6664_v15 = vpack.c.bf16 %v6619_v54, %v6618_v58  ;;  %v6460_v51 = vpop.permute.xlu1 %6459  ;;  %v6131_v58 = vld [vmem:[#allocation7 + $0x1e8] sm:$0xff] }
 0xb3c   : > { %v6621_v26 = vmul.f32 %v6460_v51, %v6109_v8  ;;  %v6455_v56 = vpop.permute.xlu0 %6454  ;;  %v6130_v8 = vld [vmem:[#allocation7 + $0x1e0] sm:$0xff] }
 0xb3d   : > { %v6620_v60 = vmul.f32 %v6455_v56, %v6108_v63  ;;  %9048 = vmatprep.mubr.msk.bf16.mxu0 %vm2936_vm5, %v6664_v15 }
 0xb3f   : > { %v6665_v14 = vpack.c.bf16 %v6621_v26, %v6620_v60  ;;  %v6530_v1 = vpop.permute.xlu1 %6529  ;;  %v6133_v60 = vld [vmem:[#allocation7 + $0x1f8] sm:$0xff] }
 0xb40   : > { %v6635_v57 = vmul.f32 %v6530_v1, %v6123_v59  ;;  %v6525_v3 = vpop.permute.xlu0 %6524  ;;  %v6132_v59 = vld [vmem:[#allocation7 + $0x1f0] sm:$0xff] }
 0xb41   : > { %v6634_v19 = vmul.f32 %v6525_v3, %v6122_v38  ;;  %9049 = vmatmul.mubr.msk.bf16.gmra.mrb[20].mxu0 %vm2936_vm5, %v6665_v14 }
 0xb43   : > { %v6672_v35 = vpack.c.bf16 %v6635_v57, %v6634_v19  ;;  %v6540_v7 = vpop.permute.xlu1 %6539 }
 0xb44   : > { %v6637_v37 = vmul.f32 %v6540_v7, %v6125_v21  ;;  %v6535_v17 = vpop.permute.xlu0 %6534 }
 0xb45   : > { %v6636_v5 = vmul.f32 %v6535_v17, %v6124_v55  ;;  %9066 = vmatprep.mubr.msk.bf16.mxu1 %vm2936_vm5, %v6672_v35 }
 0xb47   : > { %v6673_v4 = vpack.c.bf16 %v6637_v37, %v6636_v5  ;;  %v6470_v30 = vpop.permute.xlu1 %6469 }
 0xb48   : > { %v6623_v43 = vmul.f32 %v6470_v30, %v6111_v62  ;;  %v6465_v32 = vpop.permute.xlu0 %6464 }
 0xb49   : > { %v6622_v23 = vmul.f32 %v6465_v32, %v6110_v10  ;;  %9067 = vmatmul.mubr.msk.bf16.gmra.mrb[20].mxu1 %vm2936_vm5, %v6673_v4 }
 0xb4b   : > { %v6666_v46 = vpack.c.bf16 %v6623_v43, %v6622_v23  ;;  %v6480_v47 = vpop.permute.xlu1 %6479 }
 0xb4c   : > { %v6625_v27 = vmul.f32 %v6480_v47, %v6113_v16  ;;  %v6475_v28 = vpop.permute.xlu0 %6474 }
 0xb4d   : > { %v6624_v41 = vmul.f32 %v6475_v28, %v6112_v31  ;;  %9052 = vmatprep.mubr.msk.bf16.mxu0 %vm2936_vm5, %v6666_v46 }
 0xb4f   : > { %v6667_v49 = vpack.c.bf16 %v6625_v27, %v6624_v41  ;;  %v6550_v45 = vpop.permute.xlu1 %6549 }
 0xb50   : > { %v6639_v39 = vmul.f32 %v6550_v45, %v6127_v36  ;;  %v6545_v9 = vpop.permute.xlu0 %6544 }
 0xb51   : > { %v6638_v40 = vmul.f32 %v6545_v9, %v6126_v25  ;;  %9053 = vmatmul.mubr.msk.bf16.gmra.mrb[24].mxu0 %vm2936_vm5, %v6667_v49 }
 0xb53   : > { %v6674_v6 = vpack.c.bf16 %v6639_v39, %v6638_v40  ;;  %v6560_v0 = vpop.permute.xlu1 %6559 }
 0xb54   : > { %v6641_v24 = vmul.f32 %v6560_v0, %v6129_v18  ;;  %v6555_v53 = vpop.permute.xlu0 %6554 }
 0xb55   : > { %v6640_v48 = vmul.f32 %v6555_v53, %v6128_v33  ;;  %9070 = vmatprep.mubr.msk.bf16.mxu1 %vm2936_vm5, %v6674_v6 }
 0xb57   : > { %v6675_v44 = vpack.c.bf16 %v6641_v24, %v6640_v48  ;;  %v6490_v42 = vpop.permute.xlu1 %6489 }
 0xb58   : > { %v6627_v20 = vmul.f32 %v6490_v42, %v6115_v12  ;;  %v6485_v11 = vpop.permute.xlu0 %6484 }
 0xb59   : > { %v6626_v2 = vmul.f32 %v6485_v11, %v6114_v61  ;;  %9071 = vmatmul.mubr.msk.bf16.gmra.mrb[24].mxu1 %vm2936_vm5, %v6675_v44 }
 0xb5b   : > { %v6668_v29 = vpack.c.bf16 %v6627_v20, %v6626_v2  ;;  %v6500_v13 = vpop.permute.xlu1 %6499 }
 0xb5c   : > { %v6629_v52 = vmul.f32 %v6500_v13, %v6117_v22  ;;  %v6495_v54 = vpop.permute.xlu0 %6494 }
 0xb5d   : > { %v6628_v34 = vmul.f32 %v6495_v54, %v6116_v50  ;;  %9056 = vmatprep.mubr.msk.bf16.mxu0 %vm2936_vm5, %v6668_v29 }
 0xb5f   : > { %v6669_v63 = vpack.c.bf16 %v6629_v52, %v6628_v34  ;;  %v6570_v15 = vpop.permute.xlu1 %6569 }
 0xb60   : > { %v6643_v51 = vmul.f32 %v6570_v15, %v6131_v58  ;;  %v6565_v26 = vpop.permute.xlu0 %6564 }
 0xb61   : > { %v6642_v56 = vmul.f32 %v6565_v26, %v6130_v8  ;;  %9057 = vmatmul.mubr.msk.bf16.gmra.mrb[28].mxu0 %vm2936_vm5, %v6669_v63 }
 0xb63   : > { %v6676_v38 = vpack.c.bf16 %v6643_v51, %v6642_v56  ;;  %v6580_v14 = vpop.permute.xlu1 %6579 }
 0xb64   : > { %v6645_v1 = vmul.f32 %v6580_v14, %v6133_v60  ;;  %v6575_v57 = vpop.permute.xlu0 %6574 }
 0xb65   : > { %v6644_v3 = vmul.f32 %v6575_v57, %v6132_v59  ;;  %9074 = vmatprep.mubr.msk.bf16.mxu1 %vm2936_vm5, %v6676_v38 }
 0xb67   : > { %v6677_v19 = vpack.c.bf16 %v6645_v1, %v6644_v3 }
 0xb69   : > { %9075 = vmatmul.mubr.msk.bf16.gmra.mrb[28].mxu1 %vm2936_vm5, %v6677_v19 }
 0xbc5   : > { %v9010_v21 = vpop.f32.mrb[0].mxu0 }
 0xbc6   : > { %v6744_v55 = vpop.f32.mrb[1].mxu0  ;;  %v7194_v17 = vsel %vm7179_vm8, %v9010_v21, 0.0 }
 0xbc7   : > { %v9011_v35 = vpop.f32.mrb[2].mxu0  ;;  %v7180_v10 = vsel %vm7179_vm8, %v6744_v55, 0.0 }
 0xbc8   : > { %v6747_v7 = vpop.f32.mrb[3].mxu0  ;;  %v7201_v32 = vsel %vm7179_vm8, %v9011_v35, 0.0 }
 0xbc9   : > { %v7187_v46 = vsel %vm7179_vm8, %v6747_v7, 0.0 }
 0xbcc   : > { %v9028_v37 = vpop.f32.mrb[0].mxu1 }
 0xbcd   : > { %v7195_v5 = vsel %vm7179_vm8, %v9028_v37, 0.0  ;;  %v6868_v62 = vpop.f32.mrb[1].mxu1 }
 0xbce   : > { %v13793_v4 = vadd.f32 %v7195_v5, %v7194_v17  ;;  %v7181_v30 = vsel %vm7179_vm8, %v6868_v62, 0.0  ;;  %v9029_v43 = vpop.f32.mrb[2].mxu1 }
 0xbcf   : > { %v13797_v23 = vadd.f32 %v7181_v30, %v7180_v10  ;;  %v7202_v16 = vsel %vm7179_vm8, %v9029_v43, 0.0  ;;  %v6871_v31 = vpop.f32.mrb[3].mxu1 }
 0xbd0   : > { %v13801_v47 = vadd.f32 %v7202_v16, %v7201_v32  ;;  %v7188_v27 = vsel %vm7179_vm8, %v6871_v31, 0.0 }
 0xbd1   : > { %v13804_v28 = vadd.f32 %v7188_v27, %v7187_v46 }
 0xbd4   : > { %v9014_v41 = vpop.f32.mrb[4].mxu0 }
 0xbd5   : > { %v6760_v36 = vpop.f32.mrb[5].mxu0  ;;  %v7222_v39 = vsel %vm7179_vm8, %v9014_v41, 0.0 }
 0xbd6   : > { %v9015_v25 = vpop.f32.mrb[6].mxu0  ;;  %v7208_v18 = vsel %vm7179_vm8, %v6760_v36, 0.0 }
 0xbd7   : > { %v6763_v49 = vpop.f32.mrb[7].mxu0  ;;  %v7229_v24 = vsel %vm7179_vm8, %v9015_v25, 0.0 }
 0xbd8   : > { %v7215_v61 = vsel %vm7179_vm8, %v6763_v49, 0.0 }
 0xbdc   : > { %v9032_v45 = vpop.f32.mrb[4].mxu1 }
 0xbdd   : > { %v7223_v9 = vsel %vm7179_vm8, %v9032_v45, 0.0  ;;  %v6884_v40 = vpop.f32.mrb[5].mxu1 }
 0xbde   : > { %v13809_v33 = vadd.f32 %v7223_v9, %v7222_v39  ;;  %v7209_v6 = vsel %vm7179_vm8, %v6884_v40, 0.0  ;;  %v9033_v0 = vpop.f32.mrb[6].mxu1 }
 0xbdf   : > { %v13813_v53 = vadd.f32 %v7209_v6, %v7208_v18  ;;  %v7230_v48 = vsel %vm7179_vm8, %v9033_v0, 0.0  ;;  %v6887_v12 = vpop.f32.mrb[7].mxu1 }
 0xbe0   : > { %v13817_v44 = vadd.f32 %v7230_v48, %v7229_v24  ;;  %v7216_v42 = vsel %vm7179_vm8, %v6887_v12, 0.0 }
 0xbe1   : > { %v13820_v20 = vadd.f32 %v7216_v42, %v7215_v61 }
 0xbe4   : > { %v9018_v11 = vpop.f32.mrb[8].mxu0 }
 0xbe5   : > { %v6776_v2 = vpop.f32.mrb[9].mxu0  ;;  %v7250_v13 = vsel %vm7179_vm8, %v9018_v11, 0.0 }
 0xbe6   : > { %v9019_v22 = vpop.f32.mrb[10].mxu0  ;;  %v7236_v34 = vsel %vm7179_vm8, %v6776_v2, 0.0 }
 0xbe7   : > { %v6779_v50 = vpop.f32.mrb[11].mxu0  ;;  %v7257_v15 = vsel %vm7179_vm8, %v9019_v22, 0.0 }
 0xbe8   : > { %v7243_v60 = vsel %vm7179_vm8, %v6779_v50, 0.0 }
 0xbec   : > { %v9036_v29 = vpop.f32.mrb[8].mxu1 }
 0xbed   : > { %v7251_v52 = vsel %vm7179_vm8, %v9036_v29, 0.0  ;;  %v6900_v54 = vpop.f32.mrb[9].mxu1  ;;  %v6054_v29 = vld [vmem:[%s10169_s4] sm:$0xff] }
 0xbee   : > { %v13825_v58 = vadd.f32 %v7251_v52, %v7250_v13  ;;  %v7237_v8 = vsel %vm7179_vm8, %v6900_v54, 0.0  ;;  %v9037_v63 = vpop.f32.mrb[10].mxu1 }
 0xbef   : > { %v13829_v51 = vadd.f32 %v7237_v8, %v7236_v34  ;;  %v7258_v26 = vsel %vm7179_vm8, %v9037_v63, 0.0  ;;  %v6903_v56 = vpop.f32.mrb[11].mxu1  ;;  %v6055_v34 = vld [vmem:[%s10169_s4 + $0x8] sm:$0xff]  ;;  %v6056_v8 = vld [vmem:[%s10169_s4 + $0x10] sm:$0xff] }
 0xbf0   : > { %v13833_v59 = vadd.f32 %v7258_v26, %v7257_v15  ;;  %v7244_v38 = vsel %vm7179_vm8, %v6903_v56, 0.0 }
 0xbf1   : > { %v13836_v14 = vadd.f32 %v7244_v38, %v7243_v60 }
 0xbf4   : > { %v9022_v1 = vpop.f32.mrb[12].mxu0 }
 0xbf5   : > { %v6792_v57 = vpop.f32.mrb[13].mxu0  ;;  %v7278_v55 = vsel %vm7179_vm8, %v9022_v1, 0.0 }
 0xbf6   : > { %v9023_v3 = vpop.f32.mrb[14].mxu0  ;;  %v7264_v37 = vsel %vm7179_vm8, %v6792_v57, 0.0 }
 0xbf7   : > { %v6795_v19 = vpop.f32.mrb[15].mxu0  ;;  %v7285_v10 = vsel %vm7179_vm8, %v9023_v3, 0.0 }
 0xbf8   : > { %v7271_v16 = vsel %vm7179_vm8, %v6795_v19, 0.0 }
 0xbfc   : > { %v9040_v21 = vpop.f32.mrb[12].mxu1 }
 0xbfd   : > { %v7279_v35 = vsel %vm7179_vm8, %v9040_v21, 0.0  ;;  %v6916_v7 = vpop.f32.mrb[13].mxu1 }
 0xbfe   : > { %v13841_v17 = vadd.f32 %v7279_v35, %v7278_v55  ;;  %v7265_v5 = vsel %vm7179_vm8, %v6916_v7, 0.0  ;;  %v9041_v62 = vpop.f32.mrb[14].mxu1  ;;  %v6057_v35 = vld [vmem:[%s10169_s4 + $0x18] sm:$0xff] }
 0xbff   : > { %v13845_v30 = vadd.f32 %v7265_v5, %v7264_v37  ;;  %v7286_v43 = vsel %vm7179_vm8, %v9041_v62, 0.0  ;;  %v6919_v32 = vpop.f32.mrb[15].mxu1 }
 0xc00   : > { %v13849_v31 = vadd.f32 %v7286_v43, %v7285_v10  ;;  %v7272_v46 = vsel %vm7179_vm8, %v6919_v32, 0.0 }
 0xc01   : > { %v13852_v27 = vadd.f32 %v7272_v46, %v7271_v16 }
 0xc04   : > { %v9046_v41 = vpop.f32.mrb[16].mxu0 }
 0xc05   : > { %v7197_v36 = vsel %vm7179_vm8, %v9046_v41, 0.0  ;;  %v6992_v25 = vpop.f32.mrb[17].mxu0 }
 0xc06   : > { %v7198_v49 = vadd.f32 %v7197_v36, %v13793_v4  ;;  %v7183_v45 = vsel %vm7179_vm8, %v6992_v25, 0.0  ;;  %v9047_v39 = vpop.f32.mrb[18].mxu0 }
 0xc07   : > { %v7184_v9 = vadd.f32 %v7183_v45, %v13797_v23  ;;  %v7204_v40 = vsel %vm7179_vm8, %v9047_v39, 0.0  ;;  %v6995_v18 = vpop.f32.mrb[19].mxu0  ;;  %v13866_v23 = vld [vmem:[%s14855_s16] ss:$0 sm:$0xff]  ;;  %s14861_s16 = sld [smem:[#allocation155_spill]] }
 0xc08   : > { %v7205_v6 = vadd.f32 %v7204_v40, %v13801_v47  ;;  %v7190_v0 = vsel %vm7179_vm8, %v6995_v18, 0.0  ;;  %v6058_v18 = vld [vmem:[%s10169_s4 + $0x20] sm:$0xff] }
 0xc09   : > { %v7191_v24 = vadd.f32 %v7190_v0, %v13804_v28 }
 0xc0c   : > { %v9064_v48 = vpop.f32.mrb[16].mxu1 }
 0xc0d   : > { %v7199_v12 = vsel %vm7179_vm8, %v9064_v48, 0.0  ;;  %v7116_v4 = vpop.f32.mrb[17].mxu1  ;;  %v6059_v48 = vld [vmem:[%s10169_s4 + $0x28] sm:$0xff] }
 0xc0e   : > { %v7200_v61 = vadd.f32 %v7199_v12, %v7198_v49  ;;  %v7185_v42 = vsel %vm7179_vm8, %v7116_v4, 0.0  ;;  %v9065_v11 = vpop.f32.mrb[18].mxu1  ;;  %v6060_v12 = vld [vmem:[%s10169_s4 + $0x30] sm:$0xff] }
 0xc0f   : > { %v7186_v47 = vadd.f32 %v7185_v42, %v7184_v9  ;;  %v7206_v2 = vsel %vm7179_vm8, %v9065_v11, 0.0  ;;  %v7119_v22 = vpop.f32.mrb[19].mxu1 }
 0xc10   : > { %v7207_v28 = vadd.f32 %v7206_v2, %v7205_v6  ;;  %v7192_v50 = vsel %vm7179_vm8, %v7119_v22, 0.0  ;;  %v7301_v13 = vadd.f32 %v13866_v23, %v7200_v61 }
 0xc11   : > { %v7299_v52 = vadd.f32 %v13866_v23, %v7186_v47  ;;  %v7193_v54 = vadd.f32 %v7192_v50, %v7191_v24  ;;  %v6061_v47 = vld [vmem:[%s10169_s4 + $0x38] sm:$0xff] }
 0xc12   : > { %v7302_v26 = vadd.f32 %v13866_v23, %v7207_v28  ;;  %v13885_v3 = vadd.f32 %v7301_v13, %v6056_v8 }
 0xc13   : > { %v7300_v63 = vadd.f32 %v13866_v23, %v7193_v54  ;;  %v13877_v15 = vadd.f32 %v7299_v52, %v6054_v29 }
 0xc14   : > { %v9050_v56 = vpop.f32.mrb[20].mxu0  ;;  %v7339_v32 = vsel %vm7179_vm8, %v13885_v3, 0.0  ;;  %v13899_v16 = vadd.f32 %v7302_v26, %v6057_v35 }
 0xc15   : > { %v7225_v60 = vsel %vm7179_vm8, %v9050_v56, 0.0  ;;  %v7008_v38 = vpop.f32.mrb[21].mxu0  ;;  %v7333_v1 = vsel %vm7179_vm8, %v13877_v15, 0.0  ;;  %v13883_v57 = vadd.f32 %v7300_v63, %v6055_v34 }
 0xc16   : > { %v7226_v19 = vadd.f32 %v7225_v60, %v13809_v33  ;;  %v7211_v21 = vsel %vm7179_vm8, %v7008_v38, 0.0  ;;  %v9051_v55 = vpop.f32.mrb[22].mxu0  ;;  %7334 = vadd.xlane.f32.xlu0 %v7333_v1 }
 0xc17   : > { %v7212_v7 = vadd.f32 %v7211_v21, %v13813_v53  ;;  %v7232_v37 = vsel %vm7179_vm8, %v9051_v55, 0.0  ;;  %v7011_v5 = vpop.f32.mrb[23].mxu0  ;;  %v7336_v62 = vsel %vm7179_vm8, %v13883_v57, 0.0 }
 0xc18   : > { %v7233_v10 = vadd.f32 %v7232_v37, %v13817_v44  ;;  %v7218_v43 = vsel %vm7179_vm8, %v7011_v5, 0.0  ;;  %7337 = vadd.xlane.f32.xlu1 %v7336_v62  ;;  %v7342_v44 = vsel %vm7179_vm8, %v13899_v16, 0.0 }
 0xc19   : > { %v7219_v33 = vadd.f32 %v7218_v43, %v13820_v20  ;;  %v6062_v43 = vld [vmem:[%s10169_s4 + $0x40] sm:$0xff] }
 0xc1a   : > { %7340 = vadd.xlane.f32.xlu0 %v7339_v32 }
 0xc1c   : > { %v9068_v53 = vpop.f32.mrb[20].mxu1 }
 0xc1d   : > { %v7227_v46 = vsel %vm7179_vm8, %v9068_v53, 0.0  ;;  %v7132_v41 = vpop.f32.mrb[21].mxu1 }
 0xc1e   : > { %v7228_v36 = vadd.f32 %v7227_v46, %v7226_v19  ;;  %v7213_v25 = vsel %vm7179_vm8, %v7132_v41, 0.0  ;;  %v9069_v20 = vpop.f32.mrb[22].mxu1  ;;  %7343 = vadd.xlane.f32.xlu0 %v7342_v44  ;;  %v6063_v46 = vld [vmem:[%s10169_s4 + $0x48] sm:$0xff]  ;;  %v6064_v41 = vld [vmem:[%s10169_s4 + $0x50] sm:$0xff] }
 0xc1f   : > { %v7214_v49 = vadd.f32 %v7213_v25, %v7212_v7  ;;  %v7234_v45 = vsel %vm7179_vm8, %v9069_v20, 0.0  ;;  %v7135_v39 = vpop.f32.mrb[23].mxu1 }
 0xc20   : > { %v7235_v9 = vadd.f32 %v7234_v45, %v7233_v10  ;;  %v7220_v40 = vsel %vm7179_vm8, %v7135_v39, 0.0  ;;  %v7305_v6 = vadd.f32 %v13866_v23, %v7228_v36 }
 0xc21   : > { %v7303_v0 = vadd.f32 %v13866_v23, %v7214_v49  ;;  %v7221_v24 = vadd.f32 %v7220_v40, %v7219_v33  ;;  %v6065_v49 = vld [vmem:[%s10169_s4 + $0x58] sm:$0xff] }
 0xc22   : > { %v7306_v4 = vadd.f32 %v13866_v23, %v7235_v9  ;;  %v13922_v29 = vadd.f32 %v7305_v6, %v6060_v12 }
 0xc23   : > { %v7304_v61 = vadd.f32 %v13866_v23, %v7221_v24  ;;  %v13914_v42 = vadd.f32 %v7303_v0, %v6058_v18 }
 0xc24   : > { %v9054_v11 = vpop.f32.mrb[24].mxu0  ;;  %v13930_v56 = vadd.f32 %v7306_v4, %v6061_v47  ;;  %v7351_v1 = vsel %vm7179_vm8, %v13922_v29, 0.0 }
 0xc25   : > { %v7253_v2 = vsel %vm7179_vm8, %v9054_v11, 0.0  ;;  %v7024_v22 = vpop.f32.mrb[25].mxu0  ;;  %v7345_v28 = vsel %vm7179_vm8, %v13914_v42, 0.0  ;;  %v13920_v50 = vadd.f32 %v7304_v61, %v6059_v48 }
 0xc26   : > { %v7254_v13 = vadd.f32 %v7253_v2, %v13825_v58  ;;  %v7239_v52 = vsel %vm7179_vm8, %v7024_v22, 0.0  ;;  %v9055_v54 = vpop.f32.mrb[26].mxu0  ;;  %7346 = vadd.xlane.f32.xlu1 %v7345_v28 }
 0xc27   : > { %v7240_v34 = vadd.f32 %v7239_v52, %v13829_v51  ;;  %v7260_v8 = vsel %vm7179_vm8, %v9055_v54, 0.0  ;;  %v7027_v63 = vpop.f32.mrb[27].mxu0  ;;  %v7348_v26 = vsel %vm7179_vm8, %v13920_v50, 0.0  ;;  %v7354_v51 = vsel %vm7179_vm8, %v13930_v56, 0.0 }
 0xc28   : > { %v7261_v60 = vadd.f32 %v7260_v8, %v13833_v59  ;;  %v7246_v38 = vsel %vm7179_vm8, %v7027_v63, 0.0  ;;  %7349 = vadd.xlane.f32.xlu0 %v7348_v26 }
 0xc29   : > { %v7247_v58 = vadd.f32 %v7246_v38, %v13836_v14  ;;  %v6066_v38 = vld [vmem:[%s10169_s4 + $0x60] sm:$0xff] }
 0xc2a   : > { %7352 = vadd.xlane.f32.xlu1 %v7351_v1 }
 0xc2c   : > { %v9072_v19 = vpop.f32.mrb[24].mxu1  ;;  %7355 = vadd.xlane.f32.xlu0 %v7354_v51 }
 0xc2d   : > { %v7255_v21 = vsel %vm7179_vm8, %v9072_v19, 0.0  ;;  %v7148_v59 = vpop.f32.mrb[25].mxu1  ;;  %v6067_v19 = vld [vmem:[%s10169_s4 + $0x68] sm:$0xff] }
 0xc2e   : > { %v7256_v55 = vadd.f32 %v7255_v21, %v7254_v13  ;;  %v7241_v35 = vsel %vm7179_vm8, %v7148_v59, 0.0  ;;  %v9073_v7 = vpop.f32.mrb[26].mxu1  ;;  %v6068_v21 = vld [vmem:[%s10169_s4 + $0x70] sm:$0xff] }
 0xc2f   : > { %v7242_v14 = vadd.f32 %v7241_v35, %v7240_v34  ;;  %v7262_v37 = vsel %vm7179_vm8, %v9073_v7, 0.0  ;;  %v7151_v5 = vpop.f32.mrb[27].mxu1  ;;  %v6069_v7 = vld [vmem:[%s10169_s4 + $0x78] sm:$0xff] }
 0xc30   : > { %v7263_v62 = vadd.f32 %v7262_v37, %v7261_v60  ;;  %v7248_v10 = vsel %vm7179_vm8, %v7151_v5, 0.0  ;;  %v7309_v33 = vadd.f32 %v13866_v23, %v7256_v55 }
 0xc31   : > { %v7307_v32 = vadd.f32 %v13866_v23, %v7242_v14  ;;  %v7249_v53 = vadd.f32 %v7248_v10, %v7247_v58 }
 0xc32   : > { %v7310_v44 = vadd.f32 %v13866_v23, %v7263_v62  ;;  %v13958_v18 = vadd.f32 %v7309_v33, %v6064_v41 }
 0xc33   : > { %v7308_v36 = vadd.f32 %v13866_v23, %v7249_v53  ;;  %v13950_v25 = vadd.f32 %v7307_v32, %v6062_v43 }
 0xc34   : > { %v9058_v20 = vpop.f32.mrb[28].mxu0  ;;  %v13966_v11 = vadd.f32 %v7310_v44, %v6065_v49  ;;  %v7363_v22 = vsel %vm7179_vm8, %v13958_v18, 0.0 }
 0xc35   : > { %v7281_v45 = vsel %vm7179_vm8, %v9058_v20, 0.0  ;;  %v7040_v39 = vpop.f32.mrb[29].mxu0  ;;  %v7357_v9 = vsel %vm7179_vm8, %v13950_v25, 0.0  ;;  %v13956_v40 = vadd.f32 %v7308_v36, %v6063_v46 }
 0xc36   : > { %v7282_v6 = vadd.f32 %v7281_v45, %v13841_v17  ;;  %v7267_v0 = vsel %vm7179_vm8, %v7040_v39, 0.0  ;;  %v9059_v24 = vpop.f32.mrb[30].mxu0  ;;  %7358 = vadd.xlane.f32.xlu1 %v7357_v9 }
 0xc37   : > { %v7268_v48 = vadd.f32 %v7267_v0, %v13845_v30  ;;  %v7288_v12 = vsel %vm7179_vm8, %v9059_v24, 0.0  ;;  %v7043_v4 = vpop.f32.mrb[31].mxu0  ;;  %v7360_v61 = vsel %vm7179_vm8, %v13956_v40, 0.0  ;;  %v7366_v30 = vsel %vm7179_vm8, %v13966_v11, 0.0 }
 0xc38   : > { %v7289_v47 = vadd.f32 %v7288_v12, %v13849_v31  ;;  %v7274_v2 = vsel %vm7179_vm8, %v7043_v4, 0.0  ;;  %7361 = vadd.xlane.f32.xlu0 %v7360_v61 }
 0xc39   : > { %v7275_v17 = vadd.f32 %v7274_v2, %v13852_v27 }
 0xc3a   : > { %7364 = vadd.xlane.f32.xlu1 %v7363_v22 }
 0xc3c   : > { %v9076_v28 = vpop.f32.mrb[28].mxu1  ;;  %7367 = vadd.xlane.f32.xlu0 %v7366_v30 }
 0xc3d   : > { %v7283_v13 = vsel %vm7179_vm8, %v9076_v28, 0.0  ;;  %v7164_v31 = vpop.f32.mrb[29].mxu1 }
 0xc3e   : > { %v7284_v52 = vadd.f32 %v7283_v13, %v7282_v6  ;;  %v7269_v54 = vsel %vm7179_vm8, %v7164_v31, 0.0  ;;  %v9077_v27 = vpop.f32.mrb[30].mxu1 }
 0xc3f   : > { %v7270_v34 = vadd.f32 %v7269_v54, %v7268_v48  ;;  %v7290_v8 = vsel %vm7179_vm8, %v9077_v27, 0.0  ;;  %v7167_v63 = vpop.f32.mrb[31].mxu1 }
 0xc40   : > { %v7291_v26 = vadd.f32 %v7290_v8, %v7289_v47  ;;  %v7276_v60 = vsel %vm7179_vm8, %v7167_v63, 0.0  ;;  %v7313_v58 = vadd.f32 %v13866_v23, %v7284_v52 }
 0xc41   : > { %v7311_v1 = vadd.f32 %v13866_v23, %v7270_v34  ;;  %v7277_v51 = vadd.f32 %v7276_v60, %v7275_v17 }
 0xc42   : > { %v7314_v59 = vadd.f32 %v13866_v23, %v7291_v26  ;;  %v13993_v5 = vadd.f32 %v7313_v58, %v6068_v21 }
 0xc43   : > { %v7312_v55 = vadd.f32 %v13866_v23, %v7277_v51  ;;  %v13986_v35 = vadd.f32 %v7311_v1, %v6066_v38 }
 0xc44   : > { %v13997_v10 = vadd.f32 %v7314_v59, %v6069_v7  ;;  %v7375_v23 = vsel %vm7179_vm8, %v13993_v5, 0.0 }
 0xc45   : > { %v7369_v14 = vsel %vm7179_vm8, %v13986_v35, 0.0  ;;  %v13991_v37 = vadd.f32 %v7312_v55, %v6067_v19 }
 0xc46   : > { %7370 = vadd.xlane.f32.xlu1 %v7369_v14  ;;  %v7378_v43 = vsel %vm7179_vm8, %v13997_v10, 0.0 }
 0xc47   : > { %v7372_v62 = vsel %vm7179_vm8, %v13991_v37, 0.0 }
 0xc48   : > { %7373 = vadd.xlane.f32.xlu0 %v7372_v62 }
 0xc4a   : > { %7376 = vadd.xlane.f32.xlu1 %v7375_v23 }
 0xc4c   : > { %7379 = vadd.xlane.f32.xlu0 %v7378_v43 }
 0xca3   : > { %v7335_v33 = vpop.xlane.xlu0 %7334 }
 0xca4   : > { %v7382_v32 = vmul.f32 0.03125, %v7335_v33 }
 0xca5   : > { %v7338_v53 = vpop.xlane.xlu1 %7337 }
 0xca6   : > { %v14004_v46 = vsub.f32 %v13877_v15, %v7382_v32  ;;  %v7383_v41 = vmul.f32 0.03125, %v7338_v53 }
 0xca7   : > { %v7341_v44 = vpop.xlane.xlu0 %7340 }
 0xca8   : > { %v14007_v36 = vsub.f32 %v13883_v57, %v7383_v41  ;;  %v7384_v20 = vmul.f32 0.03125, %v7341_v44  ;;  %v7414_v49 = vmul.f32 %v14004_v46, %v14004_v46 }
 0xcaa   : > { %v14012_v45 = vsub.f32 %v13885_v3, %v7384_v20  ;;  %v7430_v39 = vsel %vm7179_vm8, %v7414_v49, 0.0  ;;  %v7415_v9 = vmul.f32 %v14007_v36, %v14007_v36 }
 0xcab   : > { %7431 = vadd.xlane.f32.xlu1 %v7430_v39  ;;  %v7344_v6 = vpop.xlane.xlu0 %7343 }
 0xcac   : > { %v7385_v0 = vmul.f32 0.03125, %v7344_v6  ;;  %v7433_v24 = vsel %vm7179_vm8, %v7415_v9, 0.0  ;;  %v7416_v48 = vmul.f32 %v14012_v45, %v14012_v45 }
 0xcad   : > { %7434 = vadd.xlane.f32.xlu0 %v7433_v24  ;;  %v9644_v24 = vld [vmem:[%s14856_s7] sm:$0xff]  }
 0xcae   : > { %v14021_v12 = vsub.f32 %v13899_v16, %v7385_v0  ;;  %v7436_v4 = vsel %vm7179_vm8, %v7416_v48, 0.0  ;;  %9078 = vmatprep.subr.bf16.mxu0 %v9644_v24 }
 0xcaf   : > { %7437 = vadd.xlane.f32.xlu1 %v7436_v4  ;;  %9079 = vmatpush3.bf16.msra.mxu0 %v9644_v24  ;;  %v9645_v4 = vld [vmem:[%s14856_s7 + $0x8] sm:$0xff]  }
 0xcb0   : > { %v7417_v61 = vmul.f32 %v14021_v12, %v14021_v12  ;;  %9080 = vmatprep.subr.bf16.mxu0 %v9645_v4 }
 0xcb2   : > { %v7439_v47 = vsel %vm7179_vm8, %v7417_v61, 0.0 }
 0xcb3   : > { %v7347_v2 = vpop.xlane.xlu1 %7346  ;;  %7440 = vadd.xlane.f32.xlu0 %v7439_v47  ;;  %9081 = vmatpush3.bf16.msra.mxu0 %v9645_v4  ;;  %v14114_v4 = vld [vmem:[%s14858_s23] ss:$0 sm:$0xff] }
 0xcb4   : > { %v7386_v17 = vmul.f32 0.03125, %v7347_v2 }
 0xcb5   : > { %v7350_v22 = vpop.xlane.xlu0 %7349 }
 0xcb6   : > { %v14028_v30 = vsub.f32 %v13914_v42, %v7386_v17  ;;  %v7387_v28 = vmul.f32 0.03125, %v7350_v22 }
 0xcb7   : > { %v7353_v13 = vpop.xlane.xlu1 %7352 }
 0xcb8   : > { %v14031_v31 = vsub.f32 %v13920_v50, %v7387_v28  ;;  %v7388_v52 = vmul.f32 0.03125, %v7353_v13  ;;  %v7418_v54 = vmul.f32 %v14028_v30, %v14028_v30 }
 0xcb9   : > { %v7356_v27 = vpop.xlane.xlu0 %7355 }
 0xcba   : > { %v14036_v34 = vsub.f32 %v13922_v29, %v7388_v52  ;;  %v7389_v8 = vmul.f32 0.03125, %v7356_v27  ;;  %v7442_v63 = vsel %vm7179_vm8, %v7418_v54, 0.0  ;;  %v7419_v26 = vmul.f32 %v14031_v31, %v14031_v31 }
 0xcbb   : > { %7443 = vadd.xlane.f32.xlu1 %v7442_v63 }
 0xcbc   : > { %v14042_v60 = vsub.f32 %v13930_v56, %v7389_v8  ;;  %v7445_v38 = vsel %vm7179_vm8, %v7419_v26, 0.0  ;;  %v7420_v58 = vmul.f32 %v14036_v34, %v14036_v34 }
 0xcbd   : > { %7446 = vadd.xlane.f32.xlu0 %v7445_v38 }
 0xcbe   : > { %v7448_v1 = vsel %vm7179_vm8, %v7420_v58, 0.0  ;;  %v7421_v51 = vmul.f32 %v14042_v60, %v14042_v60 }
 0xcbf   : > { %7449 = vadd.xlane.f32.xlu1 %v7448_v1 }
 0xcc0   : > { %v7451_v19 = vsel %vm7179_vm8, %v7421_v51, 0.0 }
 0xcc1   : > { %7452 = vadd.xlane.f32.xlu0 %v7451_v19 }
 0xcc3   : > { %v7359_v21 = vpop.xlane.xlu1 %7358 }
 0xcc4   : > { %v7390_v59 = vmul.f32 0.03125, %v7359_v21 }
 0xcc5   : > { %v7362_v55 = vpop.xlane.xlu0 %7361 }
 0xcc6   : > { %v14052_v7 = vsub.f32 %v13950_v25, %v7390_v59  ;;  %v7391_v14 = vmul.f32 0.03125, %v7362_v55  ;;  %v9646_v55 = vld [vmem:[%s14857_s1] sm:$0xff]  }
 0xcc7   : > { %v7365_v62 = vpop.xlane.xlu1 %7364  ;;  %9098 = vmatprep.subr.bf16.mxu1 %v9646_v55 }
 0xcc8   : > { %v14055_v23 = vsub.f32 %v13956_v40, %v7391_v14  ;;  %v7392_v43 = vmul.f32 0.03125, %v7365_v62  ;;  %v7422_v33 = vmul.f32 %v14052_v7, %v14052_v7  ;;  %v9647_v14 = vld [vmem:[%s14857_s1 + $0x8] sm:$0xff]   ;;  %9099 = vmatpush3.bf16.msra.mxu1 %v9646_v55 }
 0xcc9   : > { %v7368_v32 = vpop.xlane.xlu0 %7367  ;;  %9100 = vmatprep.subr.bf16.mxu1 %v9647_v14 }
 0xcca   : > { %v14060_v53 = vsub.f32 %v13958_v18, %v7392_v43  ;;  %v7393_v41 = vmul.f32 0.03125, %v7368_v32  ;;  %v7454_v44 = vsel %vm7179_vm8, %v7422_v33, 0.0  ;;  %v7423_v20 = vmul.f32 %v14055_v23, %v14055_v23 }
 0xccb   : > { %7455 = vadd.xlane.f32.xlu1 %v7454_v44 }
 0xccc   : > { %v14066_v49 = vsub.f32 %v13966_v11, %v7393_v41  ;;  %v7457_v39 = vsel %vm7179_vm8, %v7423_v20, 0.0  ;;  %v7424_v9 = vmul.f32 %v14060_v53, %v14060_v53  ;;  %9101 = vmatpush3.bf16.msra.mxu1 %v9647_v14 }
 0xccd   : > { %7458 = vadd.xlane.f32.xlu0 %v7457_v39 }
 0xcce   : > { %v7460_v6 = vsel %vm7179_vm8, %v7424_v9, 0.0  ;;  %v7425_v0 = vmul.f32 %v14066_v49, %v14066_v49 }
 0xccf   : > { %7461 = vadd.xlane.f32.xlu1 %v7460_v6 }
 0xcd0   : > { %v7463_v48 = vsel %vm7179_vm8, %v7425_v0, 0.0 }
 0xcd1   : > { %7464 = vadd.xlane.f32.xlu0 %v7463_v48 }
 0xcd3   : > { %v7371_v61 = vpop.xlane.xlu1 %7370 }
 0xcd4   : > { %v7394_v47 = vmul.f32 0.03125, %v7371_v61 }
 0xcd5   : > { %v7374_v2 = vpop.xlane.xlu0 %7373 }
 0xcd6   : > { %v14082_v17 = vsub.f32 %v13986_v35, %v7394_v47  ;;  %v7395_v22 = vmul.f32 0.03125, %v7374_v2 }
 0xcd7   : > { %v7377_v28 = vpop.xlane.xlu1 %7376 }
 0xcd8   : > { %v14085_v13 = vsub.f32 %v13991_v37, %v7395_v22  ;;  %v7396_v52 = vmul.f32 0.03125, %v7377_v28  ;;  %v7426_v54 = vmul.f32 %v14082_v17, %v14082_v17 }
 0xcd9   : > { %v7380_v27 = vpop.xlane.xlu0 %7379 }
 0xcda   : > { %v14090_v8 = vsub.f32 %v13993_v5, %v7396_v52  ;;  %v7397_v63 = vmul.f32 0.03125, %v7380_v27  ;;  %v7466_v26 = vsel %vm7179_vm8, %v7426_v54, 0.0  ;;  %v7427_v38 = vmul.f32 %v14085_v13, %v14085_v13 }
 0xcdb   : > { %7467 = vadd.xlane.f32.xlu1 %v7466_v26 }
 0xcdc   : > { %v14096_v58 = vsub.f32 %v13997_v10, %v7397_v63  ;;  %v7469_v1 = vsel %vm7179_vm8, %v7427_v38, 0.0  ;;  %v7428_v51 = vmul.f32 %v14090_v8, %v14090_v8  ;;  %v14122_v63 = vld [vmem:[%s14859_s13] ss:$0 sm:$0xff] }
 0xcdd   : > { %7470 = vadd.xlane.f32.xlu0 %v7469_v1 }
 0xcde   : > { %v7472_v19 = vsel %vm7179_vm8, %v7428_v51, 0.0  ;;  %v7429_v21 = vmul.f32 %v14096_v58, %v14096_v58 }
 0xcdf   : > { %7473 = vadd.xlane.f32.xlu1 %v7472_v19 }
 0xce0   : > { %v7475_v59 = vsel %vm7179_vm8, %v7429_v21, 0.0 }
 0xce1   : > { %7476 = vadd.xlane.f32.xlu0 %v7475_v59 }
 0xd38   : > { %v7432_v62 = vpop.xlane.xlu1 %7431 }
 0xd39   : > { %v7478_v43 = vmul.f32 0.03125, %v7432_v62 }
 0xd3a   : > { %v7435_v33 = vpop.xlane.xlu0 %7434 }
 0xd3b   : > { %v7494_v32 = vadd.f32 1e-05, %v7478_v43  ;;  %v7479_v41 = vmul.f32 0.03125, %v7435_v33 }
 0xd3c   : > { %v7438_v44 = vpop.xlane.xlu1 %7437 }
 0xd3d   : > { %9782 = vrsqrt.f32 %v7494_v32  ;;  %v7495_v20 = vadd.f32 1e-05, %v7479_v41  ;;  %v7480_v39 = vmul.f32 0.03125, %v7438_v44 }
 0xd3f   : > { %9784 = vrsqrt.f32 %v7495_v20  ;;  %v7496_v9 = vadd.f32 1e-05, %v7480_v39 }
 0xd40   : > { %v7441_v6 = vpop.xlane.xlu0 %7440 }
 0xd41   : > { %9786 = vrsqrt.f32 %v7496_v9  ;;  %v7481_v0 = vmul.f32 0.03125, %v7441_v6 }
 0xd43   : > { %v7497_v24 = vadd.f32 1e-05, %v7481_v0 }
 0xd45   : > { %9788 = vrsqrt.f32 %v7497_v24 }
 0xd47   : > { %v9783_v48 = vpop.eup %9782 }
 0xd48   : > { %v7526_v61 = vmul.f32 %v9783_v48, %v14004_v46  ;;  %v7444_v47 = vpop.xlane.xlu1 %7443 }
 0xd49   : > { %v9785_v2 = vpop.eup %9784  ;;  %v7482_v22 = vmul.f32 0.03125, %v7444_v47 }
 0xd4a   : > { %v7527_v28 = vmul.f32 %v9785_v2, %v14007_v36  ;;  %v7447_v52 = vpop.xlane.xlu0 %7446  ;;  %v7548_v54 = vmul.f32 %v14114_v4, %v7526_v61 }
 0xd4b   : > { %v9787_v27 = vpop.eup %9786  ;;  %v7498_v26 = vadd.f32 1e-05, %v7482_v22  ;;  %v7483_v38 = vmul.f32 0.03125, %v7447_v52 }
 0xd4c   : > { %v7528_v1 = vmul.f32 %v9787_v27, %v14012_v45  ;;  %v7450_v51 = vpop.xlane.xlu1 %7449  ;;  %v7549_v46 = vmul.f32 %v14114_v4, %v7527_v28  ;;  %v7570_v59 = vadd.f32 %v14122_v63, %v7548_v54 }
 0xd4d   : > { %9790 = vrsqrt.f32 %v7498_v26  ;;  %v7499_v19 = vadd.f32 1e-05, %v7483_v38  ;;  %v7484_v21 = vmul.f32 0.03125, %v7450_v51 }
 0xd4e   : > { %v7453_v36 = vpop.xlane.xlu0 %7452  ;;  %v7571_v55 = vadd.f32 %v14122_v63, %v7549_v46  ;;  %v7550_v33 = vmul.f32 %v14114_v4, %v7528_v1 }
 0xd4f   : > { %v9789_v14 = vpop.eup %9788  ;;  %9792 = vrsqrt.f32 %v7499_v19  ;;  %v7500_v62 = vadd.f32 1e-05, %v7484_v21  ;;  %v7485_v43 = vmul.f32 0.03125, %v7453_v36 }
 0xd50   : > { %v7529_v32 = vmul.f32 %v9789_v14, %v14021_v12  ;;  %v7586_v45 = vpack.c.bf16 %v7571_v55, %v7570_v59  ;;  %v7572_v20 = vadd.f32 %v14122_v63, %v7550_v33 }
 0xd51   : > { %9794 = vrsqrt.f32 %v7500_v62  ;;  %v7501_v41 = vadd.f32 1e-05, %v7485_v43 }
 0xd52   : > { %v7551_v44 = vmul.f32 %v14114_v4, %v7529_v32  ;;  %9082 = vmatprep.mubr.msk.bf16.mxu0 %vm7179_vm8, %v7586_v45 }
 0xd53   : > { %9796 = vrsqrt.f32 %v7501_v41 }
 0xd54   : > { %v7573_v39 = vadd.f32 %v14122_v63, %v7551_v44 }
 0xd56   : > { %v7587_v9 = vpack.c.bf16 %v7573_v39, %v7572_v20 }
 0xd57   : > { %v9791_v6 = vpop.eup %9790 }
 0xd58   : > { %v7530_v0 = vmul.f32 %v9791_v6, %v14028_v30  ;;  %v7456_v24 = vpop.xlane.xlu1 %7455  ;;  %9083 = vmatmul.mubr.msk.bf16.vlgmr.msra.gmra.mrb[32].mxu0 %vm7179_vm8, %v7587_v9 }
 0xd59   : > { %v9793_v12 = vpop.eup %9792  ;;  %v7486_v48 = vmul.f32 0.03125, %v7456_v24 }
 0xd5a   : > { %v7531_v61 = vmul.f32 %v9793_v12, %v14031_v31  ;;  %v7459_v47 = vpop.xlane.xlu0 %7458  ;;  %v7552_v2 = vmul.f32 %v14114_v4, %v7530_v0 }
 0xd5b   : > { %v9795_v22 = vpop.eup %9794  ;;  %v7502_v28 = vadd.f32 1e-05, %v7486_v48  ;;  %v7487_v52 = vmul.f32 0.03125, %v7459_v47 }
 0xd5c   : > { %v7532_v54 = vmul.f32 %v9795_v22, %v14036_v34  ;;  %v7462_v27 = vpop.xlane.xlu1 %7461  ;;  %v7553_v26 = vmul.f32 %v14114_v4, %v7531_v61  ;;  %v7574_v31 = vadd.f32 %v14122_v63, %v7552_v2 }
 0xd5d   : > { %v9797_v38 = vpop.eup %9796  ;;  %9798 = vrsqrt.f32 %v7502_v28  ;;  %v7503_v30 = vadd.f32 1e-05, %v7487_v52  ;;  %v7488_v1 = vmul.f32 0.03125, %v7462_v27 }
 0xd5e   : > { %v7533_v51 = vmul.f32 %v9797_v38, %v14042_v60  ;;  %v7465_v46 = vpop.xlane.xlu0 %7464  ;;  %v7575_v19 = vadd.f32 %v14122_v63, %v7553_v26  ;;  %v7554_v21 = vmul.f32 %v14114_v4, %v7532_v54 }
 0xd5f   : > { %9800 = vrsqrt.f32 %v7503_v30  ;;  %v7504_v36 = vadd.f32 1e-05, %v7488_v1  ;;  %v7489_v59 = vmul.f32 0.03125, %v7465_v46 }
 0xd60   : > { %v7588_v34 = vpack.c.bf16 %v7575_v19, %v7574_v31  ;;  %v7555_v55 = vmul.f32 %v14114_v4, %v7533_v51  ;;  %v7576_v62 = vadd.f32 %v14122_v63, %v7554_v21 }
 0xd61   : > { %9802 = vrsqrt.f32 %v7504_v36  ;;  %v7505_v14 = vadd.f32 1e-05, %v7489_v59 }
 0xd62   : > { %9086 = vmatprep.mubr.msk.bf16.mxu0 %vm7179_vm8, %v7588_v34  ;;  %v7577_v60 = vadd.f32 %v14122_v63, %v7555_v55 }
 0xd63   : > { %9804 = vrsqrt.f32 %v7505_v14 }
 0xd64   : > { %v7589_v43 = vpack.c.bf16 %v7577_v60, %v7576_v62 }
 0xd66   : > { %9087 = vmatmul.mubr.msk.bf16.gmra.mrb[36].mxu0 %vm7179_vm8, %v7589_v43 }
 0xd67   : > { %v9799_v33 = vpop.eup %9798 }
 0xd68   : > { %v7534_v32 = vmul.f32 %v9799_v33, %v14052_v7  ;;  %v7468_v45 = vpop.xlane.xlu1 %7467 }
 0xd69   : > { %v9801_v41 = vpop.eup %9800  ;;  %v7490_v44 = vmul.f32 0.03125, %v7468_v45 }
 0xd6a   : > { %v7535_v20 = vmul.f32 %v9801_v41, %v14055_v23  ;;  %v7471_v39 = vpop.xlane.xlu0 %7470  ;;  %v7556_v9 = vmul.f32 %v14114_v4, %v7534_v32  ;;  %v9649_v41 = vld [vmem:[%s14857_s1 + $0x18] sm:$0xff]  }
 0xd6b   : > { %v9803_v6 = vpop.eup %9802  ;;  %v7506_v0 = vadd.f32 1e-05, %v7490_v44  ;;  %v7491_v24 = vmul.f32 0.03125, %v7471_v39  ;;  %v9652_v44 = vld [vmem:[%s14857_s1 + $0x30] sm:$0xff]   ;;  %v14198_v39 = vld [vmem:[%s14860_s21] ss:$0 sm:$0xff] }
 0xd6c   : > { %v7536_v12 = vmul.f32 %v9803_v6, %v14060_v53  ;;  %v7474_v48 = vpop.xlane.xlu1 %7473  ;;  %v7557_v61 = vmul.f32 %v14114_v4, %v7535_v20  ;;  %v7578_v23 = vadd.f32 %v14122_v63, %v7556_v9  ;;  %v9653_v20 = vld [vmem:[%s14857_s1 + $0x38] sm:$0xff]  }
 0xd6d   : > { %v9805_v47 = vpop.eup %9804  ;;  %9806 = vrsqrt.f32 %v7506_v0  ;;  %v7507_v2 = vadd.f32 1e-05, %v7491_v24  ;;  %v7492_v7 = vmul.f32 0.03125, %v7474_v48 }
 0xd6e   : > { %v7537_v22 = vmul.f32 %v9805_v47, %v14066_v49  ;;  %v7477_v28 = vpop.xlane.xlu0 %7476  ;;  %v7579_v52 = vadd.f32 %v14122_v63, %v7557_v61  ;;  %v7558_v54 = vmul.f32 %v14114_v4, %v7536_v12 }
 0xd6f   : > { %9808 = vrsqrt.f32 %v7507_v2  ;;  %v7508_v27 = vadd.f32 1e-05, %v7492_v7  ;;  %v7493_v26 = vmul.f32 0.03125, %v7477_v28 }
 0xd70   : > { %v7590_v53 = vpack.c.bf16 %v7579_v52, %v7578_v23  ;;  %v7559_v38 = vmul.f32 %v14114_v4, %v7537_v22  ;;  %v7580_v1 = vadd.f32 %v14122_v63, %v7558_v54 }
 0xd71   : > { %9810 = vrsqrt.f32 %v7508_v27  ;;  %v7509_v30 = vadd.f32 1e-05, %v7493_v26 }
 0xd72   : > { %9090 = vmatprep.mubr.msk.bf16.mxu0 %vm7179_vm8, %v7590_v53  ;;  %v7581_v49 = vadd.f32 %v14122_v63, %v7559_v38 }
 0xd73   : > { %9812 = vrsqrt.f32 %v7509_v30 }
 0xd74   : > { %v7591_v51 = vpack.c.bf16 %v7581_v49, %v7580_v1 }
 0xd76   : > { %9091 = vmatmul.mubr.msk.bf16.gmra.mrb[40].mxu0 %vm7179_vm8, %v7591_v51 }
 0xd77   : > { %v9807_v46 = vpop.eup %9806 }
 0xd78   : > { %v7538_v31 = vmul.f32 %v9807_v46, %v14082_v17 }
 0xd79   : > { %v9809_v19 = vpop.eup %9808 }
 0xd7a   : > { %v7539_v21 = vmul.f32 %v9809_v19, %v14085_v13  ;;  %v7560_v36 = vmul.f32 %v14114_v4, %v7538_v31 }
 0xd7b   : > { %v9811_v59 = vpop.eup %9810 }
 0xd7c   : > { %v7540_v34 = vmul.f32 %v9811_v59, %v14090_v8  ;;  %v7561_v55 = vmul.f32 %v14114_v4, %v7539_v21  ;;  %v7582_v60 = vadd.f32 %v14122_v63, %v7560_v36 }
 0xd7d   : > { %v9813_v14 = vpop.eup %9812 }
 0xd7e   : > { %v7541_v62 = vmul.f32 %v9813_v14, %v14096_v58  ;;  %v7583_v43 = vadd.f32 %v14122_v63, %v7561_v55  ;;  %v7562_v33 = vmul.f32 %v14114_v4, %v7540_v34  ;;  %v9648_v58 = vld [vmem:[%s14857_s1 + $0x10] sm:$0xff]  }
 0xd7f   : > { %9102 = vmatprep.subr.bf16.mxu1 %v9648_v58 }
 0xd80   : > { %v7592_v17 = vpack.c.bf16 %v7583_v43, %v7582_v60  ;;  %v7563_v32 = vmul.f32 %v14114_v4, %v7541_v62  ;;  %v7584_v13 = vadd.f32 %v14122_v63, %v7562_v33  ;;  %9103 = vmatpush3.bf16.msra.mxu1 %v9648_v58  ;;  %v9650_v4 = vld [vmem:[%s14857_s1 + $0x20] sm:$0xff]  }
 0xd81   : > { %9104 = vmatprep.subr.bf16.mxu1 %v9649_v41 }
 0xd82   : > { %9094 = vmatprep.mubr.msk.bf16.mxu0 %vm7179_vm8, %v7592_v17  ;;  %v7585_v8 = vadd.f32 %v14122_v63, %v7563_v32  ;;  %v9651_v63 = vld [vmem:[%s14857_s1 + $0x28] sm:$0xff]  }
 0xd84   : > { %v7593_v45 = vpack.c.bf16 %v7585_v8, %v7584_v13  ;;  %9105 = vmatpush3.bf16.msra.mxu1 %v9649_v41 }
 0xd85   : > { %9106 = vmatprep.subr.bf16.mxu1 %v9650_v4 }
 0xd86   : > { %9095 = vmatmul.mubr.msk.bf16.gmra.mrb[44].mxu0 %vm7179_vm8, %v7593_v45 }
 0xd88   : > { %9107 = vmatpush3.bf16.msra.mxu1 %v9650_v4 }
 0xd89   : > { %9108 = vmatprep.subr.bf16.mxu1 %v9651_v63 }
 0xd8c   : > { %9109 = vmatpush3.bf16.msra.mxu1 %v9651_v63 }
 0xd8d   : > { %9110 = vmatprep.subr.bf16.mxu1 %v9652_v44 }
 0xd90   : > { %9111 = vmatpush3.bf16.msra.mxu1 %v9652_v44 }
 0xd91   : > { %9112 = vmatprep.subr.bf16.mxu1 %v9653_v20 }
 0xd94   : > { %9113 = vmatpush3.bf16.msra.mxu1 %v9653_v20 }
 0xe2b   : > { %v9084_v9 = vpop.f32.mrb[32].mxu0 }
 0xe2c   : > { %v7684_v6 = vadd.f32 %v9084_v9, %v14198_v39  ;;  %v7675_v0 = vpop.f32.mrb[33].mxu0 }
 0xe2d   : > { %v7676_v24 = vadd.f32 %v14198_v39, %v7675_v0  ;;  %v9085_v12 = vpop.f32.mrb[34].mxu0 }
 0xe2e   : > { %v7756_v48 = vmul.f32 0.70710677, %v7684_v6  ;;  %v7687_v61 = vadd.f32 %v9085_v12, %v14198_v39  ;;  %v7678_v47 = vpop.f32.mrb[35].mxu0  ;;  %v7740_v49 = vmul.f32 0.5, %v7684_v6 }
 0xe2f   : > { %v7754_v2 = vmul.f32 0.70710677, %v7676_v24  ;;  %v7679_v7 = vadd.f32 %v14198_v39, %v7678_v47  ;;  %v7738_v36 = vmul.f32 0.5, %v7676_v24 }
 0xe30   : > { %9814 = verf.f32 %v7756_v48  ;;  %v7757_v22 = vmul.f32 0.70710677, %v7687_v61  ;;  %v7741_v59 = vmul.f32 0.5, %v7687_v61 }
 0xe31   : > { %9816 = verf.f32 %v7754_v2  ;;  %v7755_v28 = vmul.f32 0.70710677, %v7679_v7  ;;  %v7739_v62 = vmul.f32 0.5, %v7679_v7 }
 0xe32   : > { %9818 = verf.f32 %v7757_v22 }
 0xe33   : > { %9820 = verf.f32 %v7755_v28 }
 0xe39   : > { %v9088_v23 = vpop.f32.mrb[36].mxu0 }
 0xe3a   : > { %v9815_v52 = vpop.eup %9814  ;;  %v7700_v54 = vadd.f32 %v9088_v23, %v14198_v39  ;;  %v7691_v27 = vpop.f32.mrb[37].mxu0 }
 0xe3b   : > { %v9817_v26 = vpop.eup %9816  ;;  %v7788_v53 = vadd.f32 1.0, %v9815_v52  ;;  %v7692_v38 = vadd.f32 %v14198_v39, %v7691_v27  ;;  %v9089_v30 = vpop.f32.mrb[38].mxu0 }
 0xe3c   : > { %v9819_v1 = vpop.eup %9818  ;;  %v7786_v51 = vadd.f32 1.0, %v9817_v26  ;;  %v7760_v46 = vmul.f32 0.70710677, %v7700_v54  ;;  %v7703_v31 = vadd.f32 %v9089_v30, %v14198_v39  ;;  %v7694_v19 = vpop.f32.mrb[39].mxu0  ;;  %v7744_v0 = vmul.f32 0.5, %v7700_v54 }
 0xe3d   : > { %v9821_v21 = vpop.eup %9820  ;;  %v7789_v34 = vadd.f32 1.0, %v9819_v1  ;;  %v7758_v55 = vmul.f32 0.70710677, %v7692_v38  ;;  %v7804_v14 = vmul.f32 %v7788_v53, %v7740_v49  ;;  %v7695_v17 = vadd.f32 %v14198_v39, %v7694_v19 }
 0xe3e   : > { %v7787_v60 = vadd.f32 1.0, %v9821_v21  ;;  %9822 = verf.f32 %v7760_v46  ;;  %v7761_v33 = vmul.f32 0.70710677, %v7703_v31  ;;  %v7802_v32 = vmul.f32 %v7786_v51, %v7738_v36 }
 0xe3f   : > { %v7805_v43 = vmul.f32 %v7789_v34, %v7741_v59  ;;  %9824 = verf.f32 %v7758_v55  ;;  %v7759_v45 = vmul.f32 0.70710677, %v7695_v17  ;;  %v7742_v24 = vmul.f32 0.5, %v7692_v38 }
 0xe40   : > { %v7803_v13 = vmul.f32 %v7787_v60, %v7739_v62  ;;  %9826 = verf.f32 %v7761_v33  ;;  %v7745_v47 = vmul.f32 0.5, %v7703_v31  ;;  %v7743_v23 = vmul.f32 0.5, %v7695_v17 }
 0xe41   : > { %v7819_v8 = vpack.c.bf16 %v7805_v43, %v7804_v14  ;;  %9828 = verf.f32 %v7759_v45 }
 0xe42   : > { %v7818_v58 = vpack.c.bf16 %v7803_v13, %v7802_v32 }
 0xe44   : > { %9114 = vmatprep.mubr.bf16.mxu1 %v7818_v58 }
 0xe45   : > { %9115 = vmatmul.mubr.bf16.vlgmr.msra.gmra.mrb[32].mxu1 %v7819_v8 }
 0xe48   : > { %v9823_v41 = vpop.eup %9822 }
 0xe49   : > { %v9825_v4 = vpop.eup %9824  ;;  %v9092_v63 = vpop.f32.mrb[40].mxu0  ;;  %v7792_v44 = vadd.f32 1.0, %v9823_v41 }
 0xe4a   : > { %v7716_v20 = vadd.f32 %v9092_v63, %v14198_v39  ;;  %v7707_v9 = vpop.f32.mrb[41].mxu0  ;;  %v9827_v6 = vpop.eup %9826  ;;  %v7790_v61 = vadd.f32 1.0, %v9825_v4 }
 0xe4b   : > { %v7708_v12 = vadd.f32 %v14198_v39, %v7707_v9  ;;  %v9093_v48 = vpop.f32.mrb[42].mxu0  ;;  %v7793_v2 = vadd.f32 1.0, %v9827_v6  ;;  %v9829_v28 = vpop.eup %9828  ;;  %v7808_v53 = vmul.f32 %v7792_v44, %v7744_v0 }
 0xe4c   : > { %v7764_v7 = vmul.f32 0.70710677, %v7716_v20  ;;  %v7710_v22 = vpop.f32.mrb[43].mxu0  ;;  %v7719_v27 = vadd.f32 %v9093_v48, %v14198_v39  ;;  %v7791_v1 = vadd.f32 1.0, %v9829_v28  ;;  %v7806_v38 = vmul.f32 %v7790_v61, %v7742_v24 }
 0xe4d   : > { %v7762_v52 = vmul.f32 0.70710677, %v7708_v12  ;;  %v7711_v26 = vadd.f32 %v14198_v39, %v7710_v22  ;;  %v7809_v30 = vmul.f32 %v7793_v2, %v7745_v47  ;;  %v7748_v62 = vmul.f32 0.5, %v7716_v20 }
 0xe4e   : > { %9830 = verf.f32 %v7764_v7  ;;  %v7765_v54 = vmul.f32 0.70710677, %v7719_v27  ;;  %v7807_v49 = vmul.f32 %v7791_v1, %v7743_v23  ;;  %v7746_v32 = vmul.f32 0.5, %v7708_v12 }
 0xe4f   : > { %9832 = verf.f32 %v7762_v52  ;;  %v7763_v51 = vmul.f32 0.70710677, %v7711_v26  ;;  %v7821_v46 = vpack.c.bf16 %v7809_v30, %v7808_v53  ;;  %v7749_v13 = vmul.f32 0.5, %v7719_v27 }
 0xe50   : > { %9834 = verf.f32 %v7765_v54  ;;  %v7820_v31 = vpack.c.bf16 %v7807_v49, %v7806_v38  ;;  %v7747_v41 = vmul.f32 0.5, %v7711_v26 }
 0xe51   : > { %9836 = verf.f32 %v7763_v51 }
 0xe52   : > { %9118 = vmatprep.mubr.bf16.mxu1 %v7820_v31 }
 0xe53   : > { %9119 = vmatmul.mubr.bf16.gmra.mrb[36].mxu1 %v7821_v46 }
 0xe58   : > { %v9831_v19 = vpop.eup %9830 }
 0xe59   : > { %v9833_v21 = vpop.eup %9832  ;;  %v9096_v36 = vpop.f32.mrb[44].mxu0  ;;  %v7796_v59 = vadd.f32 1.0, %v9831_v19  ;;  %v8304_v19 = vld [vmem:[%s14861_s16] ss:$0 sm:$0xff] }
 0xe5a   : > { %v7732_v34 = vadd.f32 %v9096_v36, %v14198_v39  ;;  %v7723_v55 = vpop.f32.mrb[45].mxu0  ;;  %v9835_v14 = vpop.eup %9834  ;;  %v7794_v60 = vadd.f32 1.0, %v9833_v21 }
 0xe5b   : > { %v7724_v43 = vadd.f32 %v14198_v39, %v7723_v55  ;;  %v9097_v33 = vpop.f32.mrb[46].mxu0  ;;  %v9837_v17 = vpop.eup %9836  ;;  %v7797_v8 = vadd.f32 1.0, %v9835_v14  ;;  %v7812_v9 = vmul.f32 %v7796_v59, %v7748_v62 }
 0xe5c   : > { %v7768_v45 = vmul.f32 0.70710677, %v7732_v34  ;;  %v7726_v58 = vpop.f32.mrb[47].mxu0  ;;  %v7795_v4 = vadd.f32 1.0, %v9837_v17  ;;  %v7735_v44 = vadd.f32 %v9097_v33, %v14198_v39  ;;  %v7810_v0 = vmul.f32 %v7794_v60, %v7746_v32 }
 0xe5d   : > { %v7766_v63 = vmul.f32 0.70710677, %v7724_v43  ;;  %v7813_v6 = vmul.f32 %v7797_v8, %v7749_v13  ;;  %v7727_v20 = vadd.f32 %v14198_v39, %v7726_v58  ;;  %v7752_v27 = vmul.f32 0.5, %v7732_v34 }
 0xe5e   : > { %9838 = verf.f32 %v7768_v45  ;;  %v7811_v24 = vmul.f32 %v7795_v4, %v7747_v41  ;;  %v7769_v48 = vmul.f32 0.70710677, %v7735_v44  ;;  %v7753_v26 = vmul.f32 0.5, %v7735_v44 }
 0xe5f   : > { %9840 = verf.f32 %v7766_v63  ;;  %v7767_v61 = vmul.f32 0.70710677, %v7727_v20  ;;  %v7823_v12 = vpack.c.bf16 %v7813_v6, %v7812_v9  ;;  %v7750_v53 = vmul.f32 0.5, %v7724_v43 }
 0xe60   : > { %9842 = verf.f32 %v7769_v48  ;;  %v7822_v47 = vpack.c.bf16 %v7811_v24, %v7810_v0  ;;  %v7751_v30 = vmul.f32 0.5, %v7727_v20 }
 0xe61   : > { %9844 = verf.f32 %v7767_v61 }
 0xe62   : > { %9122 = vmatprep.mubr.bf16.mxu1 %v7822_v47 }
 0xe63   : > { %9123 = vmatmul.mubr.bf16.gmra.mrb[40].mxu1 %v7823_v12 }
 0xe68   : > { %v9839_v2 = vpop.eup %9838 }
 0xe69   : > { %v9841_v7 = vpop.eup %9840  ;;  %v7800_v22 = vadd.f32 1.0, %v9839_v2 }
 0xe6a   : > { %v9843_v28 = vpop.eup %9842  ;;  %v7798_v23 = vadd.f32 1.0, %v9841_v7 }
 0xe6b   : > { %v9845_v52 = vpop.eup %9844  ;;  %v7801_v39 = vadd.f32 1.0, %v9843_v28  ;;  %v7816_v54 = vmul.f32 %v7800_v22, %v7752_v27 }
 0xe6c   : > { %v7799_v1 = vadd.f32 1.0, %v9845_v52  ;;  %v7814_v49 = vmul.f32 %v7798_v23, %v7750_v53 }
 0xe6d   : > { %v7817_v38 = vmul.f32 %v7801_v39, %v7753_v26 }
 0xe6e   : > { %v7815_v51 = vmul.f32 %v7799_v1, %v7751_v30 }
 0xe6f   : > { %v7825_v46 = vpack.c.bf16 %v7817_v38, %v7816_v54 }
 0xe70   : > { %v7824_v31 = vpack.c.bf16 %v7815_v51, %v7814_v49 }
 0xe72   : > { %9126 = vmatprep.mubr.bf16.mxu1 %v7824_v31 }
 0xe73   : > { %9127 = vmatmul.mubr.bf16.gmra.mrb[44].mxu1 %v7825_v46 }
 0xf18   : > { %v9116_v21 = vpop.f32.mrb[32].mxu1 }
 0xf19   : > { %v7940_v36 = vadd.f32 %v9116_v21, %v8304_v19  ;;  %v7931_v59 = vpop.f32.mrb[33].mxu1 }
 0xf1a   : > { %v7932_v34 = vadd.f32 %v8304_v19, %v7931_v59  ;;  %v9117_v55 = vpop.f32.mrb[34].mxu1 }
 0xf1b   : > { %v7996_v14 = vadd.f32 %v7940_v36, %v13885_v3  ;;  %v7943_v62 = vadd.f32 %v9117_v55, %v8304_v19  ;;  %v7934_v60 = vpop.f32.mrb[35].mxu1 }
 0xf1c   : > { %v7994_v43 = vadd.f32 %v7932_v34, %v13877_v15  ;;  %v7935_v33 = vadd.f32 %v8304_v19, %v7934_v60 }
 0xf1d   : > { %8012 = vst.msk [vmem:[%s10174_s28 + $0x10] sm:$0xff] %vm7179_vm8, %v7996_v14  ;;  %v7997_v17 = vadd.f32 %v7943_v62, %v13899_v16 }
 0xf1e   : > { %8010 = vst.msk [vmem:[%s10174_s28] sm:$0xff] %vm7179_vm8, %v7994_v43  ;;  %v7995_v32 = vadd.f32 %v7935_v33, %v13883_v57 }
 0xf1f   : > { %8013 = vst.msk [vmem:[%s10174_s28 + $0x18] sm:$0xff] %vm7179_vm8, %v7997_v17 }
 0xf20   : > { %8011 = vst.msk [vmem:[%s10174_s28 + $0x8] sm:$0xff] %vm7179_vm8, %v7995_v32 }
 0xf26   : > { %v9120_v3 = vpop.f32.mrb[36].mxu1 }
 0xf27   : > { %v7956_v13 = vadd.f32 %v9120_v3, %v8304_v19  ;;  %v7947_v15 = vpop.f32.mrb[37].mxu1 }
 0xf28   : > { %v7948_v8 = vadd.f32 %v8304_v19, %v7947_v15  ;;  %v9121_v45 = vpop.f32.mrb[38].mxu1 }
 0xf29   : > { %v8000_v58 = vadd.f32 %v7956_v13, %v13922_v29  ;;  %v7959_v41 = vadd.f32 %v9121_v45, %v8304_v19  ;;  %v7950_v16 = vpop.f32.mrb[39].mxu1 }
 0xf2a   : > { %v7998_v4 = vadd.f32 %v7948_v8, %v13914_v42  ;;  %v7951_v63 = vadd.f32 %v8304_v19, %v7950_v16 }
 0xf2b   : > { %8016 = vst.msk [vmem:[%s10174_s28 + $0x30] sm:$0xff] %vm7179_vm8, %v8000_v58  ;;  %v8001_v57 = vadd.f32 %v7959_v41, %v13930_v56 }
 0xf2c   : > { %8014 = vst.msk [vmem:[%s10174_s28 + $0x20] sm:$0xff] %vm7179_vm8, %v7998_v4  ;;  %v7999_v44 = vadd.f32 %v7951_v63, %v13920_v50 }
 0xf2d   : > { %8017 = vst.msk [vmem:[%s10174_s28 + $0x38] sm:$0xff] %vm7179_vm8, %v8001_v57 }
 0xf2e   : > { %8015 = vst.msk [vmem:[%s10174_s28 + $0x28] sm:$0xff] %vm7179_vm8, %v7999_v44 }
 0xf36   : > { %v9124_v29 = vpop.f32.mrb[40].mxu1 }
 0xf37   : > { %v7972_v9 = vadd.f32 %v9124_v29, %v8304_v19  ;;  %v7963_v42 = vpop.f32.mrb[41].mxu1 }
 0xf38   : > { %v7964_v6 = vadd.f32 %v8304_v19, %v7963_v42  ;;  %v9125_v20 = vpop.f32.mrb[42].mxu1 }
 0xf39   : > { %v8004_v0 = vadd.f32 %v7972_v9, %v13958_v18  ;;  %v7975_v24 = vadd.f32 %v9125_v20, %v8304_v19  ;;  %v7966_v56 = vpop.f32.mrb[43].mxu1 }
 0xf3a   : > { %v8002_v48 = vadd.f32 %v7964_v6, %v13950_v25  ;;  %v7967_v61 = vadd.f32 %v8304_v19, %v7966_v56 }
 0xf3b   : > { %8020 = vst.msk [vmem:[%s10174_s28 + $0x50] sm:$0xff] %vm7179_vm8, %v8004_v0  ;;  %v8005_v50 = vadd.f32 %v7975_v24, %v13966_v11 }
 0xf3c   : > { %8018 = vst.msk [vmem:[%s10174_s28 + $0x40] sm:$0xff] %vm7179_vm8, %v8002_v48  ;;  %v8003_v12 = vadd.f32 %v7967_v61, %v13956_v40 }
 0xf3d   : > { %8021 = vst.msk [vmem:[%s10174_s28 + $0x58] sm:$0xff] %vm7179_vm8, %v8005_v50 }
 0xf3e   : > { %8019 = vst.msk [vmem:[%s10174_s28 + $0x48] sm:$0xff] %vm7179_vm8, %v8003_v12 }
 0xf46   : > { %v9128_v18 = vpop.f32.mrb[44].mxu1 }
 0xf47   : > { %v7988_v47 = vadd.f32 %v9128_v18, %v8304_v19  ;;  %v7979_v25 = vpop.f32.mrb[45].mxu1 }
 0xf48   : > { %v7980_v2 = vadd.f32 %v8304_v19, %v7979_v25  ;;  %v9129_v7 = vpop.f32.mrb[46].mxu1 }
 0xf49   : > { %v8008_v22 = vadd.f32 %v7988_v47, %v13993_v5  ;;  %v7991_v28 = vadd.f32 %v9129_v7, %v8304_v19  ;;  %v7982_v11 = vpop.f32.mrb[47].mxu1 }
 0xf4a   : > { %v8006_v23 = vadd.f32 %v7980_v2, %v13986_v35  ;;  %v7983_v52 = vadd.f32 %v8304_v19, %v7982_v11 }
 0xf4b   : > { %8024 = vst.msk [vmem:[%s10174_s28 + $0x70] sm:$0xff] %vm7179_vm8, %v8008_v22  ;;  %v8009_v40 = vadd.f32 %v7991_v28, %v13997_v10 }
 0xf4c   : > { %8022 = vst.msk [vmem:[%s10174_s28 + $0x60] sm:$0xff] %vm7179_vm8, %v8006_v23  ;;  %v8007_v27 = vadd.f32 %v7983_v52, %v13991_v37 }
 0xf4d   : > { %8025 = vst.msk [vmem:[%s10174_s28 + $0x78] sm:$0xff] %vm7179_vm8, %v8009_v40 }
 0xf4e   : > { %8023 = vst.msk [vmem:[%s10174_s28 + $0x68] sm:$0xff] %vm7179_vm8, %v8007_v27 }
 0xf4f PF: > { %s30_s19 = sadd.s32 1, %s9928_s19   ;;  %s14862_s4 = sld [smem:[#allocation19_spill]] }
 0xf50   : > { %p27_p7 = scmp.ge.s32.totalorder %s30_s19, 10   ;;  %s14863_s28 = sld [smem:[#allocation14_spill]] }
 0xf51   : > { %s14864_s29 = sld [smem:[#allocation15_spill]]  ;;  %s14865_s12 = sld [smem:[#allocation16_spill]] }
 0xf52   : > { %s14866_s30 = sld [smem:[#allocation17_spill]]  ;;  %s14867_s18 = sld [smem:[#allocation18_spill]] }
 0xf53   : > { %s14868_s24 = smov %s9896_s25  ;;  %s14869_s25 = smov %s9900_s26 }
 0xf54   : > { %s14871_s27 = smov %s9916_s0  ;;  %29 = sbr.rel (!%p27_p7) target bundleno = 18 (0x12), region = 162 }
 0xf55   : > { %s14870_s26 = smov %s14862_s4 }
 0xf57   : > { %s14872_s0 = smov %s14865_s12 }
 0xf5b   :  { %8056 = vsyncpa [#allocation9], 1 }
 0xf5c   :  { %8058 = vsyncpa [#allocation9 + $0x1], 1 }

</bundles_post_ra>
